<compile_context>
chip_gen: v6e
topology: v6e:2x2x1
jax: 0.10.0
libtpu: 0.0.40
codegen_flags: <defaults>
</compile_context>

<pallas_src>
import functools

import jax
import jax.numpy as jnp
from jax.experimental import pallas as pl
from jax.experimental.pallas import tpu as pltpu


def _round_up(x, m):
    return ((x + m - 1) // m) * m


def _transr_kernel(head_ref, tail_ref, rel_ref, proj_ref, out_ref, *, gamma):
    # Block shapes:
    #   head_ref/tail_ref : (TE, D_ent)
    #   rel_ref           : (TE, D_rel)
    #   proj_ref          : (TE, D_ent, D_rel)
    #   out_ref           : (1, TE)            (lane-dense score row)
    h = head_ref[...].astype(jnp.float32)
    t = tail_ref[...].astype(jnp.float32)
    r = rel_ref[...].astype(jnp.float32)
    P = proj_ref[...].astype(jnp.float32)

    # Fuse the two projections: h@P - t@P == (h - t)@P.
    diff = h - t                                                  # (TE, D_ent)

    # Per-edge matvec on the VPU: broadcast-multiply then reduce over D_ent.
    # Avoids q=1 per-edge MXU matmuls (1/128-1/256 row utilization) and the
    # [:, None, :] / [:, 0, :] reshape copies of the einsum formulation.
    proj_diff = jnp.sum(diff[:, :, None] * P, axis=1)             # (TE, D_rel)

    s = proj_diff + r                                             # (TE, D_rel)
    l1 = jnp.sum(jnp.abs(s), axis=-1)                             # (TE,)
    out_ref[...] = (gamma - l1)[None, :].astype(out_ref.dtype)    # (1, TE)


def _pick_edge_tile(num_edges, d_ent, d_rel, vmem_budget_bytes):
    """Pick an edge tile so the double-buffered blocks (+ the VPU product
    intermediate) fit comfortably in the requested VMEM budget."""
    lane, sub = 128, 8
    d_rel_lane = _round_up(d_rel, lane)         # lanes of the P / rel blocks
    d_ent_sub = _round_up(d_ent, sub)           # sublanes of each P slab
    d_ent_lane = _round_up(d_ent, lane)         # lanes of head/tail blocks

    p_slab = d_ent_sub * d_rel_lane             # padded f32 elems of P per edge
    per_edge_bytes = 4 * (
        2 * p_slab                              # projection block, 2 buffers
        + 2 * 2 * d_ent_lane                    # head + tail blocks, 2 buffers
        + 2 * d_rel_lane                        # rel block, 2 buffers
        + 2 * p_slab                            # broadcast + product temps
        + 4 * d_rel_lane                        # epilogue temporaries
    )

    te = max(vmem_budget_bytes // per_edge_bytes, 1)
    te = max((te // lane) * lane, lane)         # lane-dense output, sublane ok
    te = min(te, _round_up(num_edges, lane))    # don't over-pad tiny inputs
    return int(te)


def transr_score(head_emb, tail_emb, rel_emb, projection, gamma, *,
                 te=None, vmem_budget_bytes=24 << 20):
    E, d_ent = head_emb.shape
    d_rel = rel_emb.shape[1]
    assert projection.shape == (E, d_ent, d_rel)

    if te is None:
        te = _pick_edge_tile(E, d_ent, d_rel, vmem_budget_bytes)

    # Pad edge count to a multiple of the tile (padded rows score == gamma and
    # are sliced off below) instead of asserting divisibility.
    e_pad = _round_up(E, te)
    if e_pad != E:
        pad = e_pad - E
        head_emb = jnp.pad(head_emb, ((0, pad), (0, 0)))
        tail_emb = jnp.pad(tail_emb, ((0, pad), (0, 0)))
        rel_emb = jnp.pad(rel_emb, ((0, pad), (0, 0)))
        projection = jnp.pad(projection, ((0, pad), (0, 0), (0, 0)))

    kernel = functools.partial(_transr_kernel, gamma=float(gamma))

    # Advisory cost estimate: traffic is dominated by the projection tensor.
    bytes_accessed = 4 * (e_pad * d_ent * d_rel        # projection
                          + 2 * e_pad * d_ent          # head + tail
                          + e_pad * d_rel              # rel
                          + e_pad)                     # scores
    cost = pl.CostEstimate(
        flops=2 * e_pad * d_ent * d_rel + 4 * e_pad * d_rel,
        transcendentals=0,
        bytes_accessed=bytes_accessed)

    out = pl.pallas_call(
        kernel,
        out_shape=jax.ShapeDtypeStruct((1, e_pad), jnp.float32),
        grid_spec=pltpu.PrefetchScalarGridSpec(
            num_scalar_prefetch=0,
            grid=(e_pad // te,),
            in_specs=[
                pl.BlockSpec((te, d_ent), lambda i: (i, 0)),
                pl.BlockSpec((te, d_ent), lambda i: (i, 0)),
                pl.BlockSpec((te, d_rel), lambda i: (i, 0)),
                pl.BlockSpec((te, d_ent, d_rel), lambda i: (i, 0, 0)),
            ],
            out_specs=pl.BlockSpec((1, te), lambda i: (0, i)),
        ),
        compiler_params=pltpu.CompilerParams(
            dimension_semantics=("parallel",),   # shard edge tiles across TCs
            vmem_limit_bytes=48 << 20),          # headroom above 32 MiB default
        cost_estimate=cost,
    )(head_emb, tail_emb, rel_emb, projection)
    return out[0, :E]


def transr_score_ref(head_emb, tail_emb, rel_emb, projection, gamma):
    # Pure-JAX reference mirroring the PyTorch prepare() + edge_func().
    h_p = jnp.einsum("ab,abc->ac", head_emb, projection)
    t_p = jnp.einsum("ab,abc->ac", tail_emb, projection)
    s = h_p + rel_emb - t_p
    return gamma - jnp.sum(jnp.abs(s), axis=-1)


if __name__ == "__main__":
    # Small synthetic problem consistent with the module's shapes.
    num_edges = 16          # E (not a multiple of the auto tile -> exercises padding)
    entity_dim = 32
    relation_dim = 16
    gamma = 12.0

    key = jax.random.PRNGKey(0)
    k_h, k_t, k_r, k_p = jax.random.split(key, 4)

    # Deterministic "embedding / projection_emb lookups" (synthetic init).
    head_emb = jax.random.normal(k_h, (num_edges, entity_dim), jnp.float32)
    tail_emb = jax.random.normal(k_t, (num_edges, entity_dim), jnp.float32)
    rel_emb = jax.random.normal(k_r, (num_edges, relation_dim), jnp.float32)
    # projection_emb(id).reshape(-1, entity_dim, relation_dim)
    projection = jax.random.uniform(
        k_p, (num_edges, entity_dim, relation_dim), jnp.float32,
        minval=-1.0, maxval=1.0)

    score = transr_score(head_emb, tail_emb, rel_emb, projection, gamma)
    score = jax.block_until_ready(score)

    expected = transr_score_ref(head_emb, tail_emb, rel_emb, projection, gamma)
    assert score.shape == (num_edges,)
    # (h - t) @ P vs h@P - t@P differs only by fp reordering.
    assert jnp.allclose(score, expected, rtol=1e-4, atol=1e-3), (
        "mismatch vs reference")

    print("KERNEL_OK")
</pallas_src>

<mosaic_0001>
module attributes {stable_mosaic.version = 11 : i64} {
  func.func @_transr_kernel(%arg0: i32, %arg1: memref<128x32xf32, #tpu.memory_space<vmem>>, %arg2: memref<128x32xf32, #tpu.memory_space<vmem>>, %arg3: memref<128x16xf32, #tpu.memory_space<vmem>>, %arg4: memref<128x32x16xf32, #tpu.memory_space<vmem>>, %arg5: memref<1x128xf32, #tpu.memory_space<vmem>>) attributes {dimension_semantics = [#tpu.dimension_semantics<parallel>], iteration_bounds = array<i64: 1>, scalar_prefetch = 0 : i64, scratch_operands = 0 : i64, tpu.core_type = #tpu.core_type<tc>, window_params = [{transform_indices = @transform_0, window_bounds = array<i64: 128, 32>}, {transform_indices = @transform_1, window_bounds = array<i64: 128, 32>}, {transform_indices = @transform_2, window_bounds = array<i64: 128, 16>}, {transform_indices = @transform_3, window_bounds = array<i64: 128, 32, 16>}, {transform_indices = @transform_4, window_bounds = array<i64: 1, 128>}]} {
    %c0 = arith.constant 0 : index
    %c0_0 = arith.constant 0 : index
    %0 = vector.load %arg1[%c0, %c0_0] : memref<128x32xf32, #tpu.memory_space<vmem>>, vector<128x32xf32>
    %c0_1 = arith.constant 0 : index
    %c0_2 = arith.constant 0 : index
    %1 = vector.load %arg2[%c0_1, %c0_2] : memref<128x32xf32, #tpu.memory_space<vmem>>, vector<128x32xf32>
    %c0_3 = arith.constant 0 : index
    %c0_4 = arith.constant 0 : index
    %2 = vector.load %arg3[%c0_3, %c0_4] : memref<128x16xf32, #tpu.memory_space<vmem>>, vector<128x16xf32>
    %c0_5 = arith.constant 0 : index
    %c0_6 = arith.constant 0 : index
    %c0_7 = arith.constant 0 : index
    %3 = vector.load %arg4[%c0_5, %c0_6, %c0_7] : memref<128x32x16xf32, #tpu.memory_space<vmem>>, vector<128x32x16xf32>
    %4 = arith.subf %0, %1 : vector<128x32xf32>
    %5 = vector.shape_cast %4 : vector<128x32xf32> to vector<128x32x1xf32>
    %6 = vector.broadcast %5 : vector<128x32x1xf32> to vector<128x32x16xf32>
    %7 = arith.mulf %6, %3 : vector<128x32x16xf32>
    %cst = arith.constant dense<0.000000e+00> : vector<128x16xf32>
    %8 = vector.multi_reduction <add>, %7, %cst [1] : vector<128x32x16xf32> to vector<128x16xf32>
    %9 = arith.addf %8, %2 : vector<128x16xf32>
    %10 = math.absf %9 : vector<128x16xf32>
    %cst_8 = arith.constant dense<0.000000e+00> : vector<128xf32>
    %11 = vector.multi_reduction <add>, %10, %cst_8 [1] : vector<128x16xf32> to vector<128xf32>
    %cst_9 = arith.constant 1.200000e+01 : f32
    %12 = vector.broadcast %cst_9 : f32 to vector<128xf32>
    %13 = arith.subf %12, %11 : vector<128xf32>
    %14 = vector.shape_cast %13 : vector<128xf32> to vector<1x128xf32>
    %c0_10 = arith.constant 0 : index
    %c0_11 = arith.constant 0 : index
    %15 = vector.load %arg5[%c0_10, %c0_11] : memref<1x128xf32, #tpu.memory_space<vmem>>, vector<1x128xf32>
    tpu.vector_store %arg5[%c0_10, %c0_11], %14 {strides = array<i32>} : memref<1x128xf32, #tpu.memory_space<vmem>>, vector<1x128xf32>,
    return
  }
  func.func @transform_0(%arg0: i32) -> (i32, i32) {
    %c0_i32 = arith.constant 0 : i32
    %c0_i32_0 = arith.constant 0 : i32
    return %arg0, %c0_i32 : i32, i32
  }
  func.func @transform_1(%arg0: i32) -> (i32, i32) {
    %c0_i32 = arith.constant 0 : i32
    %c0_i32_0 = arith.constant 0 : i32
    return %arg0, %c0_i32 : i32, i32
  }
  func.func @transform_2(%arg0: i32) -> (i32, i32) {
    %c0_i32 = arith.constant 0 : i32
    %c0_i32_0 = arith.constant 0 : i32
    return %arg0, %c0_i32 : i32, i32
  }
  func.func @transform_3(%arg0: i32) -> (i32, i32, i32) {
    %c0_i32 = arith.constant 0 : i32
    %c0_i32_0 = arith.constant 0 : i32
    %c0_i32_1 = arith.constant 0 : i32
    return %arg0, %c0_i32, %c0_i32_0 : i32, i32, i32
  }
  func.func @transform_4(%arg0: i32) -> (i32, i32) {
    %c0_i32 = arith.constant 0 : i32
    %c0_i32_0 = arith.constant 0 : i32
    return %c0_i32, %arg0 : i32, i32
  }
}

</mosaic_0001>

<bundles_post_ra>
// kernel: tpu_custom_call.1
= control target key start
LH: loop header
LB: loop body
LE: loop exit
PB: predicated region body
PF: predicated region fallthrough
CT: control target
= control target key end

     0   :  { %v11268_v2 = vlaneseq  ;;  %s11263_s0 = inlined_call_operand.vmem [shape: f32[128,32], index: 0, kind: input, shape index: {}]   ;;  %s11264_s1 = inlined_call_operand.vmem [shape: f32[128,32], index: 1, kind: input, shape index: {}]   ;;  %s11265_s2 = inlined_call_operand.vmem [shape: f32[128,16], index: 2, kind: input, shape index: {}]   ;;  %s11266_s3 = inlined_call_operand.vmem [shape: f32[128,32,16], index: 3, kind: input, shape index: {}]   ;;  %s11267_s4 = inlined_call_operand.hbm [shape: f32[1,128], index: 4, kind: output, shape index: {}]  }
   0x1   :  { %v18_v0 = vld [vmem:[%s11263_s0] sm:$0xff] }
   0x2   :  { %v34_v1 = vld [vmem:[%s11264_s1] sm:$0xff]  ;;  %v6357_v4 = vshrl.u32 %v11268_v2, 7 }
   0x3   :  { %v578_v3 = vsub.f32 %v18_v0, %v34_v1 }
   0x4   :  { %11280 = vst [vmem:[#allocation5_spill] sm:$0xff] %v6357_v4  ;;  %v6360_v5 = vsub.s32 0, %v6357_v4 }
   0x5   :  { %9 = vsyncpa [#allocation3], 0  ;;  %v6364_v7 = vsub.s32 1, %v6357_v4  ;;  %v6368_v9 = vsub.s32 2, %v6357_v4  ;;  %v6372_v11 = vsub.s32 3, %v6357_v4  ;;  %v6376_v13 = vsub.s32 4, %v6357_v4 }
   0x6   :  { %v597_v6 = vrot.slane %v578_v3, %v6360_v5  ;;  %v6380_v15 = vsub.s32 5, %v6357_v4  ;;  %v6384_v17 = vsub.s32 6, %v6357_v4  ;;  %v6388_v19 = vsub.s32 7, %v6357_v4  ;;  %v19_v21 = vld [vmem:[%s11263_s0 + $0x8] sm:$0xff]  ;;  %v20_v34 = vld [vmem:[%s11263_s0 + $0x10] sm:$0xff] }
   0x7   :  { %v616_v8 = vrot.slane %v578_v3, %v6364_v7  ;;  %11281 = vst [vmem:[#allocation6_spill] sm:$0xff] %v6368_v9  ;;  %v635_v10 = vrot.slane %v578_v3, %v6368_v9  ;;  %11282 = vst [vmem:[#allocation7_spill] sm:$0xff] %v6372_v11  ;;  %v654_v12 = vrot.slane %v578_v3, %v6372_v11  ;;  %v35_v22 = vld [vmem:[%s11264_s1 + $0x8] sm:$0xff]  ;;  %v36_v35 = vld [vmem:[%s11264_s1 + $0x10] sm:$0xff]  ;;  %vm3538_vm0 = vcmask 130048  }
   0x8   :  { %607 = vbcast.lane.b32.xlu1 %v597_v6, 272  ;;  %599 = vbcast.lane.b32.xlu0 %v597_v6, 256  ;;  %11283 = vst [vmem:[#allocation8_spill] sm:$0xff] %v6376_v13  ;;  %v673_v14 = vrot.slane %v578_v3, %v6376_v13  ;;  %v692_v16 = vrot.slane %v578_v3, %v6380_v15  ;;  %11284 = vst [vmem:[#allocation9_spill] sm:$0xff] %v6388_v19  ;;  %vm5844_vm1 = vcmask 1041409   ;;  %vm5847_vm2 = vcmask 1042434  }
   0x9   :  { %v711_v18 = vrot.slane %v578_v3, %v6384_v17  ;;  %v730_v20 = vrot.slane %v578_v3, %v6388_v19  ;;  %v579_v23 = vsub.f32 %v19_v21, %v35_v22  ;;  %v6419_v38 = vsub.f32 %v20_v34, %v36_v35 }
   0xa   :  { %vm5850_vm3 = vcmask 1043459   ;;  %vm5853_vm4 = vcmask 1044484   ;;  %vm5856_vm5 = vcmask 1045509   ;;  %vm5859_vm6 = vcmask 1046534  }
   0xb   :  { %v749_v24 = vrot.slane %v579_v23, %v6360_v5  ;;  %v768_v25 = vrot.slane %v579_v23, %v6364_v7  ;;  %v787_v26 = vrot.slane %v579_v23, %v6368_v9  ;;  %v806_v27 = vrot.slane %v579_v23, %v6372_v11 }
   0xc   :  { %611 = vbcast.lane.b32.xlu1 %v597_v6, 280  ;;  %603 = vbcast.lane.b32.xlu0 %v597_v6, 264  ;;  %v825_v28 = vrot.slane %v579_v23, %v6376_v13  ;;  %v844_v29 = vrot.slane %v579_v23, %v6380_v15  ;;  %v863_v30 = vrot.slane %v579_v23, %v6384_v17  ;;  %vm5862_vm7 = vcmask 1047559  }
   0xd   :  { %v882_v33 = vrot.slane %v579_v23, %v6388_v19  ;;  %v901_v41 = vrot.slane %v6419_v38, %v6360_v5  ;;  %v920_v46 = vrot.slane %v6419_v38, %v6364_v7  ;;  %v939_v51 = vrot.slane %v6419_v38, %v6368_v9  ;;  %v21_v23 = vld [vmem:[%s11263_s0 + $0x18] sm:$0xff] }
   0xe   :  { %v958_v56 = vrot.slane %v6419_v38, %v6372_v11  ;;  %v977_v61 = vrot.slane %v6419_v38, %v6376_v13  ;;  %v996_v3 = vrot.slane %v6419_v38, %v6380_v15  ;;  %v1034_v22 = vrot.slane %v6419_v38, %v6388_v19 }
   0xf   :  { %vm6181_vm8 = vcmask 130112   ;;  %vm6188_vm9 = vcmask 195712   ;;  %vm6195_vm10 = vcmask 261312   ;;  %vm6202_vm11 = vcmask 326912  }
  0x10   :  { %622 = vbcast.lane.b32.xlu1 %v616_v8, 264  ;;  %618 = vbcast.lane.b32.xlu0 %v616_v8, 256  ;;  %vm6209_vm12 = vcmask 392512   ;;  %vm6216_vm13 = vcmask 458112   ;;  %vm6223_vm14 = vcmask 523712   ;;  %vm6230_vm15 = vcmask 589312  }
  0x14   :  { %630 = vbcast.lane.b32.xlu1 %v616_v8, 280  ;;  %626 = vbcast.lane.b32.xlu0 %v616_v8, 272 }
  0x18   :  { %641 = vbcast.lane.b32.xlu1 %v635_v10, 264  ;;  %637 = vbcast.lane.b32.xlu0 %v635_v10, 256 }
  0x1c   :  { %649 = vbcast.lane.b32.xlu1 %v635_v10, 280  ;;  %645 = vbcast.lane.b32.xlu0 %v635_v10, 272 }
  0x20   :  { %660 = vbcast.lane.b32.xlu1 %v654_v12, 264  ;;  %656 = vbcast.lane.b32.xlu0 %v654_v12, 256 }
  0x24   :  { %668 = vbcast.lane.b32.xlu1 %v654_v12, 280  ;;  %664 = vbcast.lane.b32.xlu0 %v654_v12, 272 }
  0x28   :  { %679 = vbcast.lane.b32.xlu1 %v673_v14, 264  ;;  %675 = vbcast.lane.b32.xlu0 %v673_v14, 256 }
  0x2c   :  { %687 = vbcast.lane.b32.xlu1 %v673_v14, 280  ;;  %683 = vbcast.lane.b32.xlu0 %v673_v14, 272  ;;  %v1015_v14 = vrot.slane %v6419_v38, %v6384_v17 }
  0x30   :  { %698 = vbcast.lane.b32.xlu1 %v692_v16, 264  ;;  %694 = vbcast.lane.b32.xlu0 %v692_v16, 256 }
  0x34   :  { %706 = vbcast.lane.b32.xlu1 %v692_v16, 280  ;;  %702 = vbcast.lane.b32.xlu0 %v692_v16, 272 }
  0x38   :  { %717 = vbcast.lane.b32.xlu1 %v711_v18, 264  ;;  %713 = vbcast.lane.b32.xlu0 %v711_v18, 256 }
  0x3c   :  { %725 = vbcast.lane.b32.xlu1 %v711_v18, 280  ;;  %721 = vbcast.lane.b32.xlu0 %v711_v18, 272 }
  0x40   :  { %736 = vbcast.lane.b32.xlu1 %v730_v20, 264  ;;  %732 = vbcast.lane.b32.xlu0 %v730_v20, 256 }
  0x44   :  { %744 = vbcast.lane.b32.xlu1 %v730_v20, 280  ;;  %740 = vbcast.lane.b32.xlu0 %v730_v20, 272 }
  0x48   :  { %755 = vbcast.lane.b32.xlu1 %v749_v24, 264  ;;  %751 = vbcast.lane.b32.xlu0 %v749_v24, 256 }
  0x4c   :  { %763 = vbcast.lane.b32.xlu1 %v749_v24, 280  ;;  %759 = vbcast.lane.b32.xlu0 %v749_v24, 272  ;;  %v37_v24 = vld [vmem:[%s11264_s1 + $0x18] sm:$0xff] }
  0x50   :  { %774 = vbcast.lane.b32.xlu1 %v768_v25, 264  ;;  %770 = vbcast.lane.b32.xlu0 %v768_v25, 256 }
  0x54   :  { %782 = vbcast.lane.b32.xlu1 %v768_v25, 280  ;;  %778 = vbcast.lane.b32.xlu0 %v768_v25, 272 }
  0x58   :  { %793 = vbcast.lane.b32.xlu1 %v787_v26, 264  ;;  %789 = vbcast.lane.b32.xlu0 %v787_v26, 256 }
  0x5c   :  { %801 = vbcast.lane.b32.xlu1 %v787_v26, 280  ;;  %797 = vbcast.lane.b32.xlu0 %v787_v26, 272 }
  0x60   :  { %812 = vbcast.lane.b32.xlu1 %v806_v27, 264  ;;  %808 = vbcast.lane.b32.xlu0 %v806_v27, 256 }
  0x64   :  { %820 = vbcast.lane.b32.xlu1 %v806_v27, 280  ;;  %816 = vbcast.lane.b32.xlu0 %v806_v27, 272  ;;  %v6507_v27 = vsub.f32 %v21_v23, %v37_v24 }
  0x68   :  { %831 = vbcast.lane.b32.xlu1 %v825_v28, 264  ;;  %827 = vbcast.lane.b32.xlu0 %v825_v28, 256 }
  0x6c   :  { %839 = vbcast.lane.b32.xlu1 %v825_v28, 280  ;;  %835 = vbcast.lane.b32.xlu0 %v825_v28, 272 }
  0x70   :  { %850 = vbcast.lane.b32.xlu1 %v844_v29, 264  ;;  %846 = vbcast.lane.b32.xlu0 %v844_v29, 256 }
  0x74   :  { %858 = vbcast.lane.b32.xlu1 %v844_v29, 280  ;;  %854 = vbcast.lane.b32.xlu0 %v844_v29, 272 }
  0x78   :  { %869 = vbcast.lane.b32.xlu1 %v863_v30, 264  ;;  %865 = vbcast.lane.b32.xlu0 %v863_v30, 256 }
  0x7a   :  { %v6404_v31 = vpop.permute.xlu1 %607  ;;  %v6406_v32 = vpop.permute.xlu0 %599 }
  0x7c   :  { %877 = vbcast.lane.b32.xlu1 %v863_v30, 280  ;;  %873 = vbcast.lane.b32.xlu0 %v863_v30, 272  ;;  %v1053_v30 = vrot.slane %v6507_v27, %v6360_v5 }
  0x7e   :  { %v6415_v36 = vpop.permute.xlu1 %611  ;;  %v6417_v37 = vpop.permute.xlu0 %603 }
  0x80   :  { %888 = vbcast.lane.b32.xlu1 %v882_v33, 264  ;;  %884 = vbcast.lane.b32.xlu0 %v882_v33, 256 }
  0x82   :  { %v6421_v39 = vpop.permute.xlu1 %622  ;;  %v6423_v40 = vpop.permute.xlu0 %618 }
  0x84   :  { %896 = vbcast.lane.b32.xlu1 %v882_v33, 280  ;;  %892 = vbcast.lane.b32.xlu0 %v882_v33, 272 }
  0x86   :  { %v6427_v42 = vpop.permute.xlu1 %630  ;;  %v6429_v43 = vpop.permute.xlu0 %626 }
  0x88   :  { %907 = vbcast.lane.b32.xlu1 %v901_v41, 264  ;;  %903 = vbcast.lane.b32.xlu0 %v901_v41, 256 }
  0x8a   :  { %v6431_v44 = vpop.permute.xlu1 %641  ;;  %v6433_v45 = vpop.permute.xlu0 %637 }
  0x8c   :  { %915 = vbcast.lane.b32.xlu1 %v901_v41, 280  ;;  %911 = vbcast.lane.b32.xlu0 %v901_v41, 272  ;;  %v1072_v41 = vrot.slane %v6507_v27, %v6364_v7 }
  0x8e   :  { %v6437_v47 = vpop.permute.xlu1 %649  ;;  %v6439_v48 = vpop.permute.xlu0 %645 }
  0x90   :  { %926 = vbcast.lane.b32.xlu1 %v920_v46, 264  ;;  %922 = vbcast.lane.b32.xlu0 %v920_v46, 256 }
  0x92   :  { %v6441_v49 = vpop.permute.xlu1 %660  ;;  %v6443_v50 = vpop.permute.xlu0 %656 }
  0x94   :  { %934 = vbcast.lane.b32.xlu1 %v920_v46, 280  ;;  %930 = vbcast.lane.b32.xlu0 %v920_v46, 272 }
  0x96   :  { %v6447_v52 = vpop.permute.xlu1 %668  ;;  %v6449_v53 = vpop.permute.xlu0 %664 }
  0x98   :  { %945 = vbcast.lane.b32.xlu1 %v939_v51, 264  ;;  %941 = vbcast.lane.b32.xlu0 %v939_v51, 256 }
  0x9a   :  { %v6451_v54 = vpop.permute.xlu1 %679  ;;  %v6453_v55 = vpop.permute.xlu0 %675 }
  0x9c   :  { %953 = vbcast.lane.b32.xlu1 %v939_v51, 280  ;;  %949 = vbcast.lane.b32.xlu0 %v939_v51, 272 }
  0x9e   :  { %v6457_v57 = vpop.permute.xlu1 %687  ;;  %v6459_v58 = vpop.permute.xlu0 %683 }
  0xa0   :  { %964 = vbcast.lane.b32.xlu1 %v958_v56, 264  ;;  %960 = vbcast.lane.b32.xlu0 %v958_v56, 256 }
  0xa2   :  { %v6461_v59 = vpop.permute.xlu1 %698  ;;  %v6463_v60 = vpop.permute.xlu0 %694 }
  0xa4   :  { %972 = vbcast.lane.b32.xlu1 %v958_v56, 280  ;;  %968 = vbcast.lane.b32.xlu0 %v958_v56, 272 }
  0xa6   :  { %v6467_v62 = vpop.permute.xlu1 %706  ;;  %v6469_v63 = vpop.permute.xlu0 %702 }
  0xa8   :  { %983 = vbcast.lane.b32.xlu1 %v977_v61, 264  ;;  %979 = vbcast.lane.b32.xlu0 %v977_v61, 256 }
  0xaa   :  { %v6471_v0 = vpop.permute.xlu1 %717  ;;  %v6473_v1 = vpop.permute.xlu0 %713 }
  0xac   :  { %991 = vbcast.lane.b32.xlu1 %v977_v61, 280  ;;  %987 = vbcast.lane.b32.xlu0 %v977_v61, 272 }
  0xae   :  { %v6477_v6 = vpop.permute.xlu1 %725  ;;  %v6479_v8 = vpop.permute.xlu0 %721 }
  0xb0   :  { %1002 = vbcast.lane.b32.xlu1 %v996_v3, 264  ;;  %998 = vbcast.lane.b32.xlu0 %v996_v3, 256 }
  0xb2   :  { %v6481_v10 = vpop.permute.xlu1 %736  ;;  %v6483_v12 = vpop.permute.xlu0 %732 }
  0xb4   :  { %1010 = vbcast.lane.b32.xlu1 %v996_v3, 280  ;;  %1006 = vbcast.lane.b32.xlu0 %v996_v3, 272  ;;  %v1091_v3 = vrot.slane %v6507_v27, %v6368_v9 }
  0xb6   :  { %v6487_v16 = vpop.permute.xlu1 %744  ;;  %v6489_v18 = vpop.permute.xlu0 %740 }
  0xb8   :  { %1021 = vbcast.lane.b32.xlu1 %v1015_v14, 264  ;;  %1017 = vbcast.lane.b32.xlu0 %v1015_v14, 256 }
  0xba   :  { %v6491_v20 = vpop.permute.xlu1 %755  ;;  %v6493_v21 = vpop.permute.xlu0 %751 }
  0xbc   :  { %1029 = vbcast.lane.b32.xlu1 %v1015_v14, 280  ;;  %1025 = vbcast.lane.b32.xlu0 %v1015_v14, 272 }
  0xbe   :  { %v6503_v25 = vpop.permute.xlu1 %763  ;;  %v6505_v26 = vpop.permute.xlu0 %759 }
  0xc0   :  { %1040 = vbcast.lane.b32.xlu1 %v1034_v22, 264  ;;  %1036 = vbcast.lane.b32.xlu0 %v1034_v22, 256 }
  0xc2   :  { %v6509_v28 = vpop.permute.xlu1 %774  ;;  %v6511_v29 = vpop.permute.xlu0 %770 }
  0xc4   :  { %1048 = vbcast.lane.b32.xlu1 %v1034_v22, 280  ;;  %1044 = vbcast.lane.b32.xlu0 %v1034_v22, 272 }
  0xc6   :  { %v6515_v33 = vpop.permute.xlu1 %782  ;;  %v6517_v34 = vpop.permute.xlu0 %778 }
  0xc8   :  { %1059 = vbcast.lane.b32.xlu1 %v1053_v30, 264  ;;  %1055 = vbcast.lane.b32.xlu0 %v1053_v30, 256 }
  0xca   :  { %v6519_v35 = vpop.permute.xlu1 %793  ;;  %v6521_v38 = vpop.permute.xlu0 %789 }
  0xcc   :  { %1067 = vbcast.lane.b32.xlu1 %v1053_v30, 280  ;;  %1063 = vbcast.lane.b32.xlu0 %v1053_v30, 272  ;;  %v1110_v30 = vrot.slane %v6507_v27, %v6372_v11 }
  0xce   :  { %v6525_v46 = vpop.permute.xlu1 %801  ;;  %v6527_v51 = vpop.permute.xlu0 %797 }
  0xcf   :  { %11285 = vst [vmem:[#allocation10_spill] sm:$0xff] %v6525_v46  ;;  %v73_v46 = vld [vmem:[%s11266_s3 + $0x38] sm:$0xff] }
  0xd0   :  { %1078 = vbcast.lane.b32.xlu1 %v1072_v41, 264  ;;  %1074 = vbcast.lane.b32.xlu0 %v1072_v41, 256 }
  0xd2   :  { %v6529_v56 = vpop.permute.xlu1 %812  ;;  %v6531_v61 = vpop.permute.xlu0 %808 }
  0xd3   :  { %11286 = vst [vmem:[#allocation11_spill] sm:$0xff] %v6529_v56  ;;  %11287 = vst [vmem:[#allocation12_spill] sm:$0xff] %v6531_v61 }
  0xd4   :  { %1086 = vbcast.lane.b32.xlu1 %v1072_v41, 280  ;;  %1082 = vbcast.lane.b32.xlu0 %v1072_v41, 272 }
  0xd6   :  { %v6535_v14 = vpop.permute.xlu1 %820  ;;  %v6537_v22 = vpop.permute.xlu0 %816 }
  0xd7   :  { %11288 = vst [vmem:[#allocation13_spill] sm:$0xff] %v6535_v14  ;;  %11289 = vst [vmem:[#allocation14_spill] sm:$0xff] %v6537_v22 }
  0xd8   :  { %1097 = vbcast.lane.b32.xlu1 %v1091_v3, 264  ;;  %1093 = vbcast.lane.b32.xlu0 %v1091_v3, 256 }
  0xda   :  { %v6539_v23 = vpop.permute.xlu1 %831  ;;  %v6541_v24 = vpop.permute.xlu0 %827 }
  0xdb   :  { %11290 = vst [vmem:[#allocation15_spill] sm:$0xff] %v6539_v23  ;;  %11291 = vst [vmem:[#allocation16_spill] sm:$0xff] %v6541_v24  ;;  %v1129_v24 = vrot.slane %v6507_v27, %v6376_v13 }
  0xdc   :  { %1105 = vbcast.lane.b32.xlu1 %v1091_v3, 280  ;;  %1101 = vbcast.lane.b32.xlu0 %v1091_v3, 272 }
  0xde   :  { %v6545_v2 = vpop.permute.xlu1 %839  ;;  %v6547_v41 = vpop.permute.xlu0 %835 }
  0xdf   :  { %11292 = vst [vmem:[#allocation17_spill] sm:$0xff] %v6545_v2  ;;  %11293 = vst [vmem:[#allocation18_spill] sm:$0xff] %v6547_v41 }
  0xe0   :  { %1116 = vbcast.lane.b32.xlu1 %v1110_v30, 264  ;;  %1112 = vbcast.lane.b32.xlu0 %v1110_v30, 256 }
  0xe2   :  { %v6549_v4 = vpop.permute.xlu1 %850  ;;  %v6551_v14 = vpop.permute.xlu0 %846 }
  0xe3   :  { %11294 = vst [vmem:[#allocation19_spill] sm:$0xff] %v6549_v4  ;;  %11295 = vst [vmem:[#allocation20_spill] sm:$0xff] %v6551_v14  ;;  %v1148_v14 = vrot.slane %v6507_v27, %v6380_v15 }
  0xe4   :  { %1124 = vbcast.lane.b32.xlu1 %v1110_v30, 280  ;;  %1120 = vbcast.lane.b32.xlu0 %v1110_v30, 272 }
  0xe6   :  { %v6555_v23 = vpop.permute.xlu1 %858  ;;  %v6557_v3 = vpop.permute.xlu0 %854 }
  0xe7   :  { %11296 = vst [vmem:[#allocation21_spill] sm:$0xff] %v6555_v23  ;;  %11297 = vst [vmem:[#allocation22_spill] sm:$0xff] %v6557_v3 }
  0xe8   :  { %1135 = vbcast.lane.b32.xlu1 %v1129_v24, 264  ;;  %1131 = vbcast.lane.b32.xlu0 %v1129_v24, 256 }
  0xea   :  { %v6559_v2 = vpop.permute.xlu1 %869  ;;  %v6561_v41 = vpop.permute.xlu0 %865 }
  0xeb   :  { %11298 = vst [vmem:[#allocation23_spill] sm:$0xff] %v6559_v2  ;;  %11299 = vst [vmem:[#allocation24_spill] sm:$0xff] %v6561_v41  ;;  %v1167_v41 = vrot.slane %v6507_v27, %v6384_v17 }
  0xec   :  { %1143 = vbcast.lane.b32.xlu1 %v1129_v24, 280  ;;  %1139 = vbcast.lane.b32.xlu0 %v1129_v24, 272 }
  0xee   :  { %v6565_v4 = vpop.permute.xlu1 %877  ;;  %v6567_v30 = vpop.permute.xlu0 %873 }
  0xef   :  { %11300 = vst [vmem:[#allocation25_spill] sm:$0xff] %v6565_v4  ;;  %11301 = vst [vmem:[#allocation26_spill] sm:$0xff] %v6567_v30 }
  0xf0   :  { %1154 = vbcast.lane.b32.xlu1 %v1148_v14, 264  ;;  %1150 = vbcast.lane.b32.xlu0 %v1148_v14, 256 }
  0xf2   :  { %v6569_v23 = vpop.permute.xlu1 %888  ;;  %v6571_v3 = vpop.permute.xlu0 %884 }
  0xf3   :  { %11302 = vst [vmem:[#allocation27_spill] sm:$0xff] %v6569_v23  ;;  %11303 = vst [vmem:[#allocation28_spill] sm:$0xff] %v6571_v3  ;;  %v1186_v3 = vrot.slane %v6507_v27, %v6388_v19 }
  0xf4   :  { %1162 = vbcast.lane.b32.xlu1 %v1148_v14, 280  ;;  %1158 = vbcast.lane.b32.xlu0 %v1148_v14, 272  ;;  %v22_v14 = vld [vmem:[%s11263_s0 + $0x20] sm:$0xff] }
  0xf6   :  { %v6575_v2 = vpop.permute.xlu1 %896  ;;  %v6577_v24 = vpop.permute.xlu0 %892 }
  0xf7   :  { %11304 = vst [vmem:[#allocation29_spill] sm:$0xff] %v6575_v2  ;;  %11305 = vst [vmem:[#allocation30_spill] sm:$0xff] %v6577_v24  ;;  %v38_v2 = vld [vmem:[%s11264_s1 + $0x20] sm:$0xff] }
  0xf8   :  { %1173 = vbcast.lane.b32.xlu1 %v1167_v41, 264  ;;  %1169 = vbcast.lane.b32.xlu0 %v1167_v41, 256 }
  0xfa   :  { %v6579_v4 = vpop.permute.xlu1 %907  ;;  %v6581_v30 = vpop.permute.xlu0 %903 }
  0xfb   :  { %11306 = vst [vmem:[#allocation31_spill] sm:$0xff] %v6579_v4  ;;  %11307 = vst [vmem:[#allocation32_spill] sm:$0xff] %v6581_v30  ;;  %v6595_v30 = vsub.f32 %v22_v14, %v38_v2 }
  0xfc   :  { %1181 = vbcast.lane.b32.xlu1 %v1167_v41, 280  ;;  %1177 = vbcast.lane.b32.xlu0 %v1167_v41, 272 }
  0xfd   :  { %v1205_v27 = vrot.slane %v6595_v30, %v6360_v5  ;;  %v1224_v2 = vrot.slane %v6595_v30, %v6364_v7 }
  0xfe   :  { %v6591_v24 = vpop.permute.xlu1 %915  ;;  %v6593_v23 = vpop.permute.xlu0 %911 }
  0xff   :  { %11308 = vst [vmem:[#allocation33_spill] sm:$0xff] %v6591_v24  ;;  %11309 = vst [vmem:[#allocation34_spill] sm:$0xff] %v6593_v23 }
 0x100   :  { %1192 = vbcast.lane.b32.xlu1 %v1186_v3, 264  ;;  %1188 = vbcast.lane.b32.xlu0 %v1186_v3, 256 }
 0x102   :  { %v6597_v41 = vpop.permute.xlu1 %926  ;;  %v6599_v4 = vpop.permute.xlu0 %922 }
 0x103   :  { %11310 = vst [vmem:[#allocation35_spill] sm:$0xff] %v6597_v41  ;;  %11311 = vst [vmem:[#allocation36_spill] sm:$0xff] %v6599_v4 }
 0x104   :  { %1200 = vbcast.lane.b32.xlu1 %v1186_v3, 280  ;;  %1196 = vbcast.lane.b32.xlu0 %v1186_v3, 272 }
 0x106   :  { %v6603_v22 = vpop.permute.xlu1 %934  ;;  %v6605_v61 = vpop.permute.xlu0 %930 }
 0x107   :  { %11312 = vst [vmem:[#allocation37_spill] sm:$0xff] %v6603_v22  ;;  %11313 = vst [vmem:[#allocation38_spill] sm:$0xff] %v6605_v61 }
 0x108   :  { %1211 = vbcast.lane.b32.xlu1 %v1205_v27, 264  ;;  %1207 = vbcast.lane.b32.xlu0 %v1205_v27, 256 }
 0x10a   :  { %v6607_v24 = vpop.permute.xlu1 %945  ;;  %v6609_v23 = vpop.permute.xlu0 %941 }
 0x10b   :  { %11314 = vst [vmem:[#allocation39_spill] sm:$0xff] %v6607_v24  ;;  %11315 = vst [vmem:[#allocation40_spill] sm:$0xff] %v6609_v23  ;;  %v1243_v23 = vrot.slane %v6595_v30, %v6368_v9 }
 0x10c   :  { %1219 = vbcast.lane.b32.xlu1 %v1205_v27, 280  ;;  %1215 = vbcast.lane.b32.xlu0 %v1205_v27, 272 }
 0x10e   :  { %v6613_v14 = vpop.permute.xlu1 %953  ;;  %v6615_v3 = vpop.permute.xlu0 %949 }
 0x10f   :  { %11316 = vst [vmem:[#allocation41_spill] sm:$0xff] %v6613_v14  ;;  %11317 = vst [vmem:[#allocation42_spill] sm:$0xff] %v6615_v3 }
 0x110   :  { %1230 = vbcast.lane.b32.xlu1 %v1224_v2, 264  ;;  %1226 = vbcast.lane.b32.xlu0 %v1224_v2, 256 }
 0x112   :  { %v6617_v22 = vpop.permute.xlu1 %964  ;;  %v6619_v61 = vpop.permute.xlu0 %960 }
 0x113   :  { %11318 = vst [vmem:[#allocation43_spill] sm:$0xff] %v6617_v22  ;;  %11319 = vst [vmem:[#allocation44_spill] sm:$0xff] %v6619_v61  ;;  %v1262_v61 = vrot.slane %v6595_v30, %v6372_v11 }
 0x114   :  { %1238 = vbcast.lane.b32.xlu1 %v1224_v2, 280  ;;  %1234 = vbcast.lane.b32.xlu0 %v1224_v2, 272 }
 0x116   :  { %v6623_v24 = vpop.permute.xlu1 %972  ;;  %v6625_v27 = vpop.permute.xlu0 %968 }
 0x117   :  { %11320 = vst [vmem:[#allocation45_spill] sm:$0xff] %v6623_v24  ;;  %11321 = vst [vmem:[#allocation46_spill] sm:$0xff] %v6625_v27 }
 0x118   :  { %1249 = vbcast.lane.b32.xlu1 %v1243_v23, 264  ;;  %1245 = vbcast.lane.b32.xlu0 %v1243_v23, 256 }
 0x11a   :  { %v6627_v14 = vpop.permute.xlu1 %983  ;;  %v6629_v3 = vpop.permute.xlu0 %979 }
 0x11b   :  { %11322 = vst [vmem:[#allocation47_spill] sm:$0xff] %v6627_v14  ;;  %11323 = vst [vmem:[#allocation48_spill] sm:$0xff] %v6629_v3  ;;  %v1281_v3 = vrot.slane %v6595_v30, %v6376_v13 }
 0x11c   :  { %1257 = vbcast.lane.b32.xlu1 %v1243_v23, 280  ;;  %1253 = vbcast.lane.b32.xlu0 %v1243_v23, 272 }
 0x11e   :  { %v6633_v22 = vpop.permute.xlu1 %991  ;;  %v6635_v2 = vpop.permute.xlu0 %987 }
 0x11f   :  { %11324 = vst [vmem:[#allocation49_spill] sm:$0xff] %v6633_v22  ;;  %11325 = vst [vmem:[#allocation50_spill] sm:$0xff] %v6635_v2 }
 0x120   :  { %1268 = vbcast.lane.b32.xlu1 %v1262_v61, 264  ;;  %1264 = vbcast.lane.b32.xlu0 %v1262_v61, 256 }
 0x122   :  { %v6637_v24 = vpop.permute.xlu1 %1002  ;;  %v6639_v27 = vpop.permute.xlu0 %998 }
 0x123   :  { %11326 = vst [vmem:[#allocation51_spill] sm:$0xff] %v6637_v24  ;;  %11327 = vst [vmem:[#allocation52_spill] sm:$0xff] %v6639_v27  ;;  %v1300_v27 = vrot.slane %v6595_v30, %v6380_v15 }
 0x124   :  { %1276 = vbcast.lane.b32.xlu1 %v1262_v61, 280  ;;  %1272 = vbcast.lane.b32.xlu0 %v1262_v61, 272 }
 0x126   :  { %v6643_v14 = vpop.permute.xlu1 %1010  ;;  %v6645_v23 = vpop.permute.xlu0 %1006 }
 0x127   :  { %11328 = vst [vmem:[#allocation53_spill] sm:$0xff] %v6643_v14  ;;  %11329 = vst [vmem:[#allocation54_spill] sm:$0xff] %v6645_v23 }
 0x128   :  { %1287 = vbcast.lane.b32.xlu1 %v1281_v3, 264  ;;  %1283 = vbcast.lane.b32.xlu0 %v1281_v3, 256 }
 0x12a   :  { %v6647_v22 = vpop.permute.xlu1 %1021  ;;  %v6649_v2 = vpop.permute.xlu0 %1017 }
 0x12b   :  { %11330 = vst [vmem:[#allocation55_spill] sm:$0xff] %v6647_v22  ;;  %11331 = vst [vmem:[#allocation56_spill] sm:$0xff] %v6649_v2  ;;  %v1319_v2 = vrot.slane %v6595_v30, %v6384_v17 }
 0x12c   :  { %1295 = vbcast.lane.b32.xlu1 %v1281_v3, 280  ;;  %1291 = vbcast.lane.b32.xlu0 %v1281_v3, 272 }
 0x12e   :  { %v6653_v24 = vpop.permute.xlu1 %1029  ;;  %v6655_v61 = vpop.permute.xlu0 %1025 }
 0x12f   :  { %11332 = vst [vmem:[#allocation57_spill] sm:$0xff] %v6653_v24  ;;  %11333 = vst [vmem:[#allocation58_spill] sm:$0xff] %v6655_v61 }
 0x130   :  { %1306 = vbcast.lane.b32.xlu1 %v1300_v27, 264  ;;  %1302 = vbcast.lane.b32.xlu0 %v1300_v27, 256 }
 0x132   :  { %v6657_v14 = vpop.permute.xlu1 %1040  ;;  %v6659_v23 = vpop.permute.xlu0 %1036 }
 0x133   :  { %11334 = vst [vmem:[#allocation59_spill] sm:$0xff] %v6657_v14  ;;  %11335 = vst [vmem:[#allocation60_spill] sm:$0xff] %v6659_v23  ;;  %v1338_v23 = vrot.slane %v6595_v30, %v6388_v19 }
 0x134   :  { %1314 = vbcast.lane.b32.xlu1 %v1300_v27, 280  ;;  %1310 = vbcast.lane.b32.xlu0 %v1300_v27, 272  ;;  %v23_v27 = vld [vmem:[%s11263_s0 + $0x28] sm:$0xff] }
 0x136   :  { %v6663_v22 = vpop.permute.xlu1 %1048  ;;  %v6665_v3 = vpop.permute.xlu0 %1044 }
 0x137   :  { %11336 = vst [vmem:[#allocation61_spill] sm:$0xff] %v6663_v22  ;;  %11337 = vst [vmem:[#allocation62_spill] sm:$0xff] %v6665_v3  ;;  %v39_v22 = vld [vmem:[%s11264_s1 + $0x28] sm:$0xff] }
 0x138   :  { %1325 = vbcast.lane.b32.xlu1 %v1319_v2, 264  ;;  %1321 = vbcast.lane.b32.xlu0 %v1319_v2, 256 }
 0x13a   :  { %v6667_v24 = vpop.permute.xlu1 %1059  ;;  %v6669_v61 = vpop.permute.xlu0 %1055 }
 0x13b   :  { %11338 = vst [vmem:[#allocation63_spill] sm:$0xff] %v6667_v24  ;;  %11339 = vst [vmem:[#allocation64_spill] sm:$0xff] %v6669_v61  ;;  %v6683_v61 = vsub.f32 %v23_v27, %v39_v22 }
 0x13c   :  { %1333 = vbcast.lane.b32.xlu1 %v1319_v2, 280  ;;  %1329 = vbcast.lane.b32.xlu0 %v1319_v2, 272 }
 0x13d   :  { %v1357_v30 = vrot.slane %v6683_v61, %v6360_v5  ;;  %v1376_v22 = vrot.slane %v6683_v61, %v6364_v7 }
 0x13e   :  { %v6679_v3 = vpop.permute.xlu1 %1067  ;;  %v6681_v14 = vpop.permute.xlu0 %1063 }
 0x13f   :  { %11340 = vst [vmem:[#allocation65_spill] sm:$0xff] %v6679_v3  ;;  %11341 = vst [vmem:[#allocation66_spill] sm:$0xff] %v6681_v14 }
 0x140   :  { %1344 = vbcast.lane.b32.xlu1 %v1338_v23, 264  ;;  %1340 = vbcast.lane.b32.xlu0 %v1338_v23, 256 }
 0x142   :  { %v6685_v2 = vpop.permute.xlu1 %1078  ;;  %v6687_v24 = vpop.permute.xlu0 %1074 }
 0x143   :  { %11342 = vst [vmem:[#allocation67_spill] sm:$0xff] %v6685_v2  ;;  %11343 = vst [vmem:[#allocation68_spill] sm:$0xff] %v6687_v24 }
 0x144   :  { %1352 = vbcast.lane.b32.xlu1 %v1338_v23, 280  ;;  %1348 = vbcast.lane.b32.xlu0 %v1338_v23, 272 }
 0x146   :  { %v6691_v4 = vpop.permute.xlu1 %1086  ;;  %v6693_v41 = vpop.permute.xlu0 %1082 }
 0x147   :  { %11344 = vst [vmem:[#allocation69_spill] sm:$0xff] %v6691_v4  ;;  %11345 = vst [vmem:[#allocation70_spill] sm:$0xff] %v6693_v41 }
 0x148   :  { %1363 = vbcast.lane.b32.xlu1 %v1357_v30, 264  ;;  %1359 = vbcast.lane.b32.xlu0 %v1357_v30, 256 }
 0x14a   :  { %v6695_v3 = vpop.permute.xlu1 %1097  ;;  %v6697_v14 = vpop.permute.xlu0 %1093 }
 0x14b   :  { %11346 = vst [vmem:[#allocation71_spill] sm:$0xff] %v6695_v3  ;;  %11347 = vst [vmem:[#allocation72_spill] sm:$0xff] %v6697_v14  ;;  %v1395_v14 = vrot.slane %v6683_v61, %v6368_v9 }
 0x14c   :  { %1371 = vbcast.lane.b32.xlu1 %v1357_v30, 280  ;;  %1367 = vbcast.lane.b32.xlu0 %v1357_v30, 272 }
 0x14e   :  { %v6701_v27 = vpop.permute.xlu1 %1105  ;;  %v6703_v23 = vpop.permute.xlu0 %1101 }
 0x14f   :  { %11348 = vst [vmem:[#allocation73_spill] sm:$0xff] %v6701_v27  ;;  %11349 = vst [vmem:[#allocation74_spill] sm:$0xff] %v6703_v23 }
 0x150   :  { %1382 = vbcast.lane.b32.xlu1 %v1376_v22, 264  ;;  %1378 = vbcast.lane.b32.xlu0 %v1376_v22, 256 }
 0x152   :  { %v6705_v4 = vpop.permute.xlu1 %1116  ;;  %v6707_v41 = vpop.permute.xlu0 %1112 }
 0x153   :  { %11350 = vst [vmem:[#allocation75_spill] sm:$0xff] %v6705_v4  ;;  %11351 = vst [vmem:[#allocation76_spill] sm:$0xff] %v6707_v41  ;;  %v1414_v41 = vrot.slane %v6683_v61, %v6372_v11 }
 0x154   :  { %1390 = vbcast.lane.b32.xlu1 %v1376_v22, 280  ;;  %1386 = vbcast.lane.b32.xlu0 %v1376_v22, 272 }
 0x156   :  { %v6711_v3 = vpop.permute.xlu1 %1124  ;;  %v6713_v30 = vpop.permute.xlu0 %1120 }
 0x157   :  { %11352 = vst [vmem:[#allocation77_spill] sm:$0xff] %v6711_v3  ;;  %11353 = vst [vmem:[#allocation78_spill] sm:$0xff] %v6713_v30 }
 0x158   :  { %1401 = vbcast.lane.b32.xlu1 %v1395_v14, 264  ;;  %1397 = vbcast.lane.b32.xlu0 %v1395_v14, 256 }
 0x15a   :  { %v6715_v27 = vpop.permute.xlu1 %1135  ;;  %v6717_v23 = vpop.permute.xlu0 %1131 }
 0x15b   :  { %11354 = vst [vmem:[#allocation79_spill] sm:$0xff] %v6715_v27  ;;  %11355 = vst [vmem:[#allocation80_spill] sm:$0xff] %v6717_v23  ;;  %v1433_v23 = vrot.slane %v6683_v61, %v6376_v13 }
 0x15c   :  { %1409 = vbcast.lane.b32.xlu1 %v1395_v14, 280  ;;  %1405 = vbcast.lane.b32.xlu0 %v1395_v14, 272 }
 0x15e   :  { %v6721_v4 = vpop.permute.xlu1 %1143  ;;  %v6723_v22 = vpop.permute.xlu0 %1139 }
 0x15f   :  { %11356 = vst [vmem:[#allocation81_spill] sm:$0xff] %v6721_v4  ;;  %11357 = vst [vmem:[#allocation82_spill] sm:$0xff] %v6723_v22 }
 0x160   :  { %1420 = vbcast.lane.b32.xlu1 %v1414_v41, 264  ;;  %1416 = vbcast.lane.b32.xlu0 %v1414_v41, 256 }
 0x162   :  { %v6725_v3 = vpop.permute.xlu1 %1154  ;;  %v6727_v30 = vpop.permute.xlu0 %1150 }
 0x163   :  { %11358 = vst [vmem:[#allocation83_spill] sm:$0xff] %v6725_v3  ;;  %11359 = vst [vmem:[#allocation84_spill] sm:$0xff] %v6727_v30  ;;  %v1452_v30 = vrot.slane %v6683_v61, %v6380_v15 }
 0x164   :  { %1428 = vbcast.lane.b32.xlu1 %v1414_v41, 280  ;;  %1424 = vbcast.lane.b32.xlu0 %v1414_v41, 272 }
 0x166   :  { %v6731_v27 = vpop.permute.xlu1 %1162  ;;  %v6733_v14 = vpop.permute.xlu0 %1158 }
 0x167   :  { %11360 = vst [vmem:[#allocation85_spill] sm:$0xff] %v6731_v27  ;;  %11361 = vst [vmem:[#allocation86_spill] sm:$0xff] %v6733_v14 }
 0x168   :  { %1439 = vbcast.lane.b32.xlu1 %v1433_v23, 264  ;;  %1435 = vbcast.lane.b32.xlu0 %v1433_v23, 256 }
 0x16a   :  { %v6735_v4 = vpop.permute.xlu1 %1173  ;;  %v6737_v22 = vpop.permute.xlu0 %1169 }
 0x16b   :  { %11362 = vst [vmem:[#allocation87_spill] sm:$0xff] %v6735_v4  ;;  %11363 = vst [vmem:[#allocation88_spill] sm:$0xff] %v6737_v22  ;;  %v1471_v22 = vrot.slane %v6683_v61, %v6384_v17 }
 0x16c   :  { %1447 = vbcast.lane.b32.xlu1 %v1433_v23, 280  ;;  %1443 = vbcast.lane.b32.xlu0 %v1433_v23, 272 }
 0x16e   :  { %v6741_v3 = vpop.permute.xlu1 %1181  ;;  %v6743_v41 = vpop.permute.xlu0 %1177 }
 0x16f   :  { %11364 = vst [vmem:[#allocation89_spill] sm:$0xff] %v6741_v3  ;;  %11365 = vst [vmem:[#allocation90_spill] sm:$0xff] %v6743_v41 }
 0x170   :  { %1458 = vbcast.lane.b32.xlu1 %v1452_v30, 264  ;;  %1454 = vbcast.lane.b32.xlu0 %v1452_v30, 256 }
 0x172   :  { %v6745_v27 = vpop.permute.xlu1 %1192  ;;  %v6747_v14 = vpop.permute.xlu0 %1188 }
 0x173   :  { %11366 = vst [vmem:[#allocation91_spill] sm:$0xff] %v6745_v27  ;;  %11367 = vst [vmem:[#allocation92_spill] sm:$0xff] %v6747_v14  ;;  %v1490_v14 = vrot.slane %v6683_v61, %v6388_v19 }
 0x174   :  { %1466 = vbcast.lane.b32.xlu1 %v1452_v30, 280  ;;  %1462 = vbcast.lane.b32.xlu0 %v1452_v30, 272  ;;  %v24_v30 = vld [vmem:[%s11263_s0 + $0x30] sm:$0xff] }
 0x176   :  { %v6751_v4 = vpop.permute.xlu1 %1200  ;;  %v6753_v23 = vpop.permute.xlu0 %1196 }
 0x177   :  { %11368 = vst [vmem:[#allocation93_spill] sm:$0xff] %v6751_v4  ;;  %11369 = vst [vmem:[#allocation94_spill] sm:$0xff] %v6753_v23  ;;  %v40_v4 = vld [vmem:[%s11264_s1 + $0x30] sm:$0xff] }
 0x178   :  { %1477 = vbcast.lane.b32.xlu1 %v1471_v22, 264  ;;  %1473 = vbcast.lane.b32.xlu0 %v1471_v22, 256 }
 0x17a   :  { %v6755_v3 = vpop.permute.xlu1 %1211  ;;  %v6757_v41 = vpop.permute.xlu0 %1207 }
 0x17b   :  { %11370 = vst [vmem:[#allocation95_spill] sm:$0xff] %v6755_v3  ;;  %11371 = vst [vmem:[#allocation96_spill] sm:$0xff] %v6757_v41  ;;  %v6771_v41 = vsub.f32 %v24_v30, %v40_v4 }
 0x17c   :  { %1485 = vbcast.lane.b32.xlu1 %v1471_v22, 280  ;;  %1481 = vbcast.lane.b32.xlu0 %v1471_v22, 272 }
 0x17d   :  { %v1509_v61 = vrot.slane %v6771_v41, %v6360_v5  ;;  %v1528_v4 = vrot.slane %v6771_v41, %v6364_v7 }
 0x17e   :  { %v6767_v23 = vpop.permute.xlu1 %1219  ;;  %v6769_v27 = vpop.permute.xlu0 %1215 }
 0x17f   :  { %11372 = vst [vmem:[#allocation97_spill] sm:$0xff] %v6767_v23  ;;  %11373 = vst [vmem:[#allocation98_spill] sm:$0xff] %v6769_v27 }
 0x180   :  { %1496 = vbcast.lane.b32.xlu1 %v1490_v14, 264  ;;  %1492 = vbcast.lane.b32.xlu0 %v1490_v14, 256 }
 0x182   :  { %v6773_v22 = vpop.permute.xlu1 %1230  ;;  %v6775_v3 = vpop.permute.xlu0 %1226 }
 0x183   :  { %11374 = vst [vmem:[#allocation99_spill] sm:$0xff] %v6773_v22  ;;  %11375 = vst [vmem:[#allocation100_spill] sm:$0xff] %v6775_v3 }
 0x184   :  { %1504 = vbcast.lane.b32.xlu1 %v1490_v14, 280  ;;  %1500 = vbcast.lane.b32.xlu0 %v1490_v14, 272 }
 0x186   :  { %v6779_v24 = vpop.permute.xlu1 %1238  ;;  %v6781_v2 = vpop.permute.xlu0 %1234 }
 0x187   :  { %11376 = vst [vmem:[#allocation101_spill] sm:$0xff] %v6779_v24  ;;  %11377 = vst [vmem:[#allocation102_spill] sm:$0xff] %v6781_v2 }
 0x188   :  { %1515 = vbcast.lane.b32.xlu1 %v1509_v61, 264  ;;  %1511 = vbcast.lane.b32.xlu0 %v1509_v61, 256 }
 0x18a   :  { %v6783_v23 = vpop.permute.xlu1 %1249  ;;  %v6785_v27 = vpop.permute.xlu0 %1245 }
 0x18b   :  { %11378 = vst [vmem:[#allocation103_spill] sm:$0xff] %v6783_v23  ;;  %11379 = vst [vmem:[#allocation104_spill] sm:$0xff] %v6785_v27  ;;  %v1547_v27 = vrot.slane %v6771_v41, %v6368_v9 }
 0x18c   :  { %1523 = vbcast.lane.b32.xlu1 %v1509_v61, 280  ;;  %1519 = vbcast.lane.b32.xlu0 %v1509_v61, 272 }
 0x18e   :  { %v6789_v30 = vpop.permute.xlu1 %1257  ;;  %v6791_v14 = vpop.permute.xlu0 %1253 }
 0x18f   :  { %11380 = vst [vmem:[#allocation105_spill] sm:$0xff] %v6789_v30  ;;  %11381 = vst [vmem:[#allocation106_spill] sm:$0xff] %v6791_v14 }
 0x190   :  { %1534 = vbcast.lane.b32.xlu1 %v1528_v4, 264  ;;  %1530 = vbcast.lane.b32.xlu0 %v1528_v4, 256 }
 0x192   :  { %v6793_v24 = vpop.permute.xlu1 %1268  ;;  %v6795_v2 = vpop.permute.xlu0 %1264 }
 0x193   :  { %11382 = vst [vmem:[#allocation107_spill] sm:$0xff] %v6793_v24  ;;  %11383 = vst [vmem:[#allocation108_spill] sm:$0xff] %v6795_v2  ;;  %v1566_v2 = vrot.slane %v6771_v41, %v6372_v11 }
 0x194   :  { %1542 = vbcast.lane.b32.xlu1 %v1528_v4, 280  ;;  %1538 = vbcast.lane.b32.xlu0 %v1528_v4, 272  ;;  %v67_v4 = vld [vmem:[%s11266_s3 + $0x8] sm:$0xff] }
 0x196   :  { %v6799_v23 = vpop.permute.xlu1 %1276  ;;  %v6801_v61 = vpop.permute.xlu0 %1272 }
 0x197   :  { %11384 = vst [vmem:[#allocation109_spill] sm:$0xff] %v6799_v23  ;;  %11385 = vst [vmem:[#allocation110_spill] sm:$0xff] %v6801_v61  ;;  %v66_v61 = vld [vmem:[%s11266_s3] sm:$0xff] }
 0x198   :  { %1553 = vbcast.lane.b32.xlu1 %v1547_v27, 264  ;;  %1549 = vbcast.lane.b32.xlu0 %v1547_v27, 256  ;;  %v3026_v3 = vmul.f32 %v6406_v32, %v66_v61  ;;  %v70_v32 = vld [vmem:[%s11266_s3 + $0x20] sm:$0xff] }
 0x19a   :  { %v6803_v30 = vpop.permute.xlu1 %1287  ;;  %v6805_v14 = vpop.permute.xlu0 %1283 }
 0x19b   :  { %11386 = vst [vmem:[#allocation111_spill] sm:$0xff] %v6803_v30  ;;  %11387 = vst [vmem:[#allocation112_spill] sm:$0xff] %v6805_v14  ;;  %v3027_v14 = vmul.f32 %v6417_v37, %v67_v4  ;;  %v71_v37 = vld [vmem:[%s11266_s3 + $0x28] sm:$0xff] }
 0x19c   :  { %1561 = vbcast.lane.b32.xlu1 %v1547_v27, 280  ;;  %1557 = vbcast.lane.b32.xlu0 %v1547_v27, 272  ;;  %v3031_v56 = vmul.f32 %v6421_v39, %v71_v37  ;;  %v1604_v39 = vrot.slane %v6771_v41, %v6380_v15 }
 0x19d   :  { %v3540_v22 = vsel %vm3538_vm0, %v3027_v14, 0.0  ;;  %v69_v14 = vld [vmem:[%s11266_s3 + $0x18] sm:$0xff] }
 0x19e   :  { %v6812_v24 = vpop.permute.xlu1 %1295  ;;  %v6814_v23 = vpop.permute.xlu0 %1291 }
 0x19f   :  { %11388 = vst [vmem:[#allocation113_spill] sm:$0xff] %v6812_v24  ;;  %11389 = vst [vmem:[#allocation114_spill] sm:$0xff] %v6814_v23  ;;  %v68_v24 = vld [vmem:[%s11266_s3 + $0x10] sm:$0xff]  ;;  %v1585_v23 = vrot.slane %v6771_v41, %v6376_v13 }
 0x1a0   :  { %1572 = vbcast.lane.b32.xlu1 %v1566_v2, 264  ;;  %1568 = vbcast.lane.b32.xlu0 %v1566_v2, 256  ;;  %v72_v13 = vld [vmem:[%s11266_s3 + $0x30] sm:$0xff] }
 0x1a2   :  { %v6820_v27 = vpop.permute.xlu1 %1306  ;;  %v6822_v30 = vpop.permute.xlu0 %1302 }
 0x1a3   :  { %11390 = vst [vmem:[#allocation115_spill] sm:$0xff] %v6820_v27  ;;  %11391 = vst [vmem:[#allocation116_spill] sm:$0xff] %v6822_v30  ;;  %v3028_v30 = vmul.f32 %v6404_v31, %v68_v24 }
 0x1a4   :  { %1580 = vbcast.lane.b32.xlu1 %v1566_v2, 280  ;;  %1576 = vbcast.lane.b32.xlu0 %v1566_v2, 272  ;;  %v3539_v2 = vsel %vm3538_vm0, %v3026_v3, 0.0  ;;  %v3029_v3 = vmul.f32 %v6415_v36, %v69_v14  ;;  %v75_v36 = vld [vmem:[%s11266_s3 + $0x48] sm:$0xff] }
 0x1a5   :  { %v3541_v27 = vadd.f32 %v3540_v22, %v3539_v2  ;;  %v3542_v24 = vsel %vm3538_vm0, %v3028_v30, 0.0  ;;  %v3032_v22 = vmul.f32 %v6429_v43, %v72_v13  ;;  %v74_v13 = vld [vmem:[%s11266_s3 + $0x40] sm:$0xff]  ;;  %v79_v43 = vld [vmem:[%s11266_s3 + $0x68] sm:$0xff] }
 0x1a6   :  { %v6837_v61 = vpop.permute.xlu1 %1314  ;;  %v6839_v4 = vpop.permute.xlu0 %1310 }
 0x1a7   :  { %11392 = vst [vmem:[#allocation117_spill] sm:$0xff] %v6837_v61  ;;  %11393 = vst [vmem:[#allocation118_spill] sm:$0xff] %v6839_v4  ;;  %v3030_v61 = vmul.f32 %v6423_v40, %v70_v32  ;;  %v3543_v2 = vadd.f32 %v3542_v24, %v3541_v27  ;;  %v3553_v40 = vsel %vm3538_vm0, %v3031_v56, 0.0  ;;  %v3544_v27 = vsel %vm3538_vm0, %v3029_v3, 0.0 }
 0x1a8   :  { %1591 = vbcast.lane.b32.xlu1 %v1585_v23, 264  ;;  %1587 = vbcast.lane.b32.xlu0 %v1585_v23, 256  ;;  %v3033_v32 = vmul.f32 %v6427_v42, %v73_v46  ;;  %v3034_v3 = vmul.f32 %v6433_v45, %v74_v13  ;;  %v3039_v42 = vmul.f32 %v6441_v49, %v79_v43  ;;  %v81_v49 = vld [vmem:[%s11266_s3 + $0x78] sm:$0xff] }
 0x1a9   :  { %v3552_v37 = vsel %vm3538_vm0, %v3030_v61, 0.0  ;;  %v3555_v61 = vsel %vm3538_vm0, %v3032_v22, 0.0  ;;  %v3545_v14 = vadd.f32 %v3544_v27, %v3543_v2  ;;  %v77_v27 = vld [vmem:[%s11266_s3 + $0x58] sm:$0xff] }
 0x1aa   :  { %v6851_v4 = vpop.permute.xlu1 %1325  ;;  %v6853_v31 = vpop.permute.xlu0 %1321  ;;  %v3554_v24 = vadd.f32 %v3553_v40, %v3552_v37  ;;  %v3557_v37 = vsel %vm3538_vm0, %v3033_v32, 0.0  ;;  %v3565_v13 = vsel %vm3538_vm0, %v3034_v3, 0.0  ;;  %v3579_v43 = vsel %vm3538_vm0, %v3039_v42, 0.0  ;;  %v83_v3 = vld [vmem:[%s11266_s3 + $0x88] sm:$0xff]  ;;  %v84_v42 = vld [vmem:[%s11266_s3 + $0x90] sm:$0xff] }
 0x1ab   :  { %11394 = vst [vmem:[#allocation119_spill] sm:$0xff] %v6851_v4  ;;  %11395 = vst [vmem:[#allocation120_spill] sm:$0xff] %v6853_v31  ;;  %v76_v31 = vld [vmem:[%s11266_s3 + $0x50] sm:$0xff]  ;;  %v3546_v45 = vrot.slane %v3545_v14, 4  ;;  %v3041_v32 = vmul.f32 %v6447_v52, %v81_v49  ;;  %v87_v52 = vld [vmem:[%s11266_s3 + $0xa8] sm:$0xff] }
 0x1ac   :  { %1599 = vbcast.lane.b32.xlu1 %v1585_v23, 280  ;;  %1595 = vbcast.lane.b32.xlu0 %v1585_v23, 272  ;;  %v78_v23 = vld [vmem:[%s11266_s3 + $0x60] sm:$0xff]  ;;  %v80_v4 = vld [vmem:[%s11266_s3 + $0x70] sm:$0xff]  ;;  %v3556_v22 = vadd.f32 %v3555_v61, %v3554_v24 }
 0x1ad   :  { %v3038_v46 = vmul.f32 %v6443_v50, %v78_v23  ;;  %v1623_v50 = vrot.slane %v6771_v41, %v6384_v17 }
 0x1ae   :  { %v6877_v30 = vpop.permute.xlu1 %1333  ;;  %v6879_v56 = vpop.permute.xlu0 %1329 }
 0x1af   :  { %11396 = vst [vmem:[#allocation121_spill] sm:$0xff] %v6877_v30  ;;  %11397 = vst [vmem:[#allocation122_spill] sm:$0xff] %v6879_v56  ;;  %v3035_v30 = vmul.f32 %v6431_v44, %v75_v36  ;;  %v3036_v56 = vmul.f32 %v6439_v48, %v76_v31  ;;  %v3040_v44 = vmul.f32 %v6449_v53, %v80_v4  ;;  %v3578_v48 = vsel %vm3538_vm0, %v3038_v46, 0.0  ;;  %v86_v46 = vld [vmem:[%s11266_s3 + $0xa0] sm:$0xff] }
 0x1b0   :  { %1610 = vbcast.lane.b32.xlu1 %v1604_v39, 264  ;;  %1606 = vbcast.lane.b32.xlu0 %v1604_v39, 256  ;;  %v3558_v31 = vadd.f32 %v3557_v37, %v3556_v22  ;;  %v3037_v53 = vmul.f32 %v6437_v47, %v77_v27  ;;  %v3580_v24 = vadd.f32 %v3579_v43, %v3578_v48  ;;  %v82_v47 = vld [vmem:[%s11266_s3 + $0x80] sm:$0xff]  ;;  %v85_v48 = vld [vmem:[%s11266_s3 + $0x98] sm:$0xff] }
 0x1b1   :  { %v3566_v36 = vsel %vm3538_vm0, %v3035_v30, 0.0  ;;  %v3581_v61 = vsel %vm3538_vm0, %v3040_v44, 0.0  ;;  %v3044_v43 = vmul.f32 %v6459_v58, %v84_v42  ;;  %v25_v58 = vld [vmem:[%s11263_s0 + $0x38] sm:$0xff] }
 0x1b2   :  { %v6894_v2 = vpop.permute.xlu1 %1344  ;;  %v6896_v40 = vpop.permute.xlu0 %1340  ;;  %v3567_v30 = vadd.f32 %v3566_v36, %v3565_v13  ;;  %v3559_v22 = vrot.slane %v3558_v31, 4  ;;  %v3570_v37 = vsel %vm3538_vm0, %v3037_v53, 0.0  ;;  %v3582_v44 = vadd.f32 %v3581_v61, %v3580_v24  ;;  %v88_v61 = vld [vmem:[%s11266_s3 + $0xb0] sm:$0xff]  ;;  %v95_v24 = vld [vmem:[%s11266_s3 + $0xe8] sm:$0xff] }
 0x1b3   :  { %v3042_v13 = vmul.f32 %v6453_v55, %v82_v47  ;;  %v3047_v53 = vmul.f32 %v6461_v59, %v87_v52  ;;  %v91_v55 = vld [vmem:[%s11266_s3 + $0xc8] sm:$0xff]  ;;  %v41_v59 = vld [vmem:[%s11264_s1 + $0x38] sm:$0xff] }
 0x1b4   :  { %1618 = vbcast.lane.b32.xlu1 %v1604_v39, 280  ;;  %1614 = vbcast.lane.b32.xlu0 %v1604_v39, 272  ;;  %v3568_v39 = vsel %vm3538_vm0, %v3036_v56, 0.0  ;;  %v6930_v56 = vadd.f32 %v3546_v45, %v3545_v14  ;;  %v3583_v14 = vsel %vm3538_vm0, %v3041_v32, 0.0  ;;  %v3043_v45 = vmul.f32 %v6451_v54, %v83_v3  ;;  %v94_v3 = vld [vmem:[%s11266_s3 + $0xe0] sm:$0xff] }
 0x1b5   :  { %v3569_v27 = vadd.f32 %v3568_v39, %v3567_v30  ;;  %v3046_v39 = vmul.f32 %v6463_v60, %v86_v46  ;;  %v1642_v54 = vrot.slane %v6771_v41, %v6388_v19  ;;  %v3560_v32 = vadd.f32 %v3559_v22, %v3558_v31  ;;  %v90_v41 = vld [vmem:[%s11266_s3 + $0xc0] sm:$0xff]  ;;  %v89_v22 = vld [vmem:[%s11266_s3 + $0xb8] sm:$0xff] }
 0x1b6   :  { %v6914_v4 = vpop.permute.xlu1 %1352  ;;  %v6916_v23 = vpop.permute.xlu0 %1348  ;;  %v3592_v31 = vsel %vm3538_vm0, %v3043_v45, 0.0  ;;  %v3591_v52 = vsel %vm3538_vm0, %v3042_v13, 0.0  ;;  %v3045_v46 = vmul.f32 %v6457_v57, %v85_v48  ;;  %v96_v57 = vld [vmem:[%s11266_s3 + $0xf0] sm:$0xff]  ;;  %v6998_v13 = vsub.f32 %v25_v58, %v41_v59 }
 0x1b7   :  { %v3571_v30 = vadd.f32 %v3570_v37, %v3569_v27  ;;  %v3048_v37 = vmul.f32 %v6469_v63, %v88_v61  ;;  %v92_v27 = vld [vmem:[%s11266_s3 + $0xd0] sm:$0xff]  ;;  %v3604_v45 = vsel %vm3538_vm0, %v3046_v39, 0.0  ;;  %v3051_v63 = vmul.f32 %v6471_v0, %v91_v55 }
 0x1b8   :  { %1629 = vbcast.lane.b32.xlu1 %v1623_v50, 264  ;;  %1625 = vbcast.lane.b32.xlu0 %v1623_v50, 256  ;;  %v3050_v48 = vmul.f32 %v6473_v1, %v90_v41  ;;  %v3055_v61 = vmul.f32 %v6481_v10, %v95_v24  ;;  %v3561_v60 = vrot.slane %v3560_v32, 2  ;;  %v3049_v39 = vmul.f32 %v6467_v62, %v89_v22  ;;  %v93_v62 = vld [vmem:[%s11266_s3 + $0xd8] sm:$0xff] }
 0x1b9   :  { %v3607_v59 = vsel %vm3538_vm0, %v3048_v37, 0.0  ;;  %v3052_v0 = vmul.f32 %v6479_v8, %v92_v27  ;;  %v3056_v1 = vmul.f32 %v6489_v18, %v96_v57  ;;  %v3596_v10 = vsel %vm3538_vm0, %v3045_v46, 0.0  ;;  %v97_v41 = vld [vmem:[%s11266_s3 + $0xf8] sm:$0xff] }
 0x1ba   :  { %v6939_v49 = vpop.permute.xlu1 %1363  ;;  %v6941_v36 = vpop.permute.xlu0 %1359  ;;  %v1661_v24 = vrot.slane %v6998_v13, %v6360_v5  ;;  %v3618_v8 = vsel %vm3538_vm0, %v3051_v63, 0.0  ;;  %v3617_v18 = vsel %vm3538_vm0, %v3050_v48, 0.0  ;;  %v3609_v46 = vsel %vm3538_vm0, %v3049_v39, 0.0 }
 0x1bb   :  { %11398 = vst [vmem:[#allocation123_spill] sm:$0xff] %v6941_v36 }
 0x1bc   :  { %1637 = vbcast.lane.b32.xlu1 %v1623_v50, 280  ;;  %1633 = vbcast.lane.b32.xlu0 %v1623_v50, 272  ;;  %v6967_v50 = vadd.f32 %v3583_v14, %v3582_v44  ;;  %v3594_v44 = vsel %vm3538_vm0, %v3044_v43, 0.0  ;;  %v3605_v14 = vsel %vm3538_vm0, %v3047_v53, 0.0  ;;  %v3054_v43 = vmul.f32 %v6483_v12, %v94_v3 }
 0x1bd   :  { %v3572_v53 = vrot.slane %v3571_v30, 4  ;;  %v3606_v55 = vadd.f32 %v3605_v14, %v3604_v45  ;;  %v3631_v3 = vsel %vm3538_vm0, %v3055_v61, 0.0  ;;  %v3057_v14 = vmul.f32 %v6487_v16, %v97_v41 }
 0x1be   :  { %v6978_v47 = vpop.permute.xlu1 %1371  ;;  %v6980_v42 = vpop.permute.xlu0 %1367  ;;  %v3585_v58 = vrot.slane %v6967_v50, 4  ;;  %v3633_v45 = vsel %vm3538_vm0, %v3056_v1, 0.0  ;;  %v11402_v61 = vrot.slane %v6930_v56, 2 }
 0x1bf   :  { %11399 = vst [vmem:[#allocation124_spill] sm:$0xff] %v6978_v47  ;;  %11400 = vst [vmem:[#allocation125_spill] sm:$0xff] %v6980_v42  ;;  %v3593_v47 = vadd.f32 %v3592_v31, %v3591_v52  ;;  %v3562_v31 = vadd.f32 %v3561_v60, %v3560_v32  ;;  %v3573_v52 = vadd.f32 %v3572_v53, %v3571_v30  ;;  %v7038_v60 = vld [vmem:[%s11265_s2] sm:$0xff] }
 0x1c0   :  { %1648 = vbcast.lane.b32.xlu1 %v1642_v54, 264  ;;  %1644 = vbcast.lane.b32.xlu0 %v1642_v54, 256  ;;  %v3608_v22 = vadd.f32 %v3607_v59, %v3606_v55  ;;  %v3619_v30 = vadd.f32 %v3618_v8, %v3617_v18  ;;  %v5219_v63 = vrot.slane %v7038_v60, 1  ;;  %v3586_v16 = vadd.f32 %v3585_v58, %v6967_v50  ;;  %v99_v50 = vld [vmem:[%s11266_s3 + $0x108] sm:$0xff] }
 0x1c1   :  { %v3595_v12 = vadd.f32 %v3594_v44, %v3593_v47  ;;  %v3630_v47 = vsel %vm3538_vm0, %v3054_v43, 0.0  ;;  %v3620_v44 = vsel %vm3538_vm0, %v3052_v0, 0.0  ;;  %v3549_v43 = vadd.f32 %v11402_v61, %v6930_v56  ;;  %v98_v56 = vld [vmem:[%s11266_s3 + $0x100] sm:$0xff]  ;;  %v7064_v18 = vld [vmem:[%s11265_s2 + $0x8] sm:$0xff] }
 0x1c2   :  { %v7005_v42 = vpop.permute.xlu1 %1382  ;;  %v7007_v36 = vpop.permute.xlu0 %1378  ;;  %v3632_v57 = vadd.f32 %v3631_v3, %v3630_v47  ;;  %v3610_v53 = vadd.f32 %v3609_v46, %v3608_v22  ;;  %v3621_v39 = vadd.f32 %v3620_v44, %v3619_v30  ;;  %v3635_v55 = vsel %vm3538_vm0, %v3057_v14, 0.0  ;;  %v105_v22 = vld [vmem:[%s11266_s3 + $0x138] sm:$0xff] }
 0x1c3   :  { %v3597_v32 = vadd.f32 %v3596_v10, %v3595_v12  ;;  %v3574_v41 = vrot.slane %v3573_v52, 2  ;;  %v1680_v3 = vrot.slane %v6998_v13, %v6364_v7  ;;  %v3587_v47 = vrot.slane %v3586_v16, 2 }
 0x1c4   :  { %1656 = vbcast.lane.b32.xlu1 %v1642_v54, 280  ;;  %1652 = vbcast.lane.b32.xlu0 %v1642_v54, 272  ;;  %v3053_v54 = vmul.f32 %v6477_v6, %v93_v62  ;;  %v3634_v59 = vadd.f32 %v3633_v45, %v3632_v57  ;;  %v3563_v62 = vrot.slane %v3562_v31, 1  ;;  %v3550_v44 = vrot.slane %v3549_v43, 1  ;;  %v100_v57 = vld [vmem:[%s11266_s3 + $0x110] sm:$0xff] }
 0x1c5   :  { %v3598_v8 = vrot.slane %v3597_v32, 4  ;;  %v3611_v14 = vrot.slane %v3610_v53, 4  ;;  %v3059_v58 = vmul.f32 %v6491_v20, %v99_v50  ;;  %v3058_v46 = vmul.f32 %v6493_v21, %v98_v56  ;;  %v106_v50 = vld [vmem:[%s11266_s3 + $0x140] sm:$0xff] }
 0x1c6   :  { %v7027_v37 = vpop.permute.xlu1 %1390  ;;  %v7029_v27 = vpop.permute.xlu0 %1386  ;;  %v3622_v12 = vsel %vm3538_vm0, %v3053_v54, 0.0  ;;  %v3636_v30 = vadd.f32 %v3635_v55, %v3634_v59  ;;  %v3564_v10 = vadd.f32 %v3563_v62, %v3562_v31  ;;  %v3575_v48 = vadd.f32 %v3574_v41, %v3573_v52  ;;  %v103_v59 = vld [vmem:[%s11266_s3 + $0x128] sm:$0xff]  ;;  %v101_v41 = vld [vmem:[%s11266_s3 + $0x118] sm:$0xff] }
 0x1c7   :  { %11401 = vst [vmem:[#allocation126_spill] sm:$0xff] %v7027_v37  ;;  %v3623_v45 = vadd.f32 %v3622_v12, %v3621_v39  ;;  %v3599_v39 = vadd.f32 %v3598_v8, %v3597_v32  ;;  %v102_v12 = vld [vmem:[%s11266_s3 + $0x120] sm:$0xff]  ;;  %v3588_v20 = vadd.f32 %v3587_v47, %v3586_v16  ;;  %v3060_v21 = vmul.f32 %v6505_v26, %v100_v57  ;;  %v104_v8 = vld [vmem:[%s11266_s3 + $0x130] sm:$0xff]  ;;  %v107_v31 = vld [vmem:[%s11266_s3 + $0x148] sm:$0xff] }
 0x1c8   :  { %1667 = vbcast.lane.b32.xlu1 %v1661_v24, 264  ;;  %1663 = vbcast.lane.b32.xlu0 %v1661_v24, 256  ;;  %v3551_v52 = vadd.f32 %v3550_v44, %v3549_v43  ;;  %v3612_v32 = vadd.f32 %v3611_v14, %v3610_v53  ;;  %v3637_v62 = vrot.slane %v3636_v30, 4  ;;  %v3644_v26 = vsel %vm3538_vm0, %v3059_v58, 0.0 }
 0x1c9   :  { %v3624_v56 = vrot.slane %v3623_v45, 4  ;;  %v3643_v47 = vsel %vm3538_vm0, %v3058_v46, 0.0  ;;  %v3063_v43 = vmul.f32 %v6509_v28, %v103_v59  ;;  %v3062_v53 = vmul.f32 %v6511_v29, %v102_v12 }
 0x1ca   :  { %v7047_v0 = vpop.permute.xlu1 %1401  ;;  %v7049_v1 = vpop.permute.xlu0 %1397  ;;  %v5460_v44 = vadd.f32 %v5219_v63, %v3564_v10  ;;  %v3576_v14 = vrot.slane %v3575_v48, 1  ;;  %v3600_v57 = vrot.slane %v3599_v39, 2  ;;  %v1699_v58 = vrot.slane %v6998_v13, %v6368_v9 }
 0x1cb   :  { %11403 = vst [vmem:[#allocation127_spill] sm:$0xff] %v7047_v0  ;;  %11404 = vst [vmem:[#allocation128_spill] sm:$0xff] %v7049_v1  ;;  %v3589_v46 = vrot.slane %v3588_v20, 1  ;;  %v3061_v28 = vmul.f32 %v6503_v25, %v101_v41  ;;  %v3646_v29 = vsel %vm3538_vm0, %v3060_v21, 0.0  ;;  %v3064_v63 = vmul.f32 %v6517_v34, %v104_v8 }
 0x1cc   :  { %1675 = vbcast.lane.b32.xlu1 %v1661_v24, 280  ;;  %1671 = vbcast.lane.b32.xlu0 %v1661_v24, 272  ;;  %v3613_v10 = vrot.slane %v3612_v32, 2  ;;  %v3625_v59 = vadd.f32 %v3624_v56, %v3623_v45  ;;  %v3638_v12 = vadd.f32 %v3637_v62, %v3636_v30  ;;  %v3645_v54 = vadd.f32 %v3644_v26, %v3643_v47 }
 0x1cd   :  { %v3657_v25 = vsel %vm3538_vm0, %v3063_v43, 0.0  ;;  %v3656_v34 = vsel %vm3538_vm0, %v3062_v53, 0.0  ;;  %v3067_v45 = vmul.f32 %v6519_v35, %v107_v31  ;;  %v3066_v30 = vmul.f32 %v6521_v38, %v106_v50 }
 0x1ce   :  { %v7074_v61 = vpop.permute.xlu1 %1409  ;;  %v7076_v24 = vpop.permute.xlu0 %1405  ;;  %v7132_v21 = vadd.f32 %v3551_v52, %v7038_v60  ;;  %v5588_v56 = vand.u32 2147483647, %v5460_v44  ;;  %v3601_v62 = vadd.f32 %v3600_v57, %v3599_v39  ;;  %v3647_v41 = vadd.f32 %v3646_v29, %v3645_v54  ;;  %v109_v52 = vld [vmem:[%s11266_s3 + $0x158] sm:$0xff]  ;;  %v11413_v29 = vld [vmem:[#allocation10_spill] sm:$0xff] }
 0x1cf   :  { %11405 = vst [vmem:[#allocation129_spill] sm:$0xff] %v7074_v61  ;;  %11406 = vst [vmem:[#allocation130_spill] sm:$0xff] %v7076_v24  ;;  %v3648_v8 = vsel %vm3538_vm0, %v3061_v28, 0.0  ;;  %v3065_v26 = vmul.f32 %v6515_v33, %v105_v22  ;;  %v3659_v47 = vsel %vm3538_vm0, %v3064_v63, 0.0  ;;  %v3577_v35 = vadd.f32 %v3576_v14, %v3575_v48  ;;  %v110_v14 = vld [vmem:[%s11266_s3 + $0x160] sm:$0xff] }
 0x1d0   :  { %1686 = vbcast.lane.b32.xlu1 %v1680_v3, 264  ;;  %1682 = vbcast.lane.b32.xlu0 %v1680_v3, 256  ;;  %v3614_v31 = vadd.f32 %v3613_v10, %v3612_v32  ;;  %v3626_v38 = vrot.slane %v3625_v59, 2  ;;  %v3658_v50 = vadd.f32 %v3657_v25, %v3656_v34  ;;  %v3590_v53 = vadd.f32 %v3589_v46, %v3588_v20  ;;  %v111_v32 = vld [vmem:[%s11266_s3 + $0x168] sm:$0xff] }
 0x1d1   :  { %v3639_v44 = vrot.slane %v3638_v12, 2  ;;  %v3670_v33 = vsel %vm3538_vm0, %v3067_v45, 0.0  ;;  %v3669_v22 = vsel %vm3538_vm0, %v3066_v30, 0.0  ;;  %v5843_v57 = vrot.slane %v5588_v56, 7  ;;  %v11503_v61 = vld [vmem:[#allocation53_spill] sm:$0xff] }
 0x1d2   :  { %v7098_v55 = vpop.permute.xlu1 %1420  ;;  %v7100_v16 = vpop.permute.xlu0 %1416  ;;  %v3660_v48 = vadd.f32 %v3659_v47, %v3658_v50  ;;  %v1718_v20 = vrot.slane %v6998_v13, %v6372_v11  ;;  %v3602_v46 = vrot.slane %v3601_v62, 1  ;;  %v3661_v28 = vsel %vm3538_vm0, %v3065_v26, 0.0  ;;  %v11418_v50 = vld [vmem:[#allocation11_spill] sm:$0xff] }
 0x1d3   :  { %11407 = vst [vmem:[#allocation131_spill] sm:$0xff] %v7098_v55  ;;  %11408 = vst [vmem:[#allocation132_spill] sm:$0xff] %v7100_v16  ;;  %v3069_v63 = vmul.f32 %v11413_v29, %v109_v52  ;;  %v3615_v34 = vrot.slane %v3614_v31, 1  ;;  %v3627_v45 = vadd.f32 %v3626_v38, %v3625_v59  ;;  %v3671_v30 = vadd.f32 %v3670_v33, %v3669_v22  ;;  %v11419_v52 = vld [vmem:[#allocation12_spill] sm:$0xff] }
 0x1d4   :  { %1694 = vbcast.lane.b32.xlu1 %v1680_v3, 280  ;;  %1690 = vbcast.lane.b32.xlu0 %v1680_v3, 272  ;;  %v108_v3 = vld [vmem:[%s11266_s3 + $0x150] sm:$0xff]  ;;  %v3640_v47 = vadd.f32 %v3639_v44, %v3638_v12  ;;  %v3070_v29 = vmul.f32 %v11419_v52, %v110_v14  ;;  %v3662_v38 = vadd.f32 %v3661_v28, %v3660_v48 }
 0x1d5   :  { %v3068_v43 = vmul.f32 %v6527_v51, %v108_v3  ;;  %v3649_v51 = vadd.f32 %v3648_v8, %v3647_v41  ;;  %v11414_v3 = vrot.slane %v7038_v60, 2  ;;  %v11417_v8 = vrot.slane %v7038_v60, 3 }
 0x1d6   :  { %v7123_v6 = vpop.permute.xlu1 %1428  ;;  %v7125_v16 = vpop.permute.xlu0 %1424  ;;  %v3603_v22 = vadd.f32 %v3602_v46, %v3601_v62  ;;  %v3616_v12 = vadd.f32 %v3615_v34, %v3614_v31  ;;  %v3628_v44 = vrot.slane %v3627_v45, 1  ;;  %v3682_v31 = vsel %vm3538_vm0, %v3070_v29, 0.0  ;;  %v11426_v29 = vld [vmem:[#allocation16_spill] sm:$0xff] }
 0x1d7   :  { %11409 = vst [vmem:[#allocation133_spill] sm:$0xff] %v7123_v6  ;;  %11410 = vst [vmem:[#allocation134_spill] sm:$0xff] %v7125_v16  ;;  %v3672_v10 = vsel %vm3538_vm0, %v3068_v43, 0.0  ;;  %v5461_v25 = vadd.f32 %v11414_v3, %v3577_v35  ;;  %v5462_v26 = vadd.f32 %v11417_v8, %v3590_v53  ;;  %v3071_v43 = vmul.f32 %v11418_v50, %v111_v32  ;;  %v115_v32 = vld [vmem:[%s11266_s3 + $0x188] sm:$0xff] }
 0x1d8   :  { %1705 = vbcast.lane.b32.xlu1 %v1699_v58, 264  ;;  %1701 = vbcast.lane.b32.xlu0 %v1699_v58, 256  ;;  %v5587_v35 = vand.u32 2147483647, %v7132_v21  ;;  %v3650_v59 = vrot.slane %v3649_v51, 4  ;;  %v3673_v33 = vadd.f32 %v3672_v10, %v3671_v30  ;;  %v3674_v3 = vsel %vm3538_vm0, %v3069_v63, 0.0 }
 0x1d9   :  { %v5589_v53 = vand.u32 2147483647, %v5461_v25  ;;  %v114_v21 = vld [vmem:[%s11266_s3 + $0x180] sm:$0xff]  ;;  %v5590_v46 = vand.u32 2147483647, %v5462_v26  ;;  %v3683_v28 = vsel %vm3538_vm0, %v3071_v43, 0.0 }
 0x1da   :  { %v7141_v39 = vpop.permute.xlu1 %1439  ;;  %v7143_v54 = vpop.permute.xlu0 %1435  ;;  %v7186_v14 = vsel %vm5844_vm1, %v5843_v57, %v5587_v35  ;;  %v113_v63 = vld [vmem:[%s11266_s3 + $0x178] sm:$0xff]  ;;  %v3641_v10 = vrot.slane %v3640_v47, 1  ;;  %v3651_v25 = vadd.f32 %v3650_v59, %v3649_v51  ;;  %v3663_v34 = vrot.slane %v3662_v38, 4  ;;  %v11427_v59 = vld [vmem:[#allocation13_spill] sm:$0xff] }
 0x1db   :  { %11411 = vst [vmem:[#allocation135_spill] sm:$0xff] %v7141_v39  ;;  %11412 = vst [vmem:[#allocation136_spill] sm:$0xff] %v7143_v54  ;;  %v3675_v30 = vadd.f32 %v3674_v3, %v3673_v33  ;;  %v11423_v57 = vld [vmem:[#allocation8_spill] sm:$0xff]  ;;  %v11424_v8 = vrot.slane %v7038_v60, 4  ;;  %v11425_v43 = vld [vmem:[#allocation15_spill] sm:$0xff]  ;;  %v3074_v51 = vmul.f32 %v11426_v29, %v114_v21  ;;  %v3684_v35 = vadd.f32 %v3683_v28, %v3682_v31 }
 0x1dc   :  { %1713 = vbcast.lane.b32.xlu1 %v1699_v58, 280  ;;  %1709 = vbcast.lane.b32.xlu0 %v1699_v58, 272  ;;  %v112_v58 = vld [vmem:[%s11266_s3 + $0x170] sm:$0xff]  ;;  %v3075_v52 = vmul.f32 %v11425_v43, %v115_v32  ;;  %v3073_v33 = vmul.f32 %v11427_v59, %v113_v63  ;;  %v118_v3 = vld [vmem:[%s11266_s3 + $0x1a0] sm:$0xff]  ;;  %v11430_v32 = vrot.slane %v7038_v60, 5  ;;  %v5846_v28 = vrot.slane %v5589_v53, 6 }
 0x1dd   :  { %v5463_v26 = vadd.f32 %v11424_v8, %v3603_v22  ;;  %v5849_v31 = vrot.slane %v5590_v46, 5  ;;  %v11431_v63 = vld [vmem:[#allocation18_spill] sm:$0xff]  ;;  %v3642_v43 = vadd.f32 %v3641_v10, %v3640_v47  ;;  %v3652_v29 = vrot.slane %v3651_v25, 2  ;;  %v11432_v47 = vld [vmem:[#allocation19_spill] sm:$0xff]  ;;  %v11502_v6 = vld [vmem:[#allocation49_spill] sm:$0xff] }
 0x1de   :  { %v7163_v56 = vpop.permute.xlu1 %1447  ;;  %v7165_v41 = vpop.permute.xlu0 %1443  ;;  %v7216_v21 = vadd.f32 %v11430_v32, %v3616_v12  ;;  %v3664_v59 = vadd.f32 %v3663_v34, %v3662_v38  ;;  %v3696_v53 = vsel %vm3538_vm0, %v3075_v52, 0.0  ;;  %v3695_v12 = vsel %vm3538_vm0, %v3074_v51, 0.0  ;;  %v11433_v38 = vld [vmem:[#allocation20_spill] sm:$0xff]  ;;  %v11437_v52 = vld [vmem:[#allocation17_spill] sm:$0xff] }
 0x1df   :  { %11415 = vst [vmem:[#allocation10_spill] sm:$0xff] %v7163_v56  ;;  %11416 = vst [vmem:[#allocation137_spill] sm:$0xff] %v7165_v41  ;;  %v11420_v56 = vld [vmem:[#allocation14_spill] sm:$0xff]  ;;  %v3078_v46 = vmul.f32 %v11433_v38, %v118_v3  ;;  %v3687_v10 = vsel %vm3538_vm0, %v3073_v33, 0.0  ;;  %v5591_v32 = vand.u32 2147483647, %v5463_v26  ;;  %v3653_v38 = vadd.f32 %v3652_v29, %v3651_v25 }
 0x1e0   :  { %1724 = vbcast.lane.b32.xlu1 %v1718_v20, 264  ;;  %1720 = vbcast.lane.b32.xlu0 %v1718_v20, 256  ;;  %v3072_v41 = vmul.f32 %v11420_v56, %v112_v58  ;;  %v116_v58 = vld [vmem:[%s11266_s3 + $0x190] sm:$0xff]  ;;  %v1737_v56 = vrot.slane %v6998_v13, %v11423_v57  ;;  %v11439_v3 = vrot.slane %v7038_v60, 7  ;;  %v3697_v39 = vadd.f32 %v3696_v53, %v3695_v12  ;;  %v11442_v53 = vld [vmem:[#allocation21_spill] sm:$0xff] }
 0x1e1   :  { %v3076_v8 = vmul.f32 %v11431_v63, %v116_v58  ;;  %v5592_v63 = vand.u32 2147483647, %v7216_v21  ;;  %v1756_v26 = vrot.slane %v6998_v13, %v6380_v15  ;;  %v7252_v25 = vld [vmem:[%s11265_s2 + $0x10] sm:$0xff] }
 0x1e2   :  { %v7181_v48 = vpop.permute.xlu1 %1458  ;;  %v7183_v62 = vpop.permute.xlu0 %1454  ;;  %v3685_v50 = vsel %vm3538_vm0, %v3072_v41, 0.0  ;;  %v3629_v41 = vadd.f32 %v3628_v44, %v3627_v45  ;;  %v120_v45 = vld [vmem:[%s11266_s3 + $0x1b0] sm:$0xff]  ;;  %v5466_v33 = vadd.f32 %v11439_v3, %v3642_v43 }
 0x1e3   :  { %11421 = vst [vmem:[#allocation11_spill] sm:$0xff] %v7181_v48  ;;  %11422 = vst [vmem:[#allocation12_spill] sm:$0xff] %v7183_v62  ;;  %v3676_v62 = vrot.slane %v3675_v30, 4  ;;  %v3686_v48 = vadd.f32 %v3685_v50, %v3684_v35  ;;  %v11436_v50 = vrot.slane %v7038_v60, 6  ;;  %v3698_v51 = vsel %vm3538_vm0, %v3076_v8, 0.0 }
 0x1e4   :  { %1732 = vbcast.lane.b32.xlu1 %v1718_v20, 280  ;;  %1728 = vbcast.lane.b32.xlu0 %v1718_v20, 272  ;;  %v119_v20 = vld [vmem:[%s11266_s3 + $0x1a8] sm:$0xff]  ;;  %v3708_v60 = vsel %vm3538_vm0, %v3078_v46, 0.0  ;;  %v3699_v43 = vadd.f32 %v3698_v51, %v3697_v39  ;;  %v122_v46 = vld [vmem:[%s11266_s3 + $0x1c0] sm:$0xff] }
 0x1e5   :  { %v3079_v44 = vmul.f32 %v11432_v47, %v119_v20  ;;  %v5465_v35 = vadd.f32 %v11436_v50, %v3629_v41  ;;  %v11438_v20 = vld [vmem:[#allocation22_spill] sm:$0xff]  ;;  %v121_v41 = vld [vmem:[%s11266_s3 + $0x1b8] sm:$0xff]  ;;  %v3688_v21 = vadd.f32 %v3687_v10, %v3686_v48  ;;  %v5848_v48 = vsel %vm5847_vm2, %v5846_v28, %v7186_v14 }
 0x1e6   :  { %v7210_v54 = vpop.permute.xlu1 %1466  ;;  %v7212_v22 = vpop.permute.xlu0 %1462  ;;  %v3080_v47 = vmul.f32 %v11438_v20, %v120_v45  ;;  %v3081_v12 = vmul.f32 %v11442_v53, %v121_v41  ;;  %v123_v39 = vld [vmem:[%s11266_s3 + $0x1c8] sm:$0xff]  ;;  %v3654_v50 = vrot.slane %v3653_v38, 1  ;;  %v5594_v14 = vand.u32 2147483647, %v5466_v33  ;;  %v124_v20 = vld [vmem:[%s11266_s3 + $0x1d0] sm:$0xff] }
 0x1e7   :  { %11428 = vst [vmem:[#allocation14_spill] sm:$0xff] %v7210_v54  ;;  %11429 = vst [vmem:[#allocation15_spill] sm:$0xff] %v7212_v22  ;;  %v117_v54 = vld [vmem:[%s11266_s3 + $0x198] sm:$0xff]  ;;  %v3709_v8 = vsel %vm3538_vm0, %v3079_v44, 0.0  ;;  %v5593_v10 = vand.u32 2147483647, %v5465_v35 }
 0x1e8   :  { %1743 = vbcast.lane.b32.xlu1 %v1737_v56, 264  ;;  %1739 = vbcast.lane.b32.xlu0 %v1737_v56, 256  ;;  %v3077_v22 = vmul.f32 %v11437_v52, %v117_v54  ;;  %v3677_v54 = vadd.f32 %v3676_v62, %v3675_v30  ;;  %v5852_v62 = vrot.slane %v5591_v32, 4  ;;  %v3711_v44 = vsel %vm3538_vm0, %v3080_v47, 0.0  ;;  %v11443_v53 = vld [vmem:[#allocation23_spill] sm:$0xff]  ;;  %v11444_v35 = vld [vmem:[#allocation24_spill] sm:$0xff] }
 0x1e9   :  { %v3710_v52 = vadd.f32 %v3709_v8, %v3708_v60  ;;  %v3689_v51 = vrot.slane %v3688_v21, 4  ;;  %v5855_v47 = vrot.slane %v5592_v63, 3  ;;  %v3083_v29 = vmul.f32 %v11443_v53, %v123_v39 }
 0x1ea   :  { %v7230_v34 = vpop.permute.xlu1 %1477  ;;  %v7232_v58 = vpop.permute.xlu0 %1473  ;;  %v3700_v30 = vsel %vm3538_vm0, %v3077_v22, 0.0  ;;  %v5851_v22 = vsel %vm5850_vm3, %v5849_v31, %v5848_v48  ;;  %v3678_v32 = vrot.slane %v3677_v54, 2  ;;  %v3713_v31 = vsel %vm3538_vm0, %v3081_v12, 0.0  ;;  %v125_v12 = vld [vmem:[%s11266_s3 + $0x1d8] sm:$0xff] }
 0x1eb   :  { %11434 = vst [vmem:[#allocation16_spill] sm:$0xff] %v7230_v34  ;;  %11435 = vst [vmem:[#allocation13_spill] sm:$0xff] %v7232_v58  ;;  %v3665_v34 = vrot.slane %v3664_v59, 2  ;;  %v3701_v3 = vadd.f32 %v3700_v30, %v3699_v43  ;;  %v3712_v41 = vadd.f32 %v3711_v44, %v3710_v52  ;;  %v5858_v33 = vrot.slane %v5593_v10, 2 }
 0x1ec   :  { %1751 = vbcast.lane.b32.xlu1 %v1737_v56, 280  ;;  %1747 = vbcast.lane.b32.xlu0 %v1737_v56, 272  ;;  %v3655_v48 = vadd.f32 %v3654_v50, %v3653_v38  ;;  %v1775_v43 = vrot.slane %v6998_v13, %v6384_v17  ;;  %v5861_v30 = vrot.slane %v5594_v14, 1  ;;  %v3679_v39 = vadd.f32 %v3678_v32, %v3677_v54  ;;  %v128_v54 = vld [vmem:[%s11266_s3 + $0x1f0] sm:$0xff] }
 0x1ed   :  { %v3666_v28 = vadd.f32 %v3665_v34, %v3664_v59  ;;  %v5854_v34 = vsel %vm5853_vm4, %v5852_v62, %v5851_v22  ;;  %v3702_v62 = vrot.slane %v3701_v3, 4  ;;  %v3714_v10 = vadd.f32 %v3713_v31, %v3712_v41 }
 0x1ee   :  { %v7255_v56 = vpop.permute.xlu1 %1485  ;;  %v7257_v45 = vpop.permute.xlu0 %1481  ;;  %v5857_v52 = vsel %vm5856_vm5, %v5855_v47, %v5854_v34  ;;  %v3722_v38 = vsel %vm3538_vm0, %v3083_v29, 0.0  ;;  %v7301_v32 = vadd.f32 %v3655_v48, %v7064_v18  ;;  %v126_v47 = vld [vmem:[%s11266_s3 + $0x1e0] sm:$0xff] }
 0x1ef   :  { %11440 = vst [vmem:[#allocation18_spill] sm:$0xff] %v7255_v56  ;;  %11441 = vst [vmem:[#allocation19_spill] sm:$0xff] %v7257_v45  ;;  %v3082_v56 = vmul.f32 %v11444_v35, %v122_v46  ;;  %v11447_v45 = vld [vmem:[#allocation26_spill] sm:$0xff]  ;;  %v3667_v44 = vrot.slane %v3666_v28, 1  ;;  %v3690_v46 = vadd.f32 %v3689_v51, %v3688_v21  ;;  %v5860_v21 = vsel %vm5859_vm6, %v5858_v33, %v5857_v52  ;;  %v11450_v51 = vld [vmem:[#allocation25_spill] sm:$0xff] }
 0x1f0   :  { %1762 = vbcast.lane.b32.xlu1 %v1756_v26, 264  ;;  %1758 = vbcast.lane.b32.xlu0 %v1756_v26, 256  ;;  %v3084_v63 = vmul.f32 %v11447_v45, %v124_v20  ;;  %v3085_v20 = vmul.f32 %v11450_v51, %v125_v12  ;;  %v5863_v41 = vsel %vm5862_vm7, %v5861_v30, %v5860_v21  ;;  %v3680_v35 = vrot.slane %v3679_v39, 1  ;;  %v135_v33 = vld [vmem:[%s11266_s3 + $0x228] sm:$0xff]  ;;  %v134_v48 = vld [vmem:[%s11266_s3 + $0x220] sm:$0xff] }
 0x1f1   :  { %v3721_v45 = vsel %vm3538_vm0, %v3082_v56, 0.0  ;;  %v127_v56 = vld [vmem:[%s11266_s3 + $0x1e8] sm:$0xff]  ;;  %v3668_v53 = vadd.f32 %v3667_v44, %v3666_v28  ;;  %v3691_v31 = vrot.slane %v3690_v46, 2  ;;  %v3715_v12 = vrot.slane %v3714_v10, 4  ;;  %v11454_v21 = vld [vmem:[#allocation28_spill] sm:$0xff] }
 0x1f2   :  { %v7276_v8 = vpop.permute.xlu1 %1496  ;;  %v7278_v60 = vpop.permute.xlu0 %1492  ;;  %v3724_v29 = vsel %vm3538_vm0, %v3084_v63, 0.0  ;;  %v3723_v34 = vadd.f32 %v3722_v38, %v3721_v45  ;;  %v3703_v63 = vadd.f32 %v3702_v62, %v3701_v3  ;;  %v11453_v38 = vld [vmem:[#allocation27_spill] sm:$0xff]  ;;  %v3086_v22 = vmul.f32 %v11454_v21, %v126_v47  ;;  %v11457_v47 = vld [vmem:[#allocation36_spill] sm:$0xff] }
 0x1f3   :  { %11445 = vst [vmem:[#allocation20_spill] sm:$0xff] %v7276_v8  ;;  %11446 = vst [vmem:[#allocation17_spill] sm:$0xff] %v7278_v60  ;;  %v3087_v45 = vmul.f32 %v11453_v38, %v127_v56  ;;  %v136_v3 = vld [vmem:[%s11266_s3 + $0x230] sm:$0xff]  ;;  %v7333_v62 = vsel %vm3538_vm0, %v5863_v41, 0.0  ;;  %v3726_v30 = vsel %vm3538_vm0, %v3085_v20, 0.0  ;;  %v3094_v38 = vmul.f32 %v11457_v47, %v134_v48 }
 0x1f4   :  { %1770 = vbcast.lane.b32.xlu1 %v1756_v26, 280  ;;  %1766 = vbcast.lane.b32.xlu0 %v1756_v26, 272  ;;  %v3725_v44 = vadd.f32 %v3724_v29, %v3723_v34  ;;  %11455 = vst [vmem:[#allocation26_spill] sm:$0xff] %v7333_v62  ;;  %v131_v29 = vld [vmem:[%s11266_s3 + $0x208] sm:$0xff]  ;;  %v11456_v56 = vld [vmem:[#allocation35_spill] sm:$0xff]  ;;  %v1794_v21 = vrot.slane %v6998_v13, %v6388_v19  ;;  %v11458_v41 = vrot.slane %v7064_v18, 1 }
 0x1f5   :  { %v3095_v34 = vmul.f32 %v11456_v56, %v135_v33  ;;  %v3681_v20 = vadd.f32 %v3680_v35, %v3679_v39  ;;  %v3692_v59 = vadd.f32 %v3691_v31, %v3690_v46  ;;  %v130_v62 = vld [vmem:[%s11266_s3 + $0x200] sm:$0xff]  ;;  %v3716_v48 = vadd.f32 %v3715_v12, %v3714_v10  ;;  %v11459_v39 = vld [vmem:[#allocation30_spill] sm:$0xff] }
 0x1f6   :  { %v7292_v26 = vpop.permute.xlu1 %1504  ;;  %v7294_v50 = vpop.permute.xlu0 %1500  ;;  %v7346_v14 = vadd.f32 %v11458_v41, %v3668_v53  ;;  %v26_v33 = vld [vmem:[%s11263_s0 + $0x40] sm:$0xff]  ;;  %v129_v53 = vld [vmem:[%s11266_s3 + $0x1f8] sm:$0xff]  ;;  %v3088_v46 = vmul.f32 %v11459_v39, %v128_v54  ;;  %v11460_v35 = vld [vmem:[#allocation38_spill] sm:$0xff]  ;;  %v3727_v41 = vadd.f32 %v3726_v30, %v3725_v44  ;;  %v3735_v28 = vsel %vm3538_vm0, %v3087_v45, 0.0 }
 0x1f7   :  { %11448 = vst [vmem:[#allocation22_spill] sm:$0xff] %v7292_v26  ;;  %11449 = vst [vmem:[#allocation21_spill] sm:$0xff] %v7294_v50  ;;  %v42_v13 = vld [vmem:[%s11264_s1 + $0x40] sm:$0xff]  ;;  %v3096_v31 = vmul.f32 %v11460_v35, %v136_v3  ;;  %v132_v10 = vld [vmem:[%s11266_s3 + $0x210] sm:$0xff]  ;;  %v3761_v39 = vsel %vm3538_vm0, %v3095_v34, 0.0  ;;  %v3760_v30 = vsel %vm3538_vm0, %v3094_v38, 0.0 }
 0x1f8   :  { %1781 = vbcast.lane.b32.xlu1 %v1775_v43, 264  ;;  %1777 = vbcast.lane.b32.xlu0 %v1775_v43, 256  ;;  %v137_v54 = vld [vmem:[%s11266_s3 + $0x238] sm:$0xff]  ;;  %v7378_v44 = vsub.f32 %v26_v33, %v42_v13  ;;  %v11466_v35 = vld [vmem:[#allocation29_spill] sm:$0xff]  ;;  %v11467_v34 = vld [vmem:[#allocation34_spill] sm:$0xff] }
 0x1f9   :  { %v11464_v12 = vld [vmem:[#allocation32_spill] sm:$0xff]  ;;  %v3092_v38 = vmul.f32 %v11467_v34, %v132_v10  ;;  %v3763_v33 = vsel %vm3538_vm0, %v3096_v31, 0.0  ;;  %v140_v34 = vld [vmem:[%s11266_s3 + $0x250] sm:$0xff] }
 0x1fa   :  { %v7318_v52 = vpop.permute.xlu1 %1515  ;;  %v7320_v51 = vpop.permute.xlu0 %1511  ;;  %v3090_v3 = vmul.f32 %v11464_v12, %v130_v62  ;;  %v133_v62 = vld [vmem:[%s11266_s3 + $0x218] sm:$0xff]  ;;  %v11468_v12 = vld [vmem:[#allocation37_spill] sm:$0xff] }
 0x1fb   :  { %11451 = vst [vmem:[#allocation23_spill] sm:$0xff] %v7318_v52  ;;  %11452 = vst [vmem:[#allocation24_spill] sm:$0xff] %v7320_v51  ;;  %v3734_v51 = vsel %vm3538_vm0, %v3086_v22, 0.0  ;;  %v11463_v52 = vld [vmem:[#allocation31_spill] sm:$0xff]  ;;  %v5596_v22 = vand.u32 2147483647, %v7346_v14  ;;  %v3097_v50 = vmul.f32 %v11468_v12, %v137_v54 }
 0x1fc   :  { %1789 = vbcast.lane.b32.xlu1 %v1775_v43, 280  ;;  %1785 = vbcast.lane.b32.xlu0 %v1775_v43, 272  ;;  %v3704_v43 = vrot.slane %v3703_v63, 2  ;;  %v3091_v26 = vmul.f32 %v11463_v52, %v131_v29  ;;  %v11465_v52 = vrot.slane %v7064_v18, 2  ;;  %v3693_v29 = vrot.slane %v3692_v59, 1  ;;  %v138_v10 = vld [vmem:[%s11266_s3 + $0x240] sm:$0xff] }
 0x1fd   :  { %v3736_v60 = vadd.f32 %v3735_v28, %v3734_v51  ;;  %v3747_v31 = vsel %vm3538_vm0, %v3090_v3, 0.0  ;;  %v3750_v12 = vsel %vm3538_vm0, %v3092_v38, 0.0  ;;  %v11472_v3 = vld [vmem:[#allocation39_spill] sm:$0xff] }
 0x1fe   :  { %v7362_v56 = vpop.permute.xlu1 %1523  ;;  %v7364_v47 = vpop.permute.xlu0 %1519  ;;  %v5469_v45 = vadd.f32 %v11465_v52, %v3681_v20  ;;  %v3705_v20 = vadd.f32 %v3704_v43, %v3703_v63  ;;  %v3717_v52 = vrot.slane %v3716_v48, 2  ;;  %v3748_v54 = vsel %vm3538_vm0, %v3091_v26, 0.0  ;;  %v11471_v43 = vld [vmem:[#allocation33_spill] sm:$0xff]  ;;  %v7427_v38 = vld [vmem:[%s11265_s2 + $0x18] sm:$0xff] }
 0x1ff   :  { %11461 = vst [vmem:[#allocation25_spill] sm:$0xff] %v7362_v56  ;;  %11462 = vst [vmem:[#allocation27_spill] sm:$0xff] %v7364_v47  ;;  %v3089_v56 = vmul.f32 %v11466_v35, %v129_v53  ;;  %v3737_v47 = vsel %vm3538_vm0, %v3088_v46, 0.0  ;;  %v3762_v53 = vadd.f32 %v3761_v39, %v3760_v30  ;;  %v139_v46 = vld [vmem:[%s11266_s3 + $0x248] sm:$0xff]  ;;  %v3728_v35 = vrot.slane %v3727_v41, 4 }
 0x200   :  { %1800 = vbcast.lane.b32.xlu1 %v1794_v21, 264  ;;  %1796 = vbcast.lane.b32.xlu0 %v1794_v21, 256  ;;  %v1813_v63 = vrot.slane %v7378_v44, %v6360_v5  ;;  %v3738_v28 = vadd.f32 %v3737_v47, %v3736_v60  ;;  %v3093_v39 = vmul.f32 %v11471_v43, %v133_v62  ;;  %v3765_v26 = vsel %vm3538_vm0, %v3097_v50, 0.0  ;;  %v142_v50 = vld [vmem:[%s11266_s3 + $0x260] sm:$0xff] }
 0x201   :  { %v3739_v51 = vsel %vm3538_vm0, %v3089_v56, 0.0  ;;  %v3764_v30 = vadd.f32 %v3763_v33, %v3762_v53  ;;  %v5597_v60 = vand.u32 2147483647, %v5469_v45  ;;  %v3694_v56 = vadd.f32 %v3693_v29, %v3692_v59  ;;  %v143_v33 = vld [vmem:[%s11266_s3 + $0x268] sm:$0xff] }
 0x202   :  { %v7391_v13 = vpop.permute.xlu1 %1534  ;;  %v7393_v14 = vpop.permute.xlu0 %1530  ;;  %v3706_v47 = vrot.slane %v3705_v20, 1  ;;  %v3749_v62 = vadd.f32 %v3748_v54, %v3747_v31  ;;  %v3718_v53 = vadd.f32 %v3717_v52, %v3716_v48  ;;  %v3740_v29 = vadd.f32 %v3739_v51, %v3738_v28  ;;  %v144_v48 = vld [vmem:[%s11266_s3 + $0x270] sm:$0xff]  ;;  %v11482_v59 = vld [vmem:[#allocation41_spill] sm:$0xff] }
 0x203   :  { %11469 = vst [vmem:[#allocation28_spill] sm:$0xff] %v7391_v13  ;;  %11470 = vst [vmem:[#allocation35_spill] sm:$0xff] %v7393_v14  ;;  %v3099_v14 = vmul.f32 %v11472_v3, %v139_v46  ;;  %v3729_v46 = vadd.f32 %v3728_v35, %v3727_v41  ;;  %v3752_v54 = vsel %vm3538_vm0, %v3093_v39, 0.0  ;;  %v3766_v43 = vadd.f32 %v3765_v26, %v3764_v30  ;;  %v141_v3 = vld [vmem:[%s11266_s3 + $0x258] sm:$0xff] }
 0x204   :  { %1808 = vbcast.lane.b32.xlu1 %v1794_v21, 280  ;;  %1804 = vbcast.lane.b32.xlu0 %v1794_v21, 272  ;;  %v11473_v21 = vld [vmem:[#allocation40_spill] sm:$0xff]  ;;  %v3751_v31 = vadd.f32 %v3750_v12, %v3749_v62  ;;  %v11477_v35 = vld [vmem:[#allocation43_spill] sm:$0xff]  ;;  %v5864_v30 = vrot.slane %v5596_v22, 7  ;;  %v5866_v12 = vrot.slane %v5597_v60, 6 }
 0x205   :  { %v3098_v13 = vmul.f32 %v11473_v21, %v138_v10  ;;  %v11476_v10 = vld [vmem:[#allocation42_spill] sm:$0xff]  ;;  %v3774_v41 = vsel %vm3538_vm0, %v3099_v14, 0.0  ;;  %v11478_v21 = vld [vmem:[#allocation44_spill] sm:$0xff]  ;;  %v11481_v26 = vrot.slane %v7064_v18, 3 }
 0x206   :  { %v7414_v8 = vpop.permute.xlu1 %1542  ;;  %v7416_v58 = vpop.permute.xlu0 %1538  ;;  %v3100_v45 = vmul.f32 %v11476_v10, %v140_v34  ;;  %v3103_v34 = vmul.f32 %v11477_v35, %v143_v33  ;;  %v3102_v51 = vmul.f32 %v11478_v21, %v142_v50  ;;  %v3707_v10 = vadd.f32 %v3706_v47, %v3705_v20  ;;  %v145_v60 = vld [vmem:[%s11266_s3 + $0x278] sm:$0xff] }
 0x207   :  { %11474 = vst [vmem:[#allocation36_spill] sm:$0xff] %v7414_v8  ;;  %11475 = vst [vmem:[#allocation30_spill] sm:$0xff] %v7416_v58  ;;  %v3773_v52 = vsel %vm3538_vm0, %v3098_v13, 0.0  ;;  %v5470_v62 = vadd.f32 %v11481_v26, %v3694_v56  ;;  %v3101_v8 = vmul.f32 %v11482_v59, %v141_v3  ;;  %v11483_v58 = vld [vmem:[#allocation46_spill] sm:$0xff]  ;;  %v1832_v33 = vrot.slane %v7378_v44, %v6364_v7 }
 0x208   :  { %1819 = vbcast.lane.b32.xlu1 %v1813_v63, 264  ;;  %1815 = vbcast.lane.b32.xlu0 %v1813_v63, 256  ;;  %v3776_v14 = vsel %vm3538_vm0, %v3100_v45, 0.0  ;;  %v3104_v13 = vmul.f32 %v11483_v58, %v144_v48  ;;  %v3719_v50 = vrot.slane %v3718_v53, 1  ;;  %v3741_v35 = vrot.slane %v3740_v29, 4 }
 0x209   :  { %v3753_v21 = vadd.f32 %v3752_v54, %v3751_v31  ;;  %v3775_v22 = vadd.f32 %v3774_v41, %v3773_v52  ;;  %v3730_v20 = vrot.slane %v3729_v46, 2  ;;  %v3767_v56 = vrot.slane %v3766_v43, 4  ;;  %v11487_v52 = vld [vmem:[#allocation45_spill] sm:$0xff] }
 0x20a   :  { %v7442_v28 = vpop.permute.xlu1 %1553  ;;  %v7444_v39 = vpop.permute.xlu0 %1549  ;;  %v3787_v47 = vsel %vm3538_vm0, %v3103_v34, 0.0  ;;  %v3786_v45 = vsel %vm3538_vm0, %v3102_v51, 0.0  ;;  %v11486_v31 = vand.u32 2147483647, %v7301_v32  ;;  %v3778_v41 = vsel %vm3538_vm0, %v3101_v8, 0.0  ;;  %v147_v51 = vld [vmem:[%s11266_s3 + $0x288] sm:$0xff] }
 0x20b   :  { %11479 = vst [vmem:[#allocation38_spill] sm:$0xff] %v7442_v28  ;;  %11480 = vst [vmem:[#allocation31_spill] sm:$0xff] %v7444_v39  ;;  %v3777_v59 = vadd.f32 %v3776_v14, %v3775_v22  ;;  %v3105_v26 = vmul.f32 %v11487_v52, %v145_v60  ;;  %v3789_v34 = vsel %vm3538_vm0, %v3104_v13, 0.0  ;;  %v146_v14 = vld [vmem:[%s11266_s3 + $0x280] sm:$0xff]  ;;  %v3742_v22 = vadd.f32 %v3741_v35, %v3740_v29  ;;  %v151_v13 = vld [vmem:[%s11266_s3 + $0x2a8] sm:$0xff] }
 0x20c   :  { %1827 = vbcast.lane.b32.xlu1 %v1813_v63, 280  ;;  %1823 = vbcast.lane.b32.xlu0 %v1813_v63, 272  ;;  %v5865_v48 = vsel %vm5844_vm1, %v5864_v30, %v11486_v31  ;;  %v5598_v30 = vand.u32 2147483647, %v5470_v62  ;;  %v3754_v8 = vrot.slane %v3753_v21, 4  ;;  %v3788_v31 = vadd.f32 %v3787_v47, %v3786_v45  ;;  %v150_v60 = vld [vmem:[%s11266_s3 + $0x2a0] sm:$0xff] }
 0x20d   :  { %v7477_v32 = vsel %vm5847_vm2, %v5866_v12, %v5865_v48  ;;  %v11488_v52 = vrot.slane %v7064_v18, 4  ;;  %v3720_v3 = vadd.f32 %v3719_v50, %v3718_v53  ;;  %v3768_v12 = vadd.f32 %v3767_v56, %v3766_v43  ;;  %v11491_v45 = vld [vmem:[#allocation47_spill] sm:$0xff]  ;;  %v11494_v50 = vld [vmem:[#allocation52_spill] sm:$0xff] }
 0x20e   :  { %v7458_v58 = vpop.permute.xlu1 %1561  ;;  %v7460_v63 = vpop.permute.xlu0 %1557  ;;  %v3779_v35 = vadd.f32 %v3778_v41, %v3777_v59  ;;  %v3790_v47 = vadd.f32 %v3789_v34, %v3788_v31  ;;  %v3107_v48 = vmul.f32 %v11491_v45, %v147_v51  ;;  %v148_v28 = vld [vmem:[%s11266_s3 + $0x290] sm:$0xff]  ;;  %v1851_v56 = vrot.slane %v7378_v44, %v6368_v9 }
 0x20f   :  { %11484 = vst [vmem:[#allocation32_spill] sm:$0xff] %v7458_v58  ;;  %11485 = vst [vmem:[#allocation29_spill] sm:$0xff] %v7460_v63  ;;  %v7487_v54 = vadd.f32 %v11488_v52, %v3707_v10  ;;  %v7489_v58 = vadd.f32 %v3730_v20, %v3729_v46  ;;  %v11492_v63 = vld [vmem:[#allocation48_spill] sm:$0xff]  ;;  %v152_v53 = vld [vmem:[%s11266_s3 + $0x2b0] sm:$0xff]  ;;  %v3791_v46 = vsel %vm3538_vm0, %v3105_v26, 0.0  ;;  %v3110_v20 = vmul.f32 %v11494_v50, %v150_v60 }
 0x210   :  { %1838 = vbcast.lane.b32.xlu1 %v1832_v33, 264  ;;  %1834 = vbcast.lane.b32.xlu0 %v1832_v33, 256  ;;  %v3106_v39 = vmul.f32 %v11492_v63, %v146_v14  ;;  %v11493_v43 = vld [vmem:[#allocation51_spill] sm:$0xff]  ;;  %v7508_v63 = vrot.slane %v5598_v30, 5  ;;  %v3743_v59 = vrot.slane %v3742_v22, 2  ;;  %v3755_v41 = vadd.f32 %v3754_v8, %v3753_v21  ;;  %v11495_v51 = vld [vmem:[#allocation50_spill] sm:$0xff] }
 0x211   :  { %v3111_v10 = vmul.f32 %v11493_v43, %v151_v13  ;;  %v3108_v14 = vmul.f32 %v11495_v51, %v148_v28  ;;  %v11496_v31 = vld [vmem:[#allocation54_spill] sm:$0xff]  ;;  %v11499_v21 = vrot.slane %v7064_v18, 5  ;;  %v5599_v28 = vand.u32 2147483647, %v7487_v54  ;;  %v149_v50 = vld [vmem:[%s11266_s3 + $0x298] sm:$0xff] }
 0x212   :  { %v7491_v62 = vpop.permute.xlu1 %1572  ;;  %v7493_v29 = vpop.permute.xlu0 %1568  ;;  %v3112_v52 = vmul.f32 %v11496_v31, %v152_v53  ;;  %v155_v26 = vld [vmem:[%s11266_s3 + $0x2c8] sm:$0xff]  ;;  %v3732_v60 = vrot.slane %v7489_v58, 1  ;;  %v3769_v45 = vrot.slane %v3768_v12, 2  ;;  %v3780_v53 = vrot.slane %v3779_v35, 4  ;;  %v153_v51 = vld [vmem:[%s11266_s3 + $0x2b8] sm:$0xff] }
 0x213   :  { %11489 = vst [vmem:[#allocation34_spill] sm:$0xff] %v7491_v62  ;;  %11490 = vst [vmem:[#allocation37_spill] sm:$0xff] %v7493_v29  ;;  %v7525_v8 = vadd.f32 %v11499_v21, %v3720_v3  ;;  %v3792_v43 = vadd.f32 %v3791_v46, %v3790_v47  ;;  %v156_v3 = vld [vmem:[%s11266_s3 + $0x2d0] sm:$0xff]  ;;  %v3800_v31 = vsel %vm3538_vm0, %v3107_v48, 0.0  ;;  %v3799_v54 = vsel %vm3538_vm0, %v3106_v39, 0.0  ;;  %v11501_v29 = vld [vmem:[#allocation56_spill] sm:$0xff] }
 0x214   :  { %1846 = vbcast.lane.b32.xlu1 %v1832_v33, 280  ;;  %1842 = vbcast.lane.b32.xlu0 %v1832_v33, 272  ;;  %v154_v33 = vld [vmem:[%s11266_s3 + $0x2c0] sm:$0xff]  ;;  %v3813_v21 = vsel %vm3538_vm0, %v3111_v10, 0.0  ;;  %v3812_v47 = vsel %vm3538_vm0, %v3110_v20, 0.0  ;;  %v3744_v46 = vadd.f32 %v3743_v59, %v3742_v22  ;;  %v3756_v34 = vrot.slane %v3755_v41, 2 }
 0x215   :  { %v3114_v62 = vmul.f32 %v11501_v29, %v154_v33  ;;  %v3109_v16 = vmul.f32 %v11502_v6, %v149_v50  ;;  %v3802_v55 = vsel %vm3538_vm0, %v3108_v14, 0.0  ;;  %v3113_v48 = vmul.f32 %v11503_v61, %v153_v51  ;;  %v11506_v59 = vld [vmem:[#allocation58_spill] sm:$0xff]  ;;  %v157_v6 = vld [vmem:[%s11266_s3 + $0x2d8] sm:$0xff]  ;;  %v11509_v51 = vld [vmem:[#allocation57_spill] sm:$0xff] }
 0x216   :  { %v7519_v13 = vpop.permute.xlu1 %1580  ;;  %v7521_v30 = vpop.permute.xlu0 %1576  ;;  %v3815_v39 = vsel %vm3538_vm0, %v3112_v52, 0.0  ;;  %v3770_v20 = vadd.f32 %v3769_v45, %v3768_v12  ;;  %v3801_v37 = vadd.f32 %v3800_v31, %v3799_v54  ;;  %v3814_v22 = vadd.f32 %v3813_v21, %v3812_v47  ;;  %v158_v45 = vld [vmem:[%s11266_s3 + $0x2e0] sm:$0xff]  ;;  %v160_v54 = vld [vmem:[%s11266_s3 + $0x2f0] sm:$0xff] }
 0x217   :  { %11497 = vst [vmem:[#allocation33_spill] sm:$0xff] %v7519_v13  ;;  %11498 = vst [vmem:[#allocation39_spill] sm:$0xff] %v7521_v30  ;;  %v11500_v13 = vld [vmem:[#allocation55_spill] sm:$0xff]  ;;  %v3116_v1 = vmul.f32 %v11506_v59, %v156_v3  ;;  %v1870_v61 = vrot.slane %v7378_v44, %v6372_v11  ;;  %v5600_v29 = vand.u32 2147483647, %v7525_v8  ;;  %v3825_v33 = vsel %vm3538_vm0, %v3114_v62, 0.0 }
 0x218   :  { %1857 = vbcast.lane.b32.xlu1 %v1851_v56, 264  ;;  %1853 = vbcast.lane.b32.xlu0 %v1851_v56, 256  ;;  %v3115_v30 = vmul.f32 %v11500_v13, %v155_v26  ;;  %v3781_v26 = vadd.f32 %v3780_v53, %v3779_v35  ;;  %v3793_v13 = vrot.slane %v3792_v43, 4  ;;  %v3803_v14 = vadd.f32 %v3802_v55, %v3801_v37  ;;  %v159_v35 = vld [vmem:[%s11266_s3 + $0x2e8] sm:$0xff]  ;;  %v11510_v47 = vld [vmem:[#allocation59_spill] sm:$0xff] }
 0x219   :  { %v3816_v52 = vadd.f32 %v3815_v39, %v3814_v22  ;;  %v3817_v53 = vsel %vm3538_vm0, %v3113_v48, 0.0  ;;  %v3733_v55 = vadd.f32 %v3732_v60, %v7489_v58  ;;  %v3757_v62 = vadd.f32 %v3756_v34, %v3755_v41  ;;  %v11511_v39 = vld [vmem:[#allocation60_spill] sm:$0xff] }
 0x21a   :  { %v7548_v24 = vpop.permute.xlu1 %1591  ;;  %v7550_v10 = vpop.permute.xlu0 %1587  ;;  %v3826_v12 = vsel %vm3538_vm0, %v3115_v30, 0.0  ;;  %v3745_v30 = vrot.slane %v3744_v46, 1  ;;  %v3771_v8 = vrot.slane %v3770_v20, 1  ;;  %v3117_v3 = vmul.f32 %v11509_v51, %v157_v6  ;;  %v11512_v6 = vld [vmem:[#allocation62_spill] sm:$0xff] }
 0x21b   :  { %11504 = vst [vmem:[#allocation40_spill] sm:$0xff] %v7548_v24  ;;  %11505 = vst [vmem:[#allocation42_spill] sm:$0xff] %v7550_v10  ;;  %v3828_v31 = vsel %vm3538_vm0, %v3116_v1, 0.0  ;;  %v3827_v21 = vadd.f32 %v3826_v12, %v3825_v33  ;;  %v3119_v48 = vmul.f32 %v11510_v47, %v159_v35  ;;  %v3118_v22 = vmul.f32 %v11511_v39, %v158_v45  ;;  %v11560_v24 = vld [vmem:[#allocation90_spill] sm:$0xff] }
 0x21c   :  { %1865 = vbcast.lane.b32.xlu1 %v1851_v56, 280  ;;  %1861 = vbcast.lane.b32.xlu0 %v1851_v56, 272  ;;  %v3804_v56 = vsel %vm3538_vm0, %v3109_v16, 0.0  ;;  %v3782_v16 = vrot.slane %v3781_v26, 2  ;;  %v3794_v58 = vadd.f32 %v3793_v13, %v3792_v43  ;;  %v3818_v41 = vadd.f32 %v3817_v53, %v3816_v52  ;;  %v161_v43 = vld [vmem:[%s11266_s3 + $0x2f8] sm:$0xff] }
 0x21d   :  { %v3805_v60 = vadd.f32 %v3804_v56, %v3803_v14  ;;  %v5870_v34 = vrot.slane %v5599_v28, 4  ;;  %v3829_v59 = vadd.f32 %v3828_v31, %v3827_v21  ;;  %v3120_v51 = vmul.f32 %v11512_v6, %v160_v54 }
 0x21e   :  { %v7569_v50 = vpop.permute.xlu1 %1599  ;;  %v7571_v37 = vpop.permute.xlu0 %1595  ;;  %v5872_v33 = vrot.slane %v5600_v29, 3  ;;  %v3758_v35 = vrot.slane %v3757_v62, 1  ;;  %v3772_v47 = vadd.f32 %v3771_v8, %v3770_v20  ;;  %v3830_v45 = vsel %vm3538_vm0, %v3117_v3, 0.0  ;;  %v11516_v8 = vld [vmem:[#allocation61_spill] sm:$0xff] }
 0x21f   :  { %11507 = vst [vmem:[#allocation43_spill] sm:$0xff] %v7569_v50  ;;  %11508 = vst [vmem:[#allocation44_spill] sm:$0xff] %v7571_v37  ;;  %v11515_v37 = vrot.slane %v7064_v18, 6  ;;  %v3746_v28 = vadd.f32 %v3745_v30, %v3744_v46  ;;  %v3783_v13 = vadd.f32 %v3782_v16, %v3781_v26  ;;  %v3839_v14 = vsel %vm3538_vm0, %v3119_v48, 0.0  ;;  %v167_v16 = vld [vmem:[%s11266_s3 + $0x328] sm:$0xff] }
 0x220   :  { %1876 = vbcast.lane.b32.xlu1 %v1870_v61, 264  ;;  %1872 = vbcast.lane.b32.xlu0 %v1870_v61, 256  ;;  %v3838_v52 = vsel %vm3538_vm0, %v3118_v22, 0.0  ;;  %v1889_v56 = vrot.slane %v7378_v44, %v11423_v57  ;;  %v3795_v29 = vrot.slane %v3794_v58, 2  ;;  %v3806_v53 = vrot.slane %v3805_v60, 4 }
 0x221   :  { %v5473_v12 = vadd.f32 %v11515_v37, %v3733_v55  ;;  %v3819_v20 = vrot.slane %v3818_v41, 4  ;;  %v5869_v37 = vsel %vm5850_vm3, %v7508_v63, %v7477_v32  ;;  %v3831_v55 = vadd.f32 %v3830_v45, %v3829_v59  ;;  %v166_v32 = vld [vmem:[%s11266_s3 + $0x320] sm:$0xff] }
 0x222   :  { %v7582_v1 = vpop.permute.xlu1 %1610  ;;  %v7584_v50 = vpop.permute.xlu0 %1606  ;;  %v3121_v46 = vmul.f32 %v11516_v8, %v161_v43  ;;  %v3841_v26 = vsel %vm3538_vm0, %v3120_v51, 0.0  ;;  %v3759_v31 = vadd.f32 %v3758_v35, %v3757_v62  ;;  %v3840_v54 = vadd.f32 %v3839_v14, %v3838_v52  ;;  %v11522_v14 = vld [vmem:[#allocation68_spill] sm:$0xff] }
 0x223   :  { %11513 = vst [vmem:[#allocation41_spill] sm:$0xff] %v7582_v1  ;;  %11514 = vst [vmem:[#allocation46_spill] sm:$0xff] %v7584_v50  ;;  %v11519_v63 = vrot.slane %v7064_v18, 7  ;;  %v5601_v48 = vand.u32 2147483647, %v5473_v12  ;;  %v11520_v39 = vrot.slane %v7252_v25, 1  ;;  %v3796_v6 = vadd.f32 %v3795_v29, %v3794_v58 }
 0x224   :  { %1884 = vbcast.lane.b32.xlu1 %v1870_v61, 280  ;;  %1880 = vbcast.lane.b32.xlu0 %v1870_v61, 272  ;;  %v5871_v61 = vsel %vm5853_vm4, %v5870_v34, %v5869_v37  ;;  %v3784_v59 = vrot.slane %v3783_v13, 1  ;;  %v3807_v51 = vadd.f32 %v3806_v53, %v3805_v60  ;;  %v3820_v35 = vadd.f32 %v3819_v20, %v3818_v41  ;;  %v168_v18 = vld [vmem:[%s11266_s3 + $0x330] sm:$0xff]  ;;  %v163_v60 = vld [vmem:[%s11266_s3 + $0x308] sm:$0xff]  ;;  %v165_v34 = vld [vmem:[%s11266_s3 + $0x318] sm:$0xff] }
 0x225   :  { %v5474_v21 = vadd.f32 %v11519_v63, %v3746_v28  ;;  %v5476_v22 = vadd.f32 %v11520_v39, %v3772_v47  ;;  %v5873_v62 = vsel %vm5856_vm5, %v5872_v33, %v5871_v61  ;;  %v3842_v45 = vadd.f32 %v3841_v26, %v3840_v54  ;;  %v11521_v28 = vld [vmem:[#allocation67_spill] sm:$0xff]  ;;  %v11525_v26 = vld [vmem:[#allocation70_spill] sm:$0xff] }
 0x226   :  { %v7601_v30 = vpop.permute.xlu1 %1618  ;;  %v7603_v3 = vpop.permute.xlu0 %1614  ;;  %v3832_v43 = vrot.slane %v3831_v55, 4  ;;  %v3843_v12 = vsel %vm3538_vm0, %v3121_v46, 0.0  ;;  %v3127_v47 = vmul.f32 %v11521_v28, %v167_v16  ;;  %v3126_v52 = vmul.f32 %v11522_v14, %v166_v32  ;;  %v162_v46 = vld [vmem:[%s11266_s3 + $0x300] sm:$0xff]  ;;  %v11535_v28 = vld [vmem:[#allocation71_spill] sm:$0xff] }
 0x227   :  { %11517 = vst [vmem:[#allocation45_spill] sm:$0xff] %v7601_v30  ;;  %11518 = vst [vmem:[#allocation47_spill] sm:$0xff] %v7603_v3  ;;  %v7629_v58 = vadd.f32 %v3759_v31, %v7252_v25  ;;  %v5602_v41 = vand.u32 2147483647, %v5474_v21  ;;  %v5874_v29 = vrot.slane %v5601_v48, 2  ;;  %v3785_v8 = vadd.f32 %v3784_v59, %v3783_v13  ;;  %v169_v21 = vld [vmem:[%s11266_s3 + $0x338] sm:$0xff] }
 0x228   :  { %1895 = vbcast.lane.b32.xlu1 %v1889_v56, 264  ;;  %1891 = vbcast.lane.b32.xlu0 %v1889_v56, 256  ;;  %v5604_v20 = vand.u32 2147483647, %v5476_v22  ;;  %v3128_v61 = vmul.f32 %v11525_v26, %v168_v18  ;;  %v1908_v31 = vrot.slane %v7378_v44, %v6380_v15  ;;  %v3797_v54 = vrot.slane %v3796_v6, 1  ;;  %v11526_v48 = vld [vmem:[#allocation63_spill] sm:$0xff] }
 0x229   :  { %v3808_v16 = vrot.slane %v3807_v51, 2  ;;  %v3821_v32 = vrot.slane %v3820_v35, 2  ;;  %v3844_v63 = vadd.f32 %v3843_v12, %v3842_v45  ;;  %v3833_v13 = vadd.f32 %v3832_v43, %v3831_v55  ;;  %v11529_v14 = vld [vmem:[#allocation64_spill] sm:$0xff]  ;;  %v164_v45 = vld [vmem:[%s11266_s3 + $0x310] sm:$0xff] }
 0x22a   :  { %v7624_v37 = vpop.permute.xlu1 %1629  ;;  %v7626_v33 = vpop.permute.xlu0 %1625  ;;  %v3123_v39 = vmul.f32 %v11526_v48, %v163_v60  ;;  %v3865_v22 = vsel %vm3538_vm0, %v3127_v47, 0.0  ;;  %v3864_v59 = vsel %vm3538_vm0, %v3126_v52, 0.0  ;;  %v3122_v26 = vmul.f32 %v11529_v14, %v162_v46  ;;  %v11531_v60 = vld [vmem:[#allocation69_spill] sm:$0xff]  ;;  %v181_v50 = vld [vmem:[%s11266_s3 + $0x398] sm:$0xff] }
 0x22b   :  { %11523 = vst [vmem:[#allocation48_spill] sm:$0xff] %v7624_v37  ;;  %11524 = vst [vmem:[#allocation51_spill] sm:$0xff] %v7626_v33  ;;  %v7657_v55 = vsel %vm5859_vm6, %v5874_v29, %v5873_v62  ;;  %v7659_v43 = vrot.slane %v5602_v41, 1  ;;  %v7661_v12 = vrot.slane %v5604_v20, 7  ;;  %v11530_v47 = vrot.slane %v7252_v25, 2  ;;  %v171_v46 = vld [vmem:[%s11266_s3 + $0x348] sm:$0xff] }
 0x22c   :  { %1903 = vbcast.lane.b32.xlu1 %v1889_v56, 280  ;;  %1899 = vbcast.lane.b32.xlu0 %v1889_v56, 272  ;;  %v3129_v48 = vmul.f32 %v11531_v60, %v169_v21  ;;  %v3867_v53 = vsel %vm3538_vm0, %v3128_v61, 0.0  ;;  %v170_v62 = vld [vmem:[%s11266_s3 + $0x340] sm:$0xff]  ;;  %v3798_v41 = vadd.f32 %v3797_v54, %v3796_v6  ;;  %v3809_v29 = vadd.f32 %v3808_v16, %v3807_v51  ;;  %v11532_v6 = vld [vmem:[#allocation66_spill] sm:$0xff] }
 0x22d   :  { %v7665_v52 = vadd.f32 %v11530_v47, %v3785_v8  ;;  %v3845_v20 = vrot.slane %v3844_v63, 4  ;;  %v3866_v14 = vadd.f32 %v3865_v22, %v3864_v59  ;;  %v175_v8 = vld [vmem:[%s11266_s3 + $0x368] sm:$0xff]  ;;  %v174_v61 = vld [vmem:[%s11266_s3 + $0x360] sm:$0xff]  ;;  %v3822_v21 = vadd.f32 %v3821_v32, %v3820_v35  ;;  %v172_v32 = vld [vmem:[%s11266_s3 + $0x350] sm:$0xff] }
 0x22e   :  { %v7647_v18 = vpop.permute.xlu1 %1637  ;;  %v7649_v56 = vpop.permute.xlu0 %1633  ;;  %v3834_v47 = vrot.slane %v3833_v13, 2  ;;  %v3852_v60 = vsel %vm3538_vm0, %v3123_v39, 0.0  ;;  %v3124_v51 = vmul.f32 %v11532_v6, %v164_v45  ;;  %v3851_v22 = vsel %vm3538_vm0, %v3122_v26, 0.0  ;;  %v176_v39 = vld [vmem:[%s11266_s3 + $0x370] sm:$0xff] }
 0x22f   :  { %11527 = vst [vmem:[#allocation52_spill] sm:$0xff] %v7647_v18  ;;  %11528 = vst [vmem:[#allocation50_spill] sm:$0xff] %v7649_v56  ;;  %v3868_v59 = vadd.f32 %v3867_v53, %v3866_v14  ;;  %v3131_v18 = vmul.f32 %v11535_v28, %v171_v46  ;;  %v11536_v56 = vld [vmem:[#allocation72_spill] sm:$0xff]  ;;  %v3869_v45 = vsel %vm3538_vm0, %v3129_v48, 0.0  ;;  %v11537_v6 = vld [vmem:[#allocation75_spill] sm:$0xff]  ;;  %v1927_v53 = vrot.slane %v7378_v44, %v6384_v17 }
 0x230   :  { %1914 = vbcast.lane.b32.xlu1 %v1908_v31, 264  ;;  %1910 = vbcast.lane.b32.xlu0 %v1908_v31, 256  ;;  %v3130_v35 = vmul.f32 %v11536_v56, %v170_v62  ;;  %v3810_v28 = vrot.slane %v3809_v29, 1  ;;  %v3846_v26 = vadd.f32 %v3845_v20, %v3844_v63  ;;  %v11539_v46 = vld [vmem:[#allocation65_spill] sm:$0xff]  ;;  %v11540_v14 = vrot.slane %v7252_v25, 3 }
 0x231   :  { %v3125_v62 = vmul.f32 %v11539_v46, %v165_v34  ;;  %v3854_v48 = vsel %vm3538_vm0, %v3124_v51, 0.0  ;;  %v3823_v3 = vrot.slane %v3822_v21, 1  ;;  %v7717_v56 = vadd.f32 %v3834_v47, %v3833_v13  ;;  %v173_v34 = vld [vmem:[%s11266_s3 + $0x358] sm:$0xff]  ;;  %v179_v51 = vld [vmem:[%s11266_s3 + $0x388] sm:$0xff]  ;;  %v178_v46 = vld [vmem:[%s11266_s3 + $0x380] sm:$0xff] }
 0x232   :  { %v7686_v54 = vpop.permute.xlu1 %1648  ;;  %v7688_v16 = vpop.permute.xlu0 %1644  ;;  %v7708_v37 = vadd.f32 %v11540_v14, %v3798_v41  ;;  %v3853_v63 = vadd.f32 %v3852_v60, %v3851_v22  ;;  %v3870_v20 = vadd.f32 %v3869_v45, %v3868_v59  ;;  %v177_v41 = vld [vmem:[%s11266_s3 + $0x378] sm:$0xff]  ;;  %v7732_v60 = vadd.f32 %v3810_v28, %v3809_v29  ;;  %v11545_v14 = vld [vmem:[#allocation73_spill] sm:$0xff] }
 0x233   :  { %11533 = vst [vmem:[#allocation54_spill] sm:$0xff] %v7686_v54  ;;  %11534 = vst [vmem:[#allocation55_spill] sm:$0xff] %v7688_v16  ;;  %v3135_v54 = vmul.f32 %v11537_v6, %v175_v8  ;;  %v11538_v16 = vld [vmem:[#allocation76_spill] sm:$0xff]  ;;  %v11541_v8 = vld [vmem:[#allocation74_spill] sm:$0xff]  ;;  %v3847_v22 = vrot.slane %v3846_v26, 2  ;;  %v3856_v59 = vsel %vm3538_vm0, %v3125_v62, 0.0 }
 0x234   :  { %v3134_v33 = vmul.f32 %v11538_v16, %v174_v61  ;;  %1922 = vbcast.lane.b32.xlu1 %v1908_v31, 280  ;;  %1918 = vbcast.lane.b32.xlu0 %v1908_v31, 272  ;;  %v3132_v6 = vmul.f32 %v11541_v8, %v172_v32  ;;  %v11542_v61 = vld [vmem:[#allocation78_spill] sm:$0xff]  ;;  %v3878_v32 = vsel %vm3538_vm0, %v3131_v18, 0.0  ;;  %v3855_v45 = vadd.f32 %v3854_v48, %v3853_v63  ;;  %v11546_v8 = vld [vmem:[#allocation77_spill] sm:$0xff] }
 0x235   :  { %v3136_v16 = vmul.f32 %v11542_v61, %v176_v39  ;;  %v3877_v39 = vsel %vm3538_vm0, %v3130_v35, 0.0  ;;  %v3891_v13 = vsel %vm3538_vm0, %v3135_v54, 0.0  ;;  %v3133_v18 = vmul.f32 %v11545_v14, %v173_v34  ;;  %v183_v29 = vld [vmem:[%s11266_s3 + $0x3a8] sm:$0xff]  ;;  %v182_v28 = vld [vmem:[%s11266_s3 + $0x3a0] sm:$0xff] }
 0x236   :  { %v7713_v31 = vpop.permute.xlu1 %1656  ;;  %v7715_v30 = vpop.permute.xlu0 %1652  ;;  %v3890_v47 = vsel %vm3538_vm0, %v3134_v33, 0.0  ;;  %v3880_v35 = vsel %vm3538_vm0, %v3132_v6, 0.0  ;;  %v3137_v54 = vmul.f32 %v11546_v8, %v177_v41  ;;  %v3871_v61 = vrot.slane %v3870_v20, 4  ;;  %v11549_v6 = vld [vmem:[#allocation79_spill] sm:$0xff] }
 0x237   :  { %11543 = vst [vmem:[#allocation56_spill] sm:$0xff] %v7713_v31  ;;  %11544 = vst [vmem:[#allocation49_spill] sm:$0xff] %v7715_v30  ;;  %v3893_v33 = vsel %vm3538_vm0, %v3136_v16, 0.0  ;;  %v3879_v63 = vadd.f32 %v3878_v32, %v3877_v39  ;;  %v3892_v34 = vadd.f32 %v3891_v13, %v3890_v47  ;;  %v3139_v14 = vmul.f32 %v11549_v6, %v179_v51  ;;  %v180_v16 = vld [vmem:[%s11266_s3 + $0x390] sm:$0xff]  ;;  %v11550_v31 = vld [vmem:[#allocation80_spill] sm:$0xff] }
 0x238   :  { %1933 = vbcast.lane.b32.xlu1 %v1927_v53, 264  ;;  %1929 = vbcast.lane.b32.xlu0 %v1927_v53, 256  ;;  %v7756_v41 = vadd.f32 %v3823_v3, %v3822_v21  ;;  %v3836_v8 = vrot.slane %v7717_v56, 1  ;;  %v3138_v30 = vmul.f32 %v11550_v31, %v178_v46  ;;  %v187_v32 = vld [vmem:[%s11266_s3 + $0x3c8] sm:$0xff]  ;;  %v1946_v51 = vrot.slane %v7378_v44, %v6388_v19  ;;  %v11551_v21 = vld [vmem:[#allocation83_spill] sm:$0xff]  ;;  %v11552_v47 = vld [vmem:[#allocation84_spill] sm:$0xff] }
 0x239   :  { %v3881_v39 = vadd.f32 %v3880_v35, %v3879_v63  ;;  %v3894_v3 = vadd.f32 %v3893_v33, %v3892_v34  ;;  %v3143_v13 = vmul.f32 %v11551_v21, %v183_v29  ;;  %v3142_v6 = vmul.f32 %v11552_v47, %v182_v28  ;;  %v186_v31 = vld [vmem:[%s11266_s3 + $0x3c0] sm:$0xff]  ;;  %v27_v46 = vld [vmem:[%s11263_s0 + $0x48] sm:$0xff] }
 0x23a   :  { %v7748_v62 = vpop.permute.xlu1 %1667  ;;  %v7750_v48 = vpop.permute.xlu0 %1663  ;;  %v3882_v44 = vsel %vm3538_vm0, %v3133_v18, 0.0  ;;  %v3895_v35 = vsel %vm3538_vm0, %v3137_v54, 0.0  ;;  %v11553_v33 = vld [vmem:[#allocation82_spill] sm:$0xff]  ;;  %v7786_v34 = vadd.f32 %v3847_v22, %v3846_v26  ;;  %v3872_v21 = vadd.f32 %v3871_v61, %v3870_v20  ;;  %v185_v26 = vld [vmem:[%s11266_s3 + $0x3b8] sm:$0xff] }
 0x23b   :  { %11547 = vst [vmem:[#allocation53_spill] sm:$0xff] %v7748_v62  ;;  %11548 = vst [vmem:[#allocation58_spill] sm:$0xff] %v7750_v48  ;;  %v184_v62 = vld [vmem:[%s11266_s3 + $0x3b0] sm:$0xff]  ;;  %v3857_v48 = vadd.f32 %v3856_v59, %v3855_v45  ;;  %v3140_v29 = vmul.f32 %v11553_v33, %v180_v16  ;;  %v3904_v47 = vsel %vm3538_vm0, %v3139_v14, 0.0  ;;  %v3903_v54 = vsel %vm3538_vm0, %v3138_v30, 0.0  ;;  %v11558_v61 = vld [vmem:[#allocation88_spill] sm:$0xff] }
 0x23c   :  { %1941 = vbcast.lane.b32.xlu1 %v1927_v53, 280  ;;  %1937 = vbcast.lane.b32.xlu0 %v1927_v53, 272  ;;  %v43_v53 = vld [vmem:[%s11264_s1 + $0x48] sm:$0xff]  ;;  %v188_v18 = vld [vmem:[%s11266_s3 + $0x3d0] sm:$0xff]  ;;  %v3146_v14 = vmul.f32 %v11558_v61, %v186_v31  ;;  %v3883_v33 = vadd.f32 %v3882_v44, %v3881_v39 }
 0x23d   :  { %v11556_v59 = vld [vmem:[#allocation86_spill] sm:$0xff]  ;;  %v11557_v22 = vld [vmem:[#allocation87_spill] sm:$0xff]  ;;  %v7802_v16 = vsub.f32 %v27_v46, %v43_v53  ;;  %v11559_v30 = vld [vmem:[#allocation81_spill] sm:$0xff]  ;;  %v3906_v10 = vsel %vm3538_vm0, %v3140_v29, 0.0  ;;  %v3148_v0 = vmul.f32 %v11560_v24, %v188_v18  ;;  %v3905_v46 = vadd.f32 %v3904_v47, %v3903_v54 }
 0x23e   :  { %v7782_v28 = vpop.permute.xlu1 %1675  ;;  %v7784_v63 = vpop.permute.xlu0 %1671  ;;  %v3144_v45 = vmul.f32 %v11556_v59, %v184_v62  ;;  %v3147_v20 = vmul.f32 %v11557_v22, %v187_v32  ;;  %v3896_v62 = vadd.f32 %v3895_v35, %v3894_v3  ;;  %v3917_v59 = vsel %vm3538_vm0, %v3143_v13, 0.0  ;;  %v11561_v53 = vld [vmem:[#allocation85_spill] sm:$0xff]  ;;  %v189_v13 = vld [vmem:[%s11266_s3 + $0x3d8] sm:$0xff] }
 0x23f   :  { %11554 = vst [vmem:[#allocation57_spill] sm:$0xff] %v7782_v28  ;;  %11555 = vst [vmem:[#allocation59_spill] sm:$0xff] %v7784_v63  ;;  %v3916_v28 = vsel %vm3538_vm0, %v3142_v6, 0.0  ;;  %v3858_v63 = vrot.slane %v3857_v48, 4  ;;  %v3141_v1 = vmul.f32 %v11559_v30, %v181_v50  ;;  %v3873_v22 = vrot.slane %v3872_v21, 2 }
 0x240   :  { %1952 = vbcast.lane.b32.xlu1 %v1946_v51, 264  ;;  %1948 = vbcast.lane.b32.xlu0 %v1946_v51, 256  ;;  %v3145_v39 = vmul.f32 %v11561_v53, %v185_v26  ;;  %v3919_v3 = vsel %vm3538_vm0, %v3144_v45, 0.0  ;;  %v3918_v6 = vadd.f32 %v3917_v59, %v3916_v28  ;;  %v3930_v50 = vsel %vm3538_vm0, %v3147_v20, 0.0  ;;  %v11562_v26 = vld [vmem:[#allocation89_spill] sm:$0xff] }
 0x241   :  { %v3929_v44 = vsel %vm3538_vm0, %v3146_v14, 0.0  ;;  %v1965_v24 = vrot.slane %v7802_v16, %v6360_v5  ;;  %v3884_v35 = vrot.slane %v3883_v33, 4  ;;  %v3897_v29 = vrot.slane %v3896_v62, 4 }
 0x242   :  { %v7809_v32 = vpop.permute.xlu1 %1686  ;;  %v7811_v31 = vpop.permute.xlu0 %1682  ;;  %v3907_v47 = vadd.f32 %v3906_v10, %v3905_v46  ;;  %v3837_v18 = vadd.f32 %v3836_v8, %v7717_v56  ;;  %v3908_v45 = vsel %vm3538_vm0, %v3141_v1, 0.0  ;;  %v3920_v54 = vadd.f32 %v3919_v3, %v3918_v6 }
 0x243   :  { %v3149_v61 = vmul.f32 %v11562_v26, %v189_v13  ;;  %v3932_v28 = vsel %vm3538_vm0, %v3148_v0, 0.0  ;;  %v3921_v59 = vsel %vm3538_vm0, %v3145_v39, 0.0  ;;  %v3931_v30 = vadd.f32 %v3930_v50, %v3929_v44 }
 0x244   :  { %1960 = vbcast.lane.b32.xlu1 %v1946_v51, 280  ;;  %1956 = vbcast.lane.b32.xlu0 %v1946_v51, 272  ;;  %v3859_v51 = vadd.f32 %v3858_v63, %v3857_v48  ;;  %v3849_v53 = vrot.slane %v7786_v34, 1  ;;  %v11563_v10 = vand.u32 2147483647, %v7665_v52  ;;  %v3874_v8 = vadd.f32 %v3873_v22, %v3872_v21 }
 0x245   :  { %v5606_v1 = vand.u32 2147483647, %v7708_v37  ;;  %v7838_v0 = vsel %vm5862_vm7, %v7659_v43, %v7657_v55  ;;  %v11564_v48 = vrot.slane %v7252_v25, 4  ;;  %v3885_v46 = vadd.f32 %v3884_v35, %v3883_v33  ;;  %v190_v33 = vld [vmem:[%s11266_s3 + $0x3e0] sm:$0xff] }
 0x246   :  { %v7826_v20 = vpop.permute.xlu1 %1694  ;;  %v7828_v14 = vpop.permute.xlu0 %1690  ;;  %v5880_v56 = vrot.slane %v11563_v10, 6  ;;  %v3909_v39 = vadd.f32 %v3908_v45, %v3907_v47  ;;  %v3933_v3 = vadd.f32 %v3932_v28, %v3931_v30  ;;  %v3898_v13 = vadd.f32 %v3897_v29, %v3896_v62 }
 0x247   :  { %v5479_v63 = vadd.f32 %v11564_v48, %v7732_v60  ;;  %v3922_v52 = vadd.f32 %v3921_v59, %v3920_v54  ;;  %v3934_v6 = vsel %vm3538_vm0, %v3149_v61, 0.0  ;;  %v11565_v22 = vand.u32 2147483647, %v7629_v58  ;;  %v191_v60 = vld [vmem:[%s11266_s3 + $0x3e8] sm:$0xff] }
 0x248   :  { %1971 = vbcast.lane.b32.xlu1 %v1965_v24, 264  ;;  %1967 = vbcast.lane.b32.xlu0 %v1965_v24, 256  ;;  %v3860_v43 = vrot.slane %v3859_v51, 2  ;;  %v3850_v62 = vadd.f32 %v3849_v53, %v7786_v34  ;;  %v11566_v50 = vrot.slane %v7252_v25, 5  ;;  %v11567_v58 = vrot.slane %v7252_v25, 6  ;;  %v192_v34 = vld [vmem:[%s11266_s3 + $0x3f0] sm:$0xff] }
 0x249   :  { %v5879_v55 = vsel %vm5844_vm1, %v7661_v12, %v11565_v22  ;;  %v5882_v29 = vrot.slane %v5606_v1, 5  ;;  %v3875_v12 = vrot.slane %v3874_v8, 1  ;;  %v1984_v47 = vrot.slane %v7802_v16, %v6364_v7  ;;  %v11569_v53 = vld [vmem:[#allocation92_spill] sm:$0xff] }
 0x24a   :  { %v7844_v37 = vpop.permute.xlu1 %1705  ;;  %v7846_v21 = vpop.permute.xlu0 %1701  ;;  %v5480_v44 = vadd.f32 %v11566_v50, %v7756_v41  ;;  %v5481_v35 = vadd.f32 %v11567_v58, %v3837_v18  ;;  %v5881_v45 = vsel %vm5847_vm2, %v5880_v56, %v5879_v55  ;;  %v3886_v54 = vrot.slane %v3885_v46, 2  ;;  %v11568_v18 = vld [vmem:[#allocation91_spill] sm:$0xff]  ;;  %v11572_v50 = vld [vmem:[#allocation94_spill] sm:$0xff] }
 0x24b   :  { %v3910_v26 = vrot.slane %v3909_v39, 4  ;;  %v3935_v61 = vadd.f32 %v3934_v6, %v3933_v3  ;;  %v5607_v41 = vand.u32 2147483647, %v5479_v63  ;;  %v3899_v28 = vrot.slane %v3898_v13, 2 }
 0x24c   :  { %1979 = vbcast.lane.b32.xlu1 %v1965_v24, 280  ;;  %1975 = vbcast.lane.b32.xlu0 %v1965_v24, 272  ;;  %v3923_v59 = vrot.slane %v3922_v52, 4  ;;  %v3151_v30 = vmul.f32 %v11568_v18, %v191_v60  ;;  %v3150_v10 = vmul.f32 %v11569_v53, %v190_v33  ;;  %v3861_v48 = vadd.f32 %v3860_v43, %v3859_v51  ;;  %v193_v51 = vld [vmem:[%s11266_s3 + $0x3f8] sm:$0xff] }
 0x24d   :  { %v11571_v56 = vrot.slane %v7252_v25, 7  ;;  %v5608_v3 = vand.u32 2147483647, %v5480_v44  ;;  %v5609_v6 = vand.u32 2147483647, %v5481_v35  ;;  %v3876_v55 = vadd.f32 %v3875_v12, %v3874_v8 }
 0x24e   :  { %v7872_v24 = vpop.permute.xlu1 %1713  ;;  %v7874_v1 = vpop.permute.xlu0 %1709  ;;  %v3152_v58 = vmul.f32 %v11572_v50, %v192_v34  ;;  %v5883_v63 = vsel %vm5850_vm3, %v5882_v29, %v5881_v45  ;;  %v3887_v33 = vadd.f32 %v3886_v54, %v3885_v46  ;;  %v3911_v18 = vadd.f32 %v3910_v26, %v3909_v39  ;;  %v11575_v34 = vld [vmem:[#allocation93_spill] sm:$0xff] }
 0x24f   :  { %11570 = vst [vmem:[#allocation60_spill] sm:$0xff] %v7872_v24  ;;  %v5482_v22 = vadd.f32 %v11571_v56, %v3850_v62  ;;  %v3936_v53 = vrot.slane %v3935_v61, 4  ;;  %v5884_v25 = vrot.slane %v5607_v41, 4  ;;  %v3900_v43 = vadd.f32 %v3899_v28, %v3898_v13 }
 0x250   :  { %1990 = vbcast.lane.b32.xlu1 %v1984_v47, 264  ;;  %1986 = vbcast.lane.b32.xlu0 %v1984_v47, 256  ;;  %v3924_v62 = vadd.f32 %v3923_v59, %v3922_v52  ;;  %v3943_v8 = vsel %vm3538_vm0, %v3151_v30, 0.0  ;;  %v3942_v44 = vsel %vm3538_vm0, %v3150_v10, 0.0  ;;  %v3862_v29 = vrot.slane %v3861_v48, 1 }
 0x251   :  { %v5610_v45 = vand.u32 2147483647, %v5482_v22  ;;  %v5886_v46 = vrot.slane %v5608_v3, 3  ;;  %v5888_v39 = vrot.slane %v5609_v6, 2  ;;  %v11574_v54 = vrot.slane %v7427_v38, 1  ;;  %v7899_v3 = vld [vmem:[%s11265_s2 + $0x20] sm:$0xff] }
 0x252   :  { %v7886_v35 = vpop.permute.xlu1 %1724  ;;  %v7888_v12 = vpop.permute.xlu0 %1720  ;;  %v3153_v56 = vmul.f32 %v11575_v34, %v193_v51  ;;  %v3945_v13 = vsel %vm3538_vm0, %v3152_v58, 0.0  ;;  %v2003_v52 = vrot.slane %v7802_v16, %v6368_v9  ;;  %v3888_v41 = vrot.slane %v3887_v33, 1  ;;  %v196_v51 = vld [vmem:[%s11266_s3 + $0x410] sm:$0xff] }
 0x253   :  { %11573 = vst [vmem:[#allocation62_spill] sm:$0xff] %v7888_v12  ;;  %v5484_v26 = vadd.f32 %v11574_v54, %v3876_v55  ;;  %v3912_v28 = vrot.slane %v3911_v18, 2  ;;  %v3937_v59 = vadd.f32 %v3936_v53, %v3935_v61  ;;  %v3944_v30 = vadd.f32 %v3943_v8, %v3942_v44  ;;  %v195_v61 = vld [vmem:[%s11266_s3 + $0x408] sm:$0xff]  ;;  %v194_v53 = vld [vmem:[%s11266_s3 + $0x400] sm:$0xff] }
 0x254   :  { %1998 = vbcast.lane.b32.xlu1 %v1984_v47, 280  ;;  %1994 = vbcast.lane.b32.xlu0 %v1984_v47, 272  ;;  %v3901_v10 = vrot.slane %v3900_v43, 1  ;;  %v3925_v22 = vrot.slane %v3924_v62, 2  ;;  %v5885_v47 = vsel %vm5853_vm4, %v5884_v25, %v5883_v63  ;;  %v7908_v50 = vsel %vm3538_vm0, %v7838_v0, 0.0 }
 0x255   :  { %11578 = vst [vmem:[#allocation68_spill] sm:$0xff] %v7908_v50  ;;  %v3946_v58 = vadd.f32 %v3945_v13, %v3944_v30  ;;  %v5887_v8 = vsel %vm5856_vm5, %v5886_v46, %v5885_v47  ;;  %v5890_v44 = vrot.slane %v5610_v45, 1  ;;  %v3863_v54 = vadd.f32 %v3862_v29, %v3861_v48  ;;  %v11579_v45 = vld [vmem:[#allocation95_spill] sm:$0xff]  ;;  %v11580_v29 = vld [vmem:[#allocation96_spill] sm:$0xff] }
 0x256   :  { %v7901_v6 = vpop.permute.xlu1 %1732  ;;  %v7903_v55 = vpop.permute.xlu0 %1728  ;;  %v3947_v63 = vsel %vm3538_vm0, %v3153_v56, 0.0  ;;  %v5889_v25 = vsel %vm5859_vm6, %v5888_v39, %v5887_v8  ;;  %v5612_v34 = vand.u32 2147483647, %v5484_v26  ;;  %v3889_v13 = vadd.f32 %v3888_v41, %v3887_v33  ;;  %v11583_v41 = vld [vmem:[#allocation98_spill] sm:$0xff]  ;;  %v197_v8 = vld [vmem:[%s11266_s3 + $0x418] sm:$0xff] }
 0x257   :  { %11576 = vst [vmem:[#allocation61_spill] sm:$0xff] %v7901_v6  ;;  %11577 = vst [vmem:[#allocation67_spill] sm:$0xff] %v7903_v55  ;;  %v3913_v30 = vadd.f32 %v3912_v28, %v3911_v18  ;;  %v3938_v60 = vrot.slane %v3937_v59, 2  ;;  %v3902_v50 = vadd.f32 %v3901_v10, %v3900_v43  ;;  %v3926_v46 = vadd.f32 %v3925_v22, %v3924_v62  ;;  %v11592_v28 = vld [vmem:[#allocation99_spill] sm:$0xff] }
 0x258   :  { %2009 = vbcast.lane.b32.xlu1 %v2003_v52, 264  ;;  %2005 = vbcast.lane.b32.xlu0 %v2003_v52, 256  ;;  %v3155_v48 = vmul.f32 %v11579_v45, %v195_v61  ;;  %v3154_v56 = vmul.f32 %v11580_v29, %v194_v53  ;;  %v3948_v6 = vadd.f32 %v3947_v63, %v3946_v58  ;;  %v5892_v10 = vrot.slane %v5612_v34, 7 }
 0x259   :  { %v5891_v18 = vsel %vm5862_vm7, %v5890_v44, %v5889_v25  ;;  %v5483_v26 = vadd.f32 %v3863_v54, %v7427_v38  ;;  %v3156_v43 = vmul.f32 %v11583_v41, %v196_v51  ;;  %v2022_v62 = vrot.slane %v7802_v16, %v6372_v11  ;;  %v199_v25 = vld [vmem:[%s11266_s3 + $0x428] sm:$0xff] }
 0x25a   :  { %v7926_v47 = vpop.permute.xlu1 %1743  ;;  %v7928_v0 = vpop.permute.xlu0 %1739  ;;  %v11584_v22 = vrot.slane %v7427_v38, 2  ;;  %v3914_v61 = vrot.slane %v3913_v30, 1  ;;  %v3939_v53 = vadd.f32 %v3938_v60, %v3937_v59  ;;  %v11585_v44 = vrot.slane %v7427_v38, 3  ;;  %v198_v59 = vld [vmem:[%s11266_s3 + $0x420] sm:$0xff] }
 0x25b   :  { %11581 = vst [vmem:[#allocation70_spill] sm:$0xff] %v7926_v47  ;;  %11582 = vst [vmem:[#allocation63_spill] sm:$0xff] %v7928_v0  ;;  %v3927_v54 = vrot.slane %v3926_v46, 1  ;;  %v3955_v63 = vsel %vm3538_vm0, %v3154_v56, 0.0  ;;  %v3949_v60 = vrot.slane %v3948_v6, 4  ;;  %v7963_v45 = vsel %vm3538_vm0, %v5891_v18, 0.0 }
 0x25c   :  { %2017 = vbcast.lane.b32.xlu1 %v2003_v52, 280  ;;  %2013 = vbcast.lane.b32.xlu0 %v2003_v52, 272  ;;  %v5485_v58 = vadd.f32 %v11584_v22, %v3889_v13  ;;  %v5486_v51 = vadd.f32 %v11585_v44, %v3902_v50  ;;  %v3956_v52 = vsel %vm3538_vm0, %v3155_v48, 0.0  ;;  %v7960_v50 = vld [vmem:[%s11265_s2 + $0x28] sm:$0xff]  ;;  %11588 = vst [vmem:[#allocation66_spill] sm:$0xff] %v7963_v45  ;;  %v3958_v44 = vsel %vm3538_vm0, %v3156_v43, 0.0 }
 0x25d   :  { %v5611_v56 = vand.u32 2147483647, %v5483_v26  ;;  %v11589_v41 = vld [vmem:[#allocation97_spill] sm:$0xff]  ;;  %v3915_v39 = vadd.f32 %v3914_v61, %v3913_v30  ;;  %v200_v43 = vld [vmem:[%s11266_s3 + $0x430] sm:$0xff]  ;;  %v3159_v48 = vmul.f32 %v11592_v28, %v199_v25  ;;  %v11593_v45 = vld [vmem:[#allocation100_spill] sm:$0xff]  ;;  %v2041_v25 = vrot.slane %v7802_v16, %v11423_v57 }
 0x25e   :  { %v7950_v34 = vpop.permute.xlu1 %1751  ;;  %v7952_v13 = vpop.permute.xlu0 %1747  ;;  %v3157_v22 = vmul.f32 %v11589_v41, %v197_v8  ;;  %v5613_v33 = vand.u32 2147483647, %v5485_v58  ;;  %v203_v18 = vld [vmem:[%s11266_s3 + $0x448] sm:$0xff]  ;;  %v202_v26 = vld [vmem:[%s11266_s3 + $0x440] sm:$0xff]  ;;  %v5614_v29 = vand.u32 2147483647, %v5486_v51  ;;  %v3928_v8 = vadd.f32 %v3927_v54, %v3926_v46 }
 0x25f   :  { %11586 = vst [vmem:[#allocation64_spill] sm:$0xff] %v7950_v34  ;;  %11587 = vst [vmem:[#allocation69_spill] sm:$0xff] %v7952_v13  ;;  %v3940_v34 = vrot.slane %v3939_v53, 1  ;;  %v3957_v13 = vadd.f32 %v3956_v52, %v3955_v63  ;;  %v7985_v61 = vsel %vm5844_vm1, %v5892_v10, %v5611_v56  ;;  %v3950_v52 = vadd.f32 %v3949_v60, %v3948_v6  ;;  %v204_v46 = vld [vmem:[%s11266_s3 + $0x450] sm:$0xff]  ;;  %v207_v54 = vld [vmem:[%s11266_s3 + $0x468] sm:$0xff] }
 0x260   :  { %2028 = vbcast.lane.b32.xlu1 %v2022_v62, 264  ;;  %2024 = vbcast.lane.b32.xlu0 %v2022_v62, 256  ;;  %v3158_v51 = vmul.f32 %v11593_v45, %v198_v59  ;;  %v206_v41 = vld [vmem:[%s11266_s3 + $0x460] sm:$0xff]  ;;  %v3960_v10 = vsel %vm3538_vm0, %v3157_v22, 0.0  ;;  %v11594_v6 = vld [vmem:[#allocation103_spill] sm:$0xff]  ;;  %v8003_v59 = vrot.slane %v5613_v33, 6 }
 0x261   :  { %v3959_v63 = vadd.f32 %v3958_v44, %v3957_v13  ;;  %v3163_v13 = vmul.f32 %v11594_v6, %v203_v18  ;;  %v11595_v60 = vld [vmem:[#allocation104_spill] sm:$0xff]  ;;  %v11596_v45 = vrot.slane %v7427_v38, 4  ;;  %v11597_v44 = vld [vmem:[#allocation102_spill] sm:$0xff]  ;;  %v3941_v18 = vadd.f32 %v3940_v34, %v3939_v53 }
 0x262   :  { %v7980_v58 = vpop.permute.xlu1 %1762  ;;  %v7982_v30 = vpop.permute.xlu0 %1758  ;;  %v3162_v28 = vmul.f32 %v11595_v60, %v202_v26  ;;  %v208_v22 = vld [vmem:[%s11266_s3 + $0x470] sm:$0xff]  ;;  %v8013_v6 = vrot.slane %v5614_v29, 5  ;;  %v11600_v0 = vld [vmem:[#allocation108_spill] sm:$0xff]  ;;  %v3969_v53 = vsel %vm3538_vm0, %v3159_v48, 0.0  ;;  %v11603_v29 = vrot.slane %v7427_v38, 5 }
 0x263   :  { %11590 = vst [vmem:[#allocation71_spill] sm:$0xff] %v7980_v58  ;;  %11591 = vst [vmem:[#allocation72_spill] sm:$0xff] %v7982_v30  ;;  %v8007_v56 = vadd.f32 %v11596_v45, %v3915_v39  ;;  %v3160_v30 = vmul.f32 %v11597_v44, %v200_v43  ;;  %v11598_v26 = vld [vmem:[#allocation106_spill] sm:$0xff]  ;;  %v11599_v60 = vld [vmem:[#allocation107_spill] sm:$0xff]  ;;  %v3166_v39 = vmul.f32 %v11600_v0, %v206_v41  ;;  %v3951_v44 = vrot.slane %v3950_v52, 2 }
 0x264   :  { %2036 = vbcast.lane.b32.xlu1 %v2022_v62, 280  ;;  %2032 = vbcast.lane.b32.xlu0 %v2022_v62, 272  ;;  %v201_v62 = vld [vmem:[%s11266_s3 + $0x438] sm:$0xff]  ;;  %v3164_v33 = vmul.f32 %v11598_v26, %v204_v46  ;;  %v3167_v58 = vmul.f32 %v11599_v60, %v207_v54  ;;  %v3961_v47 = vadd.f32 %v3960_v10, %v3959_v63  ;;  %v3968_v46 = vsel %vm3538_vm0, %v3158_v51, 0.0  ;;  %v11604_v41 = vld [vmem:[#allocation110_spill] sm:$0xff]  ;;  %v11605_v63 = vld [vmem:[#allocation101_spill] sm:$0xff] }
 0x265   :  { %v205_v34 = vld [vmem:[%s11266_s3 + $0x458] sm:$0xff]  ;;  %v5488_v55 = vadd.f32 %v11603_v29, %v3928_v8  ;;  %v3982_v54 = vsel %vm3538_vm0, %v3163_v13, 0.0  ;;  %v3981_v0 = vsel %vm3538_vm0, %v3162_v28, 0.0  ;;  %v3168_v26 = vmul.f32 %v11604_v41, %v208_v22  ;;  %v11607_v13 = vld [vmem:[#allocation105_spill] sm:$0xff] }
 0x266   :  { %v8021_v45 = vpop.permute.xlu1 %1770  ;;  %v8023_v43 = vpop.permute.xlu0 %1766  ;;  %v3161_v10 = vmul.f32 %v11605_v63, %v201_v62  ;;  %v3971_v48 = vsel %vm3538_vm0, %v3160_v30, 0.0  ;;  %v209_v60 = vld [vmem:[%s11266_s3 + $0x478] sm:$0xff]  ;;  %v11606_v8 = vrot.slane %v7427_v38, 6  ;;  %v5615_v51 = vand.u32 2147483647, %v8007_v56  ;;  %v211_v56 = vld [vmem:[%s11266_s3 + $0x488] sm:$0xff] }
 0x267   :  { %11601 = vst [vmem:[#allocation75_spill] sm:$0xff] %v8021_v45  ;;  %11602 = vst [vmem:[#allocation76_spill] sm:$0xff] %v8023_v43  ;;  %v3165_v45 = vmul.f32 %v11607_v13, %v205_v34  ;;  %v3984_v28 = vsel %vm3538_vm0, %v3164_v33, 0.0  ;;  %v3995_v22 = vsel %vm3538_vm0, %v3167_v58, 0.0  ;;  %v3994_v41 = vsel %vm3538_vm0, %v3166_v39, 0.0  ;;  %v11610_v33 = vld [vmem:[#allocation109_spill] sm:$0xff] }
 0x268   :  { %2047 = vbcast.lane.b32.xlu1 %v2041_v25, 264  ;;  %2043 = vbcast.lane.b32.xlu0 %v2041_v25, 256  ;;  %v5489_v29 = vadd.f32 %v11606_v8, %v3941_v18  ;;  %v3952_v63 = vadd.f32 %v3951_v44, %v3950_v52  ;;  %v3962_v43 = vrot.slane %v3961_v47, 4  ;;  %v3970_v24 = vadd.f32 %v3969_v53, %v3968_v46  ;;  %v210_v18 = vld [vmem:[%s11266_s3 + $0x480] sm:$0xff]  ;;  %v11611_v13 = vld [vmem:[#allocation111_spill] sm:$0xff] }
 0x269   :  { %v3983_v12 = vadd.f32 %v3982_v54, %v3981_v0  ;;  %v3169_v58 = vmul.f32 %v11610_v33, %v209_v60  ;;  %v3997_v39 = vsel %vm3538_vm0, %v3168_v26, 0.0  ;;  %v2060_v52 = vrot.slane %v7802_v16, %v6380_v15  ;;  %v212_v54 = vld [vmem:[%s11266_s3 + $0x490] sm:$0xff]  ;;  %v11612_v33 = vld [vmem:[#allocation112_spill] sm:$0xff] }
 0x26a   :  { %v8047_v62 = vpop.permute.xlu1 %1781  ;;  %v8049_v30 = vpop.permute.xlu0 %1777  ;;  %v5616_v44 = vand.u32 2147483647, %v5488_v55  ;;  %v3972_v53 = vadd.f32 %v3971_v48, %v3970_v24  ;;  %v3996_v46 = vadd.f32 %v3995_v22, %v3994_v41  ;;  %v5617_v0 = vand.u32 2147483647, %v5489_v29 }
 0x26b   :  { %11608 = vst [vmem:[#allocation65_spill] sm:$0xff] %v8047_v62  ;;  %11609 = vst [vmem:[#allocation74_spill] sm:$0xff] %v8049_v30  ;;  %v3985_v34 = vadd.f32 %v3984_v28, %v3983_v12  ;;  %v3973_v8 = vsel %vm3538_vm0, %v3161_v10, 0.0  ;;  %v3986_v60 = vsel %vm3538_vm0, %v3165_v45, 0.0  ;;  %v3171_v26 = vmul.f32 %v11611_v13, %v211_v56  ;;  %v213_v10 = vld [vmem:[%s11266_s3 + $0x498] sm:$0xff]  ;;  %v11615_v45 = vld [vmem:[#allocation114_spill] sm:$0xff] }
 0x26c   :  { %2055 = vbcast.lane.b32.xlu1 %v2041_v25, 280  ;;  %2051 = vbcast.lane.b32.xlu0 %v2041_v25, 272  ;;  %v3170_v25 = vmul.f32 %v11612_v33, %v210_v18  ;;  %v3963_v24 = vadd.f32 %v3962_v43, %v3961_v47  ;;  %v3998_v12 = vadd.f32 %v3997_v39, %v3996_v46  ;;  %v3953_v48 = vrot.slane %v3952_v63, 1  ;;  %v215_v56 = vld [vmem:[%s11266_s3 + $0x4a8] sm:$0xff]  ;;  %v214_v18 = vld [vmem:[%s11266_s3 + $0x4a0] sm:$0xff] }
 0x26d   :  { %v3999_v28 = vsel %vm3538_vm0, %v3169_v58, 0.0  ;;  %v3172_v29 = vmul.f32 %v11615_v45, %v212_v54  ;;  %v5895_v47 = vsel %vm5847_vm2, %v8003_v59, %v7985_v61  ;;  %v3974_v43 = vadd.f32 %v3973_v8, %v3972_v53  ;;  %v216_v45 = vld [vmem:[%s11266_s3 + $0x4b0] sm:$0xff] }
 0x26e   :  { %v8068_v30 = vpop.permute.xlu1 %1789  ;;  %v8070_v62 = vpop.permute.xlu0 %1785  ;;  %v3987_v41 = vadd.f32 %v3986_v60, %v3985_v34  ;;  %v5897_v58 = vsel %vm5850_vm3, %v8013_v6, %v5895_v47  ;;  %v5898_v39 = vrot.slane %v5615_v51, 4  ;;  %v4008_v46 = vsel %vm3538_vm0, %v3171_v26, 0.0  ;;  %v11618_v60 = vld [vmem:[#allocation113_spill] sm:$0xff]  ;;  %v11619_v26 = vld [vmem:[#allocation115_spill] sm:$0xff] }
 0x26f   :  { %11613 = vst [vmem:[#allocation78_spill] sm:$0xff] %v8068_v30  ;;  %11614 = vst [vmem:[#allocation73_spill] sm:$0xff] %v8070_v62  ;;  %v4007_v54 = vsel %vm3538_vm0, %v3170_v25, 0.0  ;;  %v5900_v59 = vrot.slane %v5616_v44, 3  ;;  %v5902_v53 = vrot.slane %v5617_v0, 2  ;;  %v3964_v34 = vrot.slane %v3963_v24, 2 }
 0x270   :  { %2066 = vbcast.lane.b32.xlu1 %v2060_v52, 264  ;;  %2062 = vbcast.lane.b32.xlu0 %v2060_v52, 256  ;;  %v4000_v8 = vadd.f32 %v3999_v28, %v3998_v12  ;;  %v3173_v33 = vmul.f32 %v11618_v60, %v213_v10  ;;  %v3954_v6 = vadd.f32 %v3953_v48, %v3952_v63  ;;  %v4010_v51 = vsel %vm3538_vm0, %v3172_v29, 0.0  ;;  %v11620_v25 = vld [vmem:[#allocation116_spill] sm:$0xff]  ;;  %v11621_v60 = vld [vmem:[#allocation118_spill] sm:$0xff] }
 0x271   :  { %v3175_v47 = vmul.f32 %v11619_v26, %v215_v56  ;;  %v3174_v22 = vmul.f32 %v11620_v25, %v214_v18  ;;  %v2079_v44 = vrot.slane %v7802_v16, %v6384_v17  ;;  %v3975_v0 = vrot.slane %v3974_v43, 4  ;;  %v219_v63 = vld [vmem:[%s11266_s3 + $0x4c8] sm:$0xff]  ;;  %v218_v48 = vld [vmem:[%s11266_s3 + $0x4c0] sm:$0xff]  ;;  %v220_v18 = vld [vmem:[%s11266_s3 + $0x4d0] sm:$0xff] }
 0x272   :  { %v8092_v13 = vpop.permute.xlu1 %1800  ;;  %v8094_v61 = vpop.permute.xlu0 %1796  ;;  %v3988_v12 = vrot.slane %v3987_v41, 4  ;;  %v4009_v28 = vadd.f32 %v4008_v46, %v4007_v54  ;;  %v5899_v10 = vsel %vm5853_vm4, %v5898_v39, %v5897_v58  ;;  %v3176_v55 = vmul.f32 %v11621_v60, %v216_v45  ;;  %v217_v54 = vld [vmem:[%s11266_s3 + $0x4b8] sm:$0xff]  ;;  %v223_v45 = vld [vmem:[%s11266_s3 + $0x4e8] sm:$0xff]  ;;  %v222_v26 = vld [vmem:[%s11266_s3 + $0x4e0] sm:$0xff] }
 0x273   :  { %11616 = vst [vmem:[#allocation77_spill] sm:$0xff] %v8092_v13  ;;  %11617 = vst [vmem:[#allocation79_spill] sm:$0xff] %v8094_v61  ;;  %v5901_v56 = vsel %vm5856_vm5, %v5900_v59, %v5899_v10  ;;  %v4001_v39 = vrot.slane %v4000_v8, 4  ;;  %v11624_v59 = vrot.slane %v7427_v38, 7  ;;  %v4021_v60 = vsel %vm3538_vm0, %v3175_v47, 0.0 }
 0x274   :  { %2074 = vbcast.lane.b32.xlu1 %v2060_v52, 280  ;;  %2070 = vbcast.lane.b32.xlu0 %v2060_v52, 272  ;;  %v4011_v46 = vadd.f32 %v4010_v51, %v4009_v28  ;;  %v8134_v10 = vsel %vm5859_vm6, %v5902_v53, %v5901_v56  ;;  %v3965_v51 = vadd.f32 %v3964_v34, %v3963_v24  ;;  %v4012_v28 = vsel %vm3538_vm0, %v3173_v33, 0.0  ;;  %v11626_v53 = vld [vmem:[#allocation120_spill] sm:$0xff]  ;;  %v224_v24 = vld [vmem:[%s11266_s3 + $0x4f0] sm:$0xff]  ;;  %v11627_v34 = vld [vmem:[#allocation117_spill] sm:$0xff] }
 0x275   :  { %v8131_v25 = vadd.f32 %v11624_v59, %v3954_v6  ;;  %v4020_v58 = vsel %vm3538_vm0, %v3174_v22, 0.0  ;;  %v8142_v38 = vadd.f32 %v3988_v12, %v3987_v41  ;;  %v11625_v6 = vld [vmem:[#allocation119_spill] sm:$0xff]  ;;  %v3178_v56 = vmul.f32 %v11626_v53, %v218_v48 }
 0x276   :  { %v8113_v29 = vpop.permute.xlu1 %1808  ;;  %v8115_v52 = vpop.permute.xlu0 %1804  ;;  %v3179_v59 = vmul.f32 %v11625_v6, %v219_v63  ;;  %v3177_v33 = vmul.f32 %v11627_v34, %v217_v54  ;;  %v4023_v22 = vsel %vm3538_vm0, %v3176_v55, 0.0  ;;  %v3183_v47 = vmul.f32 %v6894_v2, %v223_v45  ;;  %v11630_v63 = vld [vmem:[#allocation122_spill] sm:$0xff]  ;;  %v221_v54 = vld [vmem:[%s11266_s3 + $0x4d8] sm:$0xff]  ;;  %v11633_v34 = vld [vmem:[#allocation121_spill] sm:$0xff] }
 0x277   :  { %11622 = vst [vmem:[#allocation80_spill] sm:$0xff] %v8113_v29  ;;  %11623 = vst [vmem:[#allocation83_spill] sm:$0xff] %v8115_v52  ;;  %v3976_v29 = vadd.f32 %v3975_v0, %v3974_v43  ;;  %v3182_v30 = vmul.f32 %v6896_v40, %v222_v26  ;;  %v4002_v41 = vadd.f32 %v4001_v39, %v4000_v8  ;;  %v3966_v6 = vrot.slane %v3965_v51, 1  ;;  %v225_v39 = vld [vmem:[%s11266_s3 + $0x4f8] sm:$0xff] }
 0x278   :  { %2085 = vbcast.lane.b32.xlu1 %v2079_v44, 264  ;;  %2081 = vbcast.lane.b32.xlu0 %v2079_v44, 256  ;;  %v4013_v0 = vadd.f32 %v4012_v28, %v4011_v46  ;;  %v4022_v12 = vadd.f32 %v4021_v60, %v4020_v58  ;;  %v3180_v48 = vmul.f32 %v11630_v63, %v220_v18  ;;  %v5618_v40 = vand.u32 2147483647, %v8131_v25  ;;  %v231_v28 = vld [vmem:[%s11266_s3 + $0x528] sm:$0xff]  ;;  %v230_v60 = vld [vmem:[%s11266_s3 + $0x520] sm:$0xff] }
 0x279   :  { %v3184_v55 = vmul.f32 %v6916_v23, %v224_v24  ;;  %v2098_v2 = vrot.slane %v7802_v16, %v6388_v19  ;;  %v3977_v45 = vrot.slane %v3976_v29, 2  ;;  %v4034_v58 = vsel %vm3538_vm0, %v3179_v59, 0.0  ;;  %v28_v23 = vld [vmem:[%s11263_s0 + $0x50] sm:$0xff] }
 0x27a   :  { %v8153_v52 = vpop.permute.xlu1 %1819  ;;  %v8155_v43 = vpop.permute.xlu0 %1815  ;;  %v4024_v8 = vadd.f32 %v4023_v22, %v4022_v12  ;;  %v4033_v18 = vsel %vm3538_vm0, %v3178_v56, 0.0  ;;  %v44_v16 = vld [vmem:[%s11264_s1 + $0x50] sm:$0xff]  ;;  %v4025_v46 = vsel %vm3538_vm0, %v3177_v33, 0.0  ;;  %v4047_v26 = vsel %vm3538_vm0, %v3183_v47, 0.0 }
 0x27b   :  { %11628 = vst [vmem:[#allocation84_spill] sm:$0xff] %v8153_v52  ;;  %11629 = vst [vmem:[#allocation82_spill] sm:$0xff] %v8155_v43  ;;  %v4046_v25 = vsel %vm3538_vm0, %v3182_v30, 0.0  ;;  %v4003_v56 = vrot.slane %v4002_v41, 2  ;;  %v4014_v24 = vrot.slane %v4013_v0, 4  ;;  %v3181_v33 = vmul.f32 %v11633_v34, %v221_v54  ;;  %v232_v63 = vld [vmem:[%s11266_s3 + $0x530] sm:$0xff] }
 0x27c   :  { %2093 = vbcast.lane.b32.xlu1 %v2079_v44, 280  ;;  %2089 = vbcast.lane.b32.xlu0 %v2079_v44, 272  ;;  %v3990_v44 = vrot.slane %v8142_v38, 2  ;;  %v4036_v22 = vsel %vm3538_vm0, %v3180_v48, 0.0  ;;  %v4035_v47 = vadd.f32 %v4034_v58, %v4033_v18  ;;  %v3185_v30 = vmul.f32 %v6914_v4, %v225_v39 }
 0x27d   :  { %v4049_v12 = vsel %vm3538_vm0, %v3184_v55, 0.0  ;;  %v4048_v43 = vadd.f32 %v4047_v26, %v4046_v25  ;;  %v3191_v52 = vmul.f32 %v7005_v42, %v231_v28  ;;  %v3190_v54 = vmul.f32 %v7007_v36, %v230_v60  ;;  %v227_v42 = vld [vmem:[%s11266_s3 + $0x508] sm:$0xff]  ;;  %v11636_v60 = vld [vmem:[#allocation127_spill] sm:$0xff] }
 0x27e   :  { %v8186_v59 = vpop.permute.xlu1 %1827  ;;  %v8188_v53 = vpop.permute.xlu0 %1823  ;;  %v8201_v48 = vadd.f32 %v3966_v6, %v3965_v51  ;;  %v4037_v58 = vadd.f32 %v4036_v22, %v4035_v47  ;;  %v8207_v18 = vrot.slane %v5618_v40, 1  ;;  %v3978_v34 = vadd.f32 %v3977_v45, %v3976_v29  ;;  %v235_v51 = vld [vmem:[%s11266_s3 + $0x548] sm:$0xff]  ;;  %v234_v6 = vld [vmem:[%s11266_s3 + $0x540] sm:$0xff]  ;;  %v11640_v47 = vld [vmem:[#allocation123_spill] sm:$0xff] }
 0x27f   :  { %11631 = vst [vmem:[#allocation86_spill] sm:$0xff] %v8186_v59  ;;  %11632 = vst [vmem:[#allocation87_spill] sm:$0xff] %v8188_v53  ;;  %v8197_v59 = vsub.f32 %v28_v23, %v44_v16  ;;  %v4026_v53 = vadd.f32 %v4025_v46, %v4024_v8  ;;  %v4038_v23 = vsel %vm3538_vm0, %v3181_v33, 0.0  ;;  %v4050_v8 = vadd.f32 %v4049_v12, %v4048_v43  ;;  %v226_v45 = vld [vmem:[%s11266_s3 + $0x500] sm:$0xff]  ;;  %v11641_v12 = vld [vmem:[#allocation126_spill] sm:$0xff] }
 0x280   :  { %2104 = vbcast.lane.b32.xlu1 %v2098_v2, 264  ;;  %2100 = vbcast.lane.b32.xlu0 %v2098_v2, 256  ;;  %v3192_v36 = vmul.f32 %v7029_v27, %v232_v63  ;;  %v3991_v40 = vadd.f32 %v3990_v44, %v8142_v38  ;;  %v8222_v29 = vadd.f32 %v4003_v56, %v4002_v41  ;;  %v4051_v43 = vsel %vm3538_vm0, %v3185_v30, 0.0  ;;  %v233_v27 = vld [vmem:[%s11266_s3 + $0x538] sm:$0xff]  ;;  %v236_v44 = vld [vmem:[%s11266_s3 + $0x550] sm:$0xff] }
 0x281   :  { %v2117_v16 = vrot.slane %v8197_v59, %v6360_v5  ;;  %v4015_v46 = vadd.f32 %v4014_v24, %v4013_v0  ;;  %v4027_v26 = vrot.slane %v4026_v53, 4  ;;  %v4073_v38 = vsel %vm3538_vm0, %v3191_v52, 0.0  ;;  %v11637_v33 = vld [vmem:[#allocation128_spill] sm:$0xff] }
 0x282   :  { %v8203_v4 = vpop.permute.xlu1 %1838  ;;  %v8205_v55 = vpop.permute.xlu0 %1834  ;;  %v4072_v41 = vsel %vm3538_vm0, %v3190_v54, 0.0  ;;  %v4039_v25 = vadd.f32 %v4038_v23, %v4037_v58  ;;  %v3187_v28 = vmul.f32 %v6939_v49, %v227_v42  ;;  %v3195_v56 = vmul.f32 %v11636_v60, %v235_v51  ;;  %v11642_v42 = vld [vmem:[#allocation130_spill] sm:$0xff] }
 0x283   :  { %11634 = vst [vmem:[#allocation88_spill] sm:$0xff] %v8203_v4  ;;  %11635 = vst [vmem:[#allocation81_spill] sm:$0xff] %v8205_v55  ;;  %v3194_v0 = vmul.f32 %v11637_v33, %v234_v6  ;;  %v4052_v22 = vadd.f32 %v4051_v43, %v4050_v8  ;;  %v3186_v30 = vmul.f32 %v11640_v47, %v226_v45  ;;  %v4075_v54 = vsel %vm3538_vm0, %v3192_v36, 0.0  ;;  %v11643_v33 = vld [vmem:[#allocation125_spill] sm:$0xff]  ;;  %v237_v8 = vld [vmem:[%s11266_s3 + $0x558] sm:$0xff] }
 0x284   :  { %2112 = vbcast.lane.b32.xlu1 %v2098_v2, 280  ;;  %2108 = vbcast.lane.b32.xlu0 %v2098_v2, 272  ;;  %v228_v2 = vld [vmem:[%s11266_s3 + $0x510] sm:$0xff]  ;;  %v3193_v63 = vmul.f32 %v11641_v12, %v233_v27  ;;  %v3979_v49 = vrot.slane %v3978_v34, 1  ;;  %v3992_v58 = vrot.slane %v3991_v40, 1  ;;  %v4074_v23 = vadd.f32 %v4073_v38, %v4072_v41  ;;  %v229_v36 = vld [vmem:[%s11266_s3 + $0x518] sm:$0xff] }
 0x285   :  { %v3196_v39 = vmul.f32 %v11642_v42, %v236_v44  ;;  %v4005_v51 = vrot.slane %v8222_v29, 1  ;;  %v4016_v6 = vrot.slane %v4015_v46, 2  ;;  %v4028_v60 = vadd.f32 %v4027_v26, %v4026_v53  ;;  %v11646_v42 = vld [vmem:[#allocation129_spill] sm:$0xff] }
 0x286   :  { %v8244_v24 = vpop.permute.xlu1 %1846  ;;  %v8246_v52 = vpop.permute.xlu0 %1842  ;;  %v4040_v43 = vrot.slane %v4039_v25, 4  ;;  %v4076_v45 = vadd.f32 %v4075_v54, %v4074_v23  ;;  %v4086_v27 = vsel %vm3538_vm0, %v3195_v56, 0.0  ;;  %v4085_v38 = vsel %vm3538_vm0, %v3194_v0, 0.0  ;;  %v11647_v23 = vld [vmem:[#allocation124_spill] sm:$0xff]  ;;  %v11725_v4 = vld [vmem:[#allocation33_spill] sm:$0xff] }
 0x287   :  { %11638 = vst [vmem:[#allocation90_spill] sm:$0xff] %v8244_v24  ;;  %11639 = vst [vmem:[#allocation85_spill] sm:$0xff] %v8246_v52  ;;  %v3188_v24 = vmul.f32 %v11643_v33, %v228_v2  ;;  %v4053_v53 = vrot.slane %v4052_v22, 4  ;;  %v4060_v26 = vsel %vm3538_vm0, %v3187_v28, 0.0  ;;  %v4059_v2 = vsel %vm3538_vm0, %v3186_v30, 0.0  ;;  %v239_v30 = vld [vmem:[%s11266_s3 + $0x568] sm:$0xff] }
 0x288   :  { %2123 = vbcast.lane.b32.xlu1 %v2117_v16, 264  ;;  %2119 = vbcast.lane.b32.xlu0 %v2117_v16, 256  ;;  %v4077_v47 = vsel %vm3538_vm0, %v3193_v63, 0.0  ;;  %v3980_v12 = vadd.f32 %v3979_v49, %v3978_v34  ;;  %v3197_v33 = vmul.f32 %v11646_v42, %v237_v8  ;;  %v4088_v54 = vsel %vm3538_vm0, %v3196_v39, 0.0  ;;  %v238_v34 = vld [vmem:[%s11266_s3 + $0x560] sm:$0xff] }
 0x289   :  { %v2136_v56 = vrot.slane %v8197_v59, %v6364_v7  ;;  %v4029_v0 = vrot.slane %v4028_v60, 2  ;;  %v4087_v28 = vadd.f32 %v4086_v27, %v4085_v38  ;;  %v3993_v39 = vadd.f32 %v3992_v58, %v3991_v40  ;;  %v11650_v40 = vld [vmem:[#allocation131_spill] sm:$0xff]  ;;  %v11651_v58 = vld [vmem:[#allocation132_spill] sm:$0xff] }
 0x28a   :  { %v8262_v41 = vpop.permute.xlu1 %1857  ;;  %v8264_v44 = vpop.permute.xlu0 %1853  ;;  %v4041_v63 = vadd.f32 %v4040_v43, %v4039_v25  ;;  %v4078_v49 = vadd.f32 %v4077_v47, %v4076_v45  ;;  %v4054_v27 = vadd.f32 %v4053_v53, %v4052_v22  ;;  %v4090_v55 = vsel %vm3538_vm0, %v3197_v33, 0.0 }
 0x28b   :  { %11644 = vst [vmem:[#allocation89_spill] sm:$0xff] %v8262_v41  ;;  %11645 = vst [vmem:[#allocation91_spill] sm:$0xff] %v8264_v44  ;;  %v3189_v44 = vmul.f32 %v11647_v23, %v229_v36  ;;  %v4062_v41 = vsel %vm3538_vm0, %v3188_v24, 0.0  ;;  %v4006_v36 = vadd.f32 %v4005_v51, %v8222_v29  ;;  %v4017_v24 = vadd.f32 %v4016_v6, %v4015_v46  ;;  %v240_v23 = vld [vmem:[%s11266_s3 + $0x570] sm:$0xff] }
 0x28c   :  { %2131 = vbcast.lane.b32.xlu1 %v2117_v16, 280  ;;  %2127 = vbcast.lane.b32.xlu0 %v2117_v16, 272  ;;  %v4061_v16 = vadd.f32 %v4060_v26, %v4059_v2  ;;  %v4089_v38 = vadd.f32 %v4088_v54, %v4087_v28  ;;  %v3199_v25 = vmul.f32 %v11650_v40, %v239_v30  ;;  %v11652_v29 = vrot.slane %v7899_v3, 1  ;;  %v11654_v2 = vld [vmem:[#allocation134_spill] sm:$0xff] }
 0x28d   :  { %v3198_v43 = vmul.f32 %v11651_v58, %v238_v34  ;;  %v8294_v45 = vadd.f32 %v8201_v48, %v7899_v3  ;;  %v4030_v22 = vadd.f32 %v4029_v0, %v4028_v60  ;;  %v4064_v51 = vsel %vm3538_vm0, %v3189_v44, 0.0  ;;  %v241_v60 = vld [vmem:[%s11266_s3 + $0x578] sm:$0xff] }
 0x28e   :  { %v8281_v8 = vpop.permute.xlu1 %1865  ;;  %v8283_v42 = vpop.permute.xlu0 %1861  ;;  %v4063_v52 = vadd.f32 %v4062_v41, %v4061_v16  ;;  %v5492_v46 = vadd.f32 %v11652_v29, %v3980_v12  ;;  %v11653_v6 = vrot.slane %v7899_v3, 2  ;;  %v4042_v53 = vrot.slane %v4041_v63, 2 }
 0x28f   :  { %11648 = vst [vmem:[#allocation92_spill] sm:$0xff] %v8281_v8  ;;  %11649 = vst [vmem:[#allocation94_spill] sm:$0xff] %v8283_v42  ;;  %v4079_v26 = vrot.slane %v4078_v49, 4  ;;  %v3200_v47 = vmul.f32 %v11654_v2, %v240_v23  ;;  %v11657_v48 = vrot.slane %v7899_v3, 3  ;;  %v4018_v30 = vrot.slane %v4017_v24, 1  ;;  %v11721_v8 = vld [vmem:[#allocation42_spill] sm:$0xff] }
 0x290   :  { %2142 = vbcast.lane.b32.xlu1 %v2136_v56, 264  ;;  %2138 = vbcast.lane.b32.xlu0 %v2136_v56, 256  ;;  %v5493_v41 = vadd.f32 %v11653_v6, %v3993_v39  ;;  %v4055_v34 = vrot.slane %v4054_v27, 2  ;;  %v4091_v12 = vadd.f32 %v4090_v55, %v4089_v38  ;;  %v4065_v44 = vadd.f32 %v4064_v51, %v4063_v52  ;;  %v11658_v52 = vld [vmem:[#allocation133_spill] sm:$0xff] }
 0x291   :  { %v5494_v28 = vadd.f32 %v11657_v48, %v4006_v36  ;;  %v4099_v0 = vsel %vm3538_vm0, %v3199_v25, 0.0  ;;  %v4098_v39 = vsel %vm3538_vm0, %v3198_v43, 0.0  ;;  %v2155_v16 = vrot.slane %v8197_v59, %v6368_v9  ;;  %v242_v43 = vld [vmem:[%s11266_s3 + $0x580] sm:$0xff] }
 0x292   :  { %v8302_v33 = vpop.permute.xlu1 %1876  ;;  %v8304_v54 = vpop.permute.xlu0 %1872  ;;  %v5619_v23 = vand.u32 2147483647, %v8294_v45  ;;  %v5620_v36 = vand.u32 2147483647, %v5492_v46  ;;  %v4031_v40 = vrot.slane %v4030_v22, 1  ;;  %v5905_v55 = vsel %vm5862_vm7, %v8207_v18, %v8134_v10 }
 0x293   :  { %11655 = vst [vmem:[#allocation93_spill] sm:$0xff] %v8302_v33  ;;  %11656 = vst [vmem:[#allocation95_spill] sm:$0xff] %v8304_v54  ;;  %v4043_v38 = vadd.f32 %v4042_v53, %v4041_v63  ;;  %v4080_v58 = vadd.f32 %v4079_v26, %v4078_v49  ;;  %v3201_v29 = vmul.f32 %v11658_v52, %v241_v60  ;;  %v4101_v25 = vsel %vm3538_vm0, %v3200_v47, 0.0  ;;  %v244_v49 = vld [vmem:[%s11266_s3 + $0x590] sm:$0xff]  ;;  %v11666_v54 = vld [vmem:[#allocation137_spill] sm:$0xff] }
 0x294   :  { %2150 = vbcast.lane.b32.xlu1 %v2136_v56, 280  ;;  %2146 = vbcast.lane.b32.xlu0 %v2136_v56, 272  ;;  %v243_v56 = vld [vmem:[%s11266_s3 + $0x588] sm:$0xff]  ;;  %v5621_v51 = vand.u32 2147483647, %v5493_v41  ;;  %v4056_v10 = vadd.f32 %v4055_v34, %v4054_v27  ;;  %v4092_v18 = vrot.slane %v4091_v12, 4  ;;  %v4100_v63 = vadd.f32 %v4099_v0, %v4098_v39 }
 0x295   :  { %v5622_v6 = vand.u32 2147483647, %v5494_v28  ;;  %v4019_v53 = vadd.f32 %v4018_v30, %v4017_v24  ;;  %v4066_v26 = vrot.slane %v4065_v44, 4  ;;  %v8335_v2 = vsel %vm3538_vm0, %v5905_v55, 0.0  ;;  %v11662_v60 = vld [vmem:[#allocation135_spill] sm:$0xff]  ;;  %v11663_v41 = vld [vmem:[#allocation136_spill] sm:$0xff] }
 0x296   :  { %v8327_v45 = vpop.permute.xlu1 %1884  ;;  %v8329_v46 = vpop.permute.xlu0 %1880  ;;  %11661 = vst [vmem:[#allocation97_spill] sm:$0xff] %v8335_v2  ;;  %v4032_v47 = vadd.f32 %v4031_v40, %v4030_v22  ;;  %v4102_v48 = vadd.f32 %v4101_v25, %v4100_v63  ;;  %v3203_v52 = vmul.f32 %v11662_v60, %v243_v56  ;;  %v3202_v27 = vmul.f32 %v11663_v41, %v242_v43  ;;  %v247_v41 = vld [vmem:[%s11266_s3 + $0x5a8] sm:$0xff] }
 0x297   :  { %11659 = vst [vmem:[#allocation96_spill] sm:$0xff] %v8327_v45  ;;  %11660 = vst [vmem:[#allocation98_spill] sm:$0xff] %v8329_v46  ;;  %v5906_v34 = vrot.slane %v5620_v36, 7  ;;  %v4044_v0 = vrot.slane %v4043_v38, 1  ;;  %v4081_v39 = vrot.slane %v4080_v58, 2  ;;  %v4103_v45 = vsel %vm3538_vm0, %v3201_v29, 0.0 }
 0x298   :  { %2161 = vbcast.lane.b32.xlu1 %v2155_v16, 264  ;;  %2157 = vbcast.lane.b32.xlu0 %v2155_v16, 256  ;;  %v5908_v28 = vrot.slane %v5621_v51, 6  ;;  %v4093_v30 = vadd.f32 %v4092_v18, %v4091_v12  ;;  %v3204_v55 = vmul.f32 %v11666_v54, %v244_v49  ;;  %v4057_v2 = vrot.slane %v4056_v10, 1  ;;  %v245_v36 = vld [vmem:[%s11266_s3 + $0x598] sm:$0xff]  ;;  %v8357_v51 = vld [vmem:[%s11265_s2 + $0x30] sm:$0xff] }
 0x299   :  { %v5910_v22 = vrot.slane %v5622_v6, 5  ;;  %v11667_v40 = vrot.slane %v7899_v3, 4  ;;  %v4067_v56 = vadd.f32 %v4066_v26, %v4065_v44  ;;  %v2174_v29 = vrot.slane %v8197_v59, %v6372_v11  ;;  %v252_v49 = vld [vmem:[%s11266_s3 + $0x5d0] sm:$0xff] }
 0x29a   :  { %v8340_v46 = vpop.permute.xlu1 %1895  ;;  %v8342_v24 = vpop.permute.xlu0 %1891  ;;  %v4104_v43 = vadd.f32 %v4103_v45, %v4102_v48  ;;  %v4112_v12 = vsel %vm3538_vm0, %v3203_v52, 0.0  ;;  %v4111_v54 = vsel %vm3538_vm0, %v3202_v27, 0.0  ;;  %v11668_v44 = vrot.slane %v7899_v3, 5  ;;  %v11671_v48 = vld [vmem:[#allocation10_spill] sm:$0xff] }
 0x29b   :  { %11664 = vst [vmem:[#allocation99_spill] sm:$0xff] %v8340_v46  ;;  %11665 = vst [vmem:[#allocation100_spill] sm:$0xff] %v8342_v24  ;;  %v5495_v25 = vadd.f32 %v11667_v40, %v4019_v53  ;;  %v4082_v63 = vadd.f32 %v4081_v39, %v4080_v58  ;;  %v4045_v45 = vadd.f32 %v4044_v0, %v4043_v38  ;;  %v4094_v26 = vrot.slane %v4093_v30, 2  ;;  %v246_v58 = vld [vmem:[%s11266_s3 + $0x5a0] sm:$0xff]  ;;  %v248_v0 = vld [vmem:[%s11266_s3 + $0x5b0] sm:$0xff] }
 0x29c   :  { %2169 = vbcast.lane.b32.xlu1 %v2155_v16, 280  ;;  %2165 = vbcast.lane.b32.xlu0 %v2155_v16, 272  ;;  %v5496_v18 = vadd.f32 %v11668_v44, %v4032_v47  ;;  %v5907_v53 = vsel %vm5844_vm1, %v5906_v34, %v5619_v23  ;;  %v3205_v60 = vmul.f32 %v11671_v48, %v245_v36  ;;  %v4114_v52 = vsel %vm3538_vm0, %v3204_v55, 0.0  ;;  %v251_v38 = vld [vmem:[%s11266_s3 + $0x5c8] sm:$0xff]  ;;  %v11720_v46 = vld [vmem:[#allocation40_spill] sm:$0xff] }
 0x29d   :  { %v4058_v47 = vadd.f32 %v4057_v2, %v4056_v10  ;;  %v4068_v27 = vrot.slane %v4067_v56, 2  ;;  %v4113_v39 = vadd.f32 %v4112_v12, %v4111_v54  ;;  %v5909_v23 = vsel %vm5847_vm2, %v5908_v28, %v5907_v53  ;;  %v11672_v10 = vld [vmem:[#allocation11_spill] sm:$0xff]  ;;  %v11673_v12 = vld [vmem:[#allocation12_spill] sm:$0xff] }
 0x29e   :  { %v8362_v16 = vpop.permute.xlu1 %1903  ;;  %v8364_v6 = vpop.permute.xlu0 %1899  ;;  %v4105_v34 = vrot.slane %v4104_v43, 4  ;;  %v5623_v55 = vand.u32 2147483647, %v5495_v25  ;;  %v5624_v40 = vand.u32 2147483647, %v5496_v18  ;;  %v5911_v36 = vsel %vm5850_vm3, %v5910_v22, %v5909_v23  ;;  %v250_v28 = vld [vmem:[%s11266_s3 + $0x5c0] sm:$0xff] }
 0x29f   :  { %11669 = vst [vmem:[#allocation103_spill] sm:$0xff] %v8362_v16  ;;  %11670 = vst [vmem:[#allocation104_spill] sm:$0xff] %v8364_v6  ;;  %v4083_v44 = vrot.slane %v4082_v63, 1  ;;  %v4115_v48 = vadd.f32 %v4114_v52, %v4113_v39  ;;  %v3207_v2 = vmul.f32 %v11672_v10, %v247_v41  ;;  %v3206_v54 = vmul.f32 %v11673_v12, %v246_v58  ;;  %v11678_v10 = vld [vmem:[#allocation15_spill] sm:$0xff] }
 0x2a0   :  { %2180 = vbcast.lane.b32.xlu1 %v2174_v29, 264  ;;  %2176 = vbcast.lane.b32.xlu0 %v2174_v29, 256  ;;  %v4095_v18 = vadd.f32 %v4094_v26, %v4093_v30  ;;  %v4116_v22 = vsel %vm3538_vm0, %v3205_v60, 0.0  ;;  %v11676_v52 = vrot.slane %v7899_v3, 6  ;;  %v11677_v58 = vrot.slane %v7899_v3, 7  ;;  %v249_v3 = vld [vmem:[%s11266_s3 + $0x5b8] sm:$0xff] }
 0x2a1   :  { %v4069_v23 = vadd.f32 %v4068_v27, %v4067_v56  ;;  %v3208_v12 = vmul.f32 %v11678_v10, %v248_v0  ;;  %v2193_v30 = vrot.slane %v8197_v59, %v11423_v57  ;;  %v4106_v26 = vadd.f32 %v4105_v34, %v4104_v43  ;;  %v11680_v60 = vld [vmem:[#allocation13_spill] sm:$0xff]  ;;  %v253_v34 = vld [vmem:[%s11266_s3 + $0x5d8] sm:$0xff] }
 0x2a2   :  { %v8389_v53 = vpop.permute.xlu1 %1914  ;;  %v8391_v25 = vpop.permute.xlu0 %1910  ;;  %v5497_v41 = vadd.f32 %v11676_v52, %v4045_v45  ;;  %v5498_v39 = vadd.f32 %v11677_v58, %v4058_v47  ;;  %v11679_v45 = vld [vmem:[#allocation16_spill] sm:$0xff]  ;;  %v3210_v47 = vmul.f32 %v11680_v60, %v250_v28  ;;  %v5912_v27 = vrot.slane %v5623_v55, 4 }
 0x2a3   :  { %11674 = vst [vmem:[#allocation102_spill] sm:$0xff] %v8389_v53  ;;  %11675 = vst [vmem:[#allocation106_spill] sm:$0xff] %v8391_v25  ;;  %v3211_v56 = vmul.f32 %v11679_v45, %v251_v38  ;;  %v4084_v0 = vadd.f32 %v4083_v44, %v4082_v63  ;;  %v4117_v52 = vadd.f32 %v4116_v22, %v4115_v48  ;;  %v4125_v58 = vsel %vm3538_vm0, %v3207_v2, 0.0  ;;  %v11683_v25 = vld [vmem:[#allocation19_spill] sm:$0xff]  ;;  %v11684_v63 = vld [vmem:[#allocation14_spill] sm:$0xff] }
 0x2a4   :  { %2188 = vbcast.lane.b32.xlu1 %v2174_v29, 280  ;;  %2184 = vbcast.lane.b32.xlu0 %v2174_v29, 272  ;;  %v4124_v10 = vsel %vm3538_vm0, %v3206_v54, 0.0  ;;  %v4096_v43 = vrot.slane %v4095_v18, 1  ;;  %v3212_v38 = vmul.f32 %v11683_v25, %v252_v49  ;;  %v5625_v45 = vand.u32 2147483647, %v5497_v41 }
 0x2a5   :  { %v5914_v28 = vrot.slane %v5624_v40, 3  ;;  %v4070_v55 = vrot.slane %v4069_v23, 1  ;;  %v3209_v44 = vmul.f32 %v11684_v63, %v249_v3  ;;  %v4127_v48 = vsel %vm3538_vm0, %v3208_v12, 0.0  ;;  %v11688_v63 = vld [vmem:[#allocation18_spill] sm:$0xff]  ;;  %v11689_v40 = vld [vmem:[#allocation20_spill] sm:$0xff] }
 0x2a6   :  { %v8412_v29 = vpop.permute.xlu1 %1922  ;;  %v8414_v53 = vpop.permute.xlu0 %1918  ;;  %v5626_v2 = vand.u32 2147483647, %v5498_v39  ;;  %v4107_v54 = vrot.slane %v4106_v26, 2  ;;  %v4126_v22 = vadd.f32 %v4125_v58, %v4124_v10  ;;  %v4138_v60 = vsel %vm3538_vm0, %v3211_v56, 0.0 }
 0x2a7   :  { %11681 = vst [vmem:[#allocation107_spill] sm:$0xff] %v8412_v29  ;;  %11682 = vst [vmem:[#allocation108_spill] sm:$0xff] %v8414_v53  ;;  %v4137_v29 = vsel %vm3538_vm0, %v3210_v47, 0.0  ;;  %v11685_v53 = vrot.slane %v7960_v50, 1  ;;  %v4118_v49 = vrot.slane %v4117_v52, 4  ;;  %v5913_v12 = vsel %vm5853_vm4, %v5912_v27, %v5911_v36  ;;  %v255_v47 = vld [vmem:[%s11266_s3 + $0x5e8] sm:$0xff] }
 0x2a8   :  { %2199 = vbcast.lane.b32.xlu1 %v2193_v30, 264  ;;  %2195 = vbcast.lane.b32.xlu0 %v2193_v30, 256  ;;  %v4097_v3 = vadd.f32 %v4096_v43, %v4095_v18  ;;  %v4128_v39 = vadd.f32 %v4127_v48, %v4126_v22  ;;  %v3213_v58 = vmul.f32 %v11688_v63, %v253_v34  ;;  %v4140_v56 = vsel %vm3538_vm0, %v3212_v38, 0.0  ;;  %v256_v34 = vld [vmem:[%s11266_s3 + $0x5f0] sm:$0xff] }
 0x2a9   :  { %v5500_v16 = vadd.f32 %v11685_v53, %v4084_v0  ;;  %v254_v53 = vld [vmem:[%s11266_s3 + $0x5e0] sm:$0xff]  ;;  %v4129_v0 = vsel %vm3538_vm0, %v3209_v44, 0.0  ;;  %v4139_v10 = vadd.f32 %v4138_v60, %v4137_v29  ;;  %v2212_v36 = vrot.slane %v8197_v59, %v6380_v15 }
 0x2aa   :  { %v8427_v25 = vpop.permute.xlu1 %1933  ;;  %v8429_v41 = vpop.permute.xlu0 %1929  ;;  %v5916_v18 = vrot.slane %v5625_v45, 2  ;;  %v4071_v27 = vadd.f32 %v4070_v55, %v4069_v23  ;;  %v4108_v43 = vadd.f32 %v4107_v54, %v4106_v26  ;;  %v5915_v38 = vsel %vm5856_vm5, %v5914_v28, %v5913_v12  ;;  %v11690_v29 = vld [vmem:[#allocation17_spill] sm:$0xff] }
 0x2ab   :  { %11686 = vst [vmem:[#allocation110_spill] sm:$0xff] %v8427_v25  ;;  %11687 = vst [vmem:[#allocation101_spill] sm:$0xff] %v8429_v41  ;;  %v5918_v48 = vrot.slane %v5626_v2, 1  ;;  %v4119_v22 = vadd.f32 %v4118_v49, %v4117_v52  ;;  %v4141_v63 = vadd.f32 %v4140_v56, %v4139_v10  ;;  %v3215_v44 = vmul.f32 %v11689_v40, %v255_v47  ;;  %v257_v52 = vld [vmem:[%s11266_s3 + $0x5f8] sm:$0xff]  ;;  %v11694_v28 = vld [vmem:[#allocation21_spill] sm:$0xff] }
 0x2ac   :  { %2207 = vbcast.lane.b32.xlu1 %v2193_v30, 280  ;;  %2203 = vbcast.lane.b32.xlu0 %v2193_v30, 272  ;;  %v3214_v60 = vmul.f32 %v11690_v29, %v254_v53  ;;  %v5628_v45 = vand.u32 2147483647, %v5500_v16  ;;  %v11693_v23 = vrot.slane %v7960_v50, 2  ;;  %v4130_v55 = vadd.f32 %v4129_v0, %v4128_v39  ;;  %v259_v39 = vld [vmem:[%s11266_s3 + $0x608] sm:$0xff] }
 0x2ad   :  { %v4142_v54 = vsel %vm3538_vm0, %v3213_v58, 0.0  ;;  %v3216_v2 = vmul.f32 %v11694_v28, %v256_v34  ;;  %v5917_v49 = vsel %vm5859_vm6, %v5916_v18, %v5915_v38  ;;  %v5499_v12 = vadd.f32 %v4071_v27, %v7960_v50  ;;  %v258_v58 = vld [vmem:[%s11266_s3 + $0x600] sm:$0xff]  ;;  %v11697_v28 = vld [vmem:[#allocation22_spill] sm:$0xff] }
 0x2ae   :  { %v8449_v30 = vpop.permute.xlu1 %1941  ;;  %v8451_v41 = vpop.permute.xlu0 %1937  ;;  %v5501_v26 = vadd.f32 %v11693_v23, %v4097_v3  ;;  %v4109_v3 = vrot.slane %v4108_v43, 1  ;;  %v5919_v56 = vsel %vm5862_vm7, %v5918_v48, %v5917_v49  ;;  %v4120_v53 = vrot.slane %v4119_v22, 2  ;;  %v11698_v48 = vld [vmem:[#allocation23_spill] sm:$0xff]  ;;  %v11699_v47 = vld [vmem:[#allocation24_spill] sm:$0xff] }
 0x2af   :  { %11691 = vst [vmem:[#allocation105_spill] sm:$0xff] %v8449_v30  ;;  %11692 = vst [vmem:[#allocation109_spill] sm:$0xff] %v8451_v41  ;;  %v4143_v0 = vadd.f32 %v4142_v54, %v4141_v63  ;;  %v4151_v10 = vsel %vm3538_vm0, %v3215_v44, 0.0  ;;  %v4150_v18 = vsel %vm3538_vm0, %v3214_v60, 0.0  ;;  %v5920_v38 = vrot.slane %v5628_v45, 7  ;;  %v8487_v45 = vld [vmem:[%s11265_s2 + $0x38] sm:$0xff] }
 0x2b0   :  { %2218 = vbcast.lane.b32.xlu1 %v2212_v36, 264  ;;  %2214 = vbcast.lane.b32.xlu0 %v2212_v36, 256  ;;  %v5629_v29 = vand.u32 2147483647, %v5501_v26  ;;  %v4131_v23 = vrot.slane %v4130_v55, 4  ;;  %v3217_v16 = vmul.f32 %v11697_v28, %v257_v52  ;;  %v4153_v40 = vsel %vm3538_vm0, %v3216_v2, 0.0 }
 0x2b1   :  { %v3219_v49 = vmul.f32 %v11698_v48, %v259_v39  ;;  %v3218_v30 = vmul.f32 %v11699_v47, %v258_v58  ;;  %v2231_v63 = vrot.slane %v8197_v59, %v6384_v17  ;;  %v5627_v44 = vand.u32 2147483647, %v5499_v12  ;;  %v262_v12 = vld [vmem:[%s11266_s3 + $0x620] sm:$0xff]  ;;  %v11708_v41 = vld [vmem:[#allocation38_spill] sm:$0xff] }
 0x2b2   :  { %v8474_v27 = vpop.permute.xlu1 %1952  ;;  %v8476_v34 = vpop.permute.xlu0 %1948  ;;  %v4110_v60 = vadd.f32 %v4109_v3, %v4108_v43  ;;  %v4152_v54 = vadd.f32 %v4151_v10, %v4150_v18  ;;  %v8490_v26 = vsel %vm3538_vm0, %v5919_v56, 0.0  ;;  %v8492_v52 = vadd.f32 %v4120_v53, %v4119_v22  ;;  %v263_v43 = vld [vmem:[%s11266_s3 + $0x628] sm:$0xff]  ;;  %v264_v53 = vld [vmem:[%s11266_s3 + $0x630] sm:$0xff]  ;;  %v266_v18 = vld [vmem:[%s11266_s3 + $0x640] sm:$0xff] }
 0x2b3   :  { %11695 = vst [vmem:[#allocation111_spill] sm:$0xff] %v8474_v27  ;;  %11696 = vst [vmem:[#allocation112_spill] sm:$0xff] %v8476_v34  ;;  %v4144_v2 = vrot.slane %v4143_v0, 4  ;;  %v8509_v56 = vrot.slane %v5629_v29, 6  ;;  %v267_v10 = vld [vmem:[%s11266_s3 + $0x648] sm:$0xff]  ;;  %v8522_v48 = vsel %vm5844_vm1, %v5920_v38, %v5627_v44  ;;  %v8524_v29 = vadd.f32 %v4131_v23, %v4130_v55  ;;  %v261_v55 = vld [vmem:[%s11266_s3 + $0x618] sm:$0xff] }
 0x2b4   :  { %2226 = vbcast.lane.b32.xlu1 %v2212_v36, 280  ;;  %2222 = vbcast.lane.b32.xlu0 %v2212_v36, 272  ;;  %11700 = vst [vmem:[#allocation114_spill] sm:$0xff] %v8490_v26  ;;  %v260_v36 = vld [vmem:[%s11266_s3 + $0x610] sm:$0xff]  ;;  %v4154_v47 = vadd.f32 %v4153_v40, %v4152_v54  ;;  %v4155_v40 = vsel %vm3538_vm0, %v3217_v16, 0.0  ;;  %v4164_v54 = vsel %vm3538_vm0, %v3219_v49, 0.0 }
 0x2b5   :  { %v4163_v39 = vsel %vm3538_vm0, %v3218_v30, 0.0  ;;  %v271_v3 = vld [vmem:[%s11266_s3 + $0x668] sm:$0xff]  ;;  %v11703_v26 = vrot.slane %v7960_v50, 3  ;;  %v11704_v38 = vld [vmem:[#allocation27_spill] sm:$0xff]  ;;  %v11705_v23 = vld [vmem:[#allocation28_spill] sm:$0xff]  ;;  %v8546_v34 = vadd.f32 %v4144_v2, %v4143_v0 }
 0x2b6   :  { %v8505_v58 = vpop.permute.xlu1 %1960  ;;  %v8507_v22 = vpop.permute.xlu0 %1956  ;;  %v3220_v16 = vmul.f32 %v11704_v38, %v260_v36  ;;  %v3223_v49 = vmul.f32 %v11705_v23, %v263_v43  ;;  %v11706_v44 = vld [vmem:[#allocation35_spill] sm:$0xff]  ;;  %v3227_v36 = vmul.f32 %v11708_v41, %v267_v10  ;;  %v8559_v23 = vadd.f32 %v4164_v54, %v4163_v39  ;;  %v11712_v2 = vld [vmem:[#allocation34_spill] sm:$0xff]  ;;  %v11713_v10 = vld [vmem:[#allocation25_spill] sm:$0xff] }
 0x2b7   :  { %11701 = vst [vmem:[#allocation113_spill] sm:$0xff] %v8505_v58  ;;  %11702 = vst [vmem:[#allocation115_spill] sm:$0xff] %v8507_v22  ;;  %v8534_v28 = vadd.f32 %v11703_v26, %v4110_v60  ;;  %v3222_v30 = vmul.f32 %v11706_v44, %v262_v12  ;;  %v270_v58 = vld [vmem:[%s11266_s3 + $0x660] sm:$0xff]  ;;  %v265_v60 = vld [vmem:[%s11266_s3 + $0x638] sm:$0xff]  ;;  %v8557_v12 = vadd.f32 %v4155_v40, %v4154_v47 }
 0x2b8   :  { %2237 = vbcast.lane.b32.xlu1 %v2231_v63, 264  ;;  %2233 = vbcast.lane.b32.xlu0 %v2231_v63, 256  ;;  %v11707_v26 = vld [vmem:[#allocation30_spill] sm:$0xff]  ;;  %v11711_v44 = vld [vmem:[#allocation31_spill] sm:$0xff]  ;;  %v3231_v25 = vmul.f32 %v11712_v2, %v271_v3  ;;  %v11714_v47 = vld [vmem:[#allocation37_spill] sm:$0xff]  ;;  %v2250_v54 = vrot.slane %v8197_v59, %v6388_v19 }
 0x2b9   :  { %v3224_v27 = vmul.f32 %v11707_v26, %v264_v53  ;;  %v3226_v22 = vmul.f32 %v11711_v44, %v266_v18  ;;  %v268_v0 = vld [vmem:[%s11266_s3 + $0x650] sm:$0xff]  ;;  %v8571_v26 = vmul.f32 %v11713_v10, %v261_v55  ;;  %v3230_v39 = vmul.f32 %v11714_v47, %v270_v58  ;;  %v275_v18 = vld [vmem:[%s11266_s3 + $0x688] sm:$0xff]  ;;  %v274_v40 = vld [vmem:[%s11266_s3 + $0x680] sm:$0xff] }
 0x2ba   :  { %v8553_v38 = vpop.permute.xlu1 %1971  ;;  %v8555_v43 = vpop.permute.xlu0 %1967  ;;  %v272_v41 = vld [vmem:[%s11266_s3 + $0x670] sm:$0xff]  ;;  %v279_v3 = vld [vmem:[%s11266_s3 + $0x6a8] sm:$0xff]  ;;  %v8586_v55 = vsel %vm3538_vm0, %v3220_v16, 0.0  ;;  %v4177_v58 = vsel %vm3538_vm0, %v3223_v49, 0.0  ;;  %v4176_v44 = vsel %vm3538_vm0, %v3222_v30, 0.0  ;;  %v11715_v2 = vld [vmem:[#allocation36_spill] sm:$0xff]  ;;  %v3235_v33 = vmul.f32 %v11720_v46, %v275_v18 }
 0x2bb   :  { %11709 = vst [vmem:[#allocation116_spill] sm:$0xff] %v8553_v38  ;;  %11710 = vst [vmem:[#allocation118_spill] sm:$0xff] %v8555_v43  ;;  %v3225_v10 = vmul.f32 %v11715_v2, %v265_v60  ;;  %v278_v47 = vld [vmem:[%s11266_s3 + $0x6a0] sm:$0xff]  ;;  %v45_v59 = vld [vmem:[%s11264_s1 + $0x58] sm:$0xff]  ;;  %v4179_v16 = vsel %vm3538_vm0, %v3224_v27, 0.0  ;;  %v4190_v49 = vsel %vm3538_vm0, %v3227_v36, 0.0  ;;  %v3234_v42 = vmul.f32 %v11721_v8, %v274_v40 }
 0x2bc   :  { %2245 = vbcast.lane.b32.xlu1 %v2231_v63, 280  ;;  %2241 = vbcast.lane.b32.xlu0 %v2231_v63, 272  ;;  %v29_v63 = vld [vmem:[%s11263_s0 + $0x58] sm:$0xff]  ;;  %v11716_v60 = vld [vmem:[#allocation29_spill] sm:$0xff]  ;;  %v4189_v27 = vsel %vm3538_vm0, %v3226_v22, 0.0  ;;  %v4203_v36 = vsel %vm3538_vm0, %v3231_v25, 0.0  ;;  %v4178_v46 = vadd.f32 %v4177_v58, %v4176_v44 }
 0x2bd   :  { %v269_v30 = vld [vmem:[%s11266_s3 + $0x658] sm:$0xff]  ;;  %v3228_v2 = vmul.f32 %v11716_v60, %v268_v0  ;;  %v276_v0 = vld [vmem:[%s11266_s3 + $0x690] sm:$0xff]  ;;  %v11722_v60 = vld [vmem:[#allocation41_spill] sm:$0xff]  ;;  %v8627_v25 = vsub.f32 %v29_v63, %v45_v59  ;;  %v4181_v8 = vsel %vm3538_vm0, %v3225_v10, 0.0  ;;  %v4191_v58 = vadd.f32 %v4190_v49, %v4189_v27 }
 0x2be   :  { %v273_v53 = vld [vmem:[%s11266_s3 + $0x678] sm:$0xff]  ;;  %v8610_v6 = vpop.permute.xlu1 %1979  ;;  %v8612_v24 = vpop.permute.xlu0 %1975  ;;  %v4180_v63 = vadd.f32 %v4179_v16, %v4178_v46  ;;  %v4216_v10 = vsel %vm3538_vm0, %v3235_v33, 0.0  ;;  %v4157_v46 = vrot.slane %v8557_v12, 4 }
 0x2bf   :  { %v11717_v43 = vld [vmem:[#allocation39_spill] sm:$0xff]  ;;  %11718 = vst [vmem:[#allocation119_spill] sm:$0xff] %v8610_v6  ;;  %11719 = vst [vmem:[#allocation120_spill] sm:$0xff] %v8612_v24  ;;  %v3239_v6 = vmul.f32 %v11722_v60, %v279_v3  ;;  %v11723_v24 = vld [vmem:[#allocation46_spill] sm:$0xff]  ;;  %v3233_v62 = vmul.f32 %v11725_v4, %v273_v53  ;;  %v4192_v61 = vsel %vm3538_vm0, %v3228_v2, 0.0  ;;  %v4215_v53 = vsel %vm3538_vm0, %v3234_v42, 0.0 }
 0x2c0   :  { %v3232_v38 = vmul.f32 %v11717_v43, %v272_v41  ;;  %v280_v43 = vld [vmem:[%s11266_s3 + $0x6b0] sm:$0xff]  ;;  %v4202_v41 = vsel %vm3538_vm0, %v3230_v39, 0.0  ;;  %v3238_v22 = vmul.f32 %v11723_v24, %v278_v47  ;;  %2256 = vbcast.lane.b32.xlu1 %v2250_v54, 264  ;;  %2252 = vbcast.lane.b32.xlu0 %v2250_v54, 256  ;;  %v11724_v18 = vld [vmem:[#allocation32_spill] sm:$0xff]  ;;  %v2269_v16 = vrot.slane %v8627_v25, %v6360_v5  ;;  %v11729_v42 = vld [vmem:[#allocation45_spill] sm:$0xff] }
 0x2c1   :  { %v3229_v40 = vmul.f32 %v11724_v18, %v269_v30  ;;  %v11726_v39 = vld [vmem:[#allocation44_spill] sm:$0xff]  ;;  %v11727_v3 = vld [vmem:[#allocation47_spill] sm:$0xff]  ;;  %v4204_v44 = vadd.f32 %v4203_v36, %v4202_v41  ;;  %v4229_v59 = vsel %vm3538_vm0, %v3239_v6, 0.0  ;;  %v4193_v49 = vadd.f32 %v4192_v61, %v4191_v58 }
 0x2c2   :  { %v4205_v13 = vsel %vm3538_vm0, %v3232_v38, 0.0  ;;  %v3236_v19 = vmul.f32 %v11726_v39, %v276_v0  ;;  %v3240_v60 = vmul.f32 %v11727_v3, %v280_v43  ;;  %v8636_v24 = vpop.permute.xlu1 %1990  ;;  %v8638_v47 = vpop.permute.xlu0 %1986  ;;  %v277_v4 = vld [vmem:[%s11266_s3 + $0x698] sm:$0xff]  ;;  %v4228_v30 = vsel %vm3538_vm0, %v3238_v22, 0.0 }
 0x2c3   :  { %v281_v38 = vld [vmem:[%s11266_s3 + $0x6b8] sm:$0xff]  ;;  %v4194_v33 = vsel %vm3538_vm0, %v3229_v40, 0.0  ;;  %v4207_v2 = vsel %vm3538_vm0, %v3233_v62, 0.0  ;;  %v4206_v27 = vadd.f32 %v4205_v13, %v4204_v44  ;;  %v4182_v18 = vadd.f32 %v4181_v8, %v4180_v63  ;;  %v283_v62 = vld [vmem:[%s11266_s3 + $0x6c8] sm:$0xff] }
 0x2c4   :  { %2264 = vbcast.lane.b32.xlu1 %v2250_v54, 280  ;;  %2260 = vbcast.lane.b32.xlu0 %v2250_v54, 272  ;;  %v11728_v36 = vld [vmem:[#allocation43_spill] sm:$0xff]  ;;  %v4218_v43 = vsel %vm3538_vm0, %v3236_v19, 0.0  ;;  %v3241_v41 = vmul.f32 %v11729_v42, %v281_v38  ;;  %v4231_v6 = vsel %vm3538_vm0, %v3240_v60, 0.0  ;;  %v4217_v40 = vadd.f32 %v4216_v10, %v4215_v53  ;;  %v282_v19 = vld [vmem:[%s11266_s3 + $0x6c0] sm:$0xff] }
 0x2c5   :  { %v3237_v0 = vmul.f32 %v11728_v36, %v277_v4  ;;  %v4230_v61 = vadd.f32 %v4229_v59, %v4228_v30  ;;  %v11731_v39 = vrot.slane %v8524_v29, 2  ;;  %v4168_v60 = vsel %vm3538_vm0, %v8571_v26, 0.0  ;;  %v284_v4 = vld [vmem:[%s11266_s3 + $0x6d0] sm:$0xff]  ;;  %v11732_v53 = vld [vmem:[#allocation48_spill] sm:$0xff] }
 0x2c6   :  { %v8658_v22 = vpop.permute.xlu1 %1998  ;;  %v8660_v54 = vpop.permute.xlu0 %1994  ;;  %v4167_v8 = vadd.f32 %v8586_v55, %v8559_v23  ;;  %v4195_v63 = vadd.f32 %v4194_v33, %v4193_v49  ;;  %v4208_v58 = vadd.f32 %v4207_v2, %v4206_v27  ;;  %v4219_v44 = vadd.f32 %v4218_v43, %v4217_v40  ;;  %v11733_v26 = vld [vmem:[#allocation51_spill] sm:$0xff]  ;;  %v286_v43 = vld [vmem:[%s11266_s3 + $0x6e0] sm:$0xff] }
 0x2c7   :  { %11730 = vst [vmem:[#allocation117_spill] sm:$0xff] %v8658_v22  ;;  %v4134_v3 = vadd.f32 %v11731_v39, %v8524_v29  ;;  %v4232_v10 = vadd.f32 %v4231_v6, %v4230_v61  ;;  %v4220_v38 = vsel %vm3538_vm0, %v3237_v0, 0.0  ;;  %v4233_v29 = vsel %vm3538_vm0, %v3241_v41, 0.0  ;;  %v287_v0 = vld [vmem:[%s11266_s3 + $0x6e8] sm:$0xff]  ;;  %v288_v39 = vld [vmem:[%s11266_s3 + $0x6f0] sm:$0xff] }
 0x2c8   :  { %2275 = vbcast.lane.b32.xlu1 %v2269_v16, 264  ;;  %2271 = vbcast.lane.b32.xlu0 %v2269_v16, 256  ;;  %v3243_v59 = vmul.f32 %v11732_v53, %v283_v62  ;;  %v3242_v30 = vmul.f32 %v11733_v26, %v282_v19  ;;  %v11735_v55 = vrot.slane %v8492_v52, 1  ;;  %v4146_v49 = vrot.slane %v8546_v34, 2  ;;  %v11736_v6 = vld [vmem:[#allocation50_spill] sm:$0xff]  ;;  %v285_v19 = vld [vmem:[%s11266_s3 + $0x6d8] sm:$0xff] }
 0x2c9   :  { %v4158_v2 = vadd.f32 %v4157_v46, %v8557_v12  ;;  %v4183_v27 = vrot.slane %v4182_v18, 4  ;;  %v4135_v42 = vrot.slane %v4134_v3, 1  ;;  %v4169_v41 = vadd.f32 %v4168_v60, %v4167_v8  ;;  %v11738_v53 = vld [vmem:[#allocation55_spill] sm:$0xff] }
 0x2ca   :  { %v8684_v36 = vpop.permute.xlu1 %2009  ;;  %v8686_v23 = vpop.permute.xlu0 %2005  ;;  %v4123_v33 = vadd.f32 %v11735_v55, %v8492_v52  ;;  %v3244_v40 = vmul.f32 %v11736_v6, %v284_v4  ;;  %v2288_v52 = vrot.slane %v8627_v25, %v6364_v7  ;;  %v4196_v61 = vrot.slane %v4195_v63, 4 }
 0x2cb   :  { %11734 = vst [vmem:[#allocation122_spill] sm:$0xff] %v8686_v23  ;;  %v4209_v12 = vrot.slane %v4208_v58, 4  ;;  %v4221_v46 = vadd.f32 %v4220_v38, %v4219_v44  ;;  %v4234_v62 = vadd.f32 %v4233_v29, %v4232_v10  ;;  %v4242_v60 = vsel %vm3538_vm0, %v3243_v59, 0.0  ;;  %v11742_v59 = vld [vmem:[#allocation52_spill] sm:$0xff] }
 0x2cc   :  { %2283 = vbcast.lane.b32.xlu1 %v2269_v16, 280  ;;  %2279 = vbcast.lane.b32.xlu0 %v2269_v16, 272  ;;  %v4241_v8 = vsel %vm3538_vm0, %v3242_v30, 0.0  ;;  %v11737_v16 = vld [vmem:[#allocation54_spill] sm:$0xff]  ;;  %v3246_v26 = vmul.f32 %v11738_v53, %v286_v43  ;;  %v11741_v10 = vrot.slane %v7960_v50, 4  ;;  %v4147_v29 = vadd.f32 %v4146_v49, %v8546_v34 }
 0x2cd   :  { %v3247_v4 = vmul.f32 %v11737_v16, %v287_v0  ;;  %v4159_v6 = vrot.slane %v4158_v2, 2  ;;  %v4184_v13 = vadd.f32 %v4183_v27, %v4182_v18  ;;  %v4136_v22 = vadd.f32 %v4135_v42, %v4134_v3  ;;  %v11743_v0 = vld [vmem:[#allocation49_spill] sm:$0xff] }
 0x2ce   :  { %v8712_v55 = vpop.permute.xlu1 %2017  ;;  %v8714_v44 = vpop.permute.xlu0 %2013  ;;  %v8718_v38 = vadd.f32 %v11741_v10, %v4123_v33  ;;  %v3245_v23 = vmul.f32 %v11742_v59, %v285_v19  ;;  %v4244_v30 = vsel %vm3538_vm0, %v3244_v40, 0.0  ;;  %v3248_v16 = vmul.f32 %v11743_v0, %v288_v39  ;;  %v289_v33 = vld [vmem:[%s11266_s3 + $0x6f8] sm:$0xff] }
 0x2cf   :  { %11739 = vst [vmem:[#allocation121_spill] sm:$0xff] %v8712_v55  ;;  %11740 = vst [vmem:[#allocation127_spill] sm:$0xff] %v8714_v44  ;;  %v4170_v43 = vrot.slane %v4169_v41, 4  ;;  %v4197_v53 = vadd.f32 %v4196_v61, %v4195_v63  ;;  %v4222_v55 = vrot.slane %v4221_v46, 4  ;;  %v4243_v44 = vadd.f32 %v4242_v60, %v4241_v8  ;;  %v11744_v60 = vld [vmem:[#allocation56_spill] sm:$0xff] }
 0x2d0   :  { %2294 = vbcast.lane.b32.xlu1 %v2288_v52, 264  ;;  %2290 = vbcast.lane.b32.xlu0 %v2288_v52, 256  ;;  %v4210_v34 = vadd.f32 %v4209_v12, %v4208_v58  ;;  %v4235_v49 = vrot.slane %v4234_v62, 4  ;;  %v4255_v18 = vsel %vm3538_vm0, %v3247_v4, 0.0  ;;  %v4254_v3 = vsel %vm3538_vm0, %v3246_v26, 0.0 }
 0x2d1   :  { %v4148_v40 = vrot.slane %v4147_v29, 1  ;;  %v4160_v19 = vadd.f32 %v4159_v6, %v4158_v2  ;;  %v4185_v39 = vrot.slane %v4184_v13, 2  ;;  %v4245_v63 = vadd.f32 %v4244_v30, %v4243_v44 }
 0x2d2   :  { %v8729_v27 = vpop.permute.xlu1 %2028  ;;  %v8731_v42 = vpop.permute.xlu0 %2024  ;;  %v4246_v61 = vsel %vm3538_vm0, %v3245_v23, 0.0  ;;  %v3249_v8 = vmul.f32 %v11744_v60, %v289_v33  ;;  %v4257_v10 = vsel %vm3538_vm0, %v3248_v16, 0.0  ;;  %v2307_v58 = vrot.slane %v8627_v25, %v6368_v9 }
 0x2d3   :  { %v4171_v12 = vadd.f32 %v4170_v43, %v4169_v41  ;;  %v4198_v4 = vrot.slane %v4197_v53, 2  ;;  %v4223_v26 = vadd.f32 %v4222_v55, %v4221_v46  ;;  %v4256_v59 = vadd.f32 %v4255_v18, %v4254_v3  ;;  %v291_v41 = vld [vmem:[%s11266_s3 + $0x708] sm:$0xff]  ;;  %v292_v3 = vld [vmem:[%s11266_s3 + $0x710] sm:$0xff] }
 0x2d4   :  { %2302 = vbcast.lane.b32.xlu1 %v2288_v52, 280  ;;  %2298 = vbcast.lane.b32.xlu0 %v2288_v52, 272  ;;  %v11745_v0 = vand.u32 2147483647, %v8534_v28  ;;  %v4211_v6 = vrot.slane %v4210_v34, 2  ;;  %v4236_v44 = vadd.f32 %v4235_v49, %v4234_v62  ;;  %v5923_v52 = vsel %vm5847_vm2, %v8509_v56, %v8522_v48  ;;  %v290_v28 = vld [vmem:[%s11266_s3 + $0x700] sm:$0xff] }
 0x2d5   :  { %v4186_v16 = vadd.f32 %v4185_v39, %v4184_v13  ;;  %v4247_v33 = vadd.f32 %v4246_v61, %v4245_v63  ;;  %v4258_v60 = vadd.f32 %v4257_v10, %v4256_v59  ;;  %v5631_v46 = vand.u32 2147483647, %v8718_v38  ;;  %v11749_v61 = vld [vmem:[#allocation53_spill] sm:$0xff]  ;;  %v11750_v10 = vld [vmem:[#allocation58_spill] sm:$0xff] }
 0x2d6   :  { %v5924_v2 = vrot.slane %v11745_v0, 5  ;;  %v8740_v30 = vpop.permute.xlu1 %2036  ;;  %v8742_v23 = vpop.permute.xlu0 %2032  ;;  %v4259_v62 = vsel %vm3538_vm0, %v3249_v8, 0.0  ;;  %v4161_v56 = vrot.slane %v4160_v19, 1  ;;  %v11748_v48 = vrot.slane %v7960_v50, 5 }
 0x2d7   :  { %11746 = vst [vmem:[#allocation128_spill] sm:$0xff] %v8740_v30  ;;  %11747 = vst [vmem:[#allocation123_spill] sm:$0xff] %v8742_v23  ;;  %v4172_v43 = vrot.slane %v4171_v12, 2  ;;  %v4199_v49 = vadd.f32 %v4198_v4, %v4197_v53  ;;  %v4224_v18 = vrot.slane %v4223_v26, 2  ;;  %v4149_v39 = vadd.f32 %v4148_v40, %v4147_v29  ;;  %v11752_v4 = vld [vmem:[#allocation59_spill] sm:$0xff] }
 0x2d8   :  { %2313 = vbcast.lane.b32.xlu1 %v2307_v58, 264  ;;  %2309 = vbcast.lane.b32.xlu0 %v2307_v58, 256  ;;  %v5504_v13 = vadd.f32 %v11748_v48, %v4136_v22  ;;  %v4212_v63 = vadd.f32 %v4211_v6, %v4210_v34  ;;  %v4237_v38 = vrot.slane %v4236_v44, 2  ;;  %v3251_v8 = vmul.f32 %v11749_v61, %v291_v41  ;;  %v293_v61 = vld [vmem:[%s11266_s3 + $0x718] sm:$0xff] }
 0x2d9   :  { %v3250_v59 = vmul.f32 %v11750_v10, %v290_v28  ;;  %v4187_v30 = vrot.slane %v4186_v16, 1  ;;  %v4248_v22 = vrot.slane %v4247_v33, 4  ;;  %v4260_v48 = vadd.f32 %v4259_v62, %v4258_v60 }
 0x2da   :  { %v8763_v0 = vpop.permute.xlu1 %2047  ;;  %v8765_v55 = vpop.permute.xlu0 %2043  ;;  %v5926_v53 = vrot.slane %v5631_v46, 4  ;;  %v3252_v23 = vmul.f32 %v11752_v4, %v292_v3  ;;  %v2326_v29 = vrot.slane %v8627_v25, %v6372_v11  ;;  %v4162_v34 = vadd.f32 %v4161_v56, %v4160_v19 }
 0x2db   :  { %11751 = vst [vmem:[#allocation126_spill] sm:$0xff] %v8765_v55  ;;  %v5632_v40 = vand.u32 2147483647, %v5504_v13  ;;  %v4173_v6 = vadd.f32 %v4172_v43, %v4171_v12  ;;  %v4200_v41 = vrot.slane %v4199_v49, 1  ;;  %v4225_v28 = vadd.f32 %v4224_v18, %v4223_v26  ;;  %v11755_v43 = vld [vmem:[#allocation57_spill] sm:$0xff] }
 0x2dc   :  { %2321 = vbcast.lane.b32.xlu1 %v2307_v58, 280  ;;  %2317 = vbcast.lane.b32.xlu0 %v2307_v58, 272  ;;  %v11753_v10 = vrot.slane %v7960_v50, 6  ;;  %v4213_v46 = vrot.slane %v4212_v63, 1  ;;  %v4238_v62 = vadd.f32 %v4237_v38, %v4236_v44  ;;  %v4268_v3 = vsel %vm3538_vm0, %v3251_v8, 0.0 }
 0x2dd   :  { %v4267_v58 = vsel %vm3538_vm0, %v3250_v59, 0.0  ;;  %v4188_v12 = vadd.f32 %v4187_v30, %v4186_v16  ;;  %v4249_v56 = vadd.f32 %v4248_v22, %v4247_v33  ;;  %v4261_v26 = vrot.slane %v4260_v48, 4  ;;  %v295_v30 = vld [vmem:[%s11266_s3 + $0x728] sm:$0xff] }
 0x2de   :  { %v5505_v60 = vadd.f32 %v11753_v10, %v4149_v39  ;;  %v8777_v4 = vpop.permute.xlu1 %2055  ;;  %v8779_v19 = vpop.permute.xlu0 %2051  ;;  %v5925_v13 = vsel %vm5850_vm3, %v5924_v2, %v5923_v52  ;;  %v3253_v18 = vmul.f32 %v11755_v43, %v293_v61  ;;  %v4270_v55 = vsel %vm3538_vm0, %v3252_v23, 0.0  ;;  %v294_v2 = vld [vmem:[%s11266_s3 + $0x720] sm:$0xff] }
 0x2df   :  { %11754 = vst [vmem:[#allocation130_spill] sm:$0xff] %v8777_v4  ;;  %v11756_v44 = vrot.slane %v7960_v50, 7  ;;  %v5927_v38 = vsel %vm5853_vm4, %v5926_v53, %v5925_v13  ;;  %v4174_v8 = vrot.slane %v4173_v6, 1  ;;  %v4201_v59 = vadd.f32 %v4200_v41, %v4199_v49 }
 0x2e0   :  { %2332 = vbcast.lane.b32.xlu1 %v2326_v29, 264  ;;  %2328 = vbcast.lane.b32.xlu0 %v2326_v29, 256  ;;  %v4226_v10 = vrot.slane %v4225_v28, 1  ;;  %v4269_v4 = vadd.f32 %v4268_v3, %v4267_v58  ;;  %v4214_v23 = vadd.f32 %v4213_v46, %v4212_v63  ;;  %v4239_v52 = vrot.slane %v4238_v62, 1  ;;  %v296_v3 = vld [vmem:[%s11266_s3 + $0x730] sm:$0xff] }
 0x2e1   :  { %v5506_v39 = vadd.f32 %v11756_v44, %v4162_v34  ;;  %v5633_v33 = vand.u32 2147483647, %v5505_v60  ;;  %v5928_v22 = vrot.slane %v5632_v40, 3  ;;  %v11757_v49 = vrot.slane %v8357_v51, 1 }
 0x2e2   :  { %v8793_v16 = vpop.permute.xlu1 %2066  ;;  %v8795_v50 = vpop.permute.xlu0 %2062  ;;  %v4250_v34 = vrot.slane %v4249_v56, 2  ;;  %v4262_v41 = vadd.f32 %v4261_v26, %v4260_v48  ;;  %v4271_v61 = vadd.f32 %v4270_v55, %v4269_v4  ;;  %v4272_v58 = vsel %vm3538_vm0, %v3253_v18, 0.0 }
 0x2e3   :  { %v5508_v53 = vadd.f32 %v11757_v49, %v4188_v12  ;;  %v3255_v63 = vmul.f32 %v7809_v32, %v295_v30  ;;  %v3254_v46 = vmul.f32 %v7811_v31, %v294_v2  ;;  %v2345_v40 = vrot.slane %v8627_v25, %v11423_v57 }
 0x2e4   :  { %2340 = vbcast.lane.b32.xlu1 %v2326_v29, 280  ;;  %2336 = vbcast.lane.b32.xlu0 %v2326_v29, 272  ;;  %v4175_v60 = vadd.f32 %v4174_v8, %v4173_v6  ;;  %v11758_v12 = vrot.slane %v8357_v51, 2  ;;  %v4227_v55 = vadd.f32 %v4226_v10, %v4225_v28  ;;  %v5634_v4 = vand.u32 2147483647, %v5506_v39  ;;  %v297_v28 = vld [vmem:[%s11266_s3 + $0x738] sm:$0xff] }
 0x2e5   :  { %v11759_v26 = vrot.slane %v8357_v51, 3  ;;  %v4240_v43 = vadd.f32 %v4239_v52, %v4238_v62  ;;  %v3256_v18 = vmul.f32 %v7828_v14, %v296_v3  ;;  %v4251_v44 = vadd.f32 %v4250_v34, %v4249_v56  ;;  %v11777_v29 = vld [vmem:[#allocation61_spill] sm:$0xff] }
 0x2e6   :  { %v5509_v48 = vadd.f32 %v11758_v12, %v4201_v59  ;;  %v8812_v32 = vpop.permute.xlu1 %2074  ;;  %v8814_v31 = vpop.permute.xlu0 %2070  ;;  %v4263_v30 = vrot.slane %v4262_v41, 2  ;;  %v4273_v6 = vadd.f32 %v4272_v58, %v4271_v61  ;;  %v5930_v39 = vrot.slane %v5633_v33, 2  ;;  %v299_v12 = vld [vmem:[%s11266_s3 + $0x748] sm:$0xff] }
 0x2e7   :  { %v5510_v13 = vadd.f32 %v11759_v26, %v4214_v23  ;;  %11760 = vst [vmem:[#allocation125_spill] sm:$0xff] %v8812_v32  ;;  %v5636_v8 = vand.u32 2147483647, %v5508_v53  ;;  %v4281_v59 = vsel %vm3538_vm0, %v3255_v63, 0.0  ;;  %v4280_v62 = vsel %vm3538_vm0, %v3254_v46, 0.0 }
 0x2e8   :  { %2351 = vbcast.lane.b32.xlu1 %v2345_v40, 264  ;;  %2347 = vbcast.lane.b32.xlu0 %v2345_v40, 256  ;;  %v5929_v14 = vsel %vm5856_vm5, %v5928_v22, %v5927_v38  ;;  %v5507_v10 = vadd.f32 %v4175_v60, %v8357_v51  ;;  %v5637_v2 = vand.u32 2147483647, %v5509_v48  ;;  %v11761_v56 = vrot.slane %v8357_v51, 4 }
 0x2e9   :  { %v5932_v52 = vrot.slane %v5634_v4, 1  ;;  %v5638_v49 = vand.u32 2147483647, %v5510_v13  ;;  %v3257_v34 = vmul.f32 %v7826_v20, %v297_v28  ;;  %v4283_v33 = vsel %vm3538_vm0, %v3256_v18, 0.0 }
 0x2ea   :  { %v5511_v23 = vadd.f32 %v11761_v56, %v4227_v55  ;;  %v8828_v53 = vpop.permute.xlu1 %2085  ;;  %v8830_v61 = vpop.permute.xlu0 %2081  ;;  %v11762_v3 = vrot.slane %v8357_v51, 5  ;;  %v4252_v38 = vrot.slane %v4251_v44, 1  ;;  %v4264_v22 = vadd.f32 %v4263_v30, %v4262_v41  ;;  %v298_v41 = vld [vmem:[%s11266_s3 + $0x740] sm:$0xff] }
 0x2eb   :  { %v4274_v63 = vrot.slane %v4273_v6, 4  ;;  %v4282_v46 = vadd.f32 %v4281_v59, %v4280_v62  ;;  %v5934_v60 = vrot.slane %v5636_v8, 7  ;;  %v2364_v20 = vrot.slane %v8627_v25, %v6380_v15 }
 0x2ec   :  { %v5512_v58 = vadd.f32 %v11762_v3, %v4240_v43  ;;  %2359 = vbcast.lane.b32.xlu1 %v2345_v40, 280  ;;  %2355 = vbcast.lane.b32.xlu0 %v2345_v40, 272  ;;  %v5931_v48 = vsel %vm5859_vm6, %v5930_v39, %v5929_v14  ;;  %v5936_v4 = vrot.slane %v5637_v2, 6  ;;  %v5639_v43 = vand.u32 2147483647, %v5511_v23  ;;  %v300_v14 = vld [vmem:[%s11266_s3 + $0x750] sm:$0xff] }
 0x2ed   :  { %v4284_v26 = vadd.f32 %v4283_v33, %v4282_v46  ;;  %v5933_v13 = vsel %vm5862_vm7, %v5932_v52, %v5931_v48  ;;  %v5635_v18 = vand.u32 2147483647, %v5507_v10  ;;  %v5938_v30 = vrot.slane %v5638_v49, 5  ;;  %v8858_v10 = vld [vmem:[%s11265_s2 + $0x40] sm:$0xff] }
 0x2ee   :  { %v4285_v40 = vsel %vm3538_vm0, %v3257_v34, 0.0  ;;  %v8846_v28 = vpop.permute.xlu1 %2093  ;;  %v8848_v8 = vpop.permute.xlu0 %2089  ;;  %v5640_v39 = vand.u32 2147483647, %v5512_v58  ;;  %v4275_v59 = vadd.f32 %v4274_v63, %v4273_v6  ;;  %v3259_v62 = vmul.f32 %v7844_v37, %v299_v12  ;;  %v301_v58 = vld [vmem:[%s11266_s3 + $0x758] sm:$0xff] }
 0x2ef   :  { %11763 = vst [vmem:[#allocation129_spill] sm:$0xff] %v8846_v28  ;;  %11764 = vst [vmem:[#allocation124_spill] sm:$0xff] %v8848_v8  ;;  %v4253_v2 = vadd.f32 %v4252_v38, %v4251_v44  ;;  %v4265_v56 = vrot.slane %v4264_v22, 1  ;;  %v3258_v23 = vmul.f32 %v7846_v21, %v298_v41  ;;  %v8861_v52 = vsel %vm3538_vm0, %v5933_v13, 0.0  ;;  %v303_v44 = vld [vmem:[%s11266_s3 + $0x768] sm:$0xff]  ;;  %v302_v21 = vld [vmem:[%s11266_s3 + $0x760] sm:$0xff] }
 0x2f0   :  { %2370 = vbcast.lane.b32.xlu1 %v2364_v20, 264  ;;  %2366 = vbcast.lane.b32.xlu0 %v2364_v20, 256  ;;  %11765 = vst [vmem:[#allocation131_spill] sm:$0xff] %v8861_v52  ;;  %v5935_v37 = vsel %vm5844_vm1, %v5934_v60, %v5635_v18  ;;  %v4286_v49 = vadd.f32 %v4285_v40, %v4284_v26  ;;  %v5940_v3 = vrot.slane %v5639_v43, 4  ;;  %v5942_v48 = vrot.slane %v5640_v39, 3  ;;  %v11794_v28 = vld [vmem:[#allocation83_spill] sm:$0xff] }
 0x2f1   :  { %v5937_v33 = vsel %vm5847_vm2, %v5936_v4, %v5935_v37  ;;  %v3260_v38 = vmul.f32 %v7874_v1, %v300_v14  ;;  %v4276_v26 = vrot.slane %v4275_v59, 2  ;;  %v4294_v41 = vsel %vm3538_vm0, %v3259_v62, 0.0  ;;  %v304_v4 = vld [vmem:[%s11266_s3 + $0x770] sm:$0xff]  ;;  %v11770_v62 = vld [vmem:[#allocation60_spill] sm:$0xff] }
 0x2f2   :  { %v8878_v46 = vpop.permute.xlu1 %2104  ;;  %v8880_v60 = vpop.permute.xlu0 %2100  ;;  %v5939_v12 = vsel %vm5850_vm3, %v5938_v30, %v5937_v33  ;;  %v4266_v13 = vadd.f32 %v4265_v56, %v4264_v22  ;;  %v11768_v43 = vrot.slane %v8357_v51, 6  ;;  %v4293_v18 = vsel %vm3538_vm0, %v3258_v23, 0.0  ;;  %v11769_v14 = vld [vmem:[#allocation62_spill] sm:$0xff]  ;;  %v305_v23 = vld [vmem:[%s11266_s3 + $0x778] sm:$0xff] }
 0x2f3   :  { %11766 = vst [vmem:[#allocation132_spill] sm:$0xff] %v8878_v46  ;;  %11767 = vst [vmem:[#allocation134_spill] sm:$0xff] %v8880_v60  ;;  %v3263_v40 = vmul.f32 %v7886_v35, %v303_v44  ;;  %v3262_v37 = vmul.f32 %v11769_v14, %v302_v21  ;;  %v2383_v30 = vrot.slane %v8627_v25, %v6384_v17  ;;  %v4287_v39 = vrot.slane %v4286_v49, 4  ;;  %v307_v22 = vld [vmem:[%s11266_s3 + $0x788] sm:$0xff]  ;;  %v11771_v44 = vld [vmem:[#allocation67_spill] sm:$0xff] }
 0x2f4   :  { %v5513_v1 = vadd.f32 %v11768_v43, %v4253_v2  ;;  %2378 = vbcast.lane.b32.xlu1 %v2364_v20, 280  ;;  %2374 = vbcast.lane.b32.xlu0 %v2364_v20, 272  ;;  %v3261_v33 = vmul.f32 %v11770_v62, %v301_v58  ;;  %v306_v2 = vld [vmem:[%s11266_s3 + $0x780] sm:$0xff]  ;;  %v5941_v56 = vsel %vm5853_vm4, %v5940_v3, %v5939_v12  ;;  %v4296_v20 = vsel %vm3538_vm0, %v3260_v38, 0.0  ;;  %v308_v38 = vld [vmem:[%s11266_s3 + $0x790] sm:$0xff]  ;;  %v311_v12 = vld [vmem:[%s11266_s3 + $0x7a8] sm:$0xff] }
 0x2f5   :  { %v3264_v21 = vmul.f32 %v11771_v44, %v304_v4  ;;  %v8914_v62 = vsel %vm5856_vm5, %v5942_v48, %v5941_v56  ;;  %v8916_v35 = vadd.f32 %v4276_v26, %v4275_v59  ;;  %v4295_v3 = vadd.f32 %v4294_v41, %v4293_v18  ;;  %v310_v4 = vld [vmem:[%s11266_s3 + $0x7a0] sm:$0xff]  ;;  %v11775_v41 = vld [vmem:[#allocation70_spill] sm:$0xff]  ;;  %v11776_v56 = vld [vmem:[#allocation63_spill] sm:$0xff] }
 0x2f6   :  { %v8909_v43 = vpop.permute.xlu1 %2112  ;;  %v8911_v14 = vpop.permute.xlu0 %2108  ;;  %v11774_v44 = vrot.slane %v8357_v51, 7  ;;  %v5641_v48 = vand.u32 2147483647, %v5513_v1  ;;  %v4307_v59 = vsel %vm3538_vm0, %v3263_v40, 0.0  ;;  %v4306_v26 = vsel %vm3538_vm0, %v3262_v37, 0.0  ;;  %v312_v51 = vld [vmem:[%s11266_s3 + $0x7b0] sm:$0xff] }
 0x2f7   :  { %11772 = vst [vmem:[#allocation133_spill] sm:$0xff] %v8909_v43  ;;  %11773 = vst [vmem:[#allocation135_spill] sm:$0xff] %v8911_v14  ;;  %v3267_v18 = vmul.f32 %v11775_v41, %v307_v22  ;;  %v3266_v63 = vmul.f32 %v11776_v56, %v306_v2  ;;  %v4288_v34 = vadd.f32 %v4287_v39, %v4286_v49  ;;  %v4298_v6 = vsel %vm3538_vm0, %v3261_v33, 0.0  ;;  %v309_v1 = vld [vmem:[%s11266_s3 + $0x798] sm:$0xff]  ;;  %v11778_v40 = vld [vmem:[#allocation69_spill] sm:$0xff] }
 0x2f8   :  { %v8929_v58 = vadd.f32 %v11774_v44, %v4266_v13  ;;  %2389 = vbcast.lane.b32.xlu1 %v2383_v30, 264  ;;  %2385 = vbcast.lane.b32.xlu0 %v2383_v30, 256  ;;  %v4297_v55 = vadd.f32 %v4296_v20, %v4295_v3  ;;  %v3265_v52 = vmul.f32 %v11777_v29, %v305_v23  ;;  %v4309_v13 = vsel %vm3538_vm0, %v3264_v21, 0.0  ;;  %v11779_v22 = vld [vmem:[#allocation71_spill] sm:$0xff]  ;;  %v11780_v49 = vld [vmem:[#allocation72_spill] sm:$0xff]  ;;  %v315_v3 = vld [vmem:[%s11266_s3 + $0x7c8] sm:$0xff] }
 0x2f9   :  { %v3268_v37 = vmul.f32 %v11778_v40, %v308_v38  ;;  %v3271_v2 = vmul.f32 %v11779_v22, %v311_v12  ;;  %v3270_v39 = vmul.f32 %v11780_v49, %v310_v4  ;;  %v4308_v23 = vadd.f32 %v4307_v59, %v4306_v26  ;;  %v313_v21 = vld [vmem:[%s11266_s3 + $0x7b8] sm:$0xff]  ;;  %v314_v59 = vld [vmem:[%s11266_s3 + $0x7c0] sm:$0xff]  ;;  %v319_v26 = vld [vmem:[%s11266_s3 + $0x7e8] sm:$0xff] }
 0x2fa   :  { %v8947_v33 = vpop.permute.xlu1 %2123  ;;  %v8949_v20 = vpop.permute.xlu0 %2119  ;;  %v5642_v38 = vand.u32 2147483647, %v8929_v58  ;;  %v5944_v12 = vrot.slane %v5641_v48, 2  ;;  %v4320_v4 = vsel %vm3538_vm0, %v3267_v18, 0.0  ;;  %v4319_v44 = vsel %vm3538_vm0, %v3266_v63, 0.0  ;;  %v11783_v41 = vld [vmem:[#allocation76_spill] sm:$0xff] }
 0x2fb   :  { %11781 = vst [vmem:[#allocation136_spill] sm:$0xff] %v8947_v33  ;;  %11782 = vst [vmem:[#allocation137_spill] sm:$0xff] %v8949_v20  ;;  %v3272_v56 = vmul.f32 %v11783_v41, %v312_v51  ;;  %v11784_v40 = vld [vmem:[#allocation9_spill] sm:$0xff]  ;;  %v4289_v48 = vrot.slane %v4288_v34, 2  ;;  %v4299_v22 = vadd.f32 %v4298_v6, %v4297_v55  ;;  %v4311_v18 = vsel %vm3538_vm0, %v3265_v52, 0.0  ;;  %v11785_v41 = vld [vmem:[#allocation64_spill] sm:$0xff] }
 0x2fc   :  { %2397 = vbcast.lane.b32.xlu1 %v2383_v30, 280  ;;  %2393 = vbcast.lane.b32.xlu0 %v2383_v30, 272  ;;  %v2402_v58 = vrot.slane %v8627_v25, %v11784_v40  ;;  %v4310_v63 = vadd.f32 %v4309_v13, %v4308_v23  ;;  %v318_v51 = vld [vmem:[%s11266_s3 + $0x7e0] sm:$0xff]  ;;  %v3269_v29 = vmul.f32 %v11785_v41, %v309_v1  ;;  %v4322_v25 = vsel %vm3538_vm0, %v3268_v37, 0.0  ;;  %v11788_v20 = vld [vmem:[#allocation75_spill] sm:$0xff]  ;;  %v11790_v60 = vld [vmem:[#allocation74_spill] sm:$0xff] }
 0x2fd   :  { %v30_v49 = vld [vmem:[%s11263_s0 + $0x60] sm:$0xff]  ;;  %v4333_v55 = vsel %vm3538_vm0, %v3271_v2, 0.0  ;;  %v4332_v52 = vsel %vm3538_vm0, %v3270_v39, 0.0  ;;  %v4321_v23 = vadd.f32 %v4320_v4, %v4319_v44  ;;  %v3273_v33 = vmul.f32 %v11788_v20, %v313_v21  ;;  %v316_v1 = vld [vmem:[%s11266_s3 + $0x7d0] sm:$0xff] }
 0x2fe   :  { %v46_v30 = vld [vmem:[%s11264_s1 + $0x60] sm:$0xff]  ;;  %v8984_v6 = vpop.permute.xlu1 %2131  ;;  %v8986_v13 = vpop.permute.xlu0 %2127  ;;  %v3274_v46 = vmul.f32 %v11790_v60, %v314_v59  ;;  %v320_v37 = vld [vmem:[%s11266_s3 + $0x7f0] sm:$0xff]  ;;  %v4335_v2 = vsel %vm3538_vm0, %v3272_v56, 0.0  ;;  %v4312_v60 = vadd.f32 %v4311_v18, %v4310_v63  ;;  %v4324_v44 = vsel %vm3538_vm0, %v3269_v29, 0.0  ;;  %v321_v29 = vld [vmem:[%s11266_s3 + $0x7f8] sm:$0xff] }
 0x2ff   :  { %11786 = vst [vmem:[#allocation10_spill] sm:$0xff] %v8984_v6  ;;  %11787 = vst [vmem:[#allocation11_spill] sm:$0xff] %v8986_v13  ;;  %v11789_v43 = vld [vmem:[#allocation65_spill] sm:$0xff]  ;;  %v11792_v6 = vld [vmem:[#allocation79_spill] sm:$0xff]  ;;  %v9000_v20 = vsub.f32 %v30_v49, %v46_v30  ;;  %v4323_v21 = vadd.f32 %v4322_v25, %v4321_v23  ;;  %v3280_v32 = vmul.f32 %v11794_v28, %v320_v37 }
 0x300   :  { %v3275_v14 = vmul.f32 %v11789_v43, %v315_v3  ;;  %v11791_v39 = vld [vmem:[#allocation77_spill] sm:$0xff]  ;;  %v3278_v4 = vmul.f32 %v11792_v6, %v318_v51  ;;  %2408 = vbcast.lane.b32.xlu1 %v2402_v58, 264  ;;  %2404 = vbcast.lane.b32.xlu0 %v2402_v58, 256  ;;  %v4290_v43 = vadd.f32 %v4289_v48, %v4288_v34  ;;  %v4300_v51 = vrot.slane %v4299_v22, 4  ;;  %v317_v48 = vld [vmem:[%s11266_s3 + $0x7d8] sm:$0xff] }
 0x301   :  { %v3279_v41 = vmul.f32 %v11791_v39, %v319_v26  ;;  %v4334_v3 = vadd.f32 %v4333_v55, %v4332_v52  ;;  %v11793_v59 = vld [vmem:[#allocation73_spill] sm:$0xff]  ;;  %v5946_v26 = vrot.slane %v5642_v38, 1  ;;  %v4337_v6 = vsel %vm3538_vm0, %v3273_v33, 0.0  ;;  %v11797_v55 = vld [vmem:[#allocation78_spill] sm:$0xff] }
 0x302   :  { %v3276_v13 = vmul.f32 %v11793_v59, %v316_v1  ;;  %v9005_v8 = vpop.permute.xlu1 %2142  ;;  %v9007_v56 = vpop.permute.xlu0 %2138  ;;  %v4346_v34 = vsel %vm3538_vm0, %v3275_v14, 0.0  ;;  %v4345_v28 = vsel %vm3538_vm0, %v3274_v46, 0.0  ;;  %v4358_v38 = vsel %vm3538_vm0, %v3278_v4, 0.0  ;;  %v11798_v46 = vld [vmem:[#allocation80_spill] sm:$0xff] }
 0x303   :  { %11795 = vst [vmem:[#allocation12_spill] sm:$0xff] %v9005_v8  ;;  %11796 = vst [vmem:[#allocation15_spill] sm:$0xff] %v9007_v56  ;;  %v4336_v49 = vadd.f32 %v4335_v2, %v4334_v3  ;;  %v4359_v18 = vsel %vm3538_vm0, %v3279_v41, 0.0  ;;  %v2421_v33 = vrot.slane %v9000_v20, %v6360_v5  ;;  %v4291_v14 = vrot.slane %v4290_v43, 1  ;;  %v11822_v56 = vld [vmem:[#allocation93_spill] sm:$0xff] }
 0x304   :  { %2416 = vbcast.lane.b32.xlu1 %v2402_v58, 280  ;;  %2412 = vbcast.lane.b32.xlu0 %v2402_v58, 272  ;;  %v4313_v63 = vrot.slane %v4312_v60, 4  ;;  %v4325_v30 = vadd.f32 %v4324_v44, %v4323_v21  ;;  %v5945_v25 = vsel %vm5859_vm6, %v5944_v12, %v8914_v62  ;;  %v3277_v52 = vmul.f32 %v11797_v55, %v317_v48  ;;  %v327_v62 = vld [vmem:[%s11266_s3 + $0x828] sm:$0xff]  ;;  %v326_v12 = vld [vmem:[%s11266_s3 + $0x820] sm:$0xff]  ;;  %v328_v48 = vld [vmem:[%s11266_s3 + $0x830] sm:$0xff] }
 0x305   :  { %v4348_v23 = vsel %vm3538_vm0, %v3276_v13, 0.0  ;;  %v3281_v1 = vmul.f32 %v11798_v46, %v321_v29  ;;  %v4361_v37 = vsel %vm3538_vm0, %v3280_v32, 0.0  ;;  %v4301_v39 = vadd.f32 %v4300_v51, %v4299_v22  ;;  %v323_v22 = vld [vmem:[%s11266_s3 + $0x808] sm:$0xff] }
 0x306   :  { %v9028_v2 = vpop.permute.xlu1 %2150  ;;  %v9030_v58 = vpop.permute.xlu0 %2146  ;;  %v4338_v41 = vadd.f32 %v4337_v6, %v4336_v49  ;;  %v4347_v4 = vadd.f32 %v4346_v34, %v4345_v28  ;;  %v4360_v3 = vadd.f32 %v4359_v18, %v4358_v38  ;;  %v11801_v13 = vrot.slane %v8916_v35, 1  ;;  %v11802_v28 = vld [vmem:[#allocation88_spill] sm:$0xff]  ;;  %v11803_v38 = vld [vmem:[#allocation81_spill] sm:$0xff] }
 0x307   :  { %11799 = vst [vmem:[#allocation16_spill] sm:$0xff] %v9028_v2  ;;  %11800 = vst [vmem:[#allocation13_spill] sm:$0xff] %v9030_v58  ;;  %v9047_v21 = vsel %vm5862_vm7, %v5946_v26, %v5945_v25  ;;  %v4314_v51 = vadd.f32 %v4313_v63, %v4312_v60  ;;  %v4326_v6 = vrot.slane %v4325_v30, 4  ;;  %v4350_v29 = vsel %vm3538_vm0, %v3277_v52, 0.0  ;;  %v331_v52 = vld [vmem:[%s11266_s3 + $0x848] sm:$0xff] }
 0x308   :  { %v9041_v32 = vadd.f32 %v11801_v13, %v8916_v35  ;;  %2427 = vbcast.lane.b32.xlu1 %v2421_v33, 264  ;;  %2423 = vbcast.lane.b32.xlu0 %v2421_v33, 256  ;;  %v4349_v49 = vadd.f32 %v4348_v23, %v4347_v4  ;;  %v4362_v34 = vadd.f32 %v4361_v37, %v4360_v3  ;;  %v322_v35 = vld [vmem:[%s11266_s3 + $0x800] sm:$0xff]  ;;  %v4363_v26 = vsel %vm3538_vm0, %v3281_v1, 0.0  ;;  %v11807_v3 = vld [vmem:[#allocation82_spill] sm:$0xff] }
 0x309   :  { %v3287_v18 = vmul.f32 %v11802_v28, %v327_v62  ;;  %v3286_v25 = vmul.f32 %v11803_v38, %v326_v12  ;;  %v9065_v55 = vadd.f32 %v4291_v14, %v4290_v43  ;;  %v4302_v23 = vrot.slane %v4301_v39, 2  ;;  %v11806_v37 = vld [vmem:[#allocation84_spill] sm:$0xff]  ;;  %v324_v12 = vld [vmem:[%s11266_s3 + $0x810] sm:$0xff]  ;;  %v11808_v43 = vld [vmem:[#allocation85_spill] sm:$0xff] }
 0x30a   :  { %v9061_v60 = vpop.permute.xlu1 %2161  ;;  %v9063_v63 = vpop.permute.xlu0 %2157  ;;  %v4339_v46 = vrot.slane %v4338_v41, 4  ;;  %v3283_v4 = vmul.f32 %v11806_v37, %v323_v22  ;;  %v330_v1 = vld [vmem:[%s11266_s3 + $0x840] sm:$0xff]  ;;  %v3282_v62 = vmul.f32 %v11807_v3, %v322_v35  ;;  %v3288_v14 = vmul.f32 %v11808_v43, %v328_v48  ;;  %v329_v35 = vld [vmem:[%s11266_s3 + $0x838] sm:$0xff]  ;;  %v332_v3 = vld [vmem:[%s11266_s3 + $0x850] sm:$0xff] }
 0x30b   :  { %11804 = vst [vmem:[#allocation19_spill] sm:$0xff] %v9061_v60  ;;  %11805 = vst [vmem:[#allocation14_spill] sm:$0xff] %v9063_v63  ;;  %v2440_v13 = vrot.slane %v9000_v20, %v6364_v7  ;;  %v4315_v28 = vrot.slane %v4314_v51, 2  ;;  %v4327_v38 = vadd.f32 %v4326_v6, %v4325_v30  ;;  %v4351_v37 = vadd.f32 %v4350_v29, %v4349_v49  ;;  %v11809_v43 = vld [vmem:[#allocation89_spill] sm:$0xff]  ;;  %v11810_v63 = vld [vmem:[#allocation91_spill] sm:$0xff] }
 0x30c   :  { %2435 = vbcast.lane.b32.xlu1 %v2421_v33, 280  ;;  %2431 = vbcast.lane.b32.xlu0 %v2421_v33, 272  ;;  %v4364_v59 = vadd.f32 %v4363_v26, %v4362_v34  ;;  %v4385_v48 = vsel %vm3538_vm0, %v3287_v18, 0.0  ;;  %v4384_v33 = vsel %vm3538_vm0, %v3286_v25, 0.0  ;;  %v3291_v44 = vmul.f32 %v11809_v43, %v331_v52  ;;  %v325_v29 = vld [vmem:[%s11266_s3 + $0x818] sm:$0xff]  ;;  %v11814_v2 = vld [vmem:[#allocation90_spill] sm:$0xff] }
 0x30d   :  { %v3290_v22 = vmul.f32 %v11810_v63, %v330_v1  ;;  %v4303_v6 = vadd.f32 %v4302_v23, %v4301_v39  ;;  %v4340_v49 = vadd.f32 %v4339_v46, %v4338_v41  ;;  %v4372_v34 = vsel %vm3538_vm0, %v3283_v4, 0.0  ;;  %v11813_v26 = vld [vmem:[#allocation87_spill] sm:$0xff]  ;;  %v11815_v1 = vld [vmem:[#allocation94_spill] sm:$0xff] }
 0x30e   :  { %v9092_v60 = vpop.permute.xlu1 %2169  ;;  %v9094_v30 = vpop.permute.xlu0 %2165  ;;  %v3284_v18 = vmul.f32 %v11813_v26, %v324_v12  ;;  %v4371_v25 = vsel %vm3538_vm0, %v3282_v62, 0.0  ;;  %v3289_v52 = vmul.f32 %v11814_v2, %v329_v35  ;;  %v4387_v63 = vsel %vm3538_vm0, %v3288_v14, 0.0  ;;  %v333_v4 = vld [vmem:[%s11266_s3 + $0x858] sm:$0xff]  ;;  %v11816_v12 = vld [vmem:[#allocation86_spill] sm:$0xff] }
 0x30f   :  { %11811 = vst [vmem:[#allocation18_spill] sm:$0xff] %v9092_v60  ;;  %11812 = vst [vmem:[#allocation20_spill] sm:$0xff] %v9094_v30  ;;  %v3292_v43 = vmul.f32 %v11815_v1, %v332_v3  ;;  %v4316_v39 = vadd.f32 %v4315_v28, %v4314_v51  ;;  %v4352_v41 = vrot.slane %v4351_v37, 4  ;;  %v4365_v23 = vrot.slane %v4364_v59, 4  ;;  %v11819_v1 = vld [vmem:[#allocation92_spill] sm:$0xff] }
 0x310   :  { %2446 = vbcast.lane.b32.xlu1 %v2440_v13, 264  ;;  %2442 = vbcast.lane.b32.xlu0 %v2440_v13, 256  ;;  %v4386_v46 = vadd.f32 %v4385_v48, %v4384_v33  ;;  %v4328_v60 = vrot.slane %v4327_v38, 2  ;;  %v3285_v26 = vmul.f32 %v11816_v12, %v325_v29  ;;  %v4398_v62 = vsel %vm3538_vm0, %v3291_v44, 0.0  ;;  %v335_v44 = vld [vmem:[%s11266_s3 + $0x868] sm:$0xff]  ;;  %v336_v12 = vld [vmem:[%s11266_s3 + $0x870] sm:$0xff] }
 0x311   :  { %v4397_v2 = vsel %vm3538_vm0, %v3290_v22, 0.0  ;;  %v4341_v3 = vrot.slane %v4340_v49, 2  ;;  %v4373_v51 = vadd.f32 %v4372_v34, %v4371_v25  ;;  %v4374_v28 = vsel %vm3538_vm0, %v3284_v18, 0.0  ;;  %v334_v22 = vld [vmem:[%s11266_s3 + $0x860] sm:$0xff] }
 0x312   :  { %v9111_v14 = vpop.permute.xlu1 %2180  ;;  %v9113_v35 = vpop.permute.xlu0 %2176  ;;  %v4388_v48 = vadd.f32 %v4387_v63, %v4386_v46  ;;  %v4389_v33 = vsel %vm3538_vm0, %v3289_v52, 0.0  ;;  %v3293_v30 = vmul.f32 %v11819_v1, %v333_v4  ;;  %v4400_v58 = vsel %vm3538_vm0, %v3292_v43, 0.0 }
 0x313   :  { %11817 = vst [vmem:[#allocation17_spill] sm:$0xff] %v9111_v14  ;;  %11818 = vst [vmem:[#allocation21_spill] sm:$0xff] %v9113_v35  ;;  %v2459_v34 = vrot.slane %v9000_v20, %v6368_v9  ;;  %v4304_v29 = vrot.slane %v4303_v6, 1  ;;  %v4353_v18 = vadd.f32 %v4352_v41, %v4351_v37  ;;  %v4366_v25 = vadd.f32 %v4365_v23, %v4364_v59  ;;  %v11823_v37 = vld [vmem:[#allocation95_spill] sm:$0xff] }
 0x314   :  { %2454 = vbcast.lane.b32.xlu1 %v2440_v13, 280  ;;  %2450 = vbcast.lane.b32.xlu0 %v2440_v13, 272  ;;  %v4399_v52 = vadd.f32 %v4398_v62, %v4397_v2  ;;  %v4317_v63 = vrot.slane %v4316_v39, 1  ;;  %v4329_v46 = vadd.f32 %v4328_v60, %v4327_v38  ;;  %v4376_v43 = vsel %vm3538_vm0, %v3285_v26, 0.0  ;;  %v6298_v60 = vld [vmem:[%s11265_s2 + $0x38] sm:$0xff] }
 0x315   :  { %v4375_v4 = vadd.f32 %v4374_v28, %v4373_v51  ;;  %v4390_v13 = vadd.f32 %v4389_v33, %v4388_v48  ;;  %v3295_v8 = vmul.f32 %v11822_v56, %v335_v44  ;;  %v3294_v59 = vmul.f32 %v11823_v37, %v334_v22  ;;  %v11826_v51 = vld [vmem:[#allocation98_spill] sm:$0xff] }
 0x316   :  { %v9131_v1 = vpop.permute.xlu1 %2188  ;;  %v9133_v35 = vpop.permute.xlu0 %2184  ;;  %v4401_v14 = vadd.f32 %v4400_v58, %v4399_v52  ;;  %v9141_v38 = vadd.f32 %v6298_v60, %v9041_v32  ;;  %v4342_v41 = vadd.f32 %v4341_v3, %v4340_v49  ;;  %v4402_v23 = vsel %vm3538_vm0, %v3293_v30, 0.0  ;;  %v339_v32 = vld [vmem:[%s11266_s3 + $0x888] sm:$0xff]  ;;  %v338_v30 = vld [vmem:[%s11266_s3 + $0x880] sm:$0xff] }
 0x317   :  { %11820 = vst [vmem:[#allocation22_spill] sm:$0xff] %v9131_v1  ;;  %11821 = vst [vmem:[#allocation23_spill] sm:$0xff] %v9133_v35  ;;  %v9146_v26 = vsel %vm3538_vm0, %v9047_v21, 0.0  ;;  %v11825_v56 = vrot.slane %v8487_v45, 1  ;;  %v4354_v62 = vrot.slane %v4353_v18, 2  ;;  %v4367_v2 = vrot.slane %v4366_v25, 2 }
 0x318   :  { %2465 = vbcast.lane.b32.xlu1 %v2459_v34, 264  ;;  %2461 = vbcast.lane.b32.xlu0 %v2459_v34, 256  ;;  %11824 = vst [vmem:[#allocation24_spill] sm:$0xff] %v9146_v26  ;;  %v3296_v28 = vmul.f32 %v11826_v51, %v336_v12  ;;  %v4305_v49 = vadd.f32 %v4304_v29, %v4303_v6  ;;  %v4330_v3 = vrot.slane %v4329_v46, 1  ;;  %v4391_v22 = vrot.slane %v4390_v13, 4  ;;  %v340_v6 = vld [vmem:[%s11266_s3 + $0x890] sm:$0xff] }
 0x319   :  { %v9151_v58 = vadd.f32 %v11825_v56, %v9065_v55  ;;  %v4318_v21 = vadd.f32 %v4317_v63, %v4316_v39  ;;  %v4377_v48 = vadd.f32 %v4376_v43, %v4375_v4  ;;  %v337_v55 = vld [vmem:[%s11266_s3 + $0x878] sm:$0xff]  ;;  %v4403_v52 = vadd.f32 %v4402_v23, %v4401_v14 }
 0x31a   :  { %v9163_v33 = vpop.permute.xlu1 %2199  ;;  %v9165_v44 = vpop.permute.xlu0 %2195  ;;  %v4411_v12 = vsel %vm3538_vm0, %v3295_v8, 0.0  ;;  %v4410_v37 = vsel %vm3538_vm0, %v3294_v59, 0.0  ;;  %v4343_v39 = vrot.slane %v4342_v41, 1  ;;  %v11829_v29 = vld [vmem:[#allocation99_spill] sm:$0xff]  ;;  %v11830_v43 = vld [vmem:[#allocation100_spill] sm:$0xff]  ;;  %v2478_v60 = vrot.slane %v9000_v20, %v6372_v11 }
 0x31b   :  { %11827 = vst [vmem:[#allocation27_spill] sm:$0xff] %v9163_v33  ;;  %11828 = vst [vmem:[#allocation28_spill] sm:$0xff] %v9165_v44  ;;  %v3299_v63 = vmul.f32 %v11829_v29, %v339_v32  ;;  %v3298_v4 = vmul.f32 %v11830_v43, %v338_v30  ;;  %v4355_v56 = vadd.f32 %v4354_v62, %v4353_v18  ;;  %v11831_v23 = vld [vmem:[#allocation96_spill] sm:$0xff]  ;;  %v4413_v59 = vsel %vm3538_vm0, %v3296_v28, 0.0 }
 0x31c   :  { %2473 = vbcast.lane.b32.xlu1 %v2459_v34, 280  ;;  %2469 = vbcast.lane.b32.xlu0 %v2459_v34, 272  ;;  %v4368_v14 = vadd.f32 %v4367_v2, %v4366_v25  ;;  %v3297_v8 = vmul.f32 %v11831_v23, %v337_v55  ;;  %v5644_v51 = vand.u32 2147483647, %v9151_v58  ;;  %v11832_v26 = vrot.slane %v8487_v45, 2  ;;  %v11833_v29 = vld [vmem:[#allocation104_spill] sm:$0xff] }
 0x31d   :  { %v4412_v32 = vadd.f32 %v4411_v12, %v4410_v37  ;;  %v3300_v30 = vmul.f32 %v11833_v29, %v340_v6  ;;  %v11836_v18 = vrot.slane %v8487_v45, 3  ;;  %v4378_v62 = vrot.slane %v4377_v48, 4  ;;  %v341_v58 = vld [vmem:[%s11266_s3 + $0x898] sm:$0xff]  ;;  %v344_v23 = vld [vmem:[%s11266_s3 + $0x8b0] sm:$0xff] }
 0x31e   :  { %v9181_v1 = vadd.f32 %v11832_v26, %v4305_v49  ;;  %v9184_v43 = vpop.permute.xlu1 %2207  ;;  %v9186_v34 = vpop.permute.xlu0 %2203  ;;  %v4392_v2 = vadd.f32 %v4391_v22, %v4390_v13  ;;  %v4404_v28 = vrot.slane %v4403_v52, 4  ;;  %v343_v26 = vld [vmem:[%s11266_s3 + $0x8a8] sm:$0xff]  ;;  %v342_v49 = vld [vmem:[%s11266_s3 + $0x8a0] sm:$0xff]  ;;  %v4331_v55 = vadd.f32 %v4330_v3, %v4329_v46 }
 0x31f   :  { %11834 = vst [vmem:[#allocation35_spill] sm:$0xff] %v9184_v43  ;;  %11835 = vst [vmem:[#allocation30_spill] sm:$0xff] %v9186_v34  ;;  %v9190_v25 = vadd.f32 %v11836_v18, %v4318_v21  ;;  %v4414_v12 = vadd.f32 %v4413_v59, %v4412_v32  ;;  %v4424_v21 = vsel %vm3538_vm0, %v3299_v63, 0.0  ;;  %v4423_v37 = vsel %vm3538_vm0, %v3298_v4, 0.0  ;;  %v11837_v18 = vld [vmem:[#allocation103_spill] sm:$0xff]  ;;  %v11838_v3 = vld [vmem:[#allocation102_spill] sm:$0xff] }
 0x320   :  { %2484 = vbcast.lane.b32.xlu1 %v2478_v60, 264  ;;  %2480 = vbcast.lane.b32.xlu0 %v2478_v60, 256  ;;  %v4344_v13 = vadd.f32 %v4343_v39, %v4342_v41  ;;  %v4356_v22 = vrot.slane %v4355_v56, 1  ;;  %v4415_v6 = vsel %vm3538_vm0, %v3297_v8, 0.0  ;;  %v4369_v29 = vrot.slane %v4368_v14, 1  ;;  %v11839_v63 = vld [vmem:[#allocation106_spill] sm:$0xff] }
 0x321   :  { %v3301_v43 = vmul.f32 %v11837_v18, %v341_v58  ;;  %v4426_v46 = vsel %vm3538_vm0, %v3300_v30, 0.0  ;;  %v3303_v59 = vmul.f32 %v11838_v3, %v343_v26  ;;  %v3302_v32 = vmul.f32 %v11839_v63, %v342_v49  ;;  %v11840_v11 = vld [vmem:[#allocation108_spill] sm:$0xff]  ;;  %v11844_v18 = vld [vmem:[#allocation107_spill] sm:$0xff] }
 0x322   :  { %v9211_v4 = vpop.permute.xlu1 %2218  ;;  %v9213_v34 = vpop.permute.xlu0 %2214  ;;  %v4379_v41 = vadd.f32 %v4378_v62, %v4377_v48  ;;  %v4393_v39 = vrot.slane %v4392_v2, 2  ;;  %v4405_v8 = vadd.f32 %v4404_v28, %v4403_v52  ;;  %v4425_v35 = vadd.f32 %v4424_v21, %v4423_v37  ;;  %v345_v48 = vld [vmem:[%s11266_s3 + $0x8b8] sm:$0xff] }
 0x323   :  { %v5645_v44 = vand.u32 2147483647, %v9181_v1  ;;  %v4416_v33 = vadd.f32 %v4415_v6, %v4414_v12  ;;  %v3304_v9 = vmul.f32 %v11840_v11, %v344_v23  ;;  %v2497_v30 = vrot.slane %v9000_v20, %v11423_v57 }
 0x324   :  { %2492 = vbcast.lane.b32.xlu1 %v2478_v60, 280  ;;  %2488 = vbcast.lane.b32.xlu0 %v2478_v60, 272  ;;  %v11841_v58 = vrot.slane %v8487_v45, 4  ;;  %v4427_v49 = vadd.f32 %v4426_v46, %v4425_v35  ;;  %v4357_v52 = vadd.f32 %v4356_v22, %v4355_v56  ;;  %v11842_v62 = vrot.slane %v8487_v45, 5 }
 0x325   :  { %v4428_v28 = vsel %vm3538_vm0, %v3301_v43, 0.0  ;;  %v4437_v11 = vsel %vm3538_vm0, %v3303_v59, 0.0  ;;  %v4436_v60 = vsel %vm3538_vm0, %v3302_v32, 0.0  ;;  %v5948_v35 = vrot.slane %v5644_v51, 7 }
 0x326   :  { %v5519_v26 = vadd.f32 %v11841_v58, %v4331_v55  ;;  %v5520_v1 = vadd.f32 %v11842_v62, %v4344_v13  ;;  %v9229_v12 = vpop.permute.xlu1 %2226  ;;  %v9231_v21 = vpop.permute.xlu0 %2222  ;;  %v4370_v55 = vadd.f32 %v4369_v29, %v4368_v14  ;;  %v4380_v37 = vrot.slane %v4379_v41, 2 }
 0x327   :  { %11843 = vst [vmem:[#allocation38_spill] sm:$0xff] %v9229_v12  ;;  %v4394_v6 = vadd.f32 %v4393_v39, %v4392_v2  ;;  %v4406_v23 = vrot.slane %v4405_v8, 2  ;;  %v5646_v56 = vand.u32 2147483647, %v9190_v25  ;;  %v4417_v22 = vrot.slane %v4416_v33, 4 }
 0x328   :  { %v3305_v13 = vmul.f32 %v11844_v18, %v345_v48  ;;  %v4439_v43 = vsel %vm3538_vm0, %v3304_v9, 0.0  ;;  %2503 = vbcast.lane.b32.xlu1 %v2497_v30, 264  ;;  %2499 = vbcast.lane.b32.xlu0 %v2497_v30, 256  ;;  %v4429_v46 = vadd.f32 %v4428_v28, %v4427_v49  ;;  %v4438_v3 = vadd.f32 %v4437_v11, %v4436_v60 }
 0x329   :  { %v11845_v59 = vrot.slane %v8487_v45, 6  ;;  %v5647_v32 = vand.u32 2147483647, %v5519_v26  ;;  %v5643_v14 = vand.u32 2147483647, %v9141_v38  ;;  %v5950_v51 = vrot.slane %v5645_v44, 6 }
 0x32a   :  { %v9239_v2 = vpop.permute.xlu1 %2237  ;;  %v9241_v29 = vpop.permute.xlu0 %2233  ;;  %v11846_v25 = vrot.slane %v8487_v45, 7  ;;  %v5648_v58 = vand.u32 2147483647, %v5520_v1  ;;  %v4381_v9 = vadd.f32 %v4380_v37, %v4379_v41  ;;  %v4395_v48 = vrot.slane %v4394_v6, 1  ;;  %v347_v38 = vld [vmem:[%s11266_s3 + $0x8c8] sm:$0xff]  ;;  %v346_v41 = vld [vmem:[%s11266_s3 + $0x8c0] sm:$0xff] }
 0x32b   :  { %v5521_v63 = vadd.f32 %v11845_v59, %v4357_v52  ;;  %v4407_v62 = vadd.f32 %v4406_v23, %v4405_v8  ;;  %v4440_v49 = vadd.f32 %v4439_v43, %v4438_v3  ;;  %v5952_v28 = vrot.slane %v5646_v56, 5  ;;  %v348_v3 = vld [vmem:[%s11266_s3 + $0x8d0] sm:$0xff] }
 0x32c   :  { %v5522_v39 = vadd.f32 %v11846_v25, %v4370_v55  ;;  %v4418_v11 = vadd.f32 %v4417_v22, %v4416_v33  ;;  %v4441_v52 = vsel %vm3538_vm0, %v3305_v13, 0.0  ;;  %2511 = vbcast.lane.b32.xlu1 %v2497_v30, 280  ;;  %2507 = vbcast.lane.b32.xlu0 %v2497_v30, 272  ;;  %v2516_v44 = vrot.slane %v9000_v20, %v6380_v15  ;;  %v9257_v33 = vld [vmem:[%s11265_s2 + $0x48] sm:$0xff] }
 0x32d   :  { %v4430_v45 = vrot.slane %v4429_v46, 4  ;;  %v5649_v8 = vand.u32 2147483647, %v5521_v63  ;;  %v5949_v26 = vsel %vm5844_vm1, %v5948_v35, %v5643_v14  ;;  %v5954_v1 = vrot.slane %v5647_v32, 4  ;;  %v11848_v59 = vld [vmem:[#allocation110_spill] sm:$0xff]  ;;  %v11849_v32 = vld [vmem:[#allocation101_spill] sm:$0xff] }
 0x32e   :  { %v9261_v30 = vpop.permute.xlu1 %2245  ;;  %v9263_v55 = vpop.permute.xlu0 %2241  ;;  %v5650_v37 = vand.u32 2147483647, %v5522_v39  ;;  %v5951_v23 = vsel %vm5847_vm2, %v5950_v51, %v5949_v26  ;;  %v5956_v56 = vrot.slane %v5648_v58, 3  ;;  %v4382_v22 = vrot.slane %v4381_v9, 1 }
 0x32f   :  { %11847 = vst [vmem:[#allocation31_spill] sm:$0xff] %v9261_v30  ;;  %v4396_v18 = vadd.f32 %v4395_v48, %v4394_v6  ;;  %v4408_v13 = vrot.slane %v4407_v62, 1  ;;  %v4442_v43 = vadd.f32 %v4441_v52, %v4440_v49  ;;  %v4419_v35 = vrot.slane %v4418_v11, 2  ;;  %v11850_v48 = vld [vmem:[#allocation109_spill] sm:$0xff] }
 0x330   :  { %v3307_v63 = vmul.f32 %v11848_v59, %v347_v38  ;;  %v3306_v14 = vmul.f32 %v11849_v32, %v346_v41  ;;  %2522 = vbcast.lane.b32.xlu1 %v2516_v44, 264  ;;  %2518 = vbcast.lane.b32.xlu0 %v2516_v44, 256  ;;  %v5953_v25 = vsel %vm5850_vm3, %v5952_v28, %v5951_v23  ;;  %v5958_v58 = vrot.slane %v5649_v8, 2  ;;  %v351_v52 = vld [vmem:[%s11266_s3 + $0x8e8] sm:$0xff]  ;;  %v350_v38 = vld [vmem:[%s11266_s3 + $0x8e0] sm:$0xff]  ;;  %v349_v32 = vld [vmem:[%s11266_s3 + $0x8d8] sm:$0xff] }
 0x331   :  { %v4431_v39 = vadd.f32 %v4430_v45, %v4429_v46  ;;  %v5955_v6 = vsel %vm5853_vm4, %v5954_v1, %v5953_v25  ;;  %v3308_v49 = vmul.f32 %v11850_v48, %v348_v3  ;;  %v5960_v45 = vrot.slane %v5650_v37, 1  ;;  %v11852_v37 = vld [vmem:[#allocation111_spill] sm:$0xff] }
 0x332   :  { %v9282_v26 = vpop.permute.xlu1 %2256  ;;  %v9284_v46 = vpop.permute.xlu0 %2252  ;;  %v5957_v28 = vsel %vm5856_vm5, %v5956_v56, %v5955_v6  ;;  %v4383_v8 = vadd.f32 %v4382_v22, %v4381_v9  ;;  %v11851_v1 = vrot.slane %v8858_v10, 1  ;;  %v4409_v3 = vadd.f32 %v4408_v13, %v4407_v62  ;;  %v352_v56 = vld [vmem:[%s11266_s3 + $0x8f0] sm:$0xff] }
 0x333   :  { %v4443_v59 = vrot.slane %v4442_v43, 4  ;;  %v4420_v25 = vadd.f32 %v4419_v35, %v4418_v11  ;;  %v4450_v48 = vsel %vm3538_vm0, %v3307_v63, 0.0  ;;  %v4449_v41 = vsel %vm3538_vm0, %v3306_v14, 0.0  ;;  %v11854_v35 = vld [vmem:[#allocation105_spill] sm:$0xff] }
 0x334   :  { %v5524_v23 = vadd.f32 %v11851_v1, %v4396_v18  ;;  %2530 = vbcast.lane.b32.xlu1 %v2516_v44, 280  ;;  %2526 = vbcast.lane.b32.xlu0 %v2516_v44, 272  ;;  %v2535_v9 = vrot.slane %v9000_v20, %v6384_v17  ;;  %v4432_v62 = vrot.slane %v4431_v39, 2  ;;  %v3311_v22 = vmul.f32 %v11852_v37, %v351_v52  ;;  %v11853_v18 = vld [vmem:[#allocation112_spill] sm:$0xff]  ;;  %v11856_v52 = vld [vmem:[#allocation115_spill] sm:$0xff] }
 0x335   :  { %v3310_v13 = vmul.f32 %v11853_v18, %v350_v38  ;;  %v5959_v11 = vsel %vm5859_vm6, %v5958_v58, %v5957_v28  ;;  %v3309_v63 = vmul.f32 %v11854_v35, %v349_v32  ;;  %v4452_v14 = vsel %vm3538_vm0, %v3308_v49, 0.0  ;;  %v353_v49 = vld [vmem:[%s11266_s3 + $0x8f8] sm:$0xff]  ;;  %v358_v18 = vld [vmem:[%s11266_s3 + $0x920] sm:$0xff] }
 0x336   :  { %v9305_v1 = vpop.permute.xlu1 %2264  ;;  %v9307_v51 = vpop.permute.xlu0 %2260  ;;  %v5961_v44 = vsel %vm5862_vm7, %v5960_v45, %v5959_v11  ;;  %v5652_v60 = vand.u32 2147483647, %v5524_v23  ;;  %v4444_v30 = vadd.f32 %v4443_v59, %v4442_v43  ;;  %v4451_v12 = vadd.f32 %v4450_v48, %v4449_v41  ;;  %v354_v59 = vld [vmem:[%s11266_s3 + $0x900] sm:$0xff] }
 0x337   :  { %11855 = vst [vmem:[#allocation34_spill] sm:$0xff] %v9305_v1  ;;  %v3312_v37 = vmul.f32 %v11856_v52, %v352_v56  ;;  %v5523_v38 = vadd.f32 %v4383_v8, %v8858_v10  ;;  %v11857_v58 = vrot.slane %v8858_v10, 2  ;;  %v4421_v32 = vrot.slane %v4420_v25, 1  ;;  %v11861_v11 = vld [vmem:[#allocation113_spill] sm:$0xff] }
 0x338   :  { %2541 = vbcast.lane.b32.xlu1 %v2535_v9, 264  ;;  %2537 = vbcast.lane.b32.xlu0 %v2535_v9, 256  ;;  %v4433_v45 = vadd.f32 %v4432_v62, %v4431_v39  ;;  %v4453_v23 = vadd.f32 %v4452_v14, %v4451_v12  ;;  %v4463_v43 = vsel %vm3538_vm0, %v3311_v22, 0.0  ;;  %v4462_v41 = vsel %vm3538_vm0, %v3310_v13, 0.0  ;;  %v356_v14 = vld [vmem:[%s11266_s3 + $0x910] sm:$0xff]  ;;  %v359_v52 = vld [vmem:[%s11266_s3 + $0x928] sm:$0xff] }
 0x339   :  { %v5525_v28 = vadd.f32 %v11857_v58, %v4409_v3  ;;  %v4454_v8 = vsel %vm3538_vm0, %v3309_v63, 0.0  ;;  %v355_v3 = vld [vmem:[%s11266_s3 + $0x908] sm:$0xff]  ;;  %v9332_v12 = vsel %vm3538_vm0, %v5961_v44, 0.0  ;;  %v5962_v22 = vrot.slane %v5652_v60, 7  ;;  %v9347_v44 = vld [vmem:[%s11265_s2 + $0x50] sm:$0xff] }
 0x33a   :  { %v9327_v48 = vpop.permute.xlu1 %2275  ;;  %v9329_v56 = vpop.permute.xlu0 %2271  ;;  %11860 = vst [vmem:[#allocation36_spill] sm:$0xff] %v9332_v12  ;;  %v4445_v13 = vrot.slane %v4444_v30, 2  ;;  %v3313_v35 = vmul.f32 %v11861_v11, %v353_v49  ;;  %v4465_v63 = vsel %vm3538_vm0, %v3312_v37, 0.0  ;;  %v5651_v58 = vand.u32 2147483647, %v5523_v38  ;;  %v31_v38 = vld [vmem:[%s11263_s0 + $0x68] sm:$0xff] }
 0x33b   :  { %11858 = vst [vmem:[#allocation25_spill] sm:$0xff] %v9327_v48  ;;  %11859 = vst [vmem:[#allocation37_spill] sm:$0xff] %v9329_v56  ;;  %v5653_v60 = vand.u32 2147483647, %v5525_v28  ;;  %v4464_v62 = vadd.f32 %v4463_v43, %v4462_v41  ;;  %v2554_v37 = vrot.slane %v9000_v20, %v11784_v40  ;;  %v4422_v49 = vadd.f32 %v4421_v32, %v4420_v25  ;;  %v11862_v43 = vld [vmem:[#allocation116_spill] sm:$0xff]  ;;  %v11863_v25 = vld [vmem:[#allocation118_spill] sm:$0xff] }
 0x33c   :  { %2549 = vbcast.lane.b32.xlu1 %v2535_v9, 280  ;;  %2545 = vbcast.lane.b32.xlu0 %v2535_v9, 272  ;;  %v4434_v11 = vrot.slane %v4433_v45, 1  ;;  %v4455_v39 = vadd.f32 %v4454_v8, %v4453_v23  ;;  %v47_v9 = vld [vmem:[%s11264_s1 + $0x68] sm:$0xff]  ;;  %v3315_v20 = vmul.f32 %v11862_v43, %v355_v3  ;;  %v3314_v32 = vmul.f32 %v11863_v25, %v354_v59  ;;  %v11866_v56 = vld [vmem:[#allocation120_spill] sm:$0xff] }
 0x33d   :  { %v4466_v28 = vadd.f32 %v4465_v63, %v4464_v62  ;;  %v9368_v6 = vadd.f32 %v4445_v13, %v4444_v30  ;;  %v4467_v12 = vsel %vm3538_vm0, %v3313_v35, 0.0  ;;  %v3316_v48 = vmul.f32 %v11866_v56, %v356_v14  ;;  %v360_v62 = vld [vmem:[%s11266_s3 + $0x930] sm:$0xff]  ;;  %v357_v63 = vld [vmem:[%s11266_s3 + $0x918] sm:$0xff]  ;;  %v363_v56 = vld [vmem:[%s11266_s3 + $0x948] sm:$0xff] }
 0x33e   :  { %v9364_v41 = vpop.permute.xlu1 %2283  ;;  %v9366_v8 = vpop.permute.xlu0 %2279  ;;  %v9376_v3 = vsel %vm5844_vm1, %v5962_v22, %v5651_v58  ;;  %v9378_v59 = vrot.slane %v5653_v60, 6  ;;  %v3319_v30 = vmul.f32 %v8636_v24, %v359_v52  ;;  %v3318_v13 = vmul.f32 %v8638_v47, %v358_v18  ;;  %v362_v24 = vld [vmem:[%s11266_s3 + $0x940] sm:$0xff]  ;;  %v11870_v23 = vld [vmem:[#allocation122_spill] sm:$0xff] }
 0x33f   :  { %11864 = vst [vmem:[#allocation29_spill] sm:$0xff] %v9364_v41  ;;  %11865 = vst [vmem:[#allocation39_spill] sm:$0xff] %v9366_v8  ;;  %v9388_v35 = vsub.f32 %v31_v38, %v47_v9  ;;  %v11867_v22 = vrot.slane %v8858_v10, 3  ;;  %v9394_v58 = vadd.f32 %v4434_v11, %v4433_v45  ;;  %v4456_v60 = vrot.slane %v4455_v39, 4  ;;  %v364_v11 = vld [vmem:[%s11266_s3 + $0x950] sm:$0xff]  ;;  %v367_v9 = vld [vmem:[%s11266_s3 + $0x968] sm:$0xff] }
 0x340   :  { %2560 = vbcast.lane.b32.xlu1 %v2554_v37, 264  ;;  %2556 = vbcast.lane.b32.xlu0 %v2554_v37, 256  ;;  %v9400_v18 = vadd.f32 %v4467_v12, %v4466_v28  ;;  %v4476_v52 = vsel %vm3538_vm0, %v3315_v20, 0.0  ;;  %v4475_v38 = vsel %vm3538_vm0, %v3314_v32, 0.0  ;;  %v3320_v45 = vmul.f32 %v8660_v54, %v360_v62  ;;  %v11869_v20 = vld [vmem:[#allocation119_spill] sm:$0xff]  ;;  %v366_v62 = vld [vmem:[%s11266_s3 + $0x960] sm:$0xff] }
 0x341   :  { %v9392_v14 = vadd.f32 %v11867_v22, %v4422_v49  ;;  %v361_v49 = vld [vmem:[%s11266_s3 + $0x938] sm:$0xff]  ;;  %v3317_v25 = vmul.f32 %v11869_v20, %v357_v63  ;;  %v4478_v32 = vsel %vm3538_vm0, %v3316_v48, 0.0  ;;  %v3323_v54 = vmul.f32 %v8684_v36, %v363_v56  ;;  %v11871_v20 = vld [vmem:[#allocation117_spill] sm:$0xff] }
 0x342   :  { %v9414_v12 = vpop.permute.xlu1 %2294  ;;  %v9416_v28 = vpop.permute.xlu0 %2290  ;;  %v4489_v22 = vsel %vm3538_vm0, %v3319_v30, 0.0  ;;  %v4488_v47 = vsel %vm3538_vm0, %v3318_v13, 0.0  ;;  %v3322_v41 = vmul.f32 %v11870_v23, %v362_v24  ;;  %v2573_v43 = vrot.slane %v9388_v35, %v6360_v5  ;;  %v11872_v8 = vld [vmem:[#allocation127_spill] sm:$0xff]  ;;  %v371_v23 = vld [vmem:[%s11266_s3 + $0x988] sm:$0xff] }
 0x343   :  { %11868 = vst [vmem:[#allocation40_spill] sm:$0xff] %v9416_v28  ;;  %v4477_v63 = vadd.f32 %v4476_v52, %v4475_v38  ;;  %v3321_v48 = vmul.f32 %v11871_v20, %v361_v49  ;;  %v3324_v36 = vmul.f32 %v11872_v8, %v364_v11  ;;  %v3327_v56 = vmul.f32 %v8729_v27, %v367_v9  ;;  %v368_v30 = vld [vmem:[%s11266_s3 + $0x970] sm:$0xff] }
 0x344   :  { %2568 = vbcast.lane.b32.xlu1 %v2554_v37, 280  ;;  %2564 = vbcast.lane.b32.xlu0 %v2554_v37, 272  ;;  %v370_v37 = vld [vmem:[%s11266_s3 + $0x980] sm:$0xff]  ;;  %v9442_v13 = vadd.f32 %v4456_v60, %v4455_v39  ;;  %v4491_v8 = vsel %vm3538_vm0, %v3320_v45, 0.0  ;;  %v3326_v27 = vmul.f32 %v8731_v42, %v366_v62  ;;  %v9452_v49 = vsel %vm3538_vm0, %v3317_v25, 0.0  ;;  %v372_v39 = vld [vmem:[%s11266_s3 + $0x990] sm:$0xff] }
 0x345   :  { %v9454_v11 = vadd.f32 %v4478_v32, %v4477_v63  ;;  %v4490_v9 = vadd.f32 %v4489_v22, %v4488_v47  ;;  %v4502_v20 = vsel %vm3538_vm0, %v3323_v54, 0.0  ;;  %v375_v42 = vld [vmem:[%s11266_s3 + $0x9a8] sm:$0xff]  ;;  %v374_v60 = vld [vmem:[%s11266_s3 + $0x9a0] sm:$0xff]  ;;  %v4501_v45 = vsel %vm3538_vm0, %v3322_v41, 0.0  ;;  %v365_v47 = vld [vmem:[%s11266_s3 + $0x958] sm:$0xff] }
 0x346   :  { %v9447_v52 = vpop.permute.xlu1 %2302  ;;  %v9449_v38 = vpop.permute.xlu0 %2298  ;;  %v369_v25 = vld [vmem:[%s11266_s3 + $0x978] sm:$0xff]  ;;  %v3331_v62 = vmul.f32 %v8763_v0, %v371_v23  ;;  %v11876_v22 = vld [vmem:[#allocation126_spill] sm:$0xff]  ;;  %v4493_v24 = vsel %vm3538_vm0, %v3321_v48, 0.0  ;;  %v4504_v41 = vsel %vm3538_vm0, %v3324_v36, 0.0  ;;  %v4515_v1 = vsel %vm3538_vm0, %v3327_v56, 0.0  ;;  %v378_v36 = vld [vmem:[%s11266_s3 + $0x9c0] sm:$0xff] }
 0x347   :  { %11873 = vst [vmem:[#allocation42_spill] sm:$0xff] %v9447_v52  ;;  %11874 = vst [vmem:[#allocation41_spill] sm:$0xff] %v9449_v38  ;;  %v11875_v32 = vld [vmem:[#allocation123_spill] sm:$0xff]  ;;  %v3330_v63 = vmul.f32 %v11876_v22, %v370_v37  ;;  %v4492_v52 = vadd.f32 %v4491_v8, %v4490_v9  ;;  %v4514_v28 = vsel %vm3538_vm0, %v3326_v27, 0.0  ;;  %v3335_v0 = vmul.f32 %v8793_v16, %v375_v42  ;;  %v379_v48 = vld [vmem:[%s11266_s3 + $0x9c8] sm:$0xff] }
 0x348   :  { %v3328_v54 = vmul.f32 %v11875_v32, %v368_v30  ;;  %2579 = vbcast.lane.b32.xlu1 %v2573_v43, 264  ;;  %2575 = vbcast.lane.b32.xlu0 %v2573_v43, 256  ;;  %v376_v38 = vld [vmem:[%s11266_s3 + $0x9b0] sm:$0xff]  ;;  %v3332_v30 = vmul.f32 %v8779_v19, %v372_v39  ;;  %v3334_v23 = vmul.f32 %v8795_v50, %v374_v60  ;;  %v11878_v27 = vld [vmem:[#allocation121_spill] sm:$0xff]  ;;  %v11879_v19 = vld [vmem:[#allocation128_spill] sm:$0xff]  ;;  %v4528_v60 = vsel %vm3538_vm0, %v3331_v62, 0.0 }
 0x349   :  { %v4503_v8 = vadd.f32 %v4502_v20, %v4501_v45  ;;  %v3325_v9 = vmul.f32 %v11878_v27, %v365_v47  ;;  %v3329_v39 = vmul.f32 %v11879_v19, %v369_v25  ;;  %v373_v16 = vld [vmem:[%s11266_s3 + $0x998] sm:$0xff]  ;;  %v2592_v50 = vrot.slane %v9388_v35, %v6364_v7  ;;  %v380_v20 = vld [vmem:[%s11266_s3 + $0x9d0] sm:$0xff] }
 0x34a   :  { %v9492_v56 = vpop.permute.xlu1 %2313  ;;  %v9494_v37 = vpop.permute.xlu0 %2309  ;;  %v4517_v42 = vsel %vm3538_vm0, %v3328_v54, 0.0  ;;  %v4527_v32 = vsel %vm3538_vm0, %v3330_v63, 0.0  ;;  %v3336_v22 = vmul.f32 %v8814_v31, %v376_v38  ;;  %v4516_v47 = vadd.f32 %v4515_v1, %v4514_v28  ;;  %v377_v25 = vld [vmem:[%s11266_s3 + $0x9b8] sm:$0xff]  ;;  %v11880_v27 = vld [vmem:[#allocation130_spill] sm:$0xff] }
 0x34b   :  { %11877 = vst [vmem:[#allocation46_spill] sm:$0xff] %v9494_v37  ;;  %v4505_v45 = vadd.f32 %v4504_v41, %v4503_v8  ;;  %v3339_v54 = vmul.f32 %v8828_v53, %v379_v48  ;;  %v3338_v62 = vmul.f32 %v8830_v61, %v378_v36  ;;  %v3333_v63 = vmul.f32 %v11880_v27, %v373_v16  ;;  %v11883_v8 = vld [vmem:[#allocation124_spill] sm:$0xff]  ;;  %v11884_v36 = vld [vmem:[#allocation125_spill] sm:$0xff] }
 0x34c   :  { %2587 = vbcast.lane.b32.xlu1 %v2573_v43, 280  ;;  %2583 = vbcast.lane.b32.xlu0 %v2573_v43, 272  ;;  %v4530_v31 = vsel %vm3538_vm0, %v3332_v30, 0.0  ;;  %v4541_v38 = vsel %vm3538_vm0, %v3335_v0, 0.0  ;;  %v4540_v19 = vsel %vm3538_vm0, %v3334_v23, 0.0  ;;  %v4506_v1 = vsel %vm3538_vm0, %v3325_v9, 0.0 }
 0x34d   :  { %v4518_v28 = vadd.f32 %v4517_v42, %v4516_v47  ;;  %v4529_v41 = vadd.f32 %v4528_v60, %v4527_v32  ;;  %v3340_v53 = vmul.f32 %v11883_v8, %v380_v20  ;;  %v4494_v48 = vadd.f32 %v4493_v24, %v4492_v52  ;;  %v381_v0 = vld [vmem:[%s11266_s3 + $0x9d8] sm:$0xff]  ;;  %v382_v20 = vld [vmem:[%s11266_s3 + $0x9e0] sm:$0xff] }
 0x34e   :  { %v9519_v37 = vpop.permute.xlu1 %2321  ;;  %v9521_v43 = vpop.permute.xlu0 %2317  ;;  %v4519_v61 = vsel %vm3538_vm0, %v3329_v39, 0.0  ;;  %v3337_v16 = vmul.f32 %v11884_v36, %v377_v25  ;;  %v4543_v30 = vsel %vm3538_vm0, %v3336_v22, 0.0  ;;  %v4542_v27 = vadd.f32 %v4541_v38, %v4540_v19  ;;  %v383_v22 = vld [vmem:[%s11266_s3 + $0x9e8] sm:$0xff]  ;;  %v11890_v36 = vld [vmem:[#allocation132_spill] sm:$0xff] }
 0x34f   :  { %11881 = vst [vmem:[#allocation32_spill] sm:$0xff] %v9519_v37  ;;  %11882 = vst [vmem:[#allocation33_spill] sm:$0xff] %v9521_v43  ;;  %v4531_v23 = vadd.f32 %v4530_v31, %v4529_v41  ;;  %v4554_v9 = vsel %vm3538_vm0, %v3339_v54, 0.0  ;;  %v4553_v42 = vsel %vm3538_vm0, %v3338_v62, 0.0  ;;  %v4458_v24 = vrot.slane %v9442_v13, 2  ;;  %v11888_v31 = vld [vmem:[#allocation129_spill] sm:$0xff] }
 0x350   :  { %2598 = vbcast.lane.b32.xlu1 %v2592_v50, 264  ;;  %2594 = vbcast.lane.b32.xlu0 %v2592_v50, 256  ;;  %v11885_v52 = vrot.slane %v9400_v18, 4  ;;  %v4507_v60 = vadd.f32 %v4506_v1, %v4505_v45  ;;  %v4532_v32 = vsel %vm3538_vm0, %v3333_v63, 0.0  ;;  %v4520_v54 = vadd.f32 %v4519_v61, %v4518_v28  ;;  %v384_v1 = vld [vmem:[%s11266_s3 + $0x9f0] sm:$0xff] }
 0x351   :  { %v4544_v62 = vadd.f32 %v4543_v30, %v4542_v27  ;;  %v3341_v38 = vmul.f32 %v11888_v31, %v381_v0  ;;  %v4481_v45 = vadd.f32 %v9452_v49, %v9454_v11  ;;  %v4545_v63 = vsel %vm3538_vm0, %v3337_v16, 0.0  ;;  %v11889_v41 = vld [vmem:[#allocation6_spill] sm:$0xff] }
 0x352   :  { %v4470_v39 = vadd.f32 %v11885_v52, %v9400_v18  ;;  %v9544_v47 = vpop.permute.xlu1 %2332  ;;  %v9546_v25 = vpop.permute.xlu0 %2328  ;;  %v4556_v18 = vsel %vm3538_vm0, %v3340_v53, 0.0  ;;  %v4555_v19 = vadd.f32 %v4554_v9, %v4553_v42  ;;  %v2611_v28 = vrot.slane %v9388_v35, %v11889_v41  ;;  %v11891_v53 = vld [vmem:[#allocation134_spill] sm:$0xff] }
 0x353   :  { %11886 = vst [vmem:[#allocation44_spill] sm:$0xff] %v9544_v47  ;;  %11887 = vst [vmem:[#allocation47_spill] sm:$0xff] %v9546_v25  ;;  %v4495_v8 = vrot.slane %v4494_v48, 4  ;;  %v4533_v61 = vadd.f32 %v4532_v32, %v4531_v23  ;;  %v3343_v30 = vmul.f32 %v11890_v36, %v383_v22  ;;  %v3342_v0 = vmul.f32 %v11891_v53, %v382_v20  ;;  %v11894_v25 = vld [vmem:[#allocation135_spill] sm:$0xff] }
 0x354   :  { %2606 = vbcast.lane.b32.xlu1 %v2592_v50, 280  ;;  %2602 = vbcast.lane.b32.xlu0 %v2592_v50, 272  ;;  %v5654_v49 = vand.u32 2147483647, %v9392_v14  ;;  %v4471_v11 = vrot.slane %v4470_v39, 2  ;;  %v4508_v16 = vrot.slane %v4507_v60, 4  ;;  %v4557_v27 = vadd.f32 %v4556_v18, %v4555_v19 }
 0x355   :  { %v4521_v52 = vrot.slane %v4520_v54, 4  ;;  %v4546_v50 = vadd.f32 %v4545_v63, %v4544_v62  ;;  %v4558_v31 = vsel %vm3538_vm0, %v3341_v38, 0.0  ;;  %v3344_v47 = vmul.f32 %v11894_v25, %v384_v1  ;;  %v385_v19 = vld [vmem:[%s11266_s3 + $0x9f8] sm:$0xff] }
 0x356   :  { %v9561_v9 = vpop.permute.xlu1 %2340  ;;  %v9563_v42 = vpop.permute.xlu0 %2336  ;;  %v11895_v23 = vrot.slane %v8858_v10, 4  ;;  %v11896_v14 = vrot.slane %v9368_v6, 1  ;;  %v4459_v20 = vadd.f32 %v4458_v24, %v9442_v13  ;;  %v4482_v18 = vrot.slane %v4481_v45, 4 }
 0x357   :  { %11892 = vst [vmem:[#allocation43_spill] sm:$0xff] %v9561_v9  ;;  %11893 = vst [vmem:[#allocation45_spill] sm:$0xff] %v9563_v42  ;;  %v4496_v62 = vadd.f32 %v4495_v8, %v4494_v48  ;;  %v4534_v38 = vrot.slane %v4533_v61, 4  ;;  %v4567_v25 = vsel %vm3538_vm0, %v3343_v30, 0.0  ;;  %v4566_v63 = vsel %vm3538_vm0, %v3342_v0, 0.0  ;;  %v11900_v8 = vld [vmem:[#allocation7_spill] sm:$0xff] }
 0x358   :  { %v5527_v32 = vadd.f32 %v11895_v23, %v9394_v58  ;;  %v4448_v22 = vadd.f32 %v11896_v14, %v9368_v6  ;;  %2617 = vbcast.lane.b32.xlu1 %v2611_v28, 264  ;;  %2613 = vbcast.lane.b32.xlu0 %v2611_v28, 256  ;;  %v5966_v58 = vrot.slane %v5654_v49, 5  ;;  %v4472_v1 = vadd.f32 %v4471_v11, %v4470_v39  ;;  %v11899_v14 = vld [vmem:[#allocation133_spill] sm:$0xff] }
 0x359   :  { %v4509_v36 = vadd.f32 %v4508_v16, %v4507_v60  ;;  %v4559_v53 = vadd.f32 %v4558_v31, %v4557_v27  ;;  %v4522_v24 = vadd.f32 %v4521_v52, %v4520_v54  ;;  %v4547_v23 = vrot.slane %v4546_v50, 4 }
 0x35a   :  { %v9579_v6 = vpop.permute.xlu1 %2351  ;;  %v9581_v13 = vpop.permute.xlu0 %2347  ;;  %v3345_v9 = vmul.f32 %v11899_v14, %v385_v19  ;;  %v4569_v42 = vsel %vm3538_vm0, %v3344_v47, 0.0  ;;  %v4568_v48 = vadd.f32 %v4567_v25, %v4566_v63  ;;  %v2630_v30 = vrot.slane %v9388_v35, %v11900_v8 }
 0x35b   :  { %11897 = vst [vmem:[#allocation48_spill] sm:$0xff] %v9579_v6  ;;  %11898 = vst [vmem:[#allocation51_spill] sm:$0xff] %v9581_v13  ;;  %v11901_v39 = vrot.slane %v8858_v10, 5  ;;  %v5655_v0 = vand.u32 2147483647, %v5527_v32  ;;  %v4460_v49 = vrot.slane %v4459_v20, 1  ;;  %v4483_v11 = vadd.f32 %v4482_v18, %v4481_v45 }
 0x35c   :  { %2625 = vbcast.lane.b32.xlu1 %v2611_v28, 280  ;;  %2621 = vbcast.lane.b32.xlu0 %v2611_v28, 272  ;;  %v4497_v16 = vrot.slane %v4496_v62, 2  ;;  %v4535_v27 = vadd.f32 %v4534_v38, %v4533_v61  ;;  %v4560_v54 = vrot.slane %v4559_v53, 4  ;;  %v4570_v52 = vadd.f32 %v4569_v42, %v4568_v48  ;;  %v387_v45 = vld [vmem:[%s11266_s3 + $0xa08] sm:$0xff]  ;;  %v386_v61 = vld [vmem:[%s11266_s3 + $0xa00] sm:$0xff] }
 0x35d   :  { %v5528_v60 = vadd.f32 %v11901_v39, %v4448_v22  ;;  %v4473_v47 = vrot.slane %v4472_v1, 1  ;;  %v5965_v28 = vsel %vm5847_vm2, %v9378_v59, %v9376_v3  ;;  %v4510_v25 = vrot.slane %v4509_v36, 2  ;;  %v11905_v13 = vld [vmem:[#allocation137_spill] sm:$0xff] }
 0x35e   :  { %v9589_v31 = vpop.permute.xlu1 %2359  ;;  %v9591_v19 = vpop.permute.xlu0 %2355  ;;  %v4523_v63 = vrot.slane %v4522_v24, 2  ;;  %v4548_v14 = vadd.f32 %v4547_v23, %v4546_v50  ;;  %v4571_v32 = vsel %vm3538_vm0, %v3345_v9, 0.0  ;;  %v5967_v3 = vsel %vm5850_vm3, %v5966_v58, %v5965_v28  ;;  %v388_v9 = vld [vmem:[%s11266_s3 + $0xa10] sm:$0xff] }
 0x35f   :  { %11902 = vst [vmem:[#allocation50_spill] sm:$0xff] %v9589_v31  ;;  %11903 = vst [vmem:[#allocation54_spill] sm:$0xff] %v9591_v19  ;;  %v5656_v22 = vand.u32 2147483647, %v5528_v60  ;;  %v5968_v59 = vrot.slane %v5655_v0, 4  ;;  %v4484_v18 = vrot.slane %v4483_v11, 2  ;;  %v4498_v50 = vadd.f32 %v4497_v16, %v4496_v62 }
 0x360   :  { %2636 = vbcast.lane.b32.xlu1 %v2630_v30, 264  ;;  %2632 = vbcast.lane.b32.xlu0 %v2630_v30, 256  ;;  %v4536_v38 = vrot.slane %v4535_v27, 2  ;;  %v4461_v23 = vadd.f32 %v4460_v49, %v4459_v20  ;;  %v4561_v48 = vadd.f32 %v4560_v54, %v4559_v53  ;;  %v4572_v39 = vadd.f32 %v4571_v32, %v4570_v52  ;;  %v11904_v31 = vld [vmem:[#allocation136_spill] sm:$0xff]  ;;  %v11908_v16 = vld [vmem:[#allocation11_spill] sm:$0xff] }
 0x361   :  { %v3347_v19 = vmul.f32 %v11904_v31, %v387_v45  ;;  %v3346_v42 = vmul.f32 %v11905_v13, %v386_v61  ;;  %v4511_v58 = vadd.f32 %v4510_v25, %v4509_v36  ;;  %v4524_v0 = vadd.f32 %v4523_v63, %v4522_v24  ;;  %v389_v36 = vld [vmem:[%s11266_s3 + $0xa18] sm:$0xff]  ;;  %v390_v24 = vld [vmem:[%s11266_s3 + $0xa20] sm:$0xff] }
 0x362   :  { %v9610_v6 = vpop.permute.xlu1 %2370  ;;  %v9612_v60 = vpop.permute.xlu0 %2366  ;;  %v4549_v28 = vrot.slane %v4548_v14, 2  ;;  %v4474_v62 = vadd.f32 %v4473_v47, %v4472_v1  ;;  %v3348_v37 = vmul.f32 %v11908_v16, %v388_v9  ;;  %v2649_v20 = vrot.slane %v9388_v35, %v11423_v57  ;;  %v391_v1 = vld [vmem:[%s11266_s3 + $0xa28] sm:$0xff]  ;;  %v11915_v16 = vld [vmem:[#allocation15_spill] sm:$0xff] }
 0x363   :  { %11906 = vst [vmem:[#allocation55_spill] sm:$0xff] %v9610_v6  ;;  %11907 = vst [vmem:[#allocation52_spill] sm:$0xff] %v9612_v60  ;;  %v9618_v53 = vsel %vm5853_vm4, %v5968_v59, %v5967_v3  ;;  %v9620_v49 = vrot.slane %v5656_v22, 3  ;;  %v4485_v13 = vadd.f32 %v4484_v18, %v4483_v11  ;;  %v4499_v54 = vrot.slane %v4498_v50, 1  ;;  %v392_v3 = vld [vmem:[%s11266_s3 + $0xa30] sm:$0xff]  ;;  %v11916_v57 = vld [vmem:[#allocation13_spill] sm:$0xff] }
 0x364   :  { %2644 = vbcast.lane.b32.xlu1 %v2630_v30, 280  ;;  %2640 = vbcast.lane.b32.xlu0 %v2630_v30, 272  ;;  %v4537_v52 = vadd.f32 %v4536_v38, %v4535_v27  ;;  %v11909_v30 = vrot.slane %v8858_v10, 6  ;;  %v4562_v47 = vrot.slane %v4561_v48, 2  ;;  %v4573_v25 = vrot.slane %v4572_v39, 4  ;;  %v11913_v38 = vld [vmem:[#allocation10_spill] sm:$0xff] }
 0x365   :  { %v4580_v11 = vsel %vm3538_vm0, %v3347_v19, 0.0  ;;  %v4579_v27 = vsel %vm3538_vm0, %v3346_v42, 0.0  ;;  %v4512_v45 = vrot.slane %v4511_v58, 1  ;;  %v4525_v61 = vrot.slane %v4524_v0, 1 }
 0x366   :  { %v5529_v31 = vadd.f32 %v11909_v30, %v4461_v23  ;;  %v9635_v63 = vpop.permute.xlu1 %2378  ;;  %v9637_v32 = vpop.permute.xlu0 %2374  ;;  %v4550_v22 = vadd.f32 %v4549_v28, %v4548_v14  ;;  %v11912_v59 = vrot.slane %v8858_v10, 7  ;;  %v3349_v9 = vmul.f32 %v11913_v38, %v389_v36  ;;  %v11914_v23 = vld [vmem:[#allocation12_spill] sm:$0xff] }
 0x367   :  { %11910 = vst [vmem:[#allocation49_spill] sm:$0xff] %v9635_v63  ;;  %11911 = vst [vmem:[#allocation56_spill] sm:$0xff] %v9637_v32  ;;  %v4582_v19 = vsel %vm3538_vm0, %v3348_v37, 0.0  ;;  %v3351_v42 = vmul.f32 %v11914_v23, %v391_v1  ;;  %v3350_v30 = vmul.f32 %v11915_v16, %v390_v24  ;;  %v4486_v63 = vrot.slane %v4485_v13, 1  ;;  %v393_v24 = vld [vmem:[%s11266_s3 + $0xa38] sm:$0xff] }
 0x368   :  { %v5530_v18 = vadd.f32 %v11912_v59, %v4474_v62  ;;  %2655 = vbcast.lane.b32.xlu1 %v2649_v20, 264  ;;  %2651 = vbcast.lane.b32.xlu0 %v2649_v20, 256  ;;  %v4500_v32 = vadd.f32 %v4499_v54, %v4498_v50  ;;  %v4538_v14 = vrot.slane %v4537_v52, 1  ;;  %v4581_v28 = vadd.f32 %v4580_v11, %v4579_v27  ;;  %v11918_v27 = vld [vmem:[#allocation16_spill] sm:$0xff] }
 0x369   :  { %v4563_v60 = vadd.f32 %v4562_v47, %v4561_v48  ;;  %v4574_v6 = vadd.f32 %v4573_v25, %v4572_v39  ;;  %v3352_v43 = vmul.f32 %v11916_v57, %v392_v3  ;;  %v5657_v36 = vand.u32 2147483647, %v5529_v31 }
 0x36a   :  { %v9649_v10 = vpop.permute.xlu1 %2389  ;;  %v9651_v62 = vpop.permute.xlu0 %2385  ;;  %v4513_v37 = vadd.f32 %v4512_v45, %v4511_v58  ;;  %v4526_v59 = vadd.f32 %v4525_v61, %v4524_v0  ;;  %v4551_v1 = vrot.slane %v4550_v22, 1  ;;  %v4583_v38 = vadd.f32 %v4582_v19, %v4581_v28 }
 0x36b   :  { %v4584_v50 = vsel %vm3538_vm0, %v3349_v9, 0.0  ;;  %v4593_v48 = vsel %vm3538_vm0, %v3351_v42, 0.0  ;;  %v4592_v39 = vsel %vm3538_vm0, %v3350_v30, 0.0  ;;  %v2668_v57 = vrot.slane %v9388_v35, %v6380_v15 }
 0x36c   :  { %2663 = vbcast.lane.b32.xlu1 %v2649_v20, 280  ;;  %2659 = vbcast.lane.b32.xlu0 %v2649_v20, 272  ;;  %v4487_v54 = vadd.f32 %v4486_v63, %v4485_v13  ;;  %v11917_v58 = vrot.slane %v9257_v33, 1  ;;  %v4539_v31 = vadd.f32 %v4538_v14, %v4537_v52  ;;  %v5658_v47 = vand.u32 2147483647, %v5530_v18 }
 0x36d   :  { %v4564_v25 = vrot.slane %v4563_v60, 1  ;;  %v4575_v11 = vrot.slane %v4574_v6, 2  ;;  %v3353_v45 = vmul.f32 %v11918_v27, %v393_v24  ;;  %v4595_v61 = vsel %vm3538_vm0, %v3352_v43, 0.0 }
 0x36e   :  { %v5532_v0 = vadd.f32 %v11917_v58, %v4500_v32  ;;  %v9665_v3 = vpop.permute.xlu1 %2397  ;;  %v9667_v9 = vpop.permute.xlu0 %2393  ;;  %v11919_v20 = vrot.slane %v9257_v33, 2  ;;  %v4552_v23 = vadd.f32 %v4551_v1, %v4550_v22  ;;  %v4585_v13 = vadd.f32 %v4584_v50, %v4583_v38 }
 0x36f   :  { %v4594_v63 = vadd.f32 %v4593_v48, %v4592_v39  ;;  %v11920_v32 = vrot.slane %v9257_v33, 3  ;;  %v5971_v18 = vsel %vm5856_vm5, %v9620_v49, %v9618_v53  ;;  %v5972_v43 = vrot.slane %v5657_v36, 2  ;;  %v395_v48 = vld [vmem:[%s11266_s3 + $0xa48] sm:$0xff] }
 0x370   :  { %v5533_v19 = vadd.f32 %v11919_v20, %v4513_v37  ;;  %2674 = vbcast.lane.b32.xlu1 %v2668_v57, 264  ;;  %2670 = vbcast.lane.b32.xlu0 %v2668_v57, 256  ;;  %v5660_v16 = vand.u32 2147483647, %v5532_v0  ;;  %v11921_v30 = vrot.slane %v9257_v33, 4  ;;  %v5974_v22 = vrot.slane %v5658_v47, 1 }
 0x371   :  { %v5534_v52 = vadd.f32 %v11920_v32, %v4526_v59  ;;  %v4596_v28 = vadd.f32 %v4595_v61, %v4594_v63  ;;  %v4576_v37 = vadd.f32 %v4575_v11, %v4574_v6  ;;  %v4597_v1 = vsel %vm3538_vm0, %v3353_v45, 0.0  ;;  %v394_v6 = vld [vmem:[%s11266_s3 + $0xa40] sm:$0xff]  ;;  %v396_v11 = vld [vmem:[%s11266_s3 + $0xa50] sm:$0xff] }
 0x372   :  { %v5535_v14 = vadd.f32 %v11921_v30, %v4539_v31  ;;  %v9680_v38 = vpop.permute.xlu1 %2408  ;;  %v9682_v59 = vpop.permute.xlu0 %2404  ;;  %v4565_v24 = vadd.f32 %v4564_v25, %v4563_v60  ;;  %v5531_v53 = vadd.f32 %v4487_v54, %v9257_v33  ;;  %v5661_v49 = vand.u32 2147483647, %v5533_v19  ;;  %v11923_v61 = vld [vmem:[#allocation19_spill] sm:$0xff]  ;;  %v11924_v19 = vld [vmem:[#allocation14_spill] sm:$0xff] }
 0x373   :  { %v4586_v36 = vrot.slane %v4585_v13, 4  ;;  %v11922_v39 = vrot.slane %v9257_v33, 5  ;;  %v5662_v0 = vand.u32 2147483647, %v5534_v52  ;;  %v2687_v60 = vrot.slane %v9388_v35, %v6384_v17 }
 0x374   :  { %2682 = vbcast.lane.b32.xlu1 %v2668_v57, 280  ;;  %2678 = vbcast.lane.b32.xlu0 %v2668_v57, 272  ;;  %v5973_v54 = vsel %vm5859_vm6, %v5972_v43, %v5971_v18  ;;  %v5976_v47 = vrot.slane %v5660_v16, 7  ;;  %v4598_v25 = vadd.f32 %v4597_v1, %v4596_v28  ;;  %v5663_v45 = vand.u32 2147483647, %v5535_v14  ;;  %v9713_v28 = vld [vmem:[%s11265_s2 + $0x58] sm:$0xff] }
 0x375   :  { %v5536_v58 = vadd.f32 %v11922_v39, %v4552_v23  ;;  %v5975_v27 = vsel %vm5862_vm7, %v5974_v22, %v5973_v54  ;;  %v3355_v20 = vmul.f32 %v11923_v61, %v395_v48  ;;  %v3354_v57 = vmul.f32 %v11924_v19, %v394_v6  ;;  %v11927_v1 = vld [vmem:[#allocation20_spill] sm:$0xff] }
 0x376   :  { %v9704_v23 = vpop.permute.xlu1 %2416  ;;  %v9706_v63 = vpop.permute.xlu0 %2412  ;;  %v4577_v32 = vrot.slane %v4576_v37, 1  ;;  %v11926_v52 = vrot.slane %v9257_v33, 6  ;;  %v5659_v43 = vand.u32 2147483647, %v5531_v53  ;;  %v5978_v16 = vrot.slane %v5661_v49, 6 }
 0x377   :  { %11925 = vst [vmem:[#allocation53_spill] sm:$0xff] %v9704_v23  ;;  %v4587_v30 = vadd.f32 %v4586_v36, %v4585_v13  ;;  %v5664_v14 = vand.u32 2147483647, %v5536_v58  ;;  %v5980_v22 = vrot.slane %v5662_v0, 5  ;;  %v3356_v48 = vmul.f32 %v11927_v1, %v396_v11  ;;  %v397_v13 = vld [vmem:[%s11266_s3 + $0xa58] sm:$0xff]  ;;  %v32_v1 = vld [vmem:[%s11263_s0 + $0x70] sm:$0xff] }
 0x378   :  { %v5537_v18 = vadd.f32 %v11926_v52, %v4565_v24  ;;  %2693 = vbcast.lane.b32.xlu1 %v2687_v60, 264  ;;  %2689 = vbcast.lane.b32.xlu0 %v2687_v60, 256  ;;  %v9718_v39 = vsel %vm3538_vm0, %v5975_v27, 0.0  ;;  %v4599_v24 = vrot.slane %v4598_v25, 4  ;;  %v5977_v49 = vsel %vm5844_vm1, %v5976_v47, %v5659_v43  ;;  %v48_v47 = vld [vmem:[%s11264_s1 + $0x70] sm:$0xff] }
 0x379   :  { %11928 = vst [vmem:[#allocation58_spill] sm:$0xff] %v9718_v39  ;;  %v5982_v36 = vrot.slane %v5663_v45, 4  ;;  %v4606_v58 = vsel %vm3538_vm0, %v3355_v20, 0.0  ;;  %v4605_v0 = vsel %vm3538_vm0, %v3354_v57, 0.0  ;;  %v4578_v27 = vadd.f32 %v4577_v32, %v4576_v37  ;;  %v11931_v57 = vld [vmem:[#allocation18_spill] sm:$0xff]  ;;  %v11936_v39 = vld [vmem:[#allocation21_spill] sm:$0xff] }
 0x37a   :  { %v9727_v54 = vpop.permute.xlu1 %2427  ;;  %v9729_v11 = vpop.permute.xlu0 %2423  ;;  %v5665_v61 = vand.u32 2147483647, %v5537_v18  ;;  %v4588_v19 = vrot.slane %v4587_v30, 2  ;;  %v5979_v45 = vsel %vm5847_vm2, %v5978_v16, %v5977_v49  ;;  %v5984_v20 = vrot.slane %v5664_v14, 3  ;;  %v399_v37 = vld [vmem:[%s11266_s3 + $0xa68] sm:$0xff]  ;;  %v398_v16 = vld [vmem:[%s11266_s3 + $0xa60] sm:$0xff] }
 0x37b   :  { %11929 = vst [vmem:[#allocation59_spill] sm:$0xff] %v9727_v54  ;;  %11930 = vst [vmem:[#allocation57_spill] sm:$0xff] %v9729_v11  ;;  %v3357_v43 = vmul.f32 %v11931_v57, %v397_v13  ;;  %v4608_v53 = vsel %vm3538_vm0, %v3356_v48, 0.0  ;;  %v2706_v32 = vrot.slane %v9388_v35, %v11784_v40  ;;  %v5981_v18 = vsel %vm5850_vm3, %v5980_v22, %v5979_v45  ;;  %v403_v14 = vld [vmem:[%s11266_s3 + $0xa88] sm:$0xff]  ;;  %v402_v48 = vld [vmem:[%s11266_s3 + $0xa80] sm:$0xff] }
 0x37c   :  { %2701 = vbcast.lane.b32.xlu1 %v2687_v60, 280  ;;  %2697 = vbcast.lane.b32.xlu0 %v2687_v60, 272  ;;  %v4600_v52 = vadd.f32 %v4599_v24, %v4598_v25  ;;  %v4607_v6 = vadd.f32 %v4606_v58, %v4605_v0  ;;  %v5983_v35 = vsel %vm5853_vm4, %v5982_v36, %v5981_v18  ;;  %v400_v25 = vld [vmem:[%s11266_s3 + $0xa70] sm:$0xff]  ;;  %v11934_v58 = vrot.slane %v9257_v33, 7  ;;  %v11935_v60 = vld [vmem:[#allocation17_spill] sm:$0xff] }
 0x37d   :  { %v404_v22 = vld [vmem:[%s11266_s3 + $0xa90] sm:$0xff]  ;;  %v9768_v49 = vsub.f32 %v32_v1, %v48_v47  ;;  %v5986_v45 = vrot.slane %v5665_v61, 2  ;;  %v9775_v57 = vadd.f32 %v4588_v19, %v4587_v30  ;;  %v3359_v31 = vmul.f32 %v11935_v60, %v399_v37  ;;  %v33_v30 = vld [vmem:[%s11263_s0 + $0x78] sm:$0xff] }
 0x37e   :  { %v9764_v24 = vpop.permute.xlu1 %2435  ;;  %v9766_v13 = vpop.permute.xlu0 %2431  ;;  %v9772_v0 = vadd.f32 %v11934_v58, %v4578_v27  ;;  %v4609_v18 = vadd.f32 %v4608_v53, %v4607_v6  ;;  %v5985_v50 = vsel %vm5856_vm5, %v5984_v20, %v5983_v35  ;;  %v4610_v42 = vsel %vm3538_vm0, %v3357_v43, 0.0  ;;  %v11937_v1 = vld [vmem:[#allocation27_spill] sm:$0xff]  ;;  %v11940_v19 = vld [vmem:[#allocation30_spill] sm:$0xff] }
 0x37f   :  { %11932 = vst [vmem:[#allocation62_spill] sm:$0xff] %v9764_v24  ;;  %11933 = vst [vmem:[#allocation60_spill] sm:$0xff] %v9766_v13  ;;  %v3358_v24 = vmul.f32 %v11936_v39, %v398_v16  ;;  %v3363_v47 = vmul.f32 %v11937_v1, %v403_v14  ;;  %v11938_v13 = vld [vmem:[#allocation28_spill] sm:$0xff]  ;;  %v4601_v53 = vrot.slane %v4600_v52, 2  ;;  %v11939_v27 = vld [vmem:[#allocation23_spill] sm:$0xff]  ;;  %v3364_v20 = vmul.f32 %v11940_v19, %v404_v22 }
 0x380   :  { %v3362_v33 = vmul.f32 %v11938_v13, %v402_v48  ;;  %2712 = vbcast.lane.b32.xlu1 %v2706_v32, 264  ;;  %2708 = vbcast.lane.b32.xlu0 %v2706_v32, 256  ;;  %v49_v6 = vld [vmem:[%s11264_s1 + $0x78] sm:$0xff]  ;;  %v3360_v61 = vmul.f32 %v11939_v27, %v400_v25  ;;  %v407_v16 = vld [vmem:[%s11266_s3 + $0xaa8] sm:$0xff]  ;;  %v9807_v60 = vrot.slane %v9768_v49, %v6360_v5  ;;  %v5666_v25 = vand.u32 2147483647, %v9772_v0 }
 0x381   :  { %v401_v43 = vld [vmem:[%s11266_s3 + $0xa78] sm:$0xff]  ;;  %v9811_v35 = vrot.slane %v9768_v49, %v6364_v7  ;;  %v9815_v22 = vsel %vm5859_vm6, %v5986_v45, %v5985_v50  ;;  %v4611_v58 = vadd.f32 %v4610_v42, %v4609_v18  ;;  %v406_v1 = vld [vmem:[%s11266_s3 + $0xaa0] sm:$0xff]  ;;  %v411_v27 = vld [vmem:[%s11266_s3 + $0xac8] sm:$0xff]  ;;  %v9829_v0 = vrot.slane %v9768_v49, %v11889_v41 }
 0x382   :  { %v405_v37 = vld [vmem:[%s11266_s3 + $0xa98] sm:$0xff]  ;;  %v9801_v14 = vpop.permute.xlu1 %2446  ;;  %v9803_v48 = vpop.permute.xlu0 %2442  ;;  %v410_v19 = vld [vmem:[%s11266_s3 + $0xac0] sm:$0xff]  ;;  %v9831_v50 = vsub.f32 %v33_v30, %v49_v6  ;;  %v4619_v42 = vsel %vm3538_vm0, %v3359_v31, 0.0  ;;  %v4618_v45 = vsel %vm3538_vm0, %v3358_v24, 0.0  ;;  %v4632_v18 = vsel %vm3538_vm0, %v3363_v47, 0.0  ;;  %v11943_v13 = vld [vmem:[#allocation22_spill] sm:$0xff] }
 0x383   :  { %11941 = vst [vmem:[#allocation67_spill] sm:$0xff] %v9801_v14  ;;  %11942 = vst [vmem:[#allocation70_spill] sm:$0xff] %v9803_v48  ;;  %v4631_v39 = vsel %vm3538_vm0, %v3362_v33, 0.0  ;;  %v9837_v36 = vadd.f32 %v4601_v53, %v4600_v52  ;;  %v3361_v48 = vmul.f32 %v11943_v13, %v401_v43  ;;  %v4621_v14 = vsel %vm3538_vm0, %v3360_v61, 0.0  ;;  %v408_v31 = vld [vmem:[%s11266_s3 + $0xab0] sm:$0xff] }
 0x384   :  { %2720 = vbcast.lane.b32.xlu1 %v2706_v32, 280  ;;  %2716 = vbcast.lane.b32.xlu0 %v2706_v32, 272  ;;  %v4634_v11 = vsel %vm3538_vm0, %v3364_v20, 0.0  ;;  %v412_v24 = vld [vmem:[%s11266_s3 + $0xad0] sm:$0xff]  ;;  %v3367_v47 = vmul.f32 %v9211_v4, %v407_v16  ;;  %v3366_v32 = vmul.f32 %v9213_v34, %v406_v1  ;;  %v3371_v52 = vmul.f32 %v9239_v2, %v411_v27  ;;  %v415_v34 = vld [vmem:[%s11266_s3 + $0xae8] sm:$0xff]  ;;  %v414_v4 = vld [vmem:[%s11266_s3 + $0xae0] sm:$0xff] }
 0x385   :  { %v3370_v33 = vmul.f32 %v9241_v29, %v410_v19  ;;  %v4612_v53 = vrot.slane %v4611_v58, 4  ;;  %v4620_v61 = vadd.f32 %v4619_v42, %v4618_v45  ;;  %v4633_v20 = vadd.f32 %v4632_v18, %v4631_v39  ;;  %v11945_v43 = vld [vmem:[#allocation35_spill] sm:$0xff] }
 0x386   :  { %v9852_v30 = vpop.permute.xlu1 %2454  ;;  %v9854_v6 = vpop.permute.xlu0 %2450  ;;  %v3365_v13 = vmul.f32 %v11945_v43, %v405_v37  ;;  %v3368_v54 = vmul.f32 %v9231_v21, %v408_v31  ;;  %v3372_v23 = vmul.f32 %v9263_v55, %v412_v24  ;;  %v9869_v2 = vrot.slane %v9831_v50, %v6364_v7  ;;  %v409_v16 = vld [vmem:[%s11266_s3 + $0xab8] sm:$0xff]  ;;  %v423_v24 = vld [vmem:[%s11266_s3 + $0xb28] sm:$0xff] }
 0x387   :  { %11944 = vst [vmem:[#allocation63_spill] sm:$0xff] %v9852_v30  ;;  %v9871_v29 = vrot.slane %v5666_v25, 1  ;;  %v4623_v55 = vsel %vm3538_vm0, %v3361_v48, 0.0  ;;  %v4622_v39 = vadd.f32 %v4621_v14, %v4620_v61  ;;  %v4635_v37 = vadd.f32 %v4634_v11, %v4633_v20  ;;  %v413_v1 = vld [vmem:[%s11266_s3 + $0xad8] sm:$0xff]  ;;  %v416_v11 = vld [vmem:[%s11266_s3 + $0xaf0] sm:$0xff] }
 0x388   :  { %2731 = vbcast.lane.b32.xlu1 %v9807_v60, 264  ;;  %2727 = vbcast.lane.b32.xlu0 %v9807_v60, 256  ;;  %v4645_v27 = vsel %vm3538_vm0, %v3367_v47, 0.0  ;;  %v4644_v7 = vsel %vm3538_vm0, %v3366_v32, 0.0  ;;  %v4658_v25 = vsel %vm3538_vm0, %v3371_v52, 0.0  ;;  %v4657_v19 = vsel %vm3538_vm0, %v3370_v33, 0.0 }
 0x389   :  { %v9892_v42 = vadd.f32 %v4612_v53, %v4611_v58  ;;  %v4636_v45 = vsel %vm3538_vm0, %v3365_v13, 0.0  ;;  %v3375_v18 = vmul.f32 %v9282_v26, %v415_v34  ;;  %v3374_v31 = vmul.f32 %v9284_v46, %v414_v4  ;;  %v422_v47 = vld [vmem:[%s11266_s3 + $0xb20] sm:$0xff]  ;;  %v11948_v32 = vld [vmem:[#allocation38_spill] sm:$0xff]  ;;  %v11949_v58 = vld [vmem:[#allocation31_spill] sm:$0xff] }
 0x38a   :  { %v9888_v14 = vpop.permute.xlu1 %2465  ;;  %v9890_v48 = vpop.permute.xlu0 %2461  ;;  %v3369_v52 = vmul.f32 %v11948_v32, %v409_v16  ;;  %v4647_v33 = vsel %vm3538_vm0, %v3368_v54, 0.0  ;;  %v3373_v53 = vmul.f32 %v11949_v58, %v413_v1  ;;  %v4660_v61 = vsel %vm3538_vm0, %v3372_v23, 0.0  ;;  %v424_v13 = vld [vmem:[%s11266_s3 + $0xb30] sm:$0xff]  ;;  %v11950_v4 = vld [vmem:[#allocation40_spill] sm:$0xff]  ;;  %v427_v23 = vld [vmem:[%s11266_s3 + $0xb48] sm:$0xff] }
 0x38b   :  { %11946 = vst [vmem:[#allocation61_spill] sm:$0xff] %v9888_v14  ;;  %11947 = vst [vmem:[#allocation69_spill] sm:$0xff] %v9890_v48  ;;  %v4624_v26 = vadd.f32 %v4623_v55, %v4622_v39  ;;  %v4646_v46 = vadd.f32 %v4645_v27, %v4644_v7  ;;  %v4659_v20 = vadd.f32 %v4658_v25, %v4657_v19  ;;  %v426_v55 = vld [vmem:[%s11266_s3 + $0xb40] sm:$0xff]  ;;  %v4671_v27 = vsel %vm3538_vm0, %v3375_v18, 0.0  ;;  %v417_v25 = vld [vmem:[%s11266_s3 + $0xaf8] sm:$0xff] }
 0x38c   :  { %2750 = vbcast.lane.b32.xlu1 %v9811_v35, 264  ;;  %2746 = vbcast.lane.b32.xlu0 %v9811_v35, 256  ;;  %v3376_v43 = vmul.f32 %v9307_v51, %v416_v11  ;;  %v4637_v34 = vadd.f32 %v4636_v45, %v4635_v37  ;;  %v3383_v54 = vmul.f32 %v9414_v12, %v423_v24  ;;  %v4670_v7 = vsel %vm3538_vm0, %v3374_v31, 0.0  ;;  %v11953_v24 = vld [vmem:[#allocation41_spill] sm:$0xff]  ;;  %v428_v32 = vld [vmem:[%s11266_s3 + $0xb50] sm:$0xff] }
 0x38d   :  { %v3382_v16 = vmul.f32 %v11950_v4, %v422_v47  ;;  %v9927_v1 = vrot.slane %v9768_v49, %v11900_v8  ;;  %v4648_v37 = vadd.f32 %v4647_v33, %v4646_v46  ;;  %v4661_v12 = vadd.f32 %v4660_v61, %v4659_v20  ;;  %v419_v33 = vld [vmem:[%s11266_s3 + $0xb08] sm:$0xff]  ;;  %v418_v4 = vld [vmem:[%s11266_s3 + $0xb00] sm:$0xff] }
 0x38e   :  { %v9921_v39 = vpop.permute.xlu1 %2473  ;;  %v9923_v51 = vpop.permute.xlu0 %2469  ;;  %v4614_v19 = vrot.slane %v9892_v42, 2  ;;  %v4649_v11 = vsel %vm3538_vm0, %v3369_v52, 0.0  ;;  %v4662_v45 = vsel %vm3538_vm0, %v3373_v53, 0.0  ;;  %v3384_v47 = vmul.f32 %v11953_v24, %v424_v13  ;;  %v425_v52 = vld [vmem:[%s11266_s3 + $0xb38] sm:$0xff]  ;;  %v11954_v53 = vld [vmem:[#allocation46_spill] sm:$0xff] }
 0x38f   :  { %11951 = vst [vmem:[#allocation71_spill] sm:$0xff] %v9921_v39  ;;  %11952 = vst [vmem:[#allocation72_spill] sm:$0xff] %v9923_v51  ;;  %v4625_v18 = vrot.slane %v4624_v26, 4  ;;  %v4673_v31 = vsel %vm3538_vm0, %v3376_v43, 0.0  ;;  %v3387_v58 = vmul.f32 %v9492_v56, %v427_v23  ;;  %v3386_v61 = vmul.f32 %v11954_v53, %v426_v55  ;;  %v11955_v20 = vld [vmem:[#allocation34_spill] sm:$0xff]  ;;  %v11958_v23 = vld [vmem:[#allocation33_spill] sm:$0xff] }
 0x390   :  { %2769 = vbcast.lane.b32.xlu1 %v9829_v0, 264  ;;  %2765 = vbcast.lane.b32.xlu0 %v9829_v0, 256  ;;  %v4672_v46 = vadd.f32 %v4671_v27, %v4670_v7  ;;  %v3377_v13 = vmul.f32 %v11955_v20, %v417_v25  ;;  %v4697_v43 = vsel %vm3538_vm0, %v3383_v54, 0.0  ;;  %v4696_v24 = vsel %vm3538_vm0, %v3382_v16, 0.0  ;;  %v11959_v7 = vld [vmem:[#allocation25_spill] sm:$0xff]  ;;  %v420_v53 = vld [vmem:[%s11266_s3 + $0xb10] sm:$0xff] }
 0x391   :  { %v4638_v51 = vrot.slane %v4637_v34, 4  ;;  %v4650_v30 = vadd.f32 %v4649_v11, %v4648_v37  ;;  %v4663_v56 = vadd.f32 %v4662_v45, %v4661_v12  ;;  %v3388_v55 = vmul.f32 %v11958_v23, %v428_v32  ;;  %v11960_v20 = vld [vmem:[#allocation42_spill] sm:$0xff]  ;;  %v11961_v37 = vld [vmem:[#allocation37_spill] sm:$0xff] }
 0x392   :  { %v9958_v21 = vpop.permute.xlu1 %2484  ;;  %v9960_v39 = vpop.permute.xlu0 %2480  ;;  %v4674_v27 = vadd.f32 %v4673_v31, %v4672_v46  ;;  %v3379_v25 = vmul.f32 %v11959_v7, %v419_v33  ;;  %v3385_v54 = vmul.f32 %v11960_v20, %v425_v52  ;;  %v4699_v16 = vsel %vm3538_vm0, %v3384_v47, 0.0 }
 0x393   :  { %11956 = vst [vmem:[#allocation76_spill] sm:$0xff] %v9958_v21  ;;  %11957 = vst [vmem:[#allocation9_spill] sm:$0xff] %v9960_v39  ;;  %v429_v39 = vld [vmem:[%s11266_s3 + $0xb58] sm:$0xff]  ;;  %v3378_v12 = vmul.f32 %v11961_v37, %v418_v4  ;;  %v4698_v11 = vadd.f32 %v4697_v43, %v4696_v24  ;;  %v4710_v45 = vsel %vm3538_vm0, %v3387_v58, 0.0  ;;  %v4709_v32 = vsel %vm3538_vm0, %v3386_v61, 0.0 }
 0x394   :  { %2902 = vbcast.lane.b32.xlu1 %v9869_v2, 264  ;;  %2898 = vbcast.lane.b32.xlu0 %v9869_v2, 256  ;;  %v9978_v31 = vadd.f32 %v4614_v19, %v9892_v42  ;;  %v4626_v33 = vadd.f32 %v4625_v18, %v4624_v26  ;;  %v4675_v47 = vsel %vm3538_vm0, %v3377_v13, 0.0  ;;  %v9987_v23 = vrot.slane %v9831_v50, %v11889_v41  ;;  %v11964_v4 = vld [vmem:[#allocation39_spill] sm:$0xff]  ;;  %v11965_v58 = vld [vmem:[#allocation32_spill] sm:$0xff]  ;;  %v431_v42 = vld [vmem:[%s11266_s3 + $0xb68] sm:$0xff] }
 0x395   :  { %v3380_v43 = vmul.f32 %v11964_v4, %v420_v53  ;;  %v4700_v24 = vadd.f32 %v4699_v16, %v4698_v11  ;;  %v3389_v7 = vmul.f32 %v11965_v58, %v429_v39  ;;  %v4712_v61 = vsel %vm3538_vm0, %v3388_v55, 0.0  ;;  %v430_v26 = vld [vmem:[%s11266_s3 + $0xb60] sm:$0xff]  ;;  %v421_v41 = vld [vmem:[%s11266_s3 + $0xb18] sm:$0xff] }
 0x396   :  { %v9981_v52 = vpop.permute.xlu1 %2492  ;;  %v9983_v46 = vpop.permute.xlu0 %2488  ;;  %v4639_v19 = vadd.f32 %v4638_v51, %v4637_v34  ;;  %v4651_v18 = vrot.slane %v4650_v30, 4  ;;  %v4701_v13 = vsel %vm3538_vm0, %v3385_v54, 0.0  ;;  %v4711_v53 = vadd.f32 %v4710_v45, %v4709_v32  ;;  %v432_v34 = vld [vmem:[%s11266_s3 + $0xb70] sm:$0xff]  ;;  %v11967_v11 = vld [vmem:[#allocation44_spill] sm:$0xff] }
 0x397   :  { %11962 = vst [vmem:[#allocation64_spill] sm:$0xff] %v9981_v52  ;;  %11963 = vst [vmem:[#allocation75_spill] sm:$0xff] %v9983_v46  ;;  %v4664_v39 = vrot.slane %v4663_v56, 4  ;;  %v4676_v55 = vadd.f32 %v4675_v47, %v4674_v27  ;;  %v4684_v20 = vsel %vm3538_vm0, %v3379_v25, 0.0  ;;  %v4683_v16 = vsel %vm3538_vm0, %v3378_v12, 0.0  ;;  %v11968_v32 = vld [vmem:[#allocation47_spill] sm:$0xff] }
 0x398   :  { %2784 = vbcast.lane.b32.xlu1 %v9927_v1, 256  ;;  %2754 = vbcast.lane.b32.xlu0 %v9811_v35, 272  ;;  %v11966_v51 = vrot.slane %v9837_v36, 1  ;;  %v4713_v54 = vadd.f32 %v4712_v61, %v4711_v53  ;;  %v3391_v45 = vmul.f32 %v11967_v11, %v431_v42  ;;  %v3390_v4 = vmul.f32 %v11968_v32, %v430_v26  ;;  %v11970_v25 = vld [vmem:[#allocation29_spill] sm:$0xff] }
 0x399   :  { %v3381_v47 = vmul.f32 %v11970_v25, %v421_v41  ;;  %v4686_v12 = vsel %vm3538_vm0, %v3380_v43, 0.0  ;;  %v4702_v52 = vadd.f32 %v4701_v13, %v4700_v24  ;;  %v4714_v46 = vsel %vm3538_vm0, %v3389_v7, 0.0  ;;  %v433_v43 = vld [vmem:[%s11266_s3 + $0xb78] sm:$0xff] }
 0x39a   :  { %v4604_v37 = vadd.f32 %v11966_v51, %v9837_v36  ;;  %v10014_v58 = vpop.permute.xlu1 %2503  ;;  %v10016_v27 = vpop.permute.xlu0 %2499  ;;  %v4627_v21 = vrot.slane %v4626_v33, 2  ;;  %v4640_v48 = vrot.slane %v4639_v19, 2  ;;  %v4685_v14 = vadd.f32 %v4684_v20, %v4683_v16  ;;  %v11971_v36 = vld [vmem:[#allocation45_spill] sm:$0xff] }
 0x39b   :  { %11969 = vst [vmem:[#allocation65_spill] sm:$0xff] %v10016_v27  ;;  %v3392_v61 = vmul.f32 %v11971_v36, %v432_v34  ;;  %v4616_v42 = vrot.slane %v9978_v31, 1  ;;  %v4652_v26 = vadd.f32 %v4651_v18, %v4650_v30  ;;  %v4665_v53 = vadd.f32 %v4664_v39, %v4663_v56  ;;  %v11975_v39 = vld [vmem:[#allocation8_spill] sm:$0xff] }
 0x39c   :  { %2917 = vbcast.lane.b32.xlu1 %v9987_v23, 256  ;;  %2788 = vbcast.lane.b32.xlu0 %v9927_v1, 264  ;;  %v4677_v51 = vrot.slane %v4676_v55, 4  ;;  %v4687_v24 = vadd.f32 %v4686_v12, %v4685_v14  ;;  %v4715_v7 = vadd.f32 %v4714_v46, %v4713_v54  ;;  %v4723_v41 = vsel %vm3538_vm0, %v3391_v45, 0.0  ;;  %v11976_v54 = vld [vmem:[#allocation43_spill] sm:$0xff] }
 0x39d   :  { %v4722_v13 = vsel %vm3538_vm0, %v3390_v4, 0.0  ;;  %v11974_v34 = vrot.slane %v9775_v57, 1  ;;  %v4688_v56 = vsel %vm3538_vm0, %v3381_v47, 0.0  ;;  %v4703_v18 = vrot.slane %v4702_v52, 4 }
 0x39e   :  { %v10030_v20 = vpop.permute.xlu1 %2511  ;;  %v10032_v16 = vpop.permute.xlu0 %2507  ;;  %v10040_v11 = vrot.slane %v9768_v49, %v11975_v39  ;;  %v4628_v14 = vadd.f32 %v4627_v21, %v4626_v33  ;;  %v4641_v46 = vadd.f32 %v4640_v48, %v4639_v19  ;;  %v3393_v45 = vmul.f32 %v11976_v54, %v433_v43  ;;  %v6299_v19 = vld [vmem:[%s11265_s2 + $0x50] sm:$0xff] }
 0x39f   :  { %11972 = vst [vmem:[#allocation74_spill] sm:$0xff] %v10030_v20  ;;  %11973 = vst [vmem:[#allocation77_spill] sm:$0xff] %v10032_v16  ;;  %v4591_v30 = vadd.f32 %v11974_v34, %v9775_v57  ;;  %v4725_v32 = vsel %vm3538_vm0, %v3392_v61, 0.0  ;;  %v11977_v4 = vrot.slane %v9347_v44, 1  ;;  %v4653_v25 = vrot.slane %v4652_v26, 2  ;;  %v11992_v16 = vld [vmem:[#allocation55_spill] sm:$0xff] }
 0x3a0   :  { %2773 = vbcast.lane.b32.xlu1 %v9829_v0, 272  ;;  %2921 = vbcast.lane.b32.xlu0 %v9987_v23, 264  ;;  %v4678_v47 = vadd.f32 %v4677_v51, %v4676_v55  ;;  %v4724_v12 = vadd.f32 %v4723_v41, %v4722_v13  ;;  %v4617_v36 = vadd.f32 %v4616_v42, %v9978_v31  ;;  %v4666_v34 = vrot.slane %v4665_v53, 2  ;;  %v435_v55 = vld [vmem:[%s11266_s3 + $0xb88] sm:$0xff]  ;;  %v434_v41 = vld [vmem:[%s11266_s3 + $0xb80] sm:$0xff] }
 0x3a1   :  { %v5540_v57 = vadd.f32 %v11977_v4, %v4604_v37  ;;  %v4689_v20 = vadd.f32 %v4688_v56, %v4687_v24  ;;  %v4716_v21 = vrot.slane %v4715_v7, 4  ;;  %v10056_v61 = vadd.f32 %v6299_v19, %v4591_v30  ;;  %v436_v19 = vld [vmem:[%s11266_s3 + $0xb90] sm:$0xff]  ;;  %v11984_v31 = vld [vmem:[#allocation48_spill] sm:$0xff] }
 0x3a2   :  { %v10049_v48 = vpop.permute.xlu1 %2522  ;;  %v10051_v33 = vpop.permute.xlu0 %2518  ;;  %v4704_v43 = vadd.f32 %v4703_v18, %v4702_v52  ;;  %v4726_v37 = vadd.f32 %v4725_v32, %v4724_v12  ;;  %v4629_v42 = vrot.slane %v4628_v14, 1  ;;  %v4642_v51 = vrot.slane %v4641_v46, 1 }
 0x3a3   :  { %11978 = vst [vmem:[#allocation79_spill] sm:$0xff] %v10049_v48  ;;  %11979 = vst [vmem:[#allocation73_spill] sm:$0xff] %v10051_v33  ;;  %v4727_v24 = vsel %vm3538_vm0, %v3393_v45, 0.0  ;;  %v10070_v52 = vrot.slane %v9831_v50, %v6360_v5  ;;  %v5668_v13 = vand.u32 2147483647, %v5540_v57  ;;  %v4654_v30 = vadd.f32 %v4653_v25, %v4652_v26 }
 0x3a4   :  { %2807 = vbcast.lane.b32.xlu1 %v10040_v11, 264  ;;  %2803 = vbcast.lane.b32.xlu0 %v10040_v11, 256  ;;  %v4679_v56 = vrot.slane %v4678_v47, 2  ;;  %v10075_v18 = vsel %vm5862_vm7, %v9871_v29, %v9815_v22  ;;  %v11981_v54 = vrot.slane %v9347_v44, 2  ;;  %v4667_v32 = vadd.f32 %v4666_v34, %v4665_v53  ;;  %v11985_v22 = vld [vmem:[#allocation51_spill] sm:$0xff] }
 0x3a5   :  { %11980 = vst [vmem:[#allocation83_spill] sm:$0xff] %v10075_v18  ;;  %v4690_v4 = vrot.slane %v4689_v20, 4  ;;  %v4717_v12 = vadd.f32 %v4716_v21, %v4715_v7  ;;  %v4705_v26 = vrot.slane %v4704_v43, 2  ;;  %v4728_v25 = vadd.f32 %v4727_v24, %v4726_v37  ;;  %v11986_v37 = vld [vmem:[#allocation54_spill] sm:$0xff] }
 0x3a6   :  { %v5541_v45 = vadd.f32 %v11981_v54, %v4617_v36  ;;  %v10082_v5 = vpop.permute.xlu1 %2530  ;;  %v10084_v57 = vpop.permute.xlu0 %2526  ;;  %v3395_v33 = vmul.f32 %v11984_v31, %v435_v55  ;;  %v3394_v29 = vmul.f32 %v11985_v22, %v434_v41  ;;  %v5667_v18 = vand.u32 2147483647, %v10056_v61 }
 0x3a7   :  { %11982 = vst [vmem:[#allocation78_spill] sm:$0xff] %v10082_v5  ;;  %11983 = vst [vmem:[#allocation80_spill] sm:$0xff] %v10084_v57  ;;  %v4630_v36 = vadd.f32 %v4629_v42, %v4628_v14  ;;  %v4643_v53 = vadd.f32 %v4642_v51, %v4641_v46  ;;  %v10093_v7 = vrot.slane %v9831_v50, %v11900_v8  ;;  %v5990_v34 = vrot.slane %v5668_v13, 7  ;;  %v437_v14 = vld [vmem:[%s11266_s3 + $0xb98] sm:$0xff]  ;;  %v10108_v13 = vld [vmem:[%s11265_s2 + $0x60] sm:$0xff] }
 0x3a8   :  { %2883 = vbcast.lane.b32.xlu1 %v10070_v52, 264  ;;  %2879 = vbcast.lane.b32.xlu0 %v10070_v52, 256  ;;  %v4655_v21 = vrot.slane %v4654_v30, 1  ;;  %v4680_v54 = vadd.f32 %v4679_v56, %v4678_v47  ;;  %v3396_v24 = vmul.f32 %v11986_v37, %v436_v19  ;;  %v5669_v55 = vand.u32 2147483647, %v5541_v45 }
 0x3a9   :  { %v4668_v31 = vrot.slane %v4667_v32, 1  ;;  %v4691_v41 = vadd.f32 %v4690_v4, %v4689_v20  ;;  %v4718_v22 = vrot.slane %v4717_v12, 2  ;;  %v4706_v42 = vadd.f32 %v4705_v26, %v4704_v43  ;;  %v11991_v26 = vld [vmem:[#allocation50_spill] sm:$0xff] }
 0x3aa   :  { %v10099_v46 = vpop.permute.xlu1 %2541  ;;  %v10101_v61 = vpop.permute.xlu0 %2537  ;;  %v4729_v8 = vrot.slane %v4728_v25, 4  ;;  %v4736_v51 = vsel %vm3538_vm0, %v3395_v33, 0.0  ;;  %v4735_v47 = vsel %vm3538_vm0, %v3394_v29, 0.0  ;;  %v11989_v20 = vrot.slane %v9347_v44, 3 }
 0x3ab   :  { %11987 = vst [vmem:[#allocation88_spill] sm:$0xff] %v10099_v46  ;;  %11988 = vst [vmem:[#allocation81_spill] sm:$0xff] %v10101_v61  ;;  %v11990_v45 = vrot.slane %v9347_v44, 4  ;;  %v4656_v33 = vadd.f32 %v4655_v21, %v4654_v30  ;;  %v3397_v29 = vmul.f32 %v11991_v26, %v437_v14  ;;  %v4738_v37 = vsel %vm3538_vm0, %v3396_v24, 0.0  ;;  %v440_v26 = vld [vmem:[%s11266_s3 + $0xbb0] sm:$0xff] }
 0x3ac   :  { %v5542_v56 = vadd.f32 %v11989_v20, %v4630_v36  ;;  %2936 = vbcast.lane.b32.xlu1 %v10093_v7, 256  ;;  %2906 = vbcast.lane.b32.xlu0 %v9869_v2, 272  ;;  %v439_v36 = vld [vmem:[%s11266_s3 + $0xba8] sm:$0xff]  ;;  %v4681_v20 = vrot.slane %v4680_v54, 1  ;;  %v4719_v43 = vadd.f32 %v4718_v22, %v4717_v12  ;;  %v4737_v19 = vadd.f32 %v4736_v51, %v4735_v47  ;;  %v11993_v12 = vld [vmem:[#allocation52_spill] sm:$0xff] }
 0x3ad   :  { %v5543_v4 = vadd.f32 %v11990_v45, %v4643_v53  ;;  %v438_v53 = vld [vmem:[%s11266_s3 + $0xba0] sm:$0xff]  ;;  %v4692_v45 = vrot.slane %v4691_v41, 2  ;;  %v5991_v30 = vsel %vm5844_vm1, %v5990_v34, %v5667_v18  ;;  %v5992_v21 = vrot.slane %v5669_v55, 6 }
 0x3ae   :  { %v10126_v5 = vpop.permute.xlu1 %2549  ;;  %v10128_v57 = vpop.permute.xlu0 %2545  ;;  %v4707_v24 = vrot.slane %v4706_v42, 1  ;;  %v4730_v14 = vadd.f32 %v4729_v8, %v4728_v25  ;;  %v4669_v61 = vadd.f32 %v4668_v31, %v4667_v32  ;;  %v5670_v46 = vand.u32 2147483647, %v5542_v56  ;;  %v11995_v32 = vld [vmem:[#allocation56_spill] sm:$0xff] }
 0x3af   :  { %v4739_v48 = vadd.f32 %v4738_v37, %v4737_v19  ;;  %v3399_v27 = vmul.f32 %v11992_v16, %v439_v36  ;;  %v3398_v22 = vmul.f32 %v11993_v12, %v438_v53  ;;  %v4740_v18 = vsel %vm3538_vm0, %v3397_v29, 0.0  ;;  %v441_v29 = vld [vmem:[%s11266_s3 + $0xbb8] sm:$0xff] }
 0x3b0   :  { %2735 = vbcast.lane.b32.xlu1 %v9807_v60, 272  ;;  %2940 = vbcast.lane.b32.xlu0 %v10093_v7, 264  ;;  %v4682_v34 = vadd.f32 %v4681_v20, %v4680_v54  ;;  %v11994_v25 = vrot.slane %v9347_v44, 5  ;;  %v5671_v8 = vand.u32 2147483647, %v5543_v4  ;;  %v4693_v51 = vadd.f32 %v4692_v45, %v4691_v41 }
 0x3b1   :  { %v4720_v47 = vrot.slane %v4719_v43, 1  ;;  %v3400_v31 = vmul.f32 %v11995_v32, %v440_v26  ;;  %v4708_v37 = vadd.f32 %v4707_v24, %v4706_v42  ;;  %v10152_v54 = vrot.slane %v9768_v49, %v6380_v15  ;;  %v443_v24 = vld [vmem:[%s11266_s3 + $0xbc8] sm:$0xff] }
 0x3b2   :  { %v5544_v55 = vadd.f32 %v11994_v25, %v4656_v33  ;;  %v10143_v16 = vpop.permute.xlu1 %2560  ;;  %v10145_v19 = vpop.permute.xlu0 %2556  ;;  %v11996_v41 = vrot.slane %v9347_v44, 6  ;;  %v5993_v33 = vsel %vm5847_vm2, %v5992_v21, %v5991_v30  ;;  %v4731_v36 = vrot.slane %v4730_v14, 2 }
 0x3b3   :  { %v4741_v53 = vadd.f32 %v4740_v18, %v4739_v48  ;;  %v4749_v20 = vsel %vm3538_vm0, %v3399_v27, 0.0  ;;  %v4748_v45 = vsel %vm3538_vm0, %v3398_v22, 0.0  ;;  %v5994_v42 = vrot.slane %v5670_v46, 5  ;;  %v11998_v22 = vld [vmem:[#allocation49_spill] sm:$0xff] }
 0x3b4   :  { %v5545_v4 = vadd.f32 %v11996_v41, %v4669_v61  ;;  %2792 = vbcast.lane.b32.xlu1 %v9927_v1, 272  ;;  %2758 = vbcast.lane.b32.xlu0 %v9811_v35, 280  ;;  %v442_v61 = vld [vmem:[%s11266_s3 + $0xbc0] sm:$0xff]  ;;  %v11997_v30 = vrot.slane %v9347_v44, 7  ;;  %v5672_v21 = vand.u32 2147483647, %v5544_v55  ;;  %v4721_v12 = vadd.f32 %v4720_v47, %v4719_v43 }
 0x3b5   :  { %v5996_v27 = vrot.slane %v5671_v8, 4  ;;  %v4694_v26 = vrot.slane %v4693_v51, 1  ;;  %v3401_v18 = vmul.f32 %v11998_v22, %v441_v29  ;;  %v4751_v35 = vsel %vm3538_vm0, %v3400_v31, 0.0  ;;  %v444_v44 = vld [vmem:[%s11266_s3 + $0xbd0] sm:$0xff] }
 0x3b6   :  { %v5546_v48 = vadd.f32 %v11997_v30, %v4682_v34  ;;  %v10171_v46 = vpop.permute.xlu1 %2568  ;;  %v10173_v25 = vpop.permute.xlu0 %2564  ;;  %v11999_v32 = vrot.slane %v9713_v28, 1  ;;  %v4750_v56 = vadd.f32 %v4749_v20, %v4748_v45  ;;  %v10182_v34 = vrot.slane %v9831_v50, %v11975_v39 }
 0x3b7   :  { %v5673_v43 = vand.u32 2147483647, %v5545_v4  ;;  %v4732_v55 = vadd.f32 %v4731_v36, %v4730_v14  ;;  %v4742_v8 = vrot.slane %v4741_v53, 4  ;;  %v3403_v47 = vmul.f32 %v9649_v10, %v443_v24 }
 0x3b8   :  { %v5548_v41 = vadd.f32 %v11999_v32, %v4708_v37  ;;  %v3402_v31 = vmul.f32 %v9651_v62, %v442_v61  ;;  %2826 = vbcast.lane.b32.xlu1 %v10152_v54, 264  ;;  %2822 = vbcast.lane.b32.xlu0 %v10152_v54, 256  ;;  %v4752_v37 = vadd.f32 %v4751_v35, %v4750_v56  ;;  %v5674_v29 = vand.u32 2147483647, %v5546_v48  ;;  %v445_v56 = vld [vmem:[%s11266_s3 + $0xbd8] sm:$0xff] }
 0x3b9   :  { %v5995_v20 = vsel %vm5850_vm3, %v5994_v42, %v5993_v33  ;;  %v5998_v45 = vrot.slane %v5672_v21, 3  ;;  %v4695_v30 = vadd.f32 %v4694_v26, %v4693_v51  ;;  %v12000_v39 = vrot.slane %v9713_v28, 2 }
 0x3ba   :  { %v4753_v14 = vsel %vm3538_vm0, %v3401_v18, 0.0  ;;  %v3404_v4 = vmul.f32 %v9667_v9, %v444_v44  ;;  %v10193_v10 = vpop.permute.xlu1 %2579  ;;  %v10195_v62 = vpop.permute.xlu0 %2575  ;;  %v5676_v36 = vand.u32 2147483647, %v5548_v41  ;;  %v5997_v51 = vsel %vm5853_vm4, %v5996_v27, %v5995_v20 }
 0x3bb   :  { %v5549_v22 = vadd.f32 %v12000_v39, %v4721_v12  ;;  %v6000_v42 = vrot.slane %v5673_v43, 2  ;;  %v4733_v24 = vrot.slane %v4732_v55, 1  ;;  %v4743_v61 = vadd.f32 %v4742_v8, %v4741_v53  ;;  %v487_v8 = vld [vmem:[%s11266_s3 + $0xd28] sm:$0xff] }
 0x3bc   :  { %v4762_v48 = vsel %vm3538_vm0, %v3403_v47, 0.0  ;;  %v4761_v9 = vsel %vm3538_vm0, %v3402_v31, 0.0  ;;  %2955 = vbcast.lane.b32.xlu1 %v10182_v34, 256  ;;  %2925 = vbcast.lane.b32.xlu0 %v9987_v23, 272  ;;  %v4754_v21 = vadd.f32 %v4753_v14, %v4752_v37  ;;  %v5999_v26 = vsel %vm5856_vm5, %v5998_v45, %v5997_v51  ;;  %v486_v45 = vld [vmem:[%s11266_s3 + $0xd20] sm:$0xff]  ;;  %v10231_v14 = vld [vmem:[%s11265_s2 + $0x68] sm:$0xff] }
 0x3bd   :  { %v6002_v12 = vrot.slane %v5674_v29, 1  ;;  %v5547_v35 = vadd.f32 %v4695_v30, %v9713_v28  ;;  %v5677_v27 = vand.u32 2147483647, %v5549_v22  ;;  %v3405_v32 = vmul.f32 %v9665_v3, %v445_v56 }
 0x3be   :  { %v4764_v53 = vsel %vm3538_vm0, %v3404_v4, 0.0  ;;  %v10211_v41 = vpop.permute.xlu1 %2587  ;;  %v2584_v44 = vpop.permute.xlu0 %2583  ;;  %v4763_v43 = vadd.f32 %v4762_v48, %v4761_v9  ;;  %v10218_v47 = vrot.slane %v9768_v49, %v6384_v17  ;;  %v6001_v31 = vsel %vm5859_vm6, %v6000_v42, %v5999_v26  ;;  %v447_v48 = vld [vmem:[%s11266_s3 + $0xbe8] sm:$0xff]  ;;  %v482_v9 = vld [vmem:[%s11266_s3 + $0xd00] sm:$0xff] }
 0x3bf   :  { %v6004_v29 = vrot.slane %v5676_v36, 7  ;;  %v4734_v3 = vadd.f32 %v4733_v24, %v4732_v55  ;;  %v4744_v20 = vrot.slane %v4743_v61, 2  ;;  %v4755_v39 = vrot.slane %v4754_v21, 4 }
 0x3c0   :  { %2777 = vbcast.lane.b32.xlu1 %v9829_v0, 280  ;;  %2959 = vbcast.lane.b32.xlu0 %v10182_v34, 264  ;;  %v4765_v22 = vadd.f32 %v4764_v53, %v4763_v43  ;;  %v10235_v55 = vrot.slane %v9831_v50, %v6380_v15  ;;  %v10238_v0 = vsel %vm5862_vm7, %v6002_v12, %v6001_v31  ;;  %v5675_v4 = vand.u32 2147483647, %v5547_v35  ;;  %v483_v15 = vld [vmem:[%s11266_s3 + $0xd08] sm:$0xff]  ;;  %v446_v31 = vld [vmem:[%s11266_s3 + $0xbe0] sm:$0xff] }
 0x3c1   :  { %12001 = vst [vmem:[#allocation84_spill] sm:$0xff] %v10238_v0  ;;  %v6006_v36 = vrot.slane %v5677_v27, 6  ;;  %v4766_v56 = vsel %vm3538_vm0, %v3405_v32, 0.0  ;;  %v5310_v24 = vrot.slane %v10231_v14, 1  ;;  %v10253_v35 = vrot.slane %v9768_v49, %v11784_v40  ;;  %v489_v49 = vld [vmem:[%s11266_s3 + $0xd38] sm:$0xff] }
 0x3c2   :  { %v2599_v51 = vpop.permute.xlu1 %2598  ;;  %v2595_v42 = vpop.permute.xlu0 %2594  ;;  %v10257_v27 = vrot.slane %v9831_v50, %v6384_v17  ;;  %v12002_v32 = vrot.slane %v9713_v28, 3  ;;  %v4745_v43 = vadd.f32 %v4744_v20, %v4743_v61  ;;  %v488_v17 = vld [vmem:[%s11266_s3 + $0xd30] sm:$0xff]  ;;  %v6005_v61 = vsel %vm5844_vm1, %v6004_v29, %v5675_v4 }
 0x3c3   :  { %v3447_v26 = vmul.f32 %v2599_v51, %v487_v8  ;;  %v3446_v12 = vmul.f32 %v2595_v42, %v486_v45  ;;  %v4767_v20 = vadd.f32 %v4766_v56, %v4765_v22  ;;  %v448_v45 = vld [vmem:[%s11266_s3 + $0xbf0] sm:$0xff]  ;;  %v3443_v30 = vmul.f32 %v10193_v10, %v483_v15 }
 0x3c4   :  { %v10261_v53 = vadd.f32 %v12002_v32, %v4734_v3  ;;  %2841 = vbcast.lane.b32.xlu1 %v10218_v47, 256  ;;  %2811 = vbcast.lane.b32.xlu0 %v10040_v11, 272  ;;  %v4756_v3 = vadd.f32 %v4755_v39, %v4754_v21  ;;  %v484_v51 = vld [vmem:[%s11266_s3 + $0xd10] sm:$0xff]  ;;  %v3442_v37 = vmul.f32 %v10195_v62, %v482_v9  ;;  %v491_v62 = vld [vmem:[%s11266_s3 + $0xd48] sm:$0xff] }
 0x3c5   :  { %v4905_v42 = vsel %vm3538_vm0, %v3447_v26, 0.0  ;;  %v4904_v32 = vsel %vm3538_vm0, %v3446_v12, 0.0  ;;  %v10288_v39 = vsel %vm5847_vm2, %v6006_v36, %v6005_v61  ;;  %v3407_v22 = vmul.f32 %v9680_v38, %v447_v48  ;;  %v490_v38 = vld [vmem:[%s11266_s3 + $0xd40] sm:$0xff] }
 0x3c6   :  { %v2607_v18 = vpop.permute.xlu1 %2606  ;;  %v2603_v29 = vpop.permute.xlu0 %2602  ;;  %v3406_v4 = vmul.f32 %v9682_v59, %v446_v31  ;;  %v5678_v26 = vand.u32 2147483647, %v10261_v53  ;;  %v3408_v12 = vmul.f32 %v9706_v63, %v448_v45  ;;  %v3444_v10 = vmul.f32 %v2584_v44, %v484_v51  ;;  %v449_v63 = vld [vmem:[%s11266_s3 + $0xbf8] sm:$0xff] }
 0x3c7   :  { %v3449_v56 = vmul.f32 %v2607_v18, %v489_v49  ;;  %v3448_v33 = vmul.f32 %v2603_v29, %v488_v17  ;;  %v4906_v15 = vadd.f32 %v4905_v42, %v4904_v32  ;;  %v4746_v59 = vrot.slane %v4745_v43, 1  ;;  %v485_v44 = vld [vmem:[%s11266_s3 + $0xd18] sm:$0xff]  ;;  %v12003_v29 = vld [vmem:[#allocation53_spill] sm:$0xff] }
 0x3c8   :  { %2887 = vbcast.lane.b32.xlu1 %v10070_v52, 272  ;;  %2845 = vbcast.lane.b32.xlu0 %v10218_v47, 264  ;;  %v4757_v18 = vrot.slane %v4756_v3, 2  ;;  %v4768_v36 = vrot.slane %v4767_v20, 4  ;;  %v4892_v9 = vsel %vm3538_vm0, %v3443_v30, 0.0  ;;  %v4891_v53 = vsel %vm3538_vm0, %v3442_v37, 0.0 }
 0x3c9   :  { %v4907_v48 = vsel %vm3538_vm0, %v3448_v33, 0.0  ;;  %v4909_v31 = vsel %vm3538_vm0, %v3449_v56, 0.0  ;;  %v4775_v45 = vsel %vm3538_vm0, %v3407_v22, 0.0  ;;  %v4774_v51 = vsel %vm3538_vm0, %v3406_v4, 0.0  ;;  %v493_v37 = vld [vmem:[%s11266_s3 + $0xd58] sm:$0xff]  ;;  %v492_v22 = vld [vmem:[%s11266_s3 + $0xd50] sm:$0xff] }
 0x3ca   :  { %v4908_v49 = vadd.f32 %v4907_v48, %v4906_v15  ;;  %v2618_v17 = vpop.permute.xlu1 %2617  ;;  %v2614_v61 = vpop.permute.xlu0 %2613  ;;  %v3409_v21 = vmul.f32 %v12003_v29, %v449_v63  ;;  %v4777_v8 = vsel %vm3538_vm0, %v3408_v12, 0.0  ;;  %v3445_v33 = vmul.f32 %v10211_v41, %v485_v44 }
 0x3cb   :  { %v3451_v42 = vmul.f32 %v2618_v17, %v491_v62  ;;  %v3450_v32 = vmul.f32 %v2614_v61, %v490_v38  ;;  %v4894_v30 = vsel %vm3538_vm0, %v3444_v10, 0.0  ;;  %v4893_v4 = vadd.f32 %v4892_v9, %v4891_v53  ;;  %v451_v9 = vld [vmem:[%s11266_s3 + $0xc08] sm:$0xff] }
 0x3cc   :  { %2944 = vbcast.lane.b32.xlu1 %v10093_v7, 272  ;;  %2910 = vbcast.lane.b32.xlu0 %v9869_v2, 280  ;;  %v4910_v56 = vadd.f32 %v4909_v31, %v4908_v49  ;;  %v4747_v15 = vadd.f32 %v4746_v59, %v4745_v43  ;;  %v4758_v10 = vadd.f32 %v4757_v18, %v4756_v3  ;;  %v6008_v44 = vrot.slane %v5678_v26, 5  ;;  %v495_v43 = vld [vmem:[%s11266_s3 + $0xd68] sm:$0xff]  ;;  %v494_v3 = vld [vmem:[%s11266_s3 + $0xd60] sm:$0xff] }
 0x3cd   :  { %v4918_v12 = vsel %vm3538_vm0, %v3451_v42, 0.0  ;;  %v4917_v41 = vsel %vm3538_vm0, %v3450_v32, 0.0  ;;  %v4769_v62 = vadd.f32 %v4768_v36, %v4767_v20  ;;  %v4776_v38 = vadd.f32 %v4775_v45, %v4774_v51  ;;  %v450_v26 = vld [vmem:[%s11266_s3 + $0xc00] sm:$0xff] }
 0x3ce   :  { %v2626_v63 = vpop.permute.xlu1 %2625  ;;  %v2622_v2 = vpop.permute.xlu0 %2621  ;;  %v4895_v48 = vadd.f32 %v4894_v30, %v4893_v4  ;;  %v4896_v53 = vsel %vm3538_vm0, %v3445_v33, 0.0  ;;  %v4919_v31 = vadd.f32 %v4918_v12, %v4917_v41  ;;  %v4779_v20 = vsel %vm3538_vm0, %v3409_v21, 0.0  ;;  %v12006_v12 = vld [vmem:[#allocation57_spill] sm:$0xff] }
 0x3cf   :  { %v3453_v17 = vmul.f32 %v2626_v63, %v493_v37  ;;  %v3452_v61 = vmul.f32 %v2622_v2, %v492_v22  ;;  %v4778_v29 = vadd.f32 %v4777_v8, %v4776_v38  ;;  %v10342_v8 = vrot.slane %v9831_v50, %v11784_v40  ;;  %v12005_v50 = vld [vmem:[#allocation59_spill] sm:$0xff] }
 0x3d0   :  { %2978 = vbcast.lane.b32.xlu1 %v10235_v55, 264  ;;  %2974 = vbcast.lane.b32.xlu0 %v10235_v55, 256  ;;  %v4911_v59 = vrot.slane %v4910_v56, 4  ;;  %v12004_v49 = vrot.slane %v9713_v28, 4  ;;  %v4759_v51 = vrot.slane %v4758_v10, 1  ;;  %v4770_v42 = vrot.slane %v4769_v62, 2 }
 0x3d1   :  { %v4922_v18 = vsel %vm3538_vm0, %v3453_v17, 0.0  ;;  %v4920_v36 = vsel %vm3538_vm0, %v3452_v61, 0.0  ;;  %v3411_v30 = vmul.f32 %v12005_v50, %v451_v9  ;;  %v4897_v21 = vadd.f32 %v4896_v53, %v4895_v48  ;;  %v496_v63 = vld [vmem:[%s11266_s3 + $0xd70] sm:$0xff] }
 0x3d2   :  { %v5551_v45 = vadd.f32 %v12004_v49, %v4747_v15  ;;  %v4921_v32 = vadd.f32 %v4920_v36, %v4919_v31  ;;  %v2637_v33 = vpop.permute.xlu1 %2636  ;;  %v2633_v40 = vpop.permute.xlu0 %2632  ;;  %v4780_v4 = vadd.f32 %v4779_v20, %v4778_v29  ;;  %v3410_v41 = vmul.f32 %v12006_v12, %v450_v26  ;;  %v497_v15 = vld [vmem:[%s11266_s3 + $0xd78] sm:$0xff]  ;;  %v452_v9 = vld [vmem:[%s11266_s3 + $0xc10] sm:$0xff]  ;;  %v498_v36 = vld [vmem:[%s11266_s3 + $0xd80] sm:$0xff] }
 0x3d3   :  { %v3455_v37 = vmul.f32 %v2637_v33, %v495_v43  ;;  %v3454_v22 = vmul.f32 %v2633_v40, %v494_v3  ;;  %v5313_v2 = vrot.slane %v10231_v14, 4  ;;  %v4912_v48 = vadd.f32 %v4911_v59, %v4910_v56  ;;  %v453_v49 = vld [vmem:[%s11266_s3 + $0xc18] sm:$0xff] }
 0x3d4   :  { %v4923_v38 = vadd.f32 %v4922_v18, %v4921_v32  ;;  %2796 = vbcast.lane.b32.xlu1 %v9927_v1, 280  ;;  %2739 = vbcast.lane.b32.xlu0 %v9807_v60, 280  ;;  %v10367_v1 = vsel %vm5850_vm3, %v6008_v44, %v10288_v39  ;;  %v4760_v60 = vadd.f32 %v4759_v51, %v4758_v10  ;;  %v5679_v3 = vand.u32 2147483647, %v5551_v45  ;;  %v12007_v45 = vld [vmem:[#allocation60_spill] sm:$0xff] }
 0x3d5   :  { %v4931_v17 = vsel %vm3538_vm0, %v3455_v37, 0.0  ;;  %v4930_v61 = vsel %vm3538_vm0, %v3454_v22, 0.0  ;;  %v10369_v29 = vadd.f32 %v4770_v42, %v4769_v62  ;;  %v4788_v56 = vsel %vm3538_vm0, %v3411_v30, 0.0  ;;  %v499_v62 = vld [vmem:[%s11266_s3 + $0xd88] sm:$0xff] }
 0x3d6   :  { %v4924_v53 = vrot.slane %v4923_v38, 4  ;;  %v2645_v31 = vpop.permute.xlu1 %2644  ;;  %v2641_v43 = vpop.permute.xlu0 %2640  ;;  %v4898_v20 = vrot.slane %v4897_v21, 4  ;;  %v4781_v18 = vrot.slane %v4780_v4, 4  ;;  %v4787_v39 = vsel %vm3538_vm0, %v3410_v41, 0.0 }
 0x3d7   :  { %v3457_v26 = vmul.f32 %v2645_v31, %v497_v15  ;;  %v3456_v59 = vmul.f32 %v2641_v43, %v496_v63  ;;  %v4932_v10 = vadd.f32 %v4931_v17, %v4930_v61  ;;  %v3412_v51 = vmul.f32 %v12007_v45, %v452_v9  ;;  %v455_v15 = vld [vmem:[%s11266_s3 + $0xc28] sm:$0xff] }
 0x3d8   :  { %v4925_v44 = vadd.f32 %v4924_v53, %v4923_v38  ;;  %2860 = vbcast.lane.b32.xlu1 %v10253_v35, 256  ;;  %2830 = vbcast.lane.b32.xlu0 %v10152_v54, 272  ;;  %v4913_v42 = vrot.slane %v4912_v48, 2  ;;  %v12008_v22 = vrot.slane %v9713_v28, 5  ;;  %v10394_v41 = vrot.slane %v5679_v3, 4  ;;  %v12009_v31 = vld [vmem:[#allocation62_spill] sm:$0xff] }
 0x3d9   :  { %v4935_v32 = vsel %vm3538_vm0, %v3457_v26, 0.0  ;;  %v4933_v33 = vsel %vm3538_vm0, %v3456_v59, 0.0  ;;  %v4789_v38 = vadd.f32 %v4788_v56, %v4787_v39  ;;  %v4899_v63 = vadd.f32 %v4898_v20, %v4897_v21  ;;  %v501_v21 = vld [vmem:[%s11266_s3 + $0xd98] sm:$0xff] }
 0x3da   :  { %v4926_v40 = vrot.slane %v4925_v44, 2  ;;  %v4934_v50 = vadd.f32 %v4933_v33, %v4932_v10  ;;  %v2656_v30 = vpop.permute.xlu1 %2655  ;;  %v2652_v37 = vpop.permute.xlu0 %2651  ;;  %v10392_v12 = vadd.f32 %v12008_v22, %v4760_v60  ;;  %v4772_v9 = vrot.slane %v10369_v29, 1  ;;  %v454_v60 = vld [vmem:[%s11266_s3 + $0xc20] sm:$0xff] }
 0x3db   :  { %v3459_v17 = vmul.f32 %v2656_v30, %v499_v62  ;;  %v3458_v61 = vmul.f32 %v2652_v37, %v498_v36  ;;  %v10400_v53 = vadd.f32 %v4781_v18, %v4780_v4  ;;  %v3413_v43 = vmul.f32 %v12009_v31, %v453_v49  ;;  %v500_v4 = vld [vmem:[%s11266_s3 + $0xd90] sm:$0xff]  ;;  %v459_v30 = vld [vmem:[%s11266_s3 + $0xc48] sm:$0xff]  ;;  %v458_v37 = vld [vmem:[%s11266_s3 + $0xc40] sm:$0xff] }
 0x3dc   :  { %v4936_v3 = vadd.f32 %v4935_v32, %v4934_v50  ;;  %2929 = vbcast.lane.b32.xlu1 %v9987_v23, 280  ;;  %2864 = vbcast.lane.b32.xlu0 %v10253_v35, 264  ;;  %v4790_v56 = vsel %vm3538_vm0, %v3412_v51, 0.0  ;;  %v4914_v20 = vadd.f32 %v4913_v42, %v4912_v48  ;;  %v12010_v18 = vld [vmem:[#allocation67_spill] sm:$0xff]  ;;  %v4927_v10 = vadd.f32 %v4926_v40, %v4925_v44  ;;  %v12011_v32 = vld [vmem:[#allocation70_spill] sm:$0xff] }
 0x3dd   :  { %v4944_v26 = vsel %vm3538_vm0, %v3459_v17, 0.0  ;;  %v4943_v59 = vsel %vm3538_vm0, %v3458_v61, 0.0  ;;  %v3415_v39 = vmul.f32 %v12010_v18, %v455_v15  ;;  %v456_v23 = vld [vmem:[%s11266_s3 + $0xc30] sm:$0xff]  ;;  %v3414_v33 = vmul.f32 %v12011_v32, %v454_v60  ;;  %v457_v60 = vld [vmem:[%s11266_s3 + $0xc38] sm:$0xff] }
 0x3de   :  { %v4937_v62 = vrot.slane %v4936_v3, 4  ;;  %v4945_v36 = vadd.f32 %v4944_v26, %v4943_v59  ;;  %v2664_v49 = vpop.permute.xlu1 %2663  ;;  %v2660_v45 = vpop.permute.xlu0 %2659  ;;  %v4900_v50 = vrot.slane %v4899_v63, 2  ;;  %v4791_v42 = vadd.f32 %v4790_v56, %v4789_v38  ;;  %v12012_v56 = vld [vmem:[#allocation61_spill] sm:$0xff] }
 0x3df   :  { %v3461_v51 = vmul.f32 %v2664_v49, %v501_v21  ;;  %v3460_v48 = vmul.f32 %v2660_v45, %v500_v4  ;;  %v4773_v44 = vadd.f32 %v4772_v9, %v10369_v29  ;;  %v5680_v40 = vand.u32 2147483647, %v10392_v12  ;;  %v12013_v59 = vld [vmem:[#allocation69_spill] sm:$0xff] }
 0x3e0   :  { %v4938_v22 = vadd.f32 %v4937_v62, %v4936_v3  ;;  %2993 = vbcast.lane.b32.xlu1 %v10257_v27, 256  ;;  %2963 = vbcast.lane.b32.xlu0 %v10182_v34, 272  ;;  %v3416_v15 = vmul.f32 %v9854_v6, %v456_v23  ;;  %v4915_v38 = vrot.slane %v4914_v20, 1  ;;  %v4801_v31 = vsel %vm3538_vm0, %v3415_v39, 0.0  ;;  %v460_v3 = vld [vmem:[%s11266_s3 + $0xc50] sm:$0xff] }
 0x3e1   :  { %v4948_v17 = vsel %vm3538_vm0, %v3461_v51, 0.0  ;;  %v4946_v61 = vsel %vm3538_vm0, %v3460_v48, 0.0  ;;  %v4928_v29 = vrot.slane %v4927_v10, 1  ;;  %v4800_v4 = vsel %vm3538_vm0, %v3414_v33, 0.0  ;;  %v12015_v33 = vld [vmem:[#allocation72_spill] sm:$0xff] }
 0x3e2   :  { %v4939_v9 = vrot.slane %v4938_v22, 2  ;;  %v4947_v12 = vadd.f32 %v4946_v61, %v4945_v36  ;;  %v10442_v21 = vpop.permute.xlu1 %2674  ;;  %v10444_v6 = vpop.permute.xlu0 %2670  ;;  %v3419_v26 = vmul.f32 %v12012_v56, %v459_v30  ;;  %v3418_v18 = vmul.f32 %v12013_v59, %v458_v37  ;;  %v12014_v36 = vld [vmem:[#allocation63_spill] sm:$0xff] }
 0x3e3   :  { %v4901_v39 = vadd.f32 %v4900_v50, %v4899_v63  ;;  %v4783_v23 = vrot.slane %v10400_v53, 2  ;;  %v4792_v62 = vsel %vm3538_vm0, %v3413_v43, 0.0  ;;  %v3417_v32 = vmul.f32 %v12014_v36, %v457_v60  ;;  %v461_v63 = vld [vmem:[%s11266_s3 + $0xc58] sm:$0xff] }
 0x3e4   :  { %v4940_v49 = vadd.f32 %v4939_v9, %v4938_v22  ;;  %v4949_v45 = vadd.f32 %v4948_v17, %v4947_v12  ;;  %2815 = vbcast.lane.b32.xlu1 %v10040_v11, 280  ;;  %2997 = vbcast.lane.b32.xlu0 %v10257_v27, 264  ;;  %v4803_v51 = vsel %vm3538_vm0, %v3416_v15, 0.0  ;;  %v3420_v48 = vmul.f32 %v12015_v33, %v460_v3 }
 0x3e5   :  { %v4916_v30 = vadd.f32 %v4915_v38, %v4914_v20  ;;  %v4802_v61 = vadd.f32 %v4801_v31, %v4800_v4  ;;  %v4929_v50 = vadd.f32 %v4928_v29, %v4927_v10  ;;  %v4793_v17 = vadd.f32 %v4792_v62, %v4791_v42  ;;  %v12016_v29 = vld [vmem:[#allocation71_spill] sm:$0xff] }
 0x3e6   :  { %v4941_v43 = vrot.slane %v4940_v49, 1  ;;  %v4950_v37 = vrot.slane %v4949_v45, 4  ;;  %v10459_v22 = vpop.permute.xlu1 %2682  ;;  %v10461_v11 = vpop.permute.xlu0 %2678  ;;  %v4814_v60 = vsel %vm3538_vm0, %v3419_v26, 0.0  ;;  %v4813_v15 = vsel %vm3538_vm0, %v3418_v18, 0.0  ;;  %v463_v26 = vld [vmem:[%s11266_s3 + $0xc68] sm:$0xff] }
 0x3e7   :  { %v4902_v9 = vrot.slane %v4901_v39, 1  ;;  %v4804_v3 = vadd.f32 %v4803_v51, %v4802_v61  ;;  %v4805_v31 = vsel %vm3538_vm0, %v3417_v32, 0.0  ;;  %v3421_v12 = vmul.f32 %v12016_v29, %v461_v63  ;;  %v467_v32 = vld [vmem:[%s11266_s3 + $0xc88] sm:$0xff] }
 0x3e8   :  { %v4942_v20 = vadd.f32 %v4941_v43, %v4940_v49  ;;  %v4951_v38 = vadd.f32 %v4950_v37, %v4949_v45  ;;  %2891 = vbcast.lane.b32.xlu1 %v10070_v52, 280  ;;  %2849 = vbcast.lane.b32.xlu0 %v10218_v47, 272  ;;  %v4816_v42 = vsel %vm3538_vm0, %v3420_v48, 0.0  ;;  %v5564_v4 = vadd.f32 %v5310_v24, %v4916_v30  ;;  %v462_v24 = vld [vmem:[%s11266_s3 + $0xc60] sm:$0xff] }
 0x3e9   :  { %v4815_v56 = vadd.f32 %v4814_v60, %v4813_v15  ;;  %v12017_v52 = vrot.slane %v10231_v14, 2  ;;  %v10482_v45 = vrot.slane %v5680_v40, 3  ;;  %v4784_v36 = vadd.f32 %v4783_v23, %v10400_v53  ;;  %v466_v53 = vld [vmem:[%s11266_s3 + $0xc80] sm:$0xff] }
 0x3ea   :  { %v4952_v18 = vrot.slane %v4951_v38, 2  ;;  %v10478_v62 = vpop.permute.xlu1 %2693  ;;  %v10480_v49 = vpop.permute.xlu0 %2689  ;;  %v4903_v51 = vadd.f32 %v4902_v9, %v4901_v39  ;;  %v12018_v33 = vrot.slane %v10231_v14, 3  ;;  %v12019_v30 = vrot.slane %v9713_v28, 6  ;;  %v12020_v37 = vld [vmem:[#allocation76_spill] sm:$0xff]  ;;  %v12021_v15 = vld [vmem:[#allocation9_spill] sm:$0xff] }
 0x3eb   :  { %v5565_v59 = vadd.f32 %v12017_v52, %v4929_v50  ;;  %v4806_v40 = vadd.f32 %v4805_v31, %v4804_v3  ;;  %v4817_v63 = vadd.f32 %v4816_v42, %v4815_v56  ;;  %v4794_v50 = vrot.slane %v4793_v17, 4  ;;  %v464_v3 = vld [vmem:[%s11266_s3 + $0xc70] sm:$0xff]  ;;  %v12022_v42 = vld [vmem:[#allocation65_spill] sm:$0xff] }
 0x3ec   :  { %v5566_v48 = vadd.f32 %v12018_v33, %v4942_v20  ;;  %v10495_v61 = vadd.f32 %v12019_v30, %v4773_v44  ;;  %v4953_v23 = vadd.f32 %v4952_v18, %v4951_v38  ;;  %2982 = vbcast.lane.b32.xlu1 %v10235_v55, 272  ;;  %2948 = vbcast.lane.b32.xlu0 %v10093_v7, 280  ;;  %v4818_v43 = vsel %vm3538_vm0, %v3421_v12, 0.0 }
 0x3ed   :  { %v3423_v60 = vmul.f32 %v12020_v37, %v463_v26  ;;  %v5692_v44 = vand.u32 2147483647, %v5564_v4  ;;  %v3422_v9 = vmul.f32 %v12021_v15, %v462_v24  ;;  %v3427_v20 = vmul.f32 %v10014_v58, %v467_v32  ;;  %v468_v24 = vld [vmem:[%s11266_s3 + $0xc90] sm:$0xff] }
 0x3ee   :  { %v5693_v38 = vand.u32 2147483647, %v5565_v59  ;;  %v4954_v31 = vrot.slane %v4953_v23, 1  ;;  %v10510_v29 = vpop.permute.xlu1 %2701  ;;  %v10512_v7 = vpop.permute.xlu0 %2697  ;;  %v3426_v56 = vmul.f32 %v12022_v42, %v466_v53  ;;  %v5563_v12 = vadd.f32 %v4903_v51, %v10231_v14  ;;  %v12023_v51 = vld [vmem:[#allocation75_spill] sm:$0xff] }
 0x3ef   :  { %v5694_v26 = vand.u32 2147483647, %v5566_v48  ;;  %v5681_v4 = vand.u32 2147483647, %v10495_v61  ;;  %v4807_v52 = vrot.slane %v4806_v40, 4  ;;  %v4819_v18 = vadd.f32 %v4818_v43, %v4817_v63  ;;  %v465_v63 = vld [vmem:[%s11266_s3 + $0xc78] sm:$0xff] }
 0x3f0   :  { %v4955_v58 = vadd.f32 %v4954_v31, %v4953_v23  ;;  %3016 = vbcast.lane.b32.xlu1 %v10342_v8, 264  ;;  %3012 = vbcast.lane.b32.xlu0 %v10342_v8, 256  ;;  %v4785_v59 = vrot.slane %v4784_v36, 1  ;;  %v10522_v32 = vadd.f32 %v4794_v50, %v4793_v17  ;;  %v4827_v33 = vsel %vm3538_vm0, %v3423_v60, 0.0  ;;  %v469_v60 = vld [vmem:[%s11266_s3 + $0xc98] sm:$0xff]  ;;  %v470_v31 = vld [vmem:[%s11266_s3 + $0xca0] sm:$0xff] }
 0x3f1   :  { %v3424_v48 = vmul.f32 %v12023_v51, %v464_v3  ;;  %v6032_v30 = vrot.slane %v5692_v44, 7  ;;  %v4826_v61 = vsel %vm3538_vm0, %v3422_v9, 0.0  ;;  %v4840_v53 = vsel %vm3538_vm0, %v3427_v20, 0.0  ;;  %v12024_v44 = vld [vmem:[#allocation77_spill] sm:$0xff] }
 0x3f2   :  { %v6034_v23 = vrot.slane %v5693_v38, 6  ;;  %v5567_v43 = vadd.f32 %v5313_v2, %v4955_v58  ;;  %v10533_v37 = vpop.permute.xlu1 %2712  ;;  %v10535_v17 = vpop.permute.xlu0 %2708  ;;  %v4839_v50 = vsel %vm3538_vm0, %v3426_v56, 0.0  ;;  %v3428_v15 = vmul.f32 %v12024_v44, %v468_v24  ;;  %v471_v9 = vld [vmem:[%s11266_s3 + $0xca8] sm:$0xff]  ;;  %v12025_v58 = vld [vmem:[#allocation64_spill] sm:$0xff] }
 0x3f3   :  { %v5691_v3 = vand.u32 2147483647, %v5563_v12  ;;  %v6036_v20 = vrot.slane %v5694_v26, 5  ;;  %v10545_v38 = vadd.f32 %v4807_v52, %v4806_v40  ;;  %v4820_v2 = vrot.slane %v4819_v18, 4  ;;  %v475_v40 = vld [vmem:[%s11266_s3 + $0xcc8] sm:$0xff]  ;;  %v474_v12 = vld [vmem:[%s11266_s3 + $0xcc0] sm:$0xff] }
 0x3f4   :  { %v5695_v42 = vand.u32 2147483647, %v5567_v43  ;;  %2868 = vbcast.lane.b32.xlu1 %v10253_v35, 272  ;;  %2834 = vbcast.lane.b32.xlu0 %v10152_v54, 280  ;;  %v4786_v56 = vadd.f32 %v4785_v59, %v4784_v36  ;;  %v4828_v24 = vadd.f32 %v4827_v33, %v4826_v61  ;;  %v3425_v51 = vmul.f32 %v12025_v58, %v465_v63  ;;  %v12026_v43 = vld [vmem:[#allocation74_spill] sm:$0xff]  ;;  %v12027_v61 = vld [vmem:[#allocation79_spill] sm:$0xff] }
 0x3f5   :  { %v4829_v44 = vsel %vm3538_vm0, %v3424_v48, 0.0  ;;  %v6033_v26 = vsel %vm5844_vm1, %v6032_v30, %v5691_v3  ;;  %v4841_v52 = vadd.f32 %v4840_v53, %v4839_v50  ;;  %v3429_v39 = vmul.f32 %v12026_v43, %v469_v60  ;;  %v12028_v58 = vld [vmem:[#allocation73_spill] sm:$0xff]  ;;  %v472_v30 = vld [vmem:[%s11266_s3 + $0xcb0] sm:$0xff]  ;;  %v12029_v53 = vld [vmem:[#allocation88_spill] sm:$0xff] }
 0x3f6   :  { %v10562_v54 = vpop.permute.xlu1 %2720  ;;  %v10564_v36 = vpop.permute.xlu0 %2716  ;;  %v6035_v59 = vsel %vm5847_vm2, %v6034_v23, %v6033_v26  ;;  %v6038_v33 = vrot.slane %v5695_v42, 4  ;;  %v4842_v48 = vsel %vm3538_vm0, %v3428_v15, 0.0  ;;  %v3431_v63 = vmul.f32 %v12027_v61, %v471_v9  ;;  %v12030_v60 = vld [vmem:[#allocation81_spill] sm:$0xff] }
 0x3f7   :  { %v3430_v10 = vmul.f32 %v12028_v58, %v470_v31  ;;  %v6037_v0 = vsel %vm5850_vm3, %v6036_v20, %v6035_v59  ;;  %v3435_v50 = vmul.f32 %v12029_v53, %v475_v40  ;;  %v3434_v3 = vmul.f32 %v12030_v60, %v474_v12  ;;  %v515_v23 = vld [vmem:[%s11266_s3 + $0xe08] sm:$0xff]  ;;  %v514_v15 = vld [vmem:[%s11266_s3 + $0xe00] sm:$0xff] }
 0x3f8   :  { %3001 = vbcast.lane.b32.xlu1 %v10257_v27, 272  ;;  %2967 = vbcast.lane.b32.xlu0 %v10182_v34, 280  ;;  %v10584_v9 = vrot.slane %v5681_v4, 2  ;;  %v10587_v20 = vsel %vm5853_vm4, %v6038_v33, %v6037_v0  ;;  %v4796_v31 = vrot.slane %v10522_v32, 2  ;;  %v4809_v42 = vrot.slane %v10545_v38, 2  ;;  %v476_v34 = vld [vmem:[%s11266_s3 + $0xcd0] sm:$0xff] }
 0x3f9   :  { %v10591_v40 = vadd.f32 %v4820_v2, %v4819_v18  ;;  %v12031_v12 = vrot.slane %v9713_v28, 7  ;;  %v4831_v4 = vsel %vm3538_vm0, %v3425_v51, 0.0  ;;  %v4830_v43 = vadd.f32 %v4829_v44, %v4828_v24  ;;  %v479_v33 = vld [vmem:[%s11266_s3 + $0xce8] sm:$0xff]  ;;  %v478_v18 = vld [vmem:[%s11266_s3 + $0xce0] sm:$0xff] }
 0x3fa   :  { %v4844_v0 = vsel %vm3538_vm0, %v3429_v39, 0.0  ;;  %v4843_v59 = vadd.f32 %v4842_v48, %v4841_v52  ;;  %v2732_v2 = vpop.permute.xlu1 %2731  ;;  %v2728_v61 = vpop.permute.xlu0 %2727  ;;  %v4853_v28 = vsel %vm3538_vm0, %v3431_v63, 0.0  ;;  %v12032_v24 = vld [vmem:[#allocation80_spill] sm:$0xff]  ;;  %v519_v48 = vld [vmem:[%s11266_s3 + $0xe28] sm:$0xff]  ;;  %v4852_v58 = vsel %vm3538_vm0, %v3430_v10, 0.0 }
 0x3fb   :  { %v10598_v26 = vadd.f32 %v12031_v12, %v4786_v56  ;;  %v473_v56 = vld [vmem:[%s11266_s3 + $0xcb8] sm:$0xff]  ;;  %v3432_v51 = vmul.f32 %v12032_v24, %v472_v30  ;;  %v3475_v44 = vmul.f32 %v2732_v2, %v515_v23  ;;  %v3474_v52 = vmul.f32 %v2728_v61, %v514_v15  ;;  %v518_v30 = vld [vmem:[%s11266_s3 + $0xe20] sm:$0xff] }
 0x3fc   :  { %v477_v39 = vld [vmem:[%s11266_s3 + $0xcd8] sm:$0xff]  ;;  %v4866_v63 = vsel %vm3538_vm0, %v3435_v50, 0.0  ;;  %v4865_v53 = vsel %vm3538_vm0, %v3434_v3, 0.0  ;;  %v3436_v60 = vmul.f32 %v10128_v57, %v476_v34  ;;  %2986 = vbcast.lane.b32.xlu1 %v10235_v55, 280  ;;  %2853 = vbcast.lane.b32.xlu0 %v10218_v47, 280  ;;  %v3439_v23 = vmul.f32 %v10143_v16, %v479_v33  ;;  %v12033_v55 = vld [vmem:[#allocation78_spill] sm:$0xff] }
 0x3fd   :  { %v3438_v15 = vmul.f32 %v10145_v19, %v478_v18  ;;  %v481_v10 = vld [vmem:[%s11266_s3 + $0xcf8] sm:$0xff]  ;;  %v4996_v50 = vsel %vm3538_vm0, %v3475_v44, 0.0  ;;  %v4995_v57 = vsel %vm3538_vm0, %v3474_v52, 0.0  ;;  %v10635_v3 = vadd.f32 %v4831_v4, %v4830_v43  ;;  %v523_v43 = vld [vmem:[%s11266_s3 + $0xe48] sm:$0xff] }
 0x3fe   :  { %v3433_v47 = vmul.f32 %v12033_v55, %v473_v56  ;;  %v3437_v34 = vmul.f32 %v10126_v5, %v477_v39  ;;  %v10639_v12 = vadd.f32 %v4996_v50, %v4995_v57  ;;  %v2751_v2 = vpop.permute.xlu1 %2750  ;;  %v2747_v16 = vpop.permute.xlu0 %2746  ;;  %v10641_v33 = vadd.f32 %v4844_v0, %v4843_v59  ;;  %v480_v5 = vld [vmem:[%s11266_s3 + $0xcf0] sm:$0xff]  ;;  %v522_v0 = vld [vmem:[%s11266_s3 + $0xe40] sm:$0xff]  ;;  %v511_v57 = vld [vmem:[%s11266_s3 + $0xde8] sm:$0xff] }
 0x3ff   :  { %v4855_v19 = vsel %vm3538_vm0, %v3432_v51, 0.0  ;;  %v3479_v18 = vmul.f32 %v2751_v2, %v519_v48  ;;  %v3478_v61 = vmul.f32 %v2747_v16, %v518_v30  ;;  %v4854_v24 = vadd.f32 %v4853_v28, %v4852_v58  ;;  %v503_v28 = vld [vmem:[%s11266_s3 + $0xda8] sm:$0xff]  ;;  %v504_v50 = vld [vmem:[%s11266_s3 + $0xdb0] sm:$0xff]  ;;  %v510_v55 = vld [vmem:[%s11266_s3 + $0xde0] sm:$0xff] }
 0x400   :  { %v4867_v44 = vadd.f32 %v4866_v63, %v4865_v53  ;;  %v4868_v52 = vsel %vm3538_vm0, %v3436_v60, 0.0  ;;  %v3441_v4 = vmul.f32 %v10171_v46, %v481_v10  ;;  %2872 = vbcast.lane.b32.xlu1 %v10253_v35, 280  ;;  %3020 = vbcast.lane.b32.xlu0 %v10342_v8, 272  ;;  %v4879_v59 = vsel %vm3538_vm0, %v3439_v23, 0.0  ;;  %v502_v35 = vld [vmem:[%s11266_s3 + $0xda0] sm:$0xff]  ;;  %v507_v63 = vld [vmem:[%s11266_s3 + $0xdc8] sm:$0xff] }
 0x401   :  { %v4878_v46 = vsel %vm3538_vm0, %v3438_v15, 0.0  ;;  %v5009_v56 = vsel %vm3538_vm0, %v3479_v18, 0.0  ;;  %v5008_v51 = vsel %vm3538_vm0, %v3478_v61, 0.0  ;;  %v10668_v39 = vsel %vm3538_vm0, %v3433_v47, 0.0  ;;  %v506_v53 = vld [vmem:[%s11266_s3 + $0xdc0] sm:$0xff]  ;;  %v508_v18 = vld [vmem:[%s11266_s3 + $0xdd0] sm:$0xff] }
 0x402   :  { %v10670_v48 = vadd.f32 %v4855_v19, %v4854_v24  ;;  %v10673_v58 = vsel %vm3538_vm0, %v3437_v34, 0.0  ;;  %v10681_v60 = vadd.f32 %v5009_v56, %v5008_v51  ;;  %v2770_v30 = vpop.permute.xlu1 %2769  ;;  %v2766_v23 = vpop.permute.xlu0 %2765  ;;  %v10683_v15 = vadd.f32 %v4868_v52, %v4867_v44  ;;  %v551_v61 = vld [vmem:[%s11266_s3 + $0xf28] sm:$0xff]  ;;  %v550_v24 = vld [vmem:[%s11266_s3 + $0xf20] sm:$0xff] }
 0x403   :  { %v3440_v10 = vmul.f32 %v10173_v25, %v480_v5  ;;  %v3483_v47 = vmul.f32 %v2770_v30, %v523_v43  ;;  %v3482_v34 = vmul.f32 %v2766_v23, %v522_v0  ;;  %v4880_v2 = vadd.f32 %v4879_v59, %v4878_v46  ;;  %v513_v30 = vld [vmem:[%s11266_s3 + $0xdf8] sm:$0xff] }
 0x404   :  { %v10696_v16 = vsel %vm3538_vm0, %v3441_v4, 0.0  ;;  %v3463_v25 = vmul.f32 %v10442_v21, %v503_v28  ;;  %v3462_v19 = vmul.f32 %v10444_v6, %v502_v35  ;;  %3024 = vbcast.lane.b32.xlu1 %v10342_v8, 280  ;;  %3005 = vbcast.lane.b32.xlu0 %v10257_v27, 280  ;;  %v505_v21 = vld [vmem:[%s11266_s3 + $0xdb8] sm:$0xff]  ;;  %v3467_v6 = vmul.f32 %v10478_v62, %v507_v63  ;;  %v512_v27 = vld [vmem:[%s11266_s3 + $0xdf0] sm:$0xff] }
 0x405   :  { %v3466_v44 = vmul.f32 %v10480_v49, %v506_v53  ;;  %v5022_v8 = vsel %vm3538_vm0, %v3483_v47, 0.0  ;;  %v5021_v52 = vsel %vm3538_vm0, %v3482_v34, 0.0  ;;  %v3464_v4 = vmul.f32 %v10461_v11, %v504_v50  ;;  %v520_v63 = vld [vmem:[%s11266_s3 + $0xe30] sm:$0xff] }
 0x406   :  { %v3471_v5 = vmul.f32 %v10533_v37, %v511_v57  ;;  %v3470_v43 = vmul.f32 %v10535_v17, %v510_v55  ;;  %v10724_v0 = vadd.f32 %v5022_v8, %v5021_v52  ;;  %v2903_v59 = vpop.permute.xlu1 %2902  ;;  %v2899_v62 = vpop.permute.xlu0 %2898  ;;  %v4881_v49 = vsel %vm3538_vm0, %v3440_v10, 0.0  ;;  %v509_v37 = vld [vmem:[%s11266_s3 + $0xdd8] sm:$0xff]  ;;  %v526_v55 = vld [vmem:[%s11266_s3 + $0xe60] sm:$0xff] }
 0x407   :  { %v3468_v46 = vmul.f32 %v10512_v7, %v508_v18  ;;  %v3511_v28 = vmul.f32 %v2903_v59, %v551_v61  ;;  %v3510_v35 = vmul.f32 %v2899_v62, %v550_v24  ;;  %v4957_v56 = vsel %vm3538_vm0, %v3463_v25, 0.0 }
 0x408   :  { %v4956_v51 = vsel %vm3538_vm0, %v3462_v19, 0.0  ;;  %v3465_v11 = vmul.f32 %v10459_v22, %v505_v21  ;;  %v3472_v17 = vmul.f32 %v10564_v36, %v512_v27  ;;  %v4970_v7 = vsel %vm3538_vm0, %v3467_v6, 0.0  ;;  %v527_v27 = vld [vmem:[%s11266_s3 + $0xe68] sm:$0xff] }
 0x409   :  { %v4969_v53 = vsel %vm3538_vm0, %v3466_v44, 0.0  ;;  %v5113_v22 = vsel %vm3538_vm0, %v3511_v28, 0.0  ;;  %v5112_v23 = vsel %vm3538_vm0, %v3510_v35, 0.0  ;;  %v4959_v10 = vsel %vm3538_vm0, %v3464_v4, 0.0 }
 0x40a   :  { %v4983_v36 = vsel %vm3538_vm0, %v3471_v5, 0.0  ;;  %v4982_v50 = vsel %vm3538_vm0, %v3470_v43, 0.0  ;;  %v10748_v57 = vadd.f32 %v5113_v22, %v5112_v23  ;;  %v2785_v47 = vpop.permute.xlu1 %2784  ;;  %v2755_v34 = vpop.permute.xlu0 %2754  ;;  %v4958_v25 = vadd.f32 %v4957_v56, %v4956_v51 }
 0x40b   :  { %v3469_v19 = vmul.f32 %v10510_v29, %v509_v37  ;;  %v4972_v18 = vsel %vm3538_vm0, %v3468_v46, 0.0  ;;  %v3480_v61 = vmul.f32 %v2755_v34, %v520_v63  ;;  %v4882_v24 = vadd.f32 %v4881_v49, %v4880_v2 }
 0x40c   :  { %v4971_v21 = vadd.f32 %v4970_v7, %v4969_v53  ;;  %v3473_v6 = vmul.f32 %v10562_v54, %v513_v30  ;;  %v4985_v44 = vsel %vm3538_vm0, %v3472_v17, 0.0  ;;  %v4960_v8 = vadd.f32 %v4959_v10, %v4958_v25  ;;  %v554_v54 = vld [vmem:[%s11266_s3 + $0xf40] sm:$0xff] }
 0x40d   :  { %v4984_v52 = vadd.f32 %v4983_v36, %v4982_v50  ;;  %v3486_v4 = vmul.f32 %v2785_v47, %v526_v55  ;;  %v5011_v5 = vsel %vm3538_vm0, %v3480_v61, 0.0  ;;  %v4858_v29 = vadd.f32 %v10668_v39, %v10670_v48 }
 0x40e   :  { %v4961_v43 = vsel %vm3538_vm0, %v3465_v11, 0.0  ;;  %v4973_v2 = vadd.f32 %v4972_v18, %v4971_v21  ;;  %v10765_v59 = vadd.f32 %v5011_v5, %v10681_v60  ;;  %v2918_v62 = vpop.permute.xlu1 %2917  ;;  %v2789_v49 = vpop.permute.xlu0 %2788  ;;  %v4871_v46 = vadd.f32 %v10673_v58, %v10683_v15  ;;  %v524_v11 = vld [vmem:[%s11266_s3 + $0xe50] sm:$0xff]  ;;  %v555_v58 = vld [vmem:[%s11266_s3 + $0xf48] sm:$0xff] }
 0x40f   :  { %v4974_v28 = vsel %vm3538_vm0, %v3469_v19, 0.0  ;;  %v4986_v35 = vadd.f32 %v4985_v44, %v4984_v52  ;;  %v3487_v56 = vmul.f32 %v2789_v49, %v527_v27  ;;  %v4833_v39 = vrot.slane %v10635_v3, 4 }
 0x410   :  { %v4846_v48 = vrot.slane %v10641_v33, 4  ;;  %v4884_v60 = vadd.f32 %v10696_v16, %v4882_v24  ;;  %v4987_v51 = vsel %vm3538_vm0, %v3473_v6, 0.0  ;;  %v4962_v15 = vadd.f32 %v4961_v43, %v4960_v8 }
 0x411   :  { %v5034_v37 = vsel %vm3538_vm0, %v3486_v4, 0.0  ;;  %v3514_v17 = vmul.f32 %v2918_v62, %v554_v54  ;;  %v5035_v63 = vsel %vm3538_vm0, %v3487_v56, 0.0  ;;  %v4810_v16 = vadd.f32 %v4809_v42, %v10545_v38  ;;  %v531_v38 = vld [vmem:[%s11266_s3 + $0xe88] sm:$0xff]  ;;  %v530_v42 = vld [vmem:[%s11266_s3 + $0xe80] sm:$0xff] }
 0x412   :  { %v4859_v7 = vrot.slane %v4858_v29, 4  ;;  %v4975_v53 = vadd.f32 %v4974_v28, %v4973_v2  ;;  %v10788_v30 = vadd.f32 %v5035_v63, %v5034_v37  ;;  %v2774_v22 = vpop.permute.xlu1 %2773  ;;  %v2922_v23 = vpop.permute.xlu0 %2921  ;;  %v4872_v10 = vrot.slane %v4871_v46, 4 }
 0x413   :  { %v4988_v36 = vadd.f32 %v4987_v51, %v4986_v35  ;;  %v3484_v50 = vmul.f32 %v2774_v22, %v524_v11  ;;  %v3515_v55 = vmul.f32 %v2922_v23, %v555_v58  ;;  %v4822_v47 = vrot.slane %v10591_v40, 2 }
 0x414   :  { %v4834_v34 = vadd.f32 %v4833_v39, %v10635_v3  ;;  %v4847_v25 = vadd.f32 %v4846_v48, %v10641_v33  ;;  %v4885_v19 = vrot.slane %v4884_v60, 4  ;;  %v4963_v18 = vrot.slane %v4962_v15, 4 }
 0x415   :  { %v5125_v61 = vsel %vm3538_vm0, %v3514_v17, 0.0  ;;  %v5024_v24 = vsel %vm3538_vm0, %v3484_v50, 0.0  ;;  %v5126_v21 = vsel %vm3538_vm0, %v3515_v55, 0.0  ;;  %v4860_v6 = vadd.f32 %v4859_v7, %v4858_v29  ;;  %v547_v29 = vld [vmem:[%s11266_s3 + $0xf08] sm:$0xff] }
 0x416   :  { %v4976_v3 = vrot.slane %v4975_v53, 4  ;;  %v10803_v33 = vadd.f32 %v5024_v24, %v10724_v0  ;;  %v10805_v44 = vadd.f32 %v5126_v21, %v5125_v61  ;;  %v2808_v27 = vpop.permute.xlu1 %2807  ;;  %v2804_v8 = vpop.permute.xlu0 %2803  ;;  %v4873_v52 = vadd.f32 %v4872_v10, %v4871_v46  ;;  %v546_v0 = vld [vmem:[%s11266_s3 + $0xf00] sm:$0xff]  ;;  %v10834_v24 = vld [vmem:[%s11265_s2 + $0x68] sm:$0xff] }
 0x417   :  { %v4989_v4 = vrot.slane %v4988_v36, 4  ;;  %v3491_v5 = vmul.f32 %v2808_v27, %v531_v38  ;;  %v3490_v43 = vmul.f32 %v2804_v8, %v530_v42  ;;  %v4823_v2 = vadd.f32 %v4822_v47, %v10591_v40  ;;  %v516_v8 = vld [vmem:[%s11266_s3 + $0xe10] sm:$0xff] }
 0x418   :  { %v4835_v54 = vrot.slane %v4834_v34, 2  ;;  %v4848_v62 = vrot.slane %v4847_v25, 2  ;;  %v4886_v49 = vadd.f32 %v4885_v19, %v4884_v60  ;;  %v4797_v46 = vadd.f32 %v4796_v31, %v10522_v32  ;;  %v552_v31 = vld [vmem:[%s11266_s3 + $0xf30] sm:$0xff] }
 0x419   :  { %v4964_v28 = vadd.f32 %v4963_v18, %v4962_v15  ;;  %v5048_v35 = vsel %vm3538_vm0, %v3491_v5, 0.0  ;;  %v5047_v40 = vsel %vm3538_vm0, %v3490_v43, 0.0  ;;  %v4811_v56 = vrot.slane %v4810_v16, 1 }
 0x41a   :  { %v4861_v39 = vrot.slane %v4860_v6, 2  ;;  %v4977_v48 = vadd.f32 %v4976_v3, %v4975_v53  ;;  %v10819_v60 = vadd.f32 %v5048_v35, %v5047_v40  ;;  %v2884_v51 = vpop.permute.xlu1 %2883  ;;  %v2880_v11 = vpop.permute.xlu0 %2879  ;;  %v4874_v58 = vrot.slane %v4873_v52, 2 }
 0x41b   :  { %v4990_v37 = vadd.f32 %v4989_v4, %v4988_v36  ;;  %v3507_v17 = vmul.f32 %v2884_v51, %v547_v29  ;;  %v3506_v63 = vmul.f32 %v2880_v11, %v546_v0  ;;  %v4824_v7 = vrot.slane %v4823_v2, 1 }
 0x41c   :  { %v4836_v22 = vadd.f32 %v4835_v54, %v4834_v34  ;;  %v4849_v23 = vadd.f32 %v4848_v62, %v4847_v25  ;;  %v4887_v32 = vrot.slane %v4886_v49, 2  ;;  %v4798_v15 = vrot.slane %v4797_v46, 1  ;;  %v558_v34 = vld [vmem:[%s11266_s3 + $0xf60] sm:$0xff] }
 0x41d   :  { %v4965_v10 = vrot.slane %v4964_v28, 2  ;;  %v5100_v53 = vsel %vm3538_vm0, %v3507_v17, 0.0  ;;  %v5099_v50 = vsel %vm3538_vm0, %v3506_v63, 0.0  ;;  %v4812_v55 = vadd.f32 %v4811_v56, %v4810_v16 }
 0x41e   :  { %v4862_v47 = vadd.f32 %v4861_v39, %v4860_v6  ;;  %v4978_v19 = vrot.slane %v4977_v48, 2  ;;  %v10826_v36 = vadd.f32 %v5100_v53, %v5099_v50  ;;  %v2937_v25 = vpop.permute.xlu1 %2936  ;;  %v2907_v38 = vpop.permute.xlu0 %2906  ;;  %v4875_v42 = vadd.f32 %v4874_v58, %v4873_v52  ;;  %v559_v52 = vld [vmem:[%s11266_s3 + $0xf68] sm:$0xff] }
 0x41f   :  { %v4991_v18 = vrot.slane %v4990_v37, 2  ;;  %v3512_v61 = vmul.f32 %v2907_v38, %v552_v31  ;;  %v5316_v16 = vrot.slane %v10834_v24, 7  ;;  %v4825_v21 = vadd.f32 %v4824_v7, %v4823_v2  ;;  %v12037_v38 = vld [vmem:[#allocation66_spill] sm:$0xff] }
 0x420   :  { %v4837_v6 = vrot.slane %v4836_v22, 1  ;;  %v4850_v3 = vrot.slane %v4849_v23, 1  ;;  %v4888_v27 = vadd.f32 %v4887_v32, %v4886_v49  ;;  %v4799_v4 = vadd.f32 %v4798_v15, %v4797_v46  ;;  %v12035_v46 = vld [vmem:[#allocation26_spill] sm:$0xff] }
 0x421   :  { %v4966_v5 = vadd.f32 %v4965_v10, %v4964_v28  ;;  %v3518_v43 = vmul.f32 %v2937_v25, %v558_v34  ;;  %v5115_v54 = vsel %vm3538_vm0, %v3512_v61, 0.0  ;;  %v12034_v62 = vrot.slane %v10108_v13, 1 }
 0x422   :  { %v4863_v2 = vrot.slane %v4862_v47, 1  ;;  %v4979_v0 = vadd.f32 %v4978_v19, %v4977_v48  ;;  %v10849_v49 = vadd.f32 %v5115_v54, %v10748_v57  ;;  %v2736_v35 = vpop.permute.xlu1 %2735  ;;  %v2941_v40 = vpop.permute.xlu0 %2940  ;;  %v4876_v56 = vrot.slane %v4875_v42, 1  ;;  %v528_v48 = vld [vmem:[%s11266_s3 + $0xe70] sm:$0xff]  ;;  %v521_v57 = vld [vmem:[%s11266_s3 + $0xe38] sm:$0xff] }
 0x423   :  { %v10846_v29 = vadd.f32 %v12034_v62, %v4812_v55  ;;  %v4992_v39 = vadd.f32 %v4991_v18, %v4990_v37  ;;  %v3476_v51 = vmul.f32 %v2736_v35, %v516_v8  ;;  %v3519_v11 = vmul.f32 %v2941_v40, %v559_v52  ;;  %6091 = vadd.xlane.f32.xlu0 %v12035_v46  ;;  %v534_v8 = vld [vmem:[%s11266_s3 + $0xea0] sm:$0xff] }
 0x424   :  { %v12036_v28 = vrot.slane %v10108_v13, 2  ;;  %v4838_v17 = vadd.f32 %v4837_v6, %v4836_v22  ;;  %v4851_v63 = vadd.f32 %v4850_v3, %v4849_v23  ;;  %v4889_v7 = vrot.slane %v4888_v27, 1  ;;  %v12039_v3 = vld [vmem:[#allocation68_spill] sm:$0xff] }
 0x425   :  { %v4967_v32 = vrot.slane %v4966_v5, 1  ;;  %v5138_v37 = vsel %vm3538_vm0, %v3518_v43, 0.0  ;;  %v4998_v31 = vsel %vm3538_vm0, %v3476_v51, 0.0  ;;  %v5139_v15 = vsel %vm3538_vm0, %v3519_v11, 0.0 }
 0x426   :  { %v5557_v58 = vadd.f32 %v12036_v28, %v4825_v21  ;;  %v4864_v10 = vadd.f32 %v4863_v2, %v4862_v47  ;;  %v4980_v53 = vrot.slane %v4979_v0, 1  ;;  %v10864_v22 = vadd.f32 %v4998_v31, %v10639_v12  ;;  %v2793_v50 = vpop.permute.xlu1 %2792  ;;  %v2759_v55 = vpop.permute.xlu0 %2758  ;;  %v535_v12 = vld [vmem:[%s11266_s3 + $0xea8] sm:$0xff] }
 0x427   :  { %v10866_v23 = vadd.f32 %v5139_v15, %v5138_v37  ;;  %v4993_v19 = vrot.slane %v4992_v39, 1  ;;  %v3488_v34 = vmul.f32 %v2793_v50, %v528_v48  ;;  %v3481_v25 = vmul.f32 %v2759_v55, %v521_v57  ;;  %6097 = vadd.xlane.f32.xlu0 %v12037_v38  ;;  %v12044_v48 = vld [vmem:[#allocation114_spill] sm:$0xff] }
 0x428   :  { %v4877_v18 = vadd.f32 %v4876_v56, %v4875_v42  ;;  %v5684_v61 = vand.u32 2147483647, %v10846_v29  ;;  %v5685_v21 = vand.u32 2147483647, %v5557_v58  ;;  %v12038_v6 = vrot.slane %v10108_v13, 3  ;;  %6094 = vadd.xlane.f32.xlu1 %v12039_v3  ;;  %v12042_v58 = vld [vmem:[#allocation97_spill] sm:$0xff] }
 0x429   :  { %v4890_v52 = vadd.f32 %v4889_v7, %v4888_v27  ;;  %v12040_v43 = vrot.slane %v10108_v13, 4  ;;  %v4968_v54 = vadd.f32 %v4967_v32, %v4966_v5  ;;  %v5037_v62 = vsel %vm3538_vm0, %v3488_v34, 0.0  ;;  %v556_v57 = vld [vmem:[%s11266_s3 + $0xf50] sm:$0xff] }
 0x42a   :  { %v5558_v47 = vadd.f32 %v12038_v6, %v4838_v17  ;;  %v5013_v29 = vsel %vm3538_vm0, %v3481_v25, 0.0  ;;  %v4981_v2 = vadd.f32 %v4980_v53, %v4979_v0  ;;  %v10884_v35 = vadd.f32 %v5037_v62, %v10788_v30  ;;  %v2827_v56 = vpop.permute.xlu1 %2826  ;;  %v2823_v51 = vpop.permute.xlu0 %2822  ;;  %v6301_v30 = vld [vmem:[%s11265_s2 + $0x60] sm:$0xff] }
 0x42b   :  { %v5559_v42 = vadd.f32 %v12040_v43, %v4851_v63  ;;  %v10887_v40 = vadd.f32 %v5013_v29, %v10765_v59  ;;  %v12041_v11 = vrot.slane %v10108_v13, 5  ;;  %v3495_v46 = vmul.f32 %v2827_v56, %v535_v12  ;;  %6100 = vadd.xlane.f32.xlu0 %v12042_v58 }
 0x42c   :  { %v3494_v28 = vmul.f32 %v2823_v51, %v534_v8  ;;  %v12043_v5 = vrot.slane %v10108_v13, 6  ;;  %v4994_v63 = vadd.f32 %v4993_v19, %v4992_v39  ;;  %v5555_v0 = vadd.f32 %v6301_v30, %v4799_v4  ;;  %6103 = vadd.xlane.f32.xlu1 %v12044_v48  ;;  %v525_v8 = vld [vmem:[%s11266_s3 + $0xe58] sm:$0xff] }
 0x42d   :  { %v5560_v27 = vadd.f32 %v12041_v11, %v4864_v10  ;;  %v5686_v59 = vand.u32 2147483647, %v5558_v47  ;;  %v5682_v7 = vand.u32 2147483647, %v10598_v26  ;;  %v12045_v32 = vrot.slane %v10108_v13, 7  ;;  %v12050_v11 = vld [vmem:[#allocation36_spill] sm:$0xff] }
 0x42e   :  { %v5561_v17 = vadd.f32 %v12043_v5, %v4877_v18  ;;  %v5061_v31 = vsel %vm3538_vm0, %v3495_v46, 0.0  ;;  %v5060_v39 = vsel %vm3538_vm0, %v3494_v28, 0.0  ;;  %v5687_v15 = vand.u32 2147483647, %v5559_v42  ;;  %v10910_v55 = vpop.permute.xlu1 %2955  ;;  %v2926_v19 = vpop.permute.xlu0 %2925  ;;  %v12048_v18 = vld [vmem:[#allocation131_spill] sm:$0xff]  ;;  %v12051_v46 = vld [vmem:[#allocation58_spill] sm:$0xff] }
 0x42f   :  { %v5562_v37 = vadd.f32 %v12045_v32, %v4890_v52  ;;  %v12046_v10 = vrot.slane %v10231_v14, 5  ;;  %v6018_v53 = vrot.slane %v5684_v61, 7  ;;  %v10908_v50 = vadd.f32 %v5061_v31, %v5060_v39  ;;  %6106 = vadd.xlane.f32.xlu0 %v12048_v18  ;;  %v12049_v61 = vld [vmem:[#allocation24_spill] sm:$0xff]  ;;  %v12052_v28 = vld [vmem:[#allocation83_spill] sm:$0xff] }
 0x430   :  { %v5688_v34 = vand.u32 2147483647, %v5560_v27  ;;  %v12047_v26 = vrot.slane %v10231_v14, 6  ;;  %v6020_v13 = vrot.slane %v5685_v21, 6  ;;  %v3516_v38 = vmul.f32 %v2926_v19, %v556_v57  ;;  %6109 = vadd.xlane.f32.xlu1 %v12049_v61 }
 0x431   :  { %v5568_v4 = vadd.f32 %v12046_v10, %v4968_v54  ;;  %v5689_v6 = vand.u32 2147483647, %v5561_v17  ;;  %v5570_v47 = vadd.f32 %v5316_v16, %v4994_v63  ;;  %v5683_v3 = vand.u32 2147483647, %v5555_v0 }
 0x432   :  { %v5569_v25 = vadd.f32 %v12047_v26, %v4981_v2  ;;  %v6022_v12 = vrot.slane %v5686_v59, 5  ;;  %v6011_v14 = vsel %vm5853_vm4, %v10394_v41, %v10367_v1  ;;  %v5690_v21 = vand.u32 2147483647, %v5562_v37  ;;  %v2778_v16 = vpop.permute.xlu1 %2777  ;;  %v10928_v62 = vpop.permute.xlu0 %2959 }
 0x433   :  { %v5128_v52 = vsel %vm3538_vm0, %v3516_v38, 0.0  ;;  %v6016_v43 = vrot.slane %v5682_v7, 1  ;;  %v6024_v42 = vrot.slane %v5687_v15, 4  ;;  %v5696_v54 = vand.u32 2147483647, %v5568_v4  ;;  %6112 = vadd.xlane.f32.xlu0 %v12050_v11  ;;  %v12053_v7 = vld [vmem:[#allocation84_spill] sm:$0xff] }
 0x434   :  { %v10926_v24 = vadd.f32 %v5128_v52, %v10805_v44  ;;  %v6019_v29 = vsel %vm5844_vm1, %v6018_v53, %v5683_v3  ;;  %v6026_v2 = vrot.slane %v5688_v34, 3  ;;  %v5697_v56 = vand.u32 2147483647, %v5569_v25  ;;  %6115 = vadd.xlane.f32.xlu1 %v12051_v46 }
 0x435   :  { %v3485_v51 = vmul.f32 %v2778_v16, %v525_v8  ;;  %v6021_v1 = vsel %vm5847_vm2, %v6020_v13, %v6019_v29  ;;  %v6028_v41 = vrot.slane %v5689_v6, 2  ;;  %v5698_v27 = vand.u32 2147483647, %v5570_v47  ;;  %v517_v16 = vld [vmem:[%s11266_s3 + $0xe18] sm:$0xff]  ;;  %v10987_v29 = vld [vmem:[%s11265_s2 + $0x70] sm:$0xff] }
 0x436   :  { %v6117_v44 = vsel %vm3538_vm0, %v12052_v28, 0.0  ;;  %v6013_v58 = vsel %vm5856_vm5, %v10482_v45, %v6011_v14  ;;  %v6023_v5 = vsel %vm5850_vm3, %v6022_v12, %v6021_v1  ;;  %v6030_v17 = vrot.slane %v5690_v21, 1  ;;  %v10942_v48 = vpop.permute.xlu1 %2841  ;;  %v10944_v57 = vpop.permute.xlu0 %2811  ;;  %v562_v1 = vld [vmem:[%s11266_s3 + $0xf80] sm:$0xff] }
 0x437   :  { %v5015_v63 = vrot.slane %v10887_v40, 4  ;;  %v5026_v30 = vsel %vm3538_vm0, %v3485_v51, 0.0  ;;  %v6025_v0 = vsel %vm5853_vm4, %v6024_v42, %v6023_v5  ;;  %v6040_v59 = vrot.slane %v5696_v54, 3  ;;  %6118 = vadd.xlane.f32.xlu0 %v6117_v44  ;;  %v529_v54 = vld [vmem:[%s11266_s3 + $0xe78] sm:$0xff] }
 0x438   :  { %v6120_v32 = vsel %vm3538_vm0, %v12053_v7, 0.0  ;;  %v6015_v45 = vsel %vm5859_vm6, %v10584_v9, %v6013_v58  ;;  %v6027_v37 = vsel %vm5856_vm5, %v6026_v2, %v6025_v0  ;;  %v6042_v31 = vrot.slane %v5697_v56, 2 }
 0x439   :  { %v5027_v39 = vadd.f32 %v5026_v30, %v10803_v33  ;;  %v6017_v15 = vsel %vm5862_vm7, %v6016_v43, %v6015_v45  ;;  %v6029_v10 = vsel %vm5859_vm6, %v6028_v41, %v6027_v37  ;;  %v6044_v4 = vrot.slane %v5698_v27, 1  ;;  %6121 = vadd.xlane.f32.xlu1 %v6120_v32 }
 0x43a   :  { %v6031_v53 = vsel %vm5862_vm7, %v6030_v17, %v6029_v10  ;;  %v5016_v19 = vadd.f32 %v5015_v63, %v10887_v40  ;;  %v6041_v34 = vsel %vm5856_vm5, %v6040_v59, %v10587_v20  ;;  %v10958_v9 = vpop.permute.xlu1 %2887  ;;  %v10960_v26 = vpop.permute.xlu0 %2845  ;;  %v6123_v33 = vsel %vm3538_vm0, %v6017_v15, 0.0  ;;  %v553_v40 = vld [vmem:[%s11266_s3 + $0xf38] sm:$0xff]  ;;  %v563_v17 = vld [vmem:[%s11266_s3 + $0xf88] sm:$0xff]  ;;  %v532_v63 = vld [vmem:[%s11266_s3 + $0xe90] sm:$0xff] }
 0x43b   :  { %v6043_v25 = vsel %vm5859_vm6, %v6042_v31, %v6041_v34  ;;  %v5028_v13 = vrot.slane %v5027_v39, 4  ;;  %6124 = vadd.xlane.f32.xlu0 %v6123_v33  ;;  %v6126_v38 = vsel %vm3538_vm0, %v6031_v53, 0.0  ;;  %v5317_v28 = vrot.slane %v10987_v29, 1  ;;  %v548_v10 = vld [vmem:[%s11266_s3 + $0xf10] sm:$0xff]  ;;  %v539_v34 = vld [vmem:[%s11266_s3 + $0xec8] sm:$0xff] }
 0x43c   :  { %v6045_v18 = vsel %vm5862_vm7, %v6044_v4, %v6043_v25  ;;  %v5017_v20 = vrot.slane %v5016_v19, 2  ;;  %v5318_v44 = vrot.slane %v10987_v29, 2  ;;  %v3522_v7 = vmul.f32 %v10910_v55, %v562_v1 }
 0x43d   :  { %6127 = vadd.xlane.f32.xlu1 %v6126_v38  ;;  %v6129_v3 = vsel %vm3538_vm0, %v6045_v18, 0.0  ;;  %v5029_v12 = vadd.f32 %v5028_v13, %v5027_v39  ;;  %v5319_v32 = vrot.slane %v10987_v29, 3  ;;  %v5320_v53 = vrot.slane %v10987_v29, 4  ;;  %v557_v13 = vld [vmem:[%s11266_s3 + $0xf58] sm:$0xff] }
 0x43e   :  { %v10969_v6 = vpop.permute.xlu1 %2944  ;;  %v2911_v47 = vpop.permute.xlu0 %2910  ;;  %v5018_v8 = vadd.f32 %v5017_v20, %v5016_v19  ;;  %v3523_v19 = vmul.f32 %v10928_v62, %v563_v17  ;;  %v5321_v62 = vrot.slane %v10987_v29, 5  ;;  %v5151_v20 = vsel %vm3538_vm0, %v3522_v7, 0.0 }
 0x43f   :  { %v3513_v61 = vmul.f32 %v2911_v47, %v553_v40  ;;  %6130 = vadd.xlane.f32.xlu0 %v6129_v3  ;;  %v5030_v42 = vrot.slane %v5029_v12, 2  ;;  %v560_v47 = vld [vmem:[%s11266_s3 + $0xf70] sm:$0xff] }
 0x440   :  { %v5019_v2 = vrot.slane %v5018_v8, 1 }
 0x441   :  { %v5117_v14 = vsel %vm3538_vm0, %v3513_v61, 0.0  ;;  %v5031_v41 = vadd.f32 %v5030_v42, %v5029_v12  ;;  %v3499_v42 = vmul.f32 %v10960_v26, %v539_v34 }
 0x442   :  { %v5118_v21 = vadd.f32 %v5117_v14, %v10849_v49  ;;  %v10974_v52 = vpop.permute.xlu1 %2978  ;;  %v10976_v43 = vpop.permute.xlu0 %2974  ;;  %v10992_v49 = vld [vmem:[%s11265_s2 + $0x78] sm:$0xff]  ;;  %v5020_v5 = vadd.f32 %v5019_v2, %v5018_v8 }
 0x443   :  { %v5324_v58 = vrot.slane %v10992_v49, 1  ;;  %v5032_v15 = vrot.slane %v5031_v41, 1  ;;  %v5325_v4 = vrot.slane %v10992_v49, 2  ;;  %v5326_v55 = vrot.slane %v10992_v49, 3 }
 0x444   :  { %v5119_v56 = vrot.slane %v5118_v21, 4  ;;  %v5572_v38 = vadd.f32 %v5317_v28, %v5020_v5  ;;  %v5327_v40 = vrot.slane %v10992_v49, 4 }
 0x445   :  { %v5033_v14 = vadd.f32 %v5032_v15, %v5031_v41 }
 0x446   :  { %v2797_v51 = vpop.permute.xlu1 %2796  ;;  %v2740_v11 = vpop.permute.xlu0 %2739  ;;  %v5120_v30 = vadd.f32 %v5119_v56, %v5118_v21 }
 0x447   :  { %v3489_v27 = vmul.f32 %v2797_v51, %v529_v54  ;;  %v3477_v46 = vmul.f32 %v2740_v11, %v517_v16  ;;  %v5152_v16 = vsel %vm3538_vm0, %v3523_v19, 0.0  ;;  %v5700_v51 = vand.u32 2147483647, %v5572_v38 }
 0x448   :  { %v5121_v18 = vrot.slane %v5120_v30, 2  ;;  %v3520_v11 = vmul.f32 %v10969_v6, %v560_v47  ;;  %v5573_v17 = vadd.f32 %v5318_v44, %v5033_v14  ;;  %v5074_v6 = vsel %vm3538_vm0, %v3499_v42, 0.0  ;;  %v533_v44 = vld [vmem:[%s11266_s3 + $0xe98] sm:$0xff] }
 0x449   :  { %v5039_v0 = vsel %vm3538_vm0, %v3489_v27, 0.0  ;;  %v5000_v59 = vsel %vm3538_vm0, %v3477_v46, 0.0  ;;  %v6046_v15 = vrot.slane %v5700_v51, 7 }
 0x44a   :  { %v5040_v45 = vadd.f32 %v5039_v0, %v10884_v35  ;;  %v5001_v37 = vadd.f32 %v5000_v59, %v10864_v22  ;;  %v11012_v31 = vpop.permute.xlu1 %2860  ;;  %v11014_v39 = vpop.permute.xlu0 %2830  ;;  %v538_v22 = vld [vmem:[%s11266_s3 + $0xec0] sm:$0xff]  ;;  %v3492_v35 = vmul.f32 %v10944_v57, %v532_v63  ;;  %v3508_v57 = vmul.f32 %v10958_v9, %v548_v10  ;;  %v567_v59 = vld [vmem:[%s11266_s3 + $0xfa8] sm:$0xff] }
 0x44b   :  { %v3498_v21 = vmul.f32 %v10942_v48, %v538_v22  ;;  %v5122_v1 = vadd.f32 %v5121_v18, %v5120_v30  ;;  %v11052_v63 = vadd.f32 %v5152_v16, %v5151_v20  ;;  %v5701_v20 = vand.u32 2147483647, %v5573_v17  ;;  %v561_v17 = vld [vmem:[%s11266_s3 + $0xf78] sm:$0xff] }
 0x44c   :  { %v5041_v33 = vrot.slane %v5040_v45, 4  ;;  %v5002_v25 = vrot.slane %v5001_v37, 4  ;;  %v5050_v2 = vsel %vm3538_vm0, %v3492_v35, 0.0  ;;  %v5102_v46 = vsel %vm3538_vm0, %v3508_v57, 0.0 }
 0x44d   :  { %v5073_v0 = vsel %vm3538_vm0, %v3498_v21, 0.0  ;;  %v5051_v30 = vadd.f32 %v5050_v2, %v10819_v60  ;;  %v5103_v10 = vadd.f32 %v5102_v46, %v10826_v36  ;;  %v5141_v60 = vsel %vm3538_vm0, %v3520_v11, 0.0  ;;  %v549_v21 = vld [vmem:[%s11266_s3 + $0xf18] sm:$0xff] }
 0x44e   :  { %v5042_v3 = vadd.f32 %v5041_v33, %v5040_v45  ;;  %v5003_v12 = vadd.f32 %v5002_v25, %v5001_v37  ;;  %v2930_v61 = vpop.permute.xlu1 %2929  ;;  %v2865_v8 = vpop.permute.xlu0 %2864  ;;  %v5123_v19 = vrot.slane %v5122_v1, 1  ;;  %v11068_v22 = vadd.f32 %v5074_v6, %v5073_v0  ;;  %v536_v33 = vld [vmem:[%s11266_s3 + $0xeb0] sm:$0xff] }
 0x44f   :  { %v3517_v54 = vmul.f32 %v2930_v61, %v557_v13  ;;  %v543_v13 = vld [vmem:[%s11266_s3 + $0xee8] sm:$0xff]  ;;  %v3527_v36 = vmul.f32 %v10974_v52, %v567_v59  ;;  %v6048_v11 = vrot.slane %v5701_v20, 6 }
 0x450   :  { %v5043_v56 = vrot.slane %v5042_v3, 2  ;;  %v5004_v9 = vrot.slane %v5003_v12, 2  ;;  %v5124_v42 = vadd.f32 %v5123_v19, %v5122_v1  ;;  %v3503_v52 = vmul.f32 %v2865_v8, %v543_v13 }
 0x451   :  { %v5130_v27 = vsel %vm3538_vm0, %v3517_v54, 0.0  ;;  %v3496_v54 = vmul.f32 %v11014_v39, %v536_v33 }
 0x452   :  { %v5044_v41 = vadd.f32 %v5043_v56, %v5042_v3  ;;  %v5005_v28 = vadd.f32 %v5004_v9, %v5003_v12  ;;  %v5131_v48 = vadd.f32 %v5130_v27, %v10926_v24  ;;  %v11048_v26 = vpop.permute.xlu1 %2993  ;;  %v11050_v5 = vpop.permute.xlu0 %2963  ;;  %v566_v24 = vld [vmem:[%s11266_s3 + $0xfa0] sm:$0xff]  ;;  %v11079_v3 = vadd.f32 %v5141_v60, %v10866_v23 }
 0x453   :  { %v3526_v57 = vmul.f32 %v10976_v43, %v566_v24  ;;  %v542_v23 = vld [vmem:[%s11266_s3 + $0xee0] sm:$0xff]  ;;  %v5165_v27 = vsel %vm3538_vm0, %v3527_v36, 0.0  ;;  %v5580_v6 = vadd.f32 %v5324_v58, %v5124_v42 }
 0x454   :  { %v5045_v7 = vrot.slane %v5044_v41, 1  ;;  %v5006_v45 = vrot.slane %v5005_v28, 1  ;;  %v5132_v37 = vrot.slane %v5131_v48, 4 }
 0x455   :  { %v5164_v1 = vsel %vm3538_vm0, %v3526_v57, 0.0  ;;  %v5708_v20 = vand.u32 2147483647, %v5580_v6 }
 0x456   :  { %v5046_v35 = vadd.f32 %v5045_v7, %v5044_v41  ;;  %v5007_v34 = vadd.f32 %v5006_v45, %v5005_v28  ;;  %v5133_v25 = vadd.f32 %v5132_v37, %v5131_v48  ;;  %v2816_v38 = vpop.permute.xlu1 %2815  ;;  %v2998_v18 = vpop.permute.xlu0 %2997  ;;  %v564_v41 = vld [vmem:[%s11266_s3 + $0xf90] sm:$0xff]  ;;  %v571_v48 = vld [vmem:[%s11266_s3 + $0xfc8] sm:$0xff]  ;;  %v5063_v7 = vsel %vm3538_vm0, %v3496_v54, 0.0 }
 0x457   :  { %v3493_v47 = vmul.f32 %v2816_v38, %v533_v44  ;;  %v5087_v45 = vsel %vm3538_vm0, %v3503_v52, 0.0  ;;  %v3524_v58 = vmul.f32 %v11050_v5, %v564_v41  ;;  %v5166_v33 = vadd.f32 %v5165_v27, %v5164_v1  ;;  %v568_v5 = vld [vmem:[%s11266_s3 + $0xfb0] sm:$0xff] }
 0x458   :  { %v5574_v12 = vadd.f32 %v5319_v32, %v5046_v35  ;;  %v5571_v61 = vadd.f32 %v5007_v34, %v10987_v29  ;;  %v5134_v14 = vrot.slane %v5133_v25, 2  ;;  %v3531_v35 = vmul.f32 %v2998_v18, %v571_v48 }
 0x459   :  { %v5052_v43 = vsel %vm3538_vm0, %v3493_v47, 0.0  ;;  %v5064_v57 = vadd.f32 %v5063_v7, %v10908_v50  ;;  %v574_v50 = vld [vmem:[%s11266_s3 + $0xfe0] sm:$0xff]  ;;  %v5154_v52 = vsel %vm3538_vm0, %v3524_v58, 0.0  ;;  %v565_v7 = vld [vmem:[%s11266_s3 + $0xf98] sm:$0xff] }
 0x45a   :  { %v5702_v16 = vand.u32 2147483647, %v5574_v12  ;;  %v5699_v2 = vand.u32 2147483647, %v5571_v61  ;;  %v5135_v32 = vadd.f32 %v5134_v14, %v5133_v25  ;;  %v5053_v56 = vadd.f32 %v5052_v43, %v5051_v30  ;;  %v2892_v9 = vpop.permute.xlu1 %2891  ;;  %v2850_v51 = vpop.permute.xlu0 %2849 }
 0x45b   :  { %v3509_v46 = vmul.f32 %v2892_v9, %v549_v21  ;;  %v3502_v30 = vmul.f32 %v11012_v31, %v542_v23  ;;  %v575_v21 = vld [vmem:[%s11266_s3 + $0xfe8] sm:$0xff]  ;;  %v5178_v43 = vsel %vm3538_vm0, %v3531_v35, 0.0  ;;  %v537_v9 = vld [vmem:[%s11266_s3 + $0xeb8] sm:$0xff] }
 0x45c   :  { %v6050_v39 = vrot.slane %v5702_v16, 5  ;;  %v5136_v8 = vrot.slane %v5135_v32, 1  ;;  %v5054_v28 = vrot.slane %v5053_v56, 4  ;;  %v6047_v0 = vsel %vm5844_vm1, %v6046_v15, %v5699_v2  ;;  %v570_v15 = vld [vmem:[%s11266_s3 + $0xfc0] sm:$0xff] }
 0x45d   :  { %v5104_v59 = vsel %vm3538_vm0, %v3509_v46, 0.0  ;;  %v6049_v24 = vsel %vm5847_vm2, %v6048_v11, %v6047_v0  ;;  %v5086_v36 = vsel %vm3538_vm0, %v3502_v30, 0.0  ;;  %v3530_v12 = vmul.f32 %v11048_v26, %v570_v15  ;;  %v544_v0 = vld [vmem:[%s11266_s3 + $0xef0] sm:$0xff] }
 0x45e   :  { %v5055_v37 = vadd.f32 %v5054_v28, %v5053_v56  ;;  %v5105_v44 = vadd.f32 %v5104_v59, %v5103_v10  ;;  %v2983_v60 = vpop.permute.xlu1 %2982  ;;  %v2949_v19 = vpop.permute.xlu0 %2948  ;;  %v11116_v34 = vsel %vm5850_vm3, %v6050_v39, %v6049_v24  ;;  %v5137_v25 = vadd.f32 %v5136_v8, %v5135_v32  ;;  %v540_v10 = vld [vmem:[%s11266_s3 + $0xed0] sm:$0xff] }
 0x45f   :  { %v3521_v31 = vmul.f32 %v2949_v19, %v561_v17  ;;  %v11127_v47 = vadd.f32 %v5087_v45, %v5086_v36  ;;  %v3500_v16 = vmul.f32 %v2850_v51, %v540_v10  ;;  %v3528_v56 = vmul.f32 %v2983_v60, %v568_v5  ;;  %v572_v19 = vld [vmem:[%s11266_s3 + $0xfd0] sm:$0xff] }
 0x460   :  { %v5056_v13 = vrot.slane %v5055_v37, 2  ;;  %v5106_v38 = vrot.slane %v5105_v44, 4  ;;  %v5581_v26 = vadd.f32 %v5325_v4, %v5137_v25  ;;  %v6060_v11 = vrot.slane %v5708_v20, 7 }
 0x461   :  { %v5143_v18 = vsel %vm3538_vm0, %v3521_v31, 0.0  ;;  %v5177_v39 = vsel %vm3538_vm0, %v3530_v12, 0.0  ;;  %v5155_v51 = vadd.f32 %v5154_v52, %v11052_v63  ;;  %v5076_v48 = vsel %vm3538_vm0, %v3500_v16, 0.0 }
 0x462   :  { %v5057_v61 = vadd.f32 %v5056_v13, %v5055_v37  ;;  %v5107_v14 = vadd.f32 %v5106_v38, %v5105_v44  ;;  %v3017_v42 = vpop.permute.xlu1 %3016  ;;  %v3013_v54 = vpop.permute.xlu0 %3012  ;;  %v5144_v2 = vadd.f32 %v5143_v18, %v11079_v3  ;;  %v11146_v4 = vadd.f32 %v5178_v43, %v5177_v39 }
 0x463   :  { %v3535_v1 = vmul.f32 %v3017_v42, %v575_v21  ;;  %v3534_v46 = vmul.f32 %v3013_v54, %v574_v50  ;;  %v5709_v30 = vand.u32 2147483647, %v5581_v26  ;;  %v5167_v63 = vsel %vm3538_vm0, %v3528_v56, 0.0 }
 0x464   :  { %v5058_v23 = vrot.slane %v5057_v61, 1  ;;  %v5108_v32 = vrot.slane %v5107_v14, 2  ;;  %v5145_v27 = vrot.slane %v5144_v2, 4  ;;  %v5077_v13 = vadd.f32 %v5076_v48, %v11068_v22 }
 0x465   :  { %v5191_v37 = vsel %vm3538_vm0, %v3535_v1, 0.0  ;;  %v5190_v44 = vsel %vm3538_vm0, %v3534_v46, 0.0  ;;  %v5168_v38 = vadd.f32 %v5167_v63, %v5166_v33  ;;  %v545_v1 = vld [vmem:[%s11266_s3 + $0xef8] sm:$0xff]  ;;  %v576_v46 = vld [vmem:[%s11266_s3 + $0xff0] sm:$0xff] }
 0x466   :  { %v5059_v8 = vadd.f32 %v5058_v23, %v5057_v61  ;;  %v5109_v3 = vadd.f32 %v5108_v32, %v5107_v14  ;;  %v2869_v41 = vpop.permute.xlu1 %2868  ;;  %v2835_v28 = vpop.permute.xlu0 %2834  ;;  %v5146_v17 = vadd.f32 %v5145_v27, %v5144_v2  ;;  %v569_v61 = vld [vmem:[%s11266_s3 + $0xfb8] sm:$0xff]  ;;  %v6062_v14 = vrot.slane %v5709_v30, 6 }
 0x467   :  { %v3497_v6 = vmul.f32 %v2835_v28, %v537_v9  ;;  %v3504_v58 = vmul.f32 %v2869_v41, %v544_v0  ;;  %v5192_v42 = vadd.f32 %v5191_v37, %v5190_v44  ;;  %v577_v37 = vld [vmem:[%s11266_s3 + $0xff8] sm:$0xff] }
 0x468   :  { %v5575_v59 = vadd.f32 %v5320_v53, %v5059_v8  ;;  %v5110_v24 = vrot.slane %v5109_v3, 1  ;;  %v5147_v45 = vrot.slane %v5146_v17, 2  ;;  %v573_v44 = vld [vmem:[%s11266_s3 + $0xfd8] sm:$0xff] }
 0x469   :  { %v5065_v60 = vsel %vm3538_vm0, %v3497_v6, 0.0  ;;  %v5089_v50 = vsel %vm3538_vm0, %v3504_v58, 0.0 }
 0x46a   :  { %v5703_v15 = vand.u32 2147483647, %v5575_v59  ;;  %v5111_v53 = vadd.f32 %v5110_v24, %v5109_v3  ;;  %v5066_v35 = vadd.f32 %v5065_v60, %v5064_v57  ;;  %v3002_v31 = vpop.permute.xlu1 %3001  ;;  %v2968_v25 = vpop.permute.xlu0 %2967  ;;  %v5148_v10 = vadd.f32 %v5147_v45, %v5146_v17  ;;  %v541_v57 = vld [vmem:[%s11266_s3 + $0xed8] sm:$0xff]  ;;  %s6324_s3 = smov [#allocation2]  }
 0x46b   :  { %v3525_v20 = vmul.f32 %v2968_v25, %v565_v7  ;;  %v3532_v12 = vmul.f32 %v3002_v31, %v572_v19  ;;  %v5090_v59 = vadd.f32 %v5089_v50, %v11127_v47  ;;  %s6289_s22 = sshll.u32 %s6324_s3, 4  ;;  %s6290_s22 = int_to_ptr.vmem [resolvable:$true] %s6289_s22 }
 0x46c   :  { %v6052_v36 = vrot.slane %v5703_v15, 4  ;;  %v5579_v5 = vadd.f32 %v5111_v53, %v10992_v49  ;;  %v5067_v18 = vrot.slane %v5066_v35, 4  ;;  %v5149_v21 = vrot.slane %v5148_v10, 1  ;;  %s6302_s23 = scalar_lea.vmem %s6290_s22, 16  ;;  %s6306_s24 = scalar_lea.vmem %s6290_s22, 32 }
 0x46d   :  { %v5156_v22 = vsel %vm3538_vm0, %v3525_v20, 0.0  ;;  %v5180_v9 = vsel %vm3538_vm0, %v3532_v12, 0.0  ;;  %p6303_p0 = scmp.ne.s32.totalorder %s6290_s22, %s6302_s23  ;;  %p6307_p1 = scmp.lt.s32.totalorder %s6290_s22, %s6290_s22 }
 0x46e   :  { %v5707_v33 = vand.u32 2147483647, %v5579_v5  ;;  %v5068_v54 = vadd.f32 %v5067_v18, %v5066_v35  ;;  %v5157_v52 = vadd.f32 %v5156_v22, %v5155_v51  ;;  %v2987_v43 = vpop.permute.xlu1 %2986  ;;  %v2854_v16 = vpop.permute.xlu0 %2853  ;;  %v5150_v2 = vadd.f32 %v5149_v21, %v5148_v10  ;;  %p6308_p2 = scmp.lt.s32.totalorder %s6306_s24, %s6302_s23 }
 0x46f   :  { %v3529_v26 = vmul.f32 %v2987_v43, %v569_v61  ;;  %v3501_v23 = vmul.f32 %v2854_v16, %v541_v57  ;;  %v11176_v32 = vsel %vm5853_vm4, %v6052_v36, %v11116_v34  ;;  %v5181_v19 = vadd.f32 %v5180_v9, %v11146_v4 }
 0x470   :  { %v5069_v56 = vrot.slane %v5068_v54, 2  ;;  %v5158_v27 = vrot.slane %v5157_v52, 4  ;;  %v6061_v39 = vsel %vm5844_vm1, %v6060_v11, %v5707_v33  ;;  %v5582_v51 = vadd.f32 %v5326_v55, %v5150_v2  ;;  %p6309_p3 = por %p6308_p2, %p6307_p1 }
 0x471   :  { %v5169_v34 = vsel %vm3538_vm0, %v3529_v26, 0.0  ;;  %v5078_v8 = vsel %vm3538_vm0, %v3501_v23, 0.0  ;;  %v6063_v3 = vsel %vm5847_vm2, %v6062_v14, %v6061_v39  ;;  %v5322_v16 = vrot.slane %v10987_v29, 6 }
 0x472   :  { %v5070_v41 = vadd.f32 %v5069_v56, %v5068_v54  ;;  %v5159_v28 = vadd.f32 %v5158_v27, %v5157_v52  ;;  %v5170_v48 = vadd.f32 %v5169_v34, %v5168_v38  ;;  %v5079_v17 = vadd.f32 %v5078_v8, %v5077_v13  ;;  %v2873_v0 = vpop.permute.xlu1 %2872  ;;  %v3021_v6 = vpop.permute.xlu0 %3020  ;;  %p6310_p4 = pnand %p6309_p3, %p6303_p0 }
 0x473   :  { %v5710_v30 = vand.u32 2147483647, %v5582_v51  ;;  %v3505_v24 = vmul.f32 %v2873_v0, %v545_v1  ;;  %v3536_v11 = vmul.f32 %v3021_v6, %v576_v46  ;;  %v5328_v56 = vrot.slane %v10992_v49, 5 }
 0x474   :  { %v5071_v63 = vrot.slane %v5070_v41, 1  ;;  %v5160_v7 = vrot.slane %v5159_v28, 2  ;;  %v5171_v55 = vrot.slane %v5170_v48, 4  ;;  %v5080_v45 = vrot.slane %v5079_v17, 4 }
 0x475   :  { %v6064_v60 = vrot.slane %v5710_v30, 5  ;;  %v5091_v15 = vsel %vm3538_vm0, %v3505_v24, 0.0  ;;  %v5193_v47 = vsel %vm3538_vm0, %v3536_v11, 0.0  ;;  %v5323_v6 = vrot.slane %v10987_v29, 7 }
 0x476   :  { %v5072_v53 = vadd.f32 %v5071_v63, %v5070_v41  ;;  %v5161_v58 = vadd.f32 %v5160_v7, %v5159_v28  ;;  %v5172_v35 = vadd.f32 %v5171_v55, %v5170_v48  ;;  %v5081_v31 = vadd.f32 %v5080_v45, %v5079_v17  ;;  %v3025_v25 = vpop.permute.xlu1 %3024  ;;  %v3006_v13 = vpop.permute.xlu0 %3005 }
 0x477   :  { %v5092_v38 = vadd.f32 %v5091_v15, %v5090_v59  ;;  %v5194_v10 = vadd.f32 %v5193_v47, %v5192_v42  ;;  %v3537_v20 = vmul.f32 %v3025_v25, %v577_v37  ;;  %v3533_v36 = vmul.f32 %v3006_v13, %v573_v44 }
 0x478   :  { %v5576_v5 = vadd.f32 %v5321_v62, %v5072_v53  ;;  %v5162_v18 = vrot.slane %v5161_v58, 1  ;;  %v5173_v12 = vrot.slane %v5172_v35, 2  ;;  %v5082_v4 = vrot.slane %v5081_v31, 2 }
 0x479   :  { %v5093_v61 = vrot.slane %v5092_v38, 4  ;;  %v5195_v57 = vsel %vm3538_vm0, %v3537_v20, 0.0  ;;  %v5182_v14 = vsel %vm3538_vm0, %v3533_v36, 0.0  ;;  %v6065_v21 = vsel %vm5850_vm3, %v6064_v60, %v6063_v3 }
 0x47a   :  { %v5704_v22 = vand.u32 2147483647, %v5576_v5  ;;  %v5163_v33 = vadd.f32 %v5162_v18, %v5161_v58  ;;  %v5174_v50 = vadd.f32 %v5173_v12, %v5172_v35  ;;  %v5083_v54 = vadd.f32 %v5082_v4, %v5081_v31 }
 0x47b   :  { %v5094_v42 = vadd.f32 %v5093_v61, %v5092_v38  ;;  %v5196_v52 = vadd.f32 %v5195_v57, %v5194_v10  ;;  %v5183_v43 = vadd.f32 %v5182_v14, %v5181_v19  ;;  %v5329_v55 = vrot.slane %v10992_v49, 6 }
 0x47c   :  { %v5583_v62 = vadd.f32 %v5327_v40, %v5163_v33  ;;  %v5175_v2 = vrot.slane %v5174_v50, 1  ;;  %v5084_v26 = vrot.slane %v5083_v54, 1  ;;  %v6054_v23 = vrot.slane %v5704_v22, 3 }
 0x47d   :  { %v5095_v9 = vrot.slane %v5094_v42, 2  ;;  %v5197_v27 = vrot.slane %v5196_v52, 4  ;;  %v5184_v1 = vrot.slane %v5183_v43, 4  ;;  %v5330_v44 = vrot.slane %v10992_v49, 7 }
 0x47e   :  { %v5711_v46 = vand.u32 2147483647, %v5583_v62  ;;  %v5176_v39 = vadd.f32 %v5175_v2, %v5174_v50  ;;  %v5085_v51 = vadd.f32 %v5084_v26, %v5083_v54  ;;  %v6055_v34 = vsel %vm5856_vm5, %v6054_v23, %v11176_v32 }
 0x47f   :  { %v5096_v8 = vadd.f32 %v5095_v9, %v5094_v42  ;;  %v5198_v3 = vadd.f32 %v5197_v27, %v5196_v52  ;;  %v5185_v41 = vadd.f32 %v5184_v1, %v5183_v43  ;;  %v12054_v22 = vlaneseq  ;;  %v12055_v52 = vld [vmem:[#allocation5_spill] sm:$0xff] }
 0x480   :  { %v6066_v28 = vrot.slane %v5711_v46, 4  ;;  %v5577_v48 = vadd.f32 %v5322_v16, %v5085_v51  ;;  %v5584_v30 = vadd.f32 %v5328_v56, %v5176_v39  ;;  %vm6244_vm1 = vcmask 720512  }
 0x481   :  { %v5097_v40 = vrot.slane %v5096_v8, 1  ;;  %v5199_v17 = vrot.slane %v5198_v3, 2  ;;  %v5186_v0 = vrot.slane %v5185_v41, 2  ;;  %v11224_v33 = vand.u32 127, %v12054_v22 }
 0x482   :  { %v5705_v59 = vand.u32 2147483647, %v5577_v48  ;;  %v6067_v24 = vsel %vm5853_vm4, %v6066_v28, %v6065_v21  ;;  %v5712_v60 = vand.u32 2147483647, %v5584_v30  ;;  %vm6251_vm2 = vcmask 786112  }
 0x483   :  { %v5098_v11 = vadd.f32 %v5097_v40, %v5096_v8  ;;  %v5200_v63 = vadd.f32 %v5199_v17, %v5198_v3  ;;  %v5187_v7 = vadd.f32 %v5186_v0, %v5185_v41  ;;  %v6176_v50 = vadd.s32 4294967288, %v11224_v33 }
 0x484   :  { %v6056_v19 = vrot.slane %v5705_v59, 2  ;;  %v6068_v25 = vrot.slane %v5712_v60, 3  ;;  %v6183_v62 = vadd.s32 4294967280, %v11224_v33  ;;  %v6174_v2 = vsub.s32 %v11224_v33, %v12055_v52 }
 0x485   :  { %v5201_v32 = vrot.slane %v5200_v63, 1  ;;  %v5188_v45 = vrot.slane %v5187_v7, 1  ;;  %v5578_v37 = vadd.f32 %v5323_v6, %v5098_v11  ;;  %v6179_v43 = vsub.s32 %v6176_v50, %v12055_v52 }
 0x486   :  { %v6057_v31 = vsel %vm5859_vm6, %v6056_v19, %v6055_v34  ;;  %v6069_v5 = vsel %vm5856_vm5, %v6068_v25, %v6067_v24  ;;  %v6190_v23 = vadd.s32 4294967272, %v11224_v33  ;;  %v6186_v27 = vsub.s32 %v6183_v62, %v12055_v52 }
 0x487   :  { %v5202_v15 = vadd.f32 %v5201_v32, %v5200_v63  ;;  %v5189_v47 = vadd.f32 %v5188_v45, %v5187_v7  ;;  %v5706_v53 = vand.u32 2147483647, %v5578_v37  ;;  %v6197_v46 = vadd.s32 4294967264, %v11224_v33 }
 0x488   :  { %v6193_v34 = vsub.s32 %v6190_v23, %v12055_v52  ;;  %v6204_v3 = vadd.s32 4294967256, %v11224_v33  ;;  %v6211_v17 = vadd.s32 4294967248, %v11224_v33  ;;  %v6218_v59 = vadd.s32 4294967240, %v11224_v33 }
 0x489   :  { %v6058_v29 = vrot.slane %v5706_v53, 1  ;;  %v5585_v58 = vadd.f32 %v5329_v55, %v5189_v47  ;;  %v5586_v35 = vadd.f32 %v5330_v44, %v5202_v15  ;;  %v6200_v48 = vsub.s32 %v6197_v46, %v12055_v52 }
 0x48a   :  { %v6207_v6 = vsub.s32 %v6204_v3, %v12055_v52  ;;  %v6225_v7 = vadd.s32 4294967232, %v11224_v33  ;;  %v6214_v32 = vsub.s32 %v6211_v17, %v12055_v52  ;;  %v6232_v37 = vadd.s32 4294967224, %v11224_v33 }
 0x48b   :  { %v6059_v13 = vsel %vm5862_vm7, %v6058_v29, %v6057_v31  ;;  %v5713_v38 = vand.u32 2147483647, %v5585_v58  ;;  %v5714_v10 = vand.u32 2147483647, %v5586_v35  ;;  %v6221_v19 = vsub.s32 %v6218_v59, %v12055_v52 }
 0x48c   :  { %v6132_v20 = vsel %vm3538_vm0, %v6059_v13, 0.0  ;;  %v6228_v47 = vsub.s32 %v6225_v7, %v12055_v52  ;;  %v6239_v53 = vadd.s32 4294967216, %v11224_v33  ;;  %v6235_v25 = vsub.s32 %v6232_v37, %v12055_v52 }
 0x48d   :  { %6133 = vadd.xlane.f32.xlu1 %v6132_v20  ;;  %v6070_v36 = vrot.slane %v5713_v38, 2  ;;  %v6072_v49 = vrot.slane %v5714_v10, 1  ;;  %vm6258_vm3 = vcmask 851712   ;;  %vm6265_vm4 = vcmask 917312  }
 0x48e   :  { %vm6272_vm5 = vcmask 982912  }
 0x48f   :  { %v6071_v18 = vsel %vm5859_vm6, %v6070_v36, %v6069_v5  ;;  %v6246_v36 = vadd.s32 4294967208, %v11224_v33  ;;  %v6253_v5 = vadd.s32 4294967200, %v11224_v33  ;;  %vm6279_vm6 = vcmask 1048512  }
 0x490   :  { %v6073_v12 = vsel %vm5862_vm7, %v6072_v49, %v6071_v18  ;;  %v6242_v49 = vsub.s32 %v6239_v53, %v12055_v52 }
 0x491   :  { %v6135_v4 = vsel %vm3538_vm0, %v6073_v12, 0.0  ;;  %vm6237_vm0 = vcmask 654912  }
 0x492   :  { %6136 = vadd.xlane.f32.xlu0 %v6135_v4 }
 0x4ac   :  { %v6092_v61 = vpop.xlane.xlu0 %6091 }
 0x4ad   :  { %v6138_v26 = vsub.f32 12.0, %v6092_v61  ;;  %v6260_v61 = vadd.s32 4294967192, %v11224_v33 }
 0x4af   :  { %v6175_v51 = vrot.slane %v6138_v26, %v6174_v2  ;;  %v6263_v26 = vsub.s32 %v6260_v61, %v12055_v52 }
 0x4b0   :  { %v6098_v57 = vpop.xlane.xlu0 %6097 }
 0x4b1   :  { %v6095_v14 = vpop.xlane.xlu1 %6094  ;;  %v6140_v1 = vsub.f32 12.0, %v6098_v57 }
 0x4b2   :  { %v6139_v16 = vsub.f32 12.0, %v6095_v14 }
 0x4b3   :  { %v6187_v28 = vrot.slane %v6140_v1, %v6186_v27  ;;  %v6274_v1 = vadd.s32 4294967176, %v11224_v33 }
 0x4b4   :  { %v6101_v21 = vpop.xlane.xlu0 %6100  ;;  %v6180_v56 = vrot.slane %v6139_v16, %v6179_v43  ;;  %v6256_v43 = vsub.s32 %v6253_v5, %v12055_v52 }
 0x4b5   :  { %v6104_v54 = vpop.xlane.xlu1 %6103  ;;  %v6141_v8 = vsub.f32 12.0, %v6101_v21  ;;  %v6249_v21 = vsub.s32 %v6246_v36, %v12055_v52 }
 0x4b6   :  { %v6182_v41 = vsel %vm6181_vm8, %v6180_v56, %v6175_v51  ;;  %v6142_v40 = vsub.f32 12.0, %v6104_v54 }
 0x4b7   :  { %v6194_v0 = vrot.slane %v6141_v8, %v6193_v34  ;;  %v6189_v11 = vsel %vm6188_vm9, %v6187_v28, %v6182_v41  ;;  %v6277_v41 = vsub.s32 %v6274_v1, %v12055_v52 }
 0x4b8   :  { %v6107_v42 = vpop.xlane.xlu0 %6106  ;;  %v6201_v55 = vrot.slane %v6142_v40, %v6200_v48 }
 0x4b9   :  { %v6110_v9 = vpop.xlane.xlu1 %6109  ;;  %v6143_v30 = vsub.f32 12.0, %v6107_v42  ;;  %v6196_v44 = vsel %vm6195_vm10, %v6194_v0, %v6189_v11  ;;  %v6267_v42 = vadd.s32 4294967184, %v11224_v33 }
 0x4ba   :  { %v6144_v45 = vsub.f32 12.0, %v6110_v9  ;;  %v6203_v58 = vsel %vm6202_vm11, %v6201_v55, %v6196_v44 }
 0x4bb   :  { %v6208_v60 = vrot.slane %v6143_v30, %v6207_v6  ;;  %v6270_v46 = vsub.s32 %v6267_v42, %v12055_v52 }
 0x4bc   :  { %v6113_v39 = vpop.xlane.xlu0 %6112  ;;  %v6215_v35 = vrot.slane %v6144_v45, %v6214_v32 }
 0x4bd   :  { %v6116_v24 = vpop.xlane.xlu1 %6115  ;;  %v6145_v15 = vsub.f32 12.0, %v6113_v39  ;;  %v6210_v38 = vsel %vm6209_vm12, %v6208_v60, %v6203_v58 }
 0x4be   :  { %v6146_v31 = vsub.f32 12.0, %v6116_v24  ;;  %v6217_v18 = vsel %vm6216_vm13, %v6215_v35, %v6210_v38 }
 0x4bf   :  { %v6222_v10 = vrot.slane %v6145_v15, %v6221_v19 }
 0x4c0   :  { %v6119_v63 = vpop.xlane.xlu0 %6118  ;;  %v6229_v12 = vrot.slane %v6146_v31, %v6228_v47 }
 0x4c1   :  { %v6147_v20 = vsub.f32 12.0, %v6119_v63  ;;  %v6224_v57 = vsel %vm6223_vm14, %v6222_v10, %v6217_v18 }
 0x4c2   :  { %v6122_v29 = vpop.xlane.xlu1 %6121  ;;  %v6231_v16 = vsel %vm6230_vm15, %v6229_v12, %v6224_v57 }
 0x4c3   :  { %v6148_v4 = vsub.f32 12.0, %v6122_v29  ;;  %v6236_v14 = vrot.slane %v6147_v20, %v6235_v25 }
 0x4c4   :  { %v6125_v13 = vpop.xlane.xlu0 %6124 }
 0x4c5   :  { %v6149_v22 = vsub.f32 12.0, %v6125_v13  ;;  %v6243_v62 = vrot.slane %v6148_v4, %v6242_v49  ;;  %v6238_v23 = vsel %vm6237_vm0, %v6236_v14, %v6231_v16 }
 0x4c6   :  { %v6128_v50 = vpop.xlane.xlu1 %6127 }
 0x4c7   :  { %v6150_v2 = vsub.f32 12.0, %v6128_v50  ;;  %v6250_v56 = vrot.slane %v6149_v22, %v6249_v21  ;;  %v6245_v51 = vsel %vm6244_vm1, %v6243_v62, %v6238_v23 }
 0x4c8   :  { %v6131_v54 = vpop.xlane.xlu0 %6130 }
 0x4c9   :  { %v6151_v9 = vsub.f32 12.0, %v6131_v54  ;;  %v6257_v34 = vrot.slane %v6150_v2, %v6256_v43  ;;  %v6252_v8 = vsel %vm6251_vm2, %v6250_v56, %v6245_v51 }
 0x4cb   :  { %v6264_v3 = vrot.slane %v6151_v9, %v6263_v26  ;;  %v6259_v17 = vsel %vm6258_vm3, %v6257_v34, %v6252_v8 }
 0x4cd   :  { %v6266_v0 = vsel %vm6265_vm4, %v6264_v3, %v6259_v17 }
 0x516   :  { %v6134_v27 = vpop.xlane.xlu1 %6133 }
 0x517   :  { %v6152_v39 = vsub.f32 12.0, %v6134_v27 }
 0x519   :  { %v6271_v28 = vrot.slane %v6152_v39, %v6270_v46 }
 0x51b   :  { %v6137_v48 = vpop.xlane.xlu0 %6136  ;;  %v6273_v6 = vsel %vm6272_vm5, %v6271_v28, %v6266_v0 }
 0x51c   :  { %v6153_v40 = vsub.f32 12.0, %v6137_v48 }
 0x51e   :  { %v6278_v33 = vrot.slane %v6153_v40, %v6277_v41 }
 0x520   :  { %v6280_v30 = vsel %vm6279_vm6, %v6278_v33, %v6273_v6 }
 0x521   :  { %6282 = vst [vmem:[#allocation2] sm:$0x1] %v6280_v30 }
 0x522   :  { %6313 = shalt.err (!%p6310_p4)
}
 0x523   :  { %6292 = dma.vmem_to_hbm [thread:$0]  %s6290_s22, 16, %s11267_s4, [#allocation3]  }
 0x524   :  { %6322 = dma.done.wait [#allocation3], 16  }
 0x525   :  { %6323 = vsyncadd [#allocation3], 4294967280 }
 0x526   :  { %6296 = vsyncpa [#allocation3], 1 }

</bundles_post_ra>
